<compile_context>
chip_gen: v5e
topology: v5e:2x2
jax: 0.10.0
libtpu: 0.0.40
codegen_flags: <defaults>
</compile_context>

<pallas_src>
import functools

import numpy as np
import jax
import jax.numpy as jnp
from jax import lax
from jax.experimental import pallas as pl
from jax.experimental.pallas import tpu as pltpu


# ----------------------------------------------------------------------------
# Surrogate persistence diagram geometry.
# TODO(synk): the original `diagram(x.flatten(), device)` (ConvDiagram) is an
# external persistent-homology computation (ripser / giotto-tda style) with no
# Pallas/JAX equivalent; a deterministic surrogate producing the same row layout
# (birth, death, hom_dim j, inner_batch i=0) with the same truncate/pad
# behaviour is used.  It reads the first 2*N_HOM*PTS_PER_HOM values of the
# flattened conv output (all inside conv channel 0 at these shapes).
# ----------------------------------------------------------------------------
N_HOM = 2
PTS_PER_HOM = 24


# ----------------------------------------------------------------------------
# Fused kernel: conv -> diagram surrogate -> embeddings -> TransformerEncoder
# (post-norm, ReLU FFN, eps=1e-5, dropout = eval-mode identity) -> mean over
# hidden -> classifier Linear(seq, n_out) -> softmax.
# ----------------------------------------------------------------------------
def fused_forward_kernel(patches_ref, peo_ref, conv_wb_ref, w0_ref, embc_ref,
                         vecs_ref, mats_ref, clsw_ref,
                         probs_ref, conv_ref, *,
                         n_batch, seq, nhead, n_layers, n_hidden, dim_ff,
                         mat_slot, approx_softmax):
    f32 = jnp.float32
    eps = 1e-5
    hd = n_hidden // nhead
    scale = 1.0 / float(hd) ** 0.5
    bs = n_batch * seq
    n_out = probs_ref.shape[1]

    # --- 1) conv layer: whole batch in one MXU matmul (lane width B*P_pad) ----
    # conv_wb = [conv_w/256 | conv_b]; patches last row = valid-pixel mask.
    conv_ref[...] = jnp.dot(conv_wb_ref[...], patches_ref[...],
                            preferred_element_type=f32)

    # --- 2) diagram surrogate: conv channel-0 values at the even/odd flatten
    #        positions, computed as one matmul on pre-transposed patch rows
    #        (rows [0, B*S) = even positions, rows [B*S, 2*B*S) = odd). ---------
    vals = jnp.dot(peo_ref[...], w0_ref[...], preferred_element_type=f32)  # (2BS,1)
    births = vals[:bs, :]                                                  # (BS, 1)
    deaths = births + jnp.abs(vals[bs:, :])

    # --- 3) embedding: diag @ emb_w.T + emb_b.  The hom-dim column, the zero
    #        inner-idx column, the bias and the zero padding rows are pre-folded
    #        into embc; birth/death contribute via two broadcast multiplies. ----
    we0 = vecs_ref[8 * n_layers + 0:8 * n_layers + 1, :n_hidden]
    we1 = vecs_ref[8 * n_layers + 1:8 * n_layers + 2, :n_hidden]
    h = births * we0 + deaths * we1 + embc_ref[...]                        # (BS, H)

    # --- 4) TransformerEncoder layers (batch folded into M for all dense math) -
    for l in range(n_layers):
        base = 4 * l * mat_slot
        wqkv = mats_ref[:, base:base + 3 * n_hidden]                        # (H, 3H)
        wo = mats_ref[:, base + mat_slot:base + mat_slot + n_hidden]        # (H, H)
        w1 = mats_ref[:, base + 2 * mat_slot:base + 2 * mat_slot + dim_ff]  # (H, F)
        w2 = mats_ref[:dim_ff, base + 3 * mat_slot:base + 3 * mat_slot + n_hidden]
        v0 = 8 * l
        bqkv = vecs_ref[v0 + 0:v0 + 1, :3 * n_hidden]
        bo = vecs_ref[v0 + 1:v0 + 2, :n_hidden]
        b1 = vecs_ref[v0 + 2:v0 + 3, :dim_ff]
        b2 = vecs_ref[v0 + 3:v0 + 4, :n_hidden]
        ln1w = vecs_ref[v0 + 4:v0 + 5, :n_hidden]
        ln1b = vecs_ref[v0 + 5:v0 + 6, :n_hidden]
        ln2w = vecs_ref[v0 + 6:v0 + 7, :n_hidden]
        ln2b = vecs_ref[v0 + 7:v0 + 8, :n_hidden]

        # fused QKV projection on the (B*S, H) slab
        qkv = jnp.dot(h, wqkv, preferred_element_type=f32) + bqkv           # (BS, 3H)

        # per-(batch, head) attention; heads concatenated along lanes and batches
        # along sublanes so the out-projection is one (B*S, H) @ (H, H) matmul.
        ctx_rows = []
        for b in range(n_batch):
            r0 = b * seq
            head_cols = []
            for n in range(nhead):
                q = qkv[r0:r0 + seq, n * hd:(n + 1) * hd] * scale
                k = qkv[r0:r0 + seq, n_hidden + n * hd:n_hidden + (n + 1) * hd]
                v = qkv[r0:r0 + seq, 2 * n_hidden + n * hd:2 * n_hidden + (n + 1) * hd]
                s = lax.dot_general(q, k, (((1,), (1,)), ((), ())),
                                    preferred_element_type=f32)             # (S, S)
                s = s - jnp.max(s, axis=-1, keepdims=True)
                p = jnp.exp(s)
                denom = jnp.sum(p, axis=-1, keepdims=True)
                if approx_softmax:
                    p = p * pl.reciprocal(denom, approx=True)
                else:
                    p = p / denom
                head_cols.append(jnp.dot(p, v, preferred_element_type=f32))  # (S, hd)
            ctx_rows.append(jnp.concatenate(head_cols, axis=1))              # (S, H)
        ctx = jnp.concatenate(ctx_rows, axis=0)                              # (BS, H)

        h = h + jnp.dot(ctx, wo, preferred_element_type=f32) + bo
        mu = jnp.mean(h, axis=-1, keepdims=True)
        var = jnp.mean((h - mu) ** 2, axis=-1, keepdims=True)
        h = (h - mu) * lax.rsqrt(var + eps) * ln1w + ln1b

        ff = jnp.dot(h, w1, preferred_element_type=f32) + b1
        ff = jnp.maximum(ff, 0.0)
        ff = jnp.dot(ff, w2, preferred_element_type=f32) + b2
        h = h + ff
        mu = jnp.mean(h, axis=-1, keepdims=True)
        var = jnp.mean((h - mu) ** 2, axis=-1, keepdims=True)
        h = (h - mu) * lax.rsqrt(var + eps) * ln2w + ln2b

    # --- 5) mean over hidden -> classifier -> softmax, one (B, n_out) store ----
    cls_b = vecs_ref[8 * n_layers + 2:8 * n_layers + 3, :n_out]
    m = jnp.mean(h, axis=-1, keepdims=True)                                  # (BS, 1)
    rows = []
    for b in range(n_batch):
        mb = m[b * seq:(b + 1) * seq, :]                                     # (S, 1)
        rows.append(lax.dot_general(mb, clsw_ref[...], (((0,), (0,)), ((), ())),
                                    preferred_element_type=f32))             # (1, n_out)
    logits = jnp.concatenate(rows, axis=0) + cls_b                           # (B, n_out)
    logits = logits - jnp.max(logits, axis=-1, keepdims=True)
    e = jnp.exp(logits)
    probs_ref[...] = e / jnp.sum(e, axis=-1, keepdims=True)                  # exact


# ----------------------------------------------------------------------------
# Wrapper: im2col / weight packing (layout glue only) + one pallas_call.
# ----------------------------------------------------------------------------
@functools.partial(jax.jit,
                   static_argnames=("max_seq", "nhead", "n_out", "approx_softmax"))
def _fused_forward(xs, params, *, max_seq, nhead, n_out, approx_softmax=False):
    f32 = jnp.float32
    xs = xs.astype(f32)
    conv_w = params["conv_w"].astype(f32)
    conv_b = params["conv_b"].astype(f32)
    layers = params["layers"]
    n_layers = len(layers)

    B, C, H, W = xs.shape
    O = conv_w.shape[0]
    OH, OW = H - 2, W - 2
    P = OH * OW
    P_pad = ((P + 127) // 128) * 128
    Hd = params["emb_w"].shape[0]
    d_ff = layers[0]["lin1_w"].shape[0]
    S = max_seq
    n_pts = N_HOM * PTS_PER_HOM
    assert 2 * n_pts <= P, "surrogate diagram would read past the conv output"
    n_keep = min(n_pts, S)

    # ---- im2col for the whole batch (9 static shifted slices) -----------------
    cols = []
    for kh in range(3):
        for kw in range(3):
            cols.append(xs[:, :, kh:kh + OH, kw:kw + OW].reshape(B, C, P))
    patches = jnp.stack(cols, axis=2).reshape(B, C * 9, P)                 # (B,36,P)

    # conv input slab: (C*9+1, B*P_pad); last row = valid-pixel mask (for bias)
    patches_pad = jnp.pad(patches, ((0, 0), (0, 0), (0, P_pad - P)))
    ones_row = jnp.pad(jnp.ones((B, 1, P), f32), ((0, 0), (0, 0), (0, P_pad - P)))
    patches_aug = jnp.concatenate([patches_pad, ones_row], axis=1)         # (B,37,Pp)
    patches_aug = patches_aug.transpose(1, 0, 2).reshape(C * 9 + 1, B * P_pad)

    # diagram-feeding patch rows: even / odd flatten positions of conv channel 0
    even_idx = np.arange(0, 2 * n_pts, 2)
    pe = patches[:, :, even_idx]                                           # (B,36,48)
    po = patches[:, :, even_idx + 1]

    def to_rows(p):  # (B, 36, n_pts) -> (B, S, 37): [patch | 1] rows, zero-padded
        pt = jnp.transpose(p, (0, 2, 1))[:, :n_keep]
        pt = jnp.concatenate([pt, jnp.ones((B, n_keep, 1), f32)], axis=2)
        return jnp.pad(pt, ((0, 0), (0, S - n_keep), (0, 0)))

    peo = jnp.concatenate([to_rows(pe).reshape(B * S, C * 9 + 1),
                           to_rows(po).reshape(B * S, C * 9 + 1)], axis=0)  # (2BS,37)

    # ---- weight packing (xs/256 pre-scale folded into the conv weights) -------
    w_mat = conv_w.reshape(O, C * 9) * (1.0 / 256.0)
    conv_wb = jnp.concatenate([w_mat, conv_b[:, None]], axis=1)             # (O, 37)
    w0_aug = conv_wb[0:1, :].T                                              # (37, 1)

    emb_wT = params["emb_w"].astype(f32).T                                  # (4, H)
    hom = np.concatenate([np.full((PTS_PER_HOM, 1), j, np.float32)
                          for j in range(N_HOM)], axis=0)[:S]
    hom = np.pad(hom, ((0, S - hom.shape[0]), (0, 0)))                      # (S, 1)
    emb_const = jnp.asarray(hom) @ emb_wT[2:3, :] + params["emb_b"].astype(f32)[None, :]
    emb_const = jnp.tile(emb_const, (B, 1))                                 # (BS, H)

    vec_w = 3 * Hd

    def vrow(v):
        v = v.astype(f32).reshape(1, -1)
        return jnp.pad(v, ((0, 0), (0, vec_w - v.shape[1])))

    slot_w = ((3 * Hd + 127) // 128) * 128

    def slot(m):
        m = m.astype(f32)
        return jnp.pad(m, ((0, Hd - m.shape[0]), (0, slot_w - m.shape[1])))

    vec_rows, mat_slots = [], []
    for lp in layers:
        vec_rows += [vrow(lp["in_proj_b"]), vrow(lp["out_proj_b"]),
                     vrow(lp["lin1_b"]), vrow(lp["lin2_b"]),
                     vrow(lp["ln1_w"]), vrow(lp["ln1_b"]),
                     vrow(lp["ln2_w"]), vrow(lp["ln2_b"])]
        mat_slots += [lp["in_proj_w"].T,      # (H, 3H)
                      lp["out_proj_w"].T,     # (H, H)
                      lp["lin1_w"].T,         # (H, F)
                      lp["lin2_w"].T]         # (F, H)
    vec_rows += [vrow(emb_wT[0]), vrow(emb_wT[1]), vrow(params["cls_b"])]
    vecs = jnp.concatenate(vec_rows, axis=0)                                # (8L+3, 3H)
    mats = jnp.concatenate([slot(m) for m in mat_slots], axis=1)            # (H, 4L*128)
    cls_wT = params["cls_w"].astype(f32).T                                  # (S, n_out)

    inputs = (patches_aug, peo, conv_wb, w0_aug, emb_const, vecs, mats, cls_wT)

    def full_spec(a):
        nd = a.ndim
        return pl.BlockSpec(a.shape, lambda i, _nd=nd: (0,) * _nd)

    kernel = functools.partial(
        fused_forward_kernel, n_batch=B, seq=S, nhead=nhead, n_layers=n_layers,
        n_hidden=Hd, dim_ff=d_ff, mat_slot=slot_w, approx_softmax=approx_softmax)

    probs, conv_flat = pl.pallas_call(
        kernel,
        out_shape=(jax.ShapeDtypeStruct((B, n_out), f32),
                   jax.ShapeDtypeStruct((O, B * P_pad), f32)),
        grid=(1,),   # single fused step (review: grid loop was pure overhead)
        in_specs=[full_spec(a) for a in inputs],
        out_specs=(pl.BlockSpec((B, n_out), lambda i: (0, 0)),
                   pl.BlockSpec((O, B * P_pad), lambda i: (0, 0))),
        compiler_params=pltpu.CompilerParams(dimension_semantics=("arbitrary",)),
    )(*inputs)

    conv_feat = conv_flat.reshape(O, B, P_pad).transpose(1, 0, 2)[:, :, :P]
    conv_feat = conv_feat.reshape(B, O, OH, OW)
    return probs, conv_feat


def topological_conv_transformer_forward(xs, params, *, max_seq, nhead, n_out,
                                         approx_softmax=False):
    """Forward pass of TopologicalConvTransformer -> (B, n_out) softmax probs."""
    probs, _ = _fused_forward(xs, params, max_seq=max_seq, nhead=nhead,
                              n_out=n_out, approx_softmax=approx_softmax)
    return probs


# ----------------------------------------------------------------------------
# Pure-JAX reference (same surrogate diagram) for correctness validation.
# ----------------------------------------------------------------------------
def _reference_forward(xs, params, *, max_seq, nhead):
    f32 = jnp.float32
    conv_w = params["conv_w"].astype(f32)
    conv_b = params["conv_b"].astype(f32)
    x = xs.astype(f32) / 256.0
    conv = lax.conv_general_dilated(
        x, conv_w, window_strides=(1, 1), padding="VALID",
        dimension_numbers=("NCHW", "OIHW", "NCHW")) + conv_b[None, :, None, None]

    def one_diagram(flat):
        pairs = flat[:2 * N_HOM * PTS_PER_HOM].reshape(N_HOM, PTS_PER_HOM, 2)
        rows = []
        for j in range(N_HOM):
            births = pairs[j, :, 0:1]
            deaths = births + jnp.abs(pairs[j, :, 1:2])
            rows.append(jnp.concatenate(
                [births, deaths, jnp.full((PTS_PER_HOM, 1), float(j), f32),
                 jnp.zeros((PTS_PER_HOM, 1), f32)], axis=1))
        d = jnp.concatenate(rows, axis=0)[:max_seq]
        return jnp.pad(d, ((0, max_seq - d.shape[0]), (0, 0)))

    def layer_norm(v, w, b, eps=1e-5):
        mu = v.mean(axis=-1, keepdims=True)
        var = ((v - mu) ** 2).mean(axis=-1, keepdims=True)
        return (v - mu) / jnp.sqrt(var + eps) * w + b

    Hd = params["emb_w"].shape[0]
    hd = Hd // nhead
    outs = []
    for b in range(xs.shape[0]):
        d = one_diagram(conv[b].reshape(-1))
        h = d @ params["emb_w"].T + params["emb_b"]
        for lp in params["layers"]:
            qkv = h @ lp["in_proj_w"].T + lp["in_proj_b"]
            heads = []
            for n in range(nhead):
                q = qkv[:, n * hd:(n + 1) * hd] / (hd ** 0.5)
                k = qkv[:, Hd + n * hd:Hd + (n + 1) * hd]
                v = qkv[:, 2 * Hd + n * hd:2 * Hd + (n + 1) * hd]
                heads.append(jax.nn.softmax(q @ k.T, axis=-1) @ v)
            attn = jnp.concatenate(heads, axis=1) @ lp["out_proj_w"].T + lp["out_proj_b"]
            h = layer_norm(h + attn, lp["ln1_w"], lp["ln1_b"])
            ff = jnp.maximum(h @ lp["lin1_w"].T + lp["lin1_b"], 0.0)
            ff = ff @ lp["lin2_w"].T + lp["lin2_b"]
            h = layer_norm(h + ff, lp["ln2_w"], lp["ln2_b"])
        m = h.mean(axis=-1)
        logits = m @ params["cls_w"].T + params["cls_b"]
        outs.append(jax.nn.softmax(logits, axis=-1))
    return conv, jnp.stack(outs, axis=0)


# ----------------------------------------------------------------------------
# Deterministic parameter init (shapes follow the PyTorch module __init__).
# ----------------------------------------------------------------------------
def init_params(key, n_in, n_conv, n_diag, n_hidden, n_out, max_seq,
                nhead, num_layers, dim_ff):
    keys = iter(jax.random.split(key, 64))

    def w(shape, scale=0.1):
        return scale * jax.random.normal(next(keys), shape, dtype=jnp.float32)

    params = {
        "conv_w": w((n_conv, n_in, 3, 3)),
        "conv_b": w((n_conv,)),
        "emb_w": w((n_hidden, n_diag)),
        "emb_b": w((n_hidden,)),
        "cls_w": w((n_out, max_seq)),
        "cls_b": w((n_out,)),
        "layers": [],
    }
    for _ in range(num_layers):
        params["layers"].append({
            "in_proj_w": w((3 * n_hidden, n_hidden)),
            "in_proj_b": w((3 * n_hidden,)),
            "out_proj_w": w((n_hidden, n_hidden)),
            "out_proj_b": w((n_hidden,)),
            "lin1_w": w((dim_ff, n_hidden)),
            "lin1_b": w((dim_ff,)),
            "lin2_w": w((n_hidden, dim_ff)),
            "lin2_b": w((n_hidden,)),
            "ln1_w": jnp.ones((n_hidden,), jnp.float32),
            "ln1_b": jnp.zeros((n_hidden,), jnp.float32),
            "ln2_w": jnp.ones((n_hidden,), jnp.float32),
            "ln2_b": jnp.zeros((n_hidden,), jnp.float32),
        })
    return params


if __name__ == "__main__":
    B, C, H, W = 2, 4, 16, 16          # xs: (batch, n_in, H, W)   NCHW
    n_conv, n_diag, n_hidden, n_out = 4, 4, 32, 4
    max_seq, nhead, num_layers, dim_ff = 64, 2, 2, 16

    key_x, key_p = jax.random.split(jax.random.PRNGKey(0))
    params = init_params(key_p, C, n_conv, n_diag, n_hidden, n_out, max_seq,
                         nhead, num_layers, dim_ff)
    xs = jax.random.uniform(key_x, (B, C, H, W), dtype=jnp.float32,
                            minval=0.0, maxval=255.0)

    probs, conv_feat = _fused_forward(xs, params, max_seq=max_seq, nhead=nhead,
                                      n_out=n_out, approx_softmax=False)
    probs = jax.block_until_ready(probs)

    assert probs.shape == (B, n_out)
    assert bool(jnp.all(jnp.isfinite(probs)))
    assert bool(jnp.allclose(jnp.sum(probs, axis=-1), 1.0, atol=1e-5))

    # pure-JAX reference check (same surrogate diagram path)
    conv_ref, probs_ref = _reference_forward(xs, params, max_seq=max_seq, nhead=nhead)
    assert bool(jnp.allclose(conv_feat, conv_ref, rtol=1e-4, atol=1e-4))
    assert bool(jnp.allclose(probs, probs_ref, rtol=1e-3, atol=1e-3))

    print("KERNEL_OK")
</pallas_src>

<mosaic_0001>
module attributes {stable_mosaic.version = 11 : i64} {
  func.func @fused_forward_kernel(%arg0: i32, %arg1: memref<37x512xf32, #tpu.memory_space<vmem>>, %arg2: memref<256x37xf32, #tpu.memory_space<vmem>>, %arg3: memref<4x37xf32, #tpu.memory_space<vmem>>, %arg4: memref<37x1xf32, #tpu.memory_space<vmem>>, %arg5: memref<128x32xf32, #tpu.memory_space<vmem>>, %arg6: memref<19x96xf32, #tpu.memory_space<vmem>>, %arg7: memref<32x1024xf32, #tpu.memory_space<vmem>>, %arg8: memref<64x4xf32, #tpu.memory_space<vmem>>, %arg9: memref<2x4xf32, #tpu.memory_space<vmem>>, %arg10: memref<4x512xf32, #tpu.memory_space<vmem>>) attributes {dimension_semantics = [#tpu.dimension_semantics<arbitrary>], iteration_bounds = array<i64: 1>, scalar_prefetch = 0 : i64, scratch_operands = 0 : i64, tpu.core_type = #tpu.core_type<tc>, window_params = [{pipeline_mode = #tpu.pipeline_mode<synchronous>, transform_indices = @transform_0, window_bounds = array<i64: 37, 512>}, {pipeline_mode = #tpu.pipeline_mode<synchronous>, transform_indices = @transform_1, window_bounds = array<i64: 256, 37>}, {pipeline_mode = #tpu.pipeline_mode<synchronous>, transform_indices = @transform_2, window_bounds = array<i64: 4, 37>}, {pipeline_mode = #tpu.pipeline_mode<synchronous>, transform_indices = @transform_3, window_bounds = array<i64: 37, 1>}, {pipeline_mode = #tpu.pipeline_mode<synchronous>, transform_indices = @transform_4, window_bounds = array<i64: 128, 32>}, {pipeline_mode = #tpu.pipeline_mode<synchronous>, transform_indices = @transform_5, window_bounds = array<i64: 19, 96>}, {pipeline_mode = #tpu.pipeline_mode<synchronous>, transform_indices = @transform_6, window_bounds = array<i64: 32, 1024>}, {pipeline_mode = #tpu.pipeline_mode<synchronous>, transform_indices = @transform_7, window_bounds = array<i64: 64, 4>}, {pipeline_mode = #tpu.pipeline_mode<synchronous>, transform_indices = @transform_8, window_bounds = array<i64: 2, 4>}, {pipeline_mode = #tpu.pipeline_mode<synchronous>, transform_indices = @transform_9, window_bounds = array<i64: 4, 512>}]} {
    %c0 = arith.constant 0 : index
    %c0_0 = arith.constant 0 : index
    %0 = vector.load %arg3[%c0, %c0_0] : memref<4x37xf32, #tpu.memory_space<vmem>>, vector<4x37xf32>
    %c0_1 = arith.constant 0 : index
    %c0_2 = arith.constant 0 : index
    %1 = vector.load %arg1[%c0_1, %c0_2] : memref<37x512xf32, #tpu.memory_space<vmem>>, vector<37x512xf32>
    %cst = arith.constant dense<0.000000e+00> : vector<4x512xf32>
    %2 = tpu.matmul %0, %1, %cst {dimension_numbers = #tpu.dot_dimension_numbers<[1], [0], [0], [1], [0, 0, 1, 1], [], []>} : vector<4x37xf32>, vector<37x512xf32>, vector<4x512xf32> -> vector<4x512xf32>
    %c0_3 = arith.constant 0 : index
    %c0_4 = arith.constant 0 : index
    %3 = vector.load %arg10[%c0_3, %c0_4] : memref<4x512xf32, #tpu.memory_space<vmem>>, vector<4x512xf32>
    tpu.vector_store %arg10[%c0_3, %c0_4], %2 {strides = array<i32>} : memref<4x512xf32, #tpu.memory_space<vmem>>, vector<4x512xf32>,
    %c0_5 = arith.constant 0 : index
    %c0_6 = arith.constant 0 : index
    %4 = vector.load %arg2[%c0_5, %c0_6] : memref<256x37xf32, #tpu.memory_space<vmem>>, vector<256x37xf32>
    %c0_7 = arith.constant 0 : index
    %c0_8 = arith.constant 0 : index
    %5 = vector.load %arg4[%c0_7, %c0_8] : memref<37x1xf32, #tpu.memory_space<vmem>>, vector<37x1xf32>
    %cst_9 = arith.constant dense<0.000000e+00> : vector<256x1xf32>
    %6 = tpu.matmul %4, %5, %cst_9 {dimension_numbers = #tpu.dot_dimension_numbers<[1], [0], [0], [1], [0, 0, 1, 1], [], []>} : vector<256x37xf32>, vector<37x1xf32>, vector<256x1xf32> -> vector<256x1xf32>
    %7 = vector.extract_strided_slice %6 {offsets = [0, 0], sizes = [128, 1], strides = [1, 1]} : vector<256x1xf32> to vector<128x1xf32>
    %8 = vector.extract_strided_slice %6 {offsets = [128, 0], sizes = [128, 1], strides = [1, 1]} : vector<256x1xf32> to vector<128x1xf32>
    %9 = math.absf %8 : vector<128x1xf32>
    %10 = arith.addf %7, %9 : vector<128x1xf32>
    %c16 = arith.constant 16 : index
    %c0_10 = arith.constant 0 : index
    %11 = vector.load %arg6[%c16, %c0_10] : memref<19x96xf32, #tpu.memory_space<vmem>>, vector<1x32xf32>
    %c17 = arith.constant 17 : index
    %c0_11 = arith.constant 0 : index
    %12 = vector.load %arg6[%c17, %c0_11] : memref<19x96xf32, #tpu.memory_space<vmem>>, vector<1x32xf32>
    %13 = vector.broadcast %7 : vector<128x1xf32> to vector<128x32xf32>
    %14 = vector.broadcast %11 : vector<1x32xf32> to vector<128x32xf32>
    %15 = arith.mulf %13, %14 : vector<128x32xf32>
    %16 = vector.broadcast %10 : vector<128x1xf32> to vector<128x32xf32>
    %17 = vector.broadcast %12 : vector<1x32xf32> to vector<128x32xf32>
    %18 = arith.mulf %16, %17 : vector<128x32xf32>
    %19 = arith.addf %15, %18 : vector<128x32xf32>
    %c0_12 = arith.constant 0 : index
    %c0_13 = arith.constant 0 : index
    %20 = vector.load %arg5[%c0_12, %c0_13] : memref<128x32xf32, #tpu.memory_space<vmem>>, vector<128x32xf32>
    %21 = arith.addf %19, %20 : vector<128x32xf32>
    %c0_14 = arith.constant 0 : index
    %c0_15 = arith.constant 0 : index
    %22 = vector.load %arg7[%c0_14, %c0_15] : memref<32x1024xf32, #tpu.memory_space<vmem>>, vector<32x96xf32>
    %c0_16 = arith.constant 0 : index
    %c128 = arith.constant 128 : index
    %23 = vector.load %arg7[%c0_16, %c128] : memref<32x1024xf32, #tpu.memory_space<vmem>>, vector<32x32xf32>
    %c0_17 = arith.constant 0 : index
    %c256 = arith.constant 256 : index
    %24 = vector.load %arg7[%c0_17, %c256] : memref<32x1024xf32, #tpu.memory_space<vmem>>, vector<32x16xf32>
    %c0_18 = arith.constant 0 : index
    %c384 = arith.constant 384 : index
    %25 = vector.load %arg7[%c0_18, %c384] : memref<32x1024xf32, #tpu.memory_space<vmem>>, vector<16x32xf32>
    %c0_19 = arith.constant 0 : index
    %c0_20 = arith.constant 0 : index
    %26 = vector.load %arg6[%c0_19, %c0_20] : memref<19x96xf32, #tpu.memory_space<vmem>>, vector<1x96xf32>
    %c1 = arith.constant 1 : index
    %c0_21 = arith.constant 0 : index
    %27 = vector.load %arg6[%c1, %c0_21] : memref<19x96xf32, #tpu.memory_space<vmem>>, vector<1x32xf32>
    %c2 = arith.constant 2 : index
    %c0_22 = arith.constant 0 : index
    %28 = vector.load %arg6[%c2, %c0_22] : memref<19x96xf32, #tpu.memory_space<vmem>>, vector<1x16xf32>
    %c3 = arith.constant 3 : index
    %c0_23 = arith.constant 0 : index
    %29 = vector.load %arg6[%c3, %c0_23] : memref<19x96xf32, #tpu.memory_space<vmem>>, vector<1x32xf32>
    %c4 = arith.constant 4 : index
    %c0_24 = arith.constant 0 : index
    %30 = vector.load %arg6[%c4, %c0_24] : memref<19x96xf32, #tpu.memory_space<vmem>>, vector<1x32xf32>
    %c5 = arith.constant 5 : index
    %c0_25 = arith.constant 0 : index
    %31 = vector.load %arg6[%c5, %c0_25] : memref<19x96xf32, #tpu.memory_space<vmem>>, vector<1x32xf32>
    %c6 = arith.constant 6 : index
    %c0_26 = arith.constant 0 : index
    %32 = vector.load %arg6[%c6, %c0_26] : memref<19x96xf32, #tpu.memory_space<vmem>>, vector<1x32xf32>
    %c7 = arith.constant 7 : index
    %c0_27 = arith.constant 0 : index
    %33 = vector.load %arg6[%c7, %c0_27] : memref<19x96xf32, #tpu.memory_space<vmem>>, vector<1x32xf32>
    %cst_28 = arith.constant dense<0.000000e+00> : vector<128x96xf32>
    %34 = tpu.matmul %21, %22, %cst_28 {dimension_numbers = #tpu.dot_dimension_numbers<[1], [0], [0], [1], [0, 0, 1, 1], [], []>} : vector<128x32xf32>, vector<32x96xf32>, vector<128x96xf32> -> vector<128x96xf32>
    %35 = vector.broadcast %26 : vector<1x96xf32> to vector<128x96xf32>
    %36 = arith.addf %34, %35 : vector<128x96xf32>
    %37 = vector.extract_strided_slice %36 {offsets = [0, 0], sizes = [64, 16], strides = [1, 1]} : vector<128x96xf32> to vector<64x16xf32>
    %cst_29 = arith.constant 2.500000e-01 : f32
    %38 = vector.broadcast %cst_29 : f32 to vector<64x16xf32>
    %39 = arith.mulf %37, %38 : vector<64x16xf32>
    %40 = vector.extract_strided_slice %36 {offsets = [0, 32], sizes = [64, 16], strides = [1, 1]} : vector<128x96xf32> to vector<64x16xf32>
    %41 = vector.extract_strided_slice %36 {offsets = [0, 64], sizes = [64, 16], strides = [1, 1]} : vector<128x96xf32> to vector<64x16xf32>
    %cst_30 = arith.constant dense<0.000000e+00> : vector<64x64xf32>
    %42 = tpu.matmul %39, %40, %cst_30 {dimension_numbers = #tpu.dot_dimension_numbers<[1], [1], [0], [0], [0, 0, 1, 0], [], []>} : vector<64x16xf32>, vector<64x16xf32>, vector<64x64xf32> -> vector<64x64xf32>
    %cst_31 = arith.constant dense<0xFF800000> : vector<64xf32>
    %43 = vector.multi_reduction <maximumf>, %42, %cst_31 [1] : vector<64x64xf32> to vector<64xf32>
    %44 = vector.shape_cast %43 : vector<64xf32> to vector<64x1xf32>
    %45 = vector.broadcast %44 : vector<64x1xf32> to vector<64x64xf32>
    %46 = arith.subf %42, %45 : vector<64x64xf32>
    %47 = math.exp %46 : vector<64x64xf32>
    %cst_32 = arith.constant dense<0.000000e+00> : vector<64xf32>
    %48 = vector.multi_reduction <add>, %47, %cst_32 [1] : vector<64x64xf32> to vector<64xf32>
    %49 = vector.shape_cast %48 : vector<64xf32> to vector<64x1xf32>
    %50 = vector.broadcast %49 : vector<64x1xf32> to vector<64x64xf32>
    %51 = arith.divf %47, %50 : vector<64x64xf32>
    %cst_33 = arith.constant dense<0.000000e+00> : vector<64x16xf32>
    %52 = tpu.matmul %51, %41, %cst_33 {dimension_numbers = #tpu.dot_dimension_numbers<[1], [0], [0], [1], [0, 0, 1, 1], [], []>} : vector<64x64xf32>, vector<64x16xf32>, vector<64x16xf32> -> vector<64x16xf32>
    %53 = vector.extract_strided_slice %36 {offsets = [0, 16], sizes = [64, 16], strides = [1, 1]} : vector<128x96xf32> to vector<64x16xf32>
    %cst_34 = arith.constant 2.500000e-01 : f32
    %54 = vector.broadcast %cst_34 : f32 to vector<64x16xf32>
    %55 = arith.mulf %53, %54 : vector<64x16xf32>
    %56 = vector.extract_strided_slice %36 {offsets = [0, 48], sizes = [64, 16], strides = [1, 1]} : vector<128x96xf32> to vector<64x16xf32>
    %57 = vector.extract_strided_slice %36 {offsets = [0, 80], sizes = [64, 16], strides = [1, 1]} : vector<128x96xf32> to vector<64x16xf32>
    %cst_35 = arith.constant dense<0.000000e+00> : vector<64x64xf32>
    %58 = tpu.matmul %55, %56, %cst_35 {dimension_numbers = #tpu.dot_dimension_numbers<[1], [1], [0], [0], [0, 0, 1, 0], [], []>} : vector<64x16xf32>, vector<64x16xf32>, vector<64x64xf32> -> vector<64x64xf32>
    %cst_36 = arith.constant dense<0xFF800000> : vector<64xf32>
    %59 = vector.multi_reduction <maximumf>, %58, %cst_36 [1] : vector<64x64xf32> to vector<64xf32>
    %60 = vector.shape_cast %59 : vector<64xf32> to vector<64x1xf32>
    %61 = vector.broadcast %60 : vector<64x1xf32> to vector<64x64xf32>
    %62 = arith.subf %58, %61 : vector<64x64xf32>
    %63 = math.exp %62 : vector<64x64xf32>
    %cst_37 = arith.constant dense<0.000000e+00> : vector<64xf32>
    %64 = vector.multi_reduction <add>, %63, %cst_37 [1] : vector<64x64xf32> to vector<64xf32>
    %65 = vector.shape_cast %64 : vector<64xf32> to vector<64x1xf32>
    %66 = vector.broadcast %65 : vector<64x1xf32> to vector<64x64xf32>
    %67 = arith.divf %63, %66 : vector<64x64xf32>
    %cst_38 = arith.constant dense<0.000000e+00> : vector<64x16xf32>
    %68 = tpu.matmul %67, %57, %cst_38 {dimension_numbers = #tpu.dot_dimension_numbers<[1], [0], [0], [1], [0, 0, 1, 1], [], []>} : vector<64x64xf32>, vector<64x16xf32>, vector<64x16xf32> -> vector<64x16xf32>
    %69 = tpu.concatenate %52, %68 in 1 : vector<64x16xf32>, vector<64x16xf32> -> vector<64x32xf32>
    %70 = vector.extract_strided_slice %36 {offsets = [64, 0], sizes = [64, 16], strides = [1, 1]} : vector<128x96xf32> to vector<64x16xf32>
    %cst_39 = arith.constant 2.500000e-01 : f32
    %71 = vector.broadcast %cst_39 : f32 to vector<64x16xf32>
    %72 = arith.mulf %70, %71 : vector<64x16xf32>
    %73 = vector.extract_strided_slice %36 {offsets = [64, 32], sizes = [64, 16], strides = [1, 1]} : vector<128x96xf32> to vector<64x16xf32>
    %74 = vector.extract_strided_slice %36 {offsets = [64, 64], sizes = [64, 16], strides = [1, 1]} : vector<128x96xf32> to vector<64x16xf32>
    %cst_40 = arith.constant dense<0.000000e+00> : vector<64x64xf32>
    %75 = tpu.matmul %72, %73, %cst_40 {dimension_numbers = #tpu.dot_dimension_numbers<[1], [1], [0], [0], [0, 0, 1, 0], [], []>} : vector<64x16xf32>, vector<64x16xf32>, vector<64x64xf32> -> vector<64x64xf32>
    %cst_41 = arith.constant dense<0xFF800000> : vector<64xf32>
    %76 = vector.multi_reduction <maximumf>, %75, %cst_41 [1] : vector<64x64xf32> to vector<64xf32>
    %77 = vector.shape_cast %76 : vector<64xf32> to vector<64x1xf32>
    %78 = vector.broadcast %77 : vector<64x1xf32> to vector<64x64xf32>
    %79 = arith.subf %75, %78 : vector<64x64xf32>
    %80 = math.exp %79 : vector<64x64xf32>
    %cst_42 = arith.constant dense<0.000000e+00> : vector<64xf32>
    %81 = vector.multi_reduction <add>, %80, %cst_42 [1] : vector<64x64xf32> to vector<64xf32>
    %82 = vector.shape_cast %81 : vector<64xf32> to vector<64x1xf32>
    %83 = vector.broadcast %82 : vector<64x1xf32> to vector<64x64xf32>
    %84 = arith.divf %80, %83 : vector<64x64xf32>
    %cst_43 = arith.constant dense<0.000000e+00> : vector<64x16xf32>
    %85 = tpu.matmul %84, %74, %cst_43 {dimension_numbers = #tpu.dot_dimension_numbers<[1], [0], [0], [1], [0, 0, 1, 1], [], []>} : vector<64x64xf32>, vector<64x16xf32>, vector<64x16xf32> -> vector<64x16xf32>
    %86 = vector.extract_strided_slice %36 {offsets = [64, 16], sizes = [64, 16], strides = [1, 1]} : vector<128x96xf32> to vector<64x16xf32>
    %cst_44 = arith.constant 2.500000e-01 : f32
    %87 = vector.broadcast %cst_44 : f32 to vector<64x16xf32>
    %88 = arith.mulf %86, %87 : vector<64x16xf32>
    %89 = vector.extract_strided_slice %36 {offsets = [64, 48], sizes = [64, 16], strides = [1, 1]} : vector<128x96xf32> to vector<64x16xf32>
    %90 = vector.extract_strided_slice %36 {offsets = [64, 80], sizes = [64, 16], strides = [1, 1]} : vector<128x96xf32> to vector<64x16xf32>
    %cst_45 = arith.constant dense<0.000000e+00> : vector<64x64xf32>
    %91 = tpu.matmul %88, %89, %cst_45 {dimension_numbers = #tpu.dot_dimension_numbers<[1], [1], [0], [0], [0, 0, 1, 0], [], []>} : vector<64x16xf32>, vector<64x16xf32>, vector<64x64xf32> -> vector<64x64xf32>
    %cst_46 = arith.constant dense<0xFF800000> : vector<64xf32>
    %92 = vector.multi_reduction <maximumf>, %91, %cst_46 [1] : vector<64x64xf32> to vector<64xf32>
    %93 = vector.shape_cast %92 : vector<64xf32> to vector<64x1xf32>
    %94 = vector.broadcast %93 : vector<64x1xf32> to vector<64x64xf32>
    %95 = arith.subf %91, %94 : vector<64x64xf32>
    %96 = math.exp %95 : vector<64x64xf32>
    %cst_47 = arith.constant dense<0.000000e+00> : vector<64xf32>
    %97 = vector.multi_reduction <add>, %96, %cst_47 [1] : vector<64x64xf32> to vector<64xf32>
    %98 = vector.shape_cast %97 : vector<64xf32> to vector<64x1xf32>
    %99 = vector.broadcast %98 : vector<64x1xf32> to vector<64x64xf32>
    %100 = arith.divf %96, %99 : vector<64x64xf32>
    %cst_48 = arith.constant dense<0.000000e+00> : vector<64x16xf32>
    %101 = tpu.matmul %100, %90, %cst_48 {dimension_numbers = #tpu.dot_dimension_numbers<[1], [0], [0], [1], [0, 0, 1, 1], [], []>} : vector<64x64xf32>, vector<64x16xf32>, vector<64x16xf32> -> vector<64x16xf32>
    %102 = tpu.concatenate %85, %101 in 1 : vector<64x16xf32>, vector<64x16xf32> -> vector<64x32xf32>
    %103 = tpu.concatenate %69, %102 in 0 : vector<64x32xf32>, vector<64x32xf32> -> vector<128x32xf32>
    %cst_49 = arith.constant dense<0.000000e+00> : vector<128x32xf32>
    %104 = tpu.matmul %103, %23, %cst_49 {dimension_numbers = #tpu.dot_dimension_numbers<[1], [0], [0], [1], [0, 0, 1, 1], [], []>} : vector<128x32xf32>, vector<32x32xf32>, vector<128x32xf32> -> vector<128x32xf32>
    %105 = arith.addf %21, %104 : vector<128x32xf32>
    %106 = vector.broadcast %27 : vector<1x32xf32> to vector<128x32xf32>
    %107 = arith.addf %105, %106 : vector<128x32xf32>
    %cst_50 = arith.constant dense<0.000000e+00> : vector<128xf32>
    %108 = vector.multi_reduction <add>, %107, %cst_50 [1] : vector<128x32xf32> to vector<128xf32>
    %109 = vector.shape_cast %108 : vector<128xf32> to vector<128x1xf32>
    %cst_51 = arith.constant 3.200000e+01 : f32
    %110 = vector.broadcast %cst_51 : f32 to vector<128x1xf32>
    %111 = arith.divf %109, %110 : vector<128x1xf32>
    %112 = vector.broadcast %111 : vector<128x1xf32> to vector<128x32xf32>
    %113 = arith.subf %107, %112 : vector<128x32xf32>
    %114 = arith.mulf %113, %113 : vector<128x32xf32>
    %cst_52 = arith.constant dense<0.000000e+00> : vector<128xf32>
    %115 = vector.multi_reduction <add>, %114, %cst_52 [1] : vector<128x32xf32> to vector<128xf32>
    %116 = vector.shape_cast %115 : vector<128xf32> to vector<128x1xf32>
    %cst_53 = arith.constant 3.200000e+01 : f32
    %117 = vector.broadcast %cst_53 : f32 to vector<128x1xf32>
    %118 = arith.divf %116, %117 : vector<128x1xf32>
    %119 = vector.broadcast %111 : vector<128x1xf32> to vector<128x32xf32>
    %120 = arith.subf %107, %119 : vector<128x32xf32>
    %cst_54 = arith.constant 9.99999974E-6 : f32
    %121 = vector.broadcast %cst_54 : f32 to vector<128x1xf32>
    %122 = arith.addf %118, %121 : vector<128x1xf32>
    %123 = math.rsqrt %122 : vector<128x1xf32>
    %124 = vector.broadcast %123 : vector<128x1xf32> to vector<128x32xf32>
    %125 = arith.mulf %120, %124 : vector<128x32xf32>
    %126 = vector.broadcast %30 : vector<1x32xf32> to vector<128x32xf32>
    %127 = arith.mulf %125, %126 : vector<128x32xf32>
    %128 = vector.broadcast %31 : vector<1x32xf32> to vector<128x32xf32>
    %129 = arith.addf %127, %128 : vector<128x32xf32>
    %cst_55 = arith.constant dense<0.000000e+00> : vector<128x16xf32>
    %130 = tpu.matmul %129, %24, %cst_55 {dimension_numbers = #tpu.dot_dimension_numbers<[1], [0], [0], [1], [0, 0, 1, 1], [], []>} : vector<128x32xf32>, vector<32x16xf32>, vector<128x16xf32> -> vector<128x16xf32>
    %131 = vector.broadcast %28 : vector<1x16xf32> to vector<128x16xf32>
    %132 = arith.addf %130, %131 : vector<128x16xf32>
    %cst_56 = arith.constant 0.000000e+00 : f32
    %133 = vector.broadcast %cst_56 : f32 to vector<128x16xf32>
    %134 = arith.maximumf %132, %133 : vector<128x16xf32>
    %cst_57 = arith.constant dense<0.000000e+00> : vector<128x32xf32>
    %135 = tpu.matmul %134, %25, %cst_57 {dimension_numbers = #tpu.dot_dimension_numbers<[1], [0], [0], [1], [0, 0, 1, 1], [], []>} : vector<128x16xf32>, vector<16x32xf32>, vector<128x32xf32> -> vector<128x32xf32>
    %136 = vector.broadcast %29 : vector<1x32xf32> to vector<128x32xf32>
    %137 = arith.addf %135, %136 : vector<128x32xf32>
    %138 = arith.addf %129, %137 : vector<128x32xf32>
    %cst_58 = arith.constant dense<0.000000e+00> : vector<128xf32>
    %139 = vector.multi_reduction <add>, %138, %cst_58 [1] : vector<128x32xf32> to vector<128xf32>
    %140 = vector.shape_cast %139 : vector<128xf32> to vector<128x1xf32>
    %cst_59 = arith.constant 3.200000e+01 : f32
    %141 = vector.broadcast %cst_59 : f32 to vector<128x1xf32>
    %142 = arith.divf %140, %141 : vector<128x1xf32>
    %143 = vector.broadcast %142 : vector<128x1xf32> to vector<128x32xf32>
    %144 = arith.subf %138, %143 : vector<128x32xf32>
    %145 = arith.mulf %144, %144 : vector<128x32xf32>
    %cst_60 = arith.constant dense<0.000000e+00> : vector<128xf32>
    %146 = vector.multi_reduction <add>, %145, %cst_60 [1] : vector<128x32xf32> to vector<128xf32>
    %147 = vector.shape_cast %146 : vector<128xf32> to vector<128x1xf32>
    %cst_61 = arith.constant 3.200000e+01 : f32
    %148 = vector.broadcast %cst_61 : f32 to vector<128x1xf32>
    %149 = arith.divf %147, %148 : vector<128x1xf32>
    %150 = vector.broadcast %142 : vector<128x1xf32> to vector<128x32xf32>
    %151 = arith.subf %138, %150 : vector<128x32xf32>
    %cst_62 = arith.constant 9.99999974E-6 : f32
    %152 = vector.broadcast %cst_62 : f32 to vector<128x1xf32>
    %153 = arith.addf %149, %152 : vector<128x1xf32>
    %154 = math.rsqrt %153 : vector<128x1xf32>
    %155 = vector.broadcast %154 : vector<128x1xf32> to vector<128x32xf32>
    %156 = arith.mulf %151, %155 : vector<128x32xf32>
    %157 = vector.broadcast %32 : vector<1x32xf32> to vector<128x32xf32>
    %158 = arith.mulf %156, %157 : vector<128x32xf32>
    %159 = vector.broadcast %33 : vector<1x32xf32> to vector<128x32xf32>
    %160 = arith.addf %158, %159 : vector<128x32xf32>
    %c0_63 = arith.constant 0 : index
    %c512 = arith.constant 512 : index
    %161 = vector.load %arg7[%c0_63, %c512] : memref<32x1024xf32, #tpu.memory_space<vmem>>, vector<32x96xf32>
    %c0_64 = arith.constant 0 : index
    %c640 = arith.constant 640 : index
    %162 = vector.load %arg7[%c0_64, %c640] : memref<32x1024xf32, #tpu.memory_space<vmem>>, vector<32x32xf32>
    %c0_65 = arith.constant 0 : index
    %c768 = arith.constant 768 : index
    %163 = vector.load %arg7[%c0_65, %c768] : memref<32x1024xf32, #tpu.memory_space<vmem>>, vector<32x16xf32>
    %c0_66 = arith.constant 0 : index
    %c896 = arith.constant 896 : index
    %164 = vector.load %arg7[%c0_66, %c896] : memref<32x1024xf32, #tpu.memory_space<vmem>>, vector<16x32xf32>
    %c8 = arith.constant 8 : index
    %c0_67 = arith.constant 0 : index
    %165 = vector.load %arg6[%c8, %c0_67] : memref<19x96xf32, #tpu.memory_space<vmem>>, vector<1x96xf32>
    %c9 = arith.constant 9 : index
    %c0_68 = arith.constant 0 : index
    %166 = vector.load %arg6[%c9, %c0_68] : memref<19x96xf32, #tpu.memory_space<vmem>>, vector<1x32xf32>
    %c10 = arith.constant 10 : index
    %c0_69 = arith.constant 0 : index
    %167 = vector.load %arg6[%c10, %c0_69] : memref<19x96xf32, #tpu.memory_space<vmem>>, vector<1x16xf32>
    %c11 = arith.constant 11 : index
    %c0_70 = arith.constant 0 : index
    %168 = vector.load %arg6[%c11, %c0_70] : memref<19x96xf32, #tpu.memory_space<vmem>>, vector<1x32xf32>
    %c12 = arith.constant 12 : index
    %c0_71 = arith.constant 0 : index
    %169 = vector.load %arg6[%c12, %c0_71] : memref<19x96xf32, #tpu.memory_space<vmem>>, vector<1x32xf32>
    %c13 = arith.constant 13 : index
    %c0_72 = arith.constant 0 : index
    %170 = vector.load %arg6[%c13, %c0_72] : memref<19x96xf32, #tpu.memory_space<vmem>>, vector<1x32xf32>
    %c14 = arith.constant 14 : index
    %c0_73 = arith.constant 0 : index
    %171 = vector.load %arg6[%c14, %c0_73] : memref<19x96xf32, #tpu.memory_space<vmem>>, vector<1x32xf32>
    %c15 = arith.constant 15 : index
    %c0_74 = arith.constant 0 : index
    %172 = vector.load %arg6[%c15, %c0_74] : memref<19x96xf32, #tpu.memory_space<vmem>>, vector<1x32xf32>
    %cst_75 = arith.constant dense<0.000000e+00> : vector<128x96xf32>
    %173 = tpu.matmul %160, %161, %cst_75 {dimension_numbers = #tpu.dot_dimension_numbers<[1], [0], [0], [1], [0, 0, 1, 1], [], []>} : vector<128x32xf32>, vector<32x96xf32>, vector<128x96xf32> -> vector<128x96xf32>
    %174 = vector.broadcast %165 : vector<1x96xf32> to vector<128x96xf32>
    %175 = arith.addf %173, %174 : vector<128x96xf32>
    %176 = vector.extract_strided_slice %175 {offsets = [0, 0], sizes = [64, 16], strides = [1, 1]} : vector<128x96xf32> to vector<64x16xf32>
    %cst_76 = arith.constant 2.500000e-01 : f32
    %177 = vector.broadcast %cst_76 : f32 to vector<64x16xf32>
    %178 = arith.mulf %176, %177 : vector<64x16xf32>
    %179 = vector.extract_strided_slice %175 {offsets = [0, 32], sizes = [64, 16], strides = [1, 1]} : vector<128x96xf32> to vector<64x16xf32>
    %180 = vector.extract_strided_slice %175 {offsets = [0, 64], sizes = [64, 16], strides = [1, 1]} : vector<128x96xf32> to vector<64x16xf32>
    %cst_77 = arith.constant dense<0.000000e+00> : vector<64x64xf32>
    %181 = tpu.matmul %178, %179, %cst_77 {dimension_numbers = #tpu.dot_dimension_numbers<[1], [1], [0], [0], [0, 0, 1, 0], [], []>} : vector<64x16xf32>, vector<64x16xf32>, vector<64x64xf32> -> vector<64x64xf32>
    %cst_78 = arith.constant dense<0xFF800000> : vector<64xf32>
    %182 = vector.multi_reduction <maximumf>, %181, %cst_78 [1] : vector<64x64xf32> to vector<64xf32>
    %183 = vector.shape_cast %182 : vector<64xf32> to vector<64x1xf32>
    %184 = vector.broadcast %183 : vector<64x1xf32> to vector<64x64xf32>
    %185 = arith.subf %181, %184 : vector<64x64xf32>
    %186 = math.exp %185 : vector<64x64xf32>
    %cst_79 = arith.constant dense<0.000000e+00> : vector<64xf32>
    %187 = vector.multi_reduction <add>, %186, %cst_79 [1] : vector<64x64xf32> to vector<64xf32>
    %188 = vector.shape_cast %187 : vector<64xf32> to vector<64x1xf32>
    %189 = vector.broadcast %188 : vector<64x1xf32> to vector<64x64xf32>
    %190 = arith.divf %186, %189 : vector<64x64xf32>
    %cst_80 = arith.constant dense<0.000000e+00> : vector<64x16xf32>
    %191 = tpu.matmul %190, %180, %cst_80 {dimension_numbers = #tpu.dot_dimension_numbers<[1], [0], [0], [1], [0, 0, 1, 1], [], []>} : vector<64x64xf32>, vector<64x16xf32>, vector<64x16xf32> -> vector<64x16xf32>
    %192 = vector.extract_strided_slice %175 {offsets = [0, 16], sizes = [64, 16], strides = [1, 1]} : vector<128x96xf32> to vector<64x16xf32>
    %cst_81 = arith.constant 2.500000e-01 : f32
    %193 = vector.broadcast %cst_81 : f32 to vector<64x16xf32>
    %194 = arith.mulf %192, %193 : vector<64x16xf32>
    %195 = vector.extract_strided_slice %175 {offsets = [0, 48], sizes = [64, 16], strides = [1, 1]} : vector<128x96xf32> to vector<64x16xf32>
    %196 = vector.extract_strided_slice %175 {offsets = [0, 80], sizes = [64, 16], strides = [1, 1]} : vector<128x96xf32> to vector<64x16xf32>
    %cst_82 = arith.constant dense<0.000000e+00> : vector<64x64xf32>
    %197 = tpu.matmul %194, %195, %cst_82 {dimension_numbers = #tpu.dot_dimension_numbers<[1], [1], [0], [0], [0, 0, 1, 0], [], []>} : vector<64x16xf32>, vector<64x16xf32>, vector<64x64xf32> -> vector<64x64xf32>
    %cst_83 = arith.constant dense<0xFF800000> : vector<64xf32>
    %198 = vector.multi_reduction <maximumf>, %197, %cst_83 [1] : vector<64x64xf32> to vector<64xf32>
    %199 = vector.shape_cast %198 : vector<64xf32> to vector<64x1xf32>
    %200 = vector.broadcast %199 : vector<64x1xf32> to vector<64x64xf32>
    %201 = arith.subf %197, %200 : vector<64x64xf32>
    %202 = math.exp %201 : vector<64x64xf32>
    %cst_84 = arith.constant dense<0.000000e+00> : vector<64xf32>
    %203 = vector.multi_reduction <add>, %202, %cst_84 [1] : vector<64x64xf32> to vector<64xf32>
    %204 = vector.shape_cast %203 : vector<64xf32> to vector<64x1xf32>
    %205 = vector.broadcast %204 : vector<64x1xf32> to vector<64x64xf32>
    %206 = arith.divf %202, %205 : vector<64x64xf32>
    %cst_85 = arith.constant dense<0.000000e+00> : vector<64x16xf32>
    %207 = tpu.matmul %206, %196, %cst_85 {dimension_numbers = #tpu.dot_dimension_numbers<[1], [0], [0], [1], [0, 0, 1, 1], [], []>} : vector<64x64xf32>, vector<64x16xf32>, vector<64x16xf32> -> vector<64x16xf32>
    %208 = tpu.concatenate %191, %207 in 1 : vector<64x16xf32>, vector<64x16xf32> -> vector<64x32xf32>
    %209 = vector.extract_strided_slice %175 {offsets = [64, 0], sizes = [64, 16], strides = [1, 1]} : vector<128x96xf32> to vector<64x16xf32>
    %cst_86 = arith.constant 2.500000e-01 : f32
    %210 = vector.broadcast %cst_86 : f32 to vector<64x16xf32>
    %211 = arith.mulf %209, %210 : vector<64x16xf32>
    %212 = vector.extract_strided_slice %175 {offsets = [64, 32], sizes = [64, 16], strides = [1, 1]} : vector<128x96xf32> to vector<64x16xf32>
    %213 = vector.extract_strided_slice %175 {offsets = [64, 64], sizes = [64, 16], strides = [1, 1]} : vector<128x96xf32> to vector<64x16xf32>
    %cst_87 = arith.constant dense<0.000000e+00> : vector<64x64xf32>
    %214 = tpu.matmul %211, %212, %cst_87 {dimension_numbers = #tpu.dot_dimension_numbers<[1], [1], [0], [0], [0, 0, 1, 0], [], []>} : vector<64x16xf32>, vector<64x16xf32>, vector<64x64xf32> -> vector<64x64xf32>
    %cst_88 = arith.constant dense<0xFF800000> : vector<64xf32>
    %215 = vector.multi_reduction <maximumf>, %214, %cst_88 [1] : vector<64x64xf32> to vector<64xf32>
    %216 = vector.shape_cast %215 : vector<64xf32> to vector<64x1xf32>
    %217 = vector.broadcast %216 : vector<64x1xf32> to vector<64x64xf32>
    %218 = arith.subf %214, %217 : vector<64x64xf32>
    %219 = math.exp %218 : vector<64x64xf32>
    %cst_89 = arith.constant dense<0.000000e+00> : vector<64xf32>
    %220 = vector.multi_reduction <add>, %219, %cst_89 [1] : vector<64x64xf32> to vector<64xf32>
    %221 = vector.shape_cast %220 : vector<64xf32> to vector<64x1xf32>
    %222 = vector.broadcast %221 : vector<64x1xf32> to vector<64x64xf32>
    %223 = arith.divf %219, %222 : vector<64x64xf32>
    %cst_90 = arith.constant dense<0.000000e+00> : vector<64x16xf32>
    %224 = tpu.matmul %223, %213, %cst_90 {dimension_numbers = #tpu.dot_dimension_numbers<[1], [0], [0], [1], [0, 0, 1, 1], [], []>} : vector<64x64xf32>, vector<64x16xf32>, vector<64x16xf32> -> vector<64x16xf32>
    %225 = vector.extract_strided_slice %175 {offsets = [64, 16], sizes = [64, 16], strides = [1, 1]} : vector<128x96xf32> to vector<64x16xf32>
    %cst_91 = arith.constant 2.500000e-01 : f32
    %226 = vector.broadcast %cst_91 : f32 to vector<64x16xf32>
    %227 = arith.mulf %225, %226 : vector<64x16xf32>
    %228 = vector.extract_strided_slice %175 {offsets = [64, 48], sizes = [64, 16], strides = [1, 1]} : vector<128x96xf32> to vector<64x16xf32>
    %229 = vector.extract_strided_slice %175 {offsets = [64, 80], sizes = [64, 16], strides = [1, 1]} : vector<128x96xf32> to vector<64x16xf32>
    %cst_92 = arith.constant dense<0.000000e+00> : vector<64x64xf32>
    %230 = tpu.matmul %227, %228, %cst_92 {dimension_numbers = #tpu.dot_dimension_numbers<[1], [1], [0], [0], [0, 0, 1, 0], [], []>} : vector<64x16xf32>, vector<64x16xf32>, vector<64x64xf32> -> vector<64x64xf32>
    %cst_93 = arith.constant dense<0xFF800000> : vector<64xf32>
    %231 = vector.multi_reduction <maximumf>, %230, %cst_93 [1] : vector<64x64xf32> to vector<64xf32>
    %232 = vector.shape_cast %231 : vector<64xf32> to vector<64x1xf32>
    %233 = vector.broadcast %232 : vector<64x1xf32> to vector<64x64xf32>
    %234 = arith.subf %230, %233 : vector<64x64xf32>
    %235 = math.exp %234 : vector<64x64xf32>
    %cst_94 = arith.constant dense<0.000000e+00> : vector<64xf32>
    %236 = vector.multi_reduction <add>, %235, %cst_94 [1] : vector<64x64xf32> to vector<64xf32>
    %237 = vector.shape_cast %236 : vector<64xf32> to vector<64x1xf32>
    %238 = vector.broadcast %237 : vector<64x1xf32> to vector<64x64xf32>
    %239 = arith.divf %235, %238 : vector<64x64xf32>
    %cst_95 = arith.constant dense<0.000000e+00> : vector<64x16xf32>
    %240 = tpu.matmul %239, %229, %cst_95 {dimension_numbers = #tpu.dot_dimension_numbers<[1], [0], [0], [1], [0, 0, 1, 1], [], []>} : vector<64x64xf32>, vector<64x16xf32>, vector<64x16xf32> -> vector<64x16xf32>
    %241 = tpu.concatenate %224, %240 in 1 : vector<64x16xf32>, vector<64x16xf32> -> vector<64x32xf32>
    %242 = tpu.concatenate %208, %241 in 0 : vector<64x32xf32>, vector<64x32xf32> -> vector<128x32xf32>
    %cst_96 = arith.constant dense<0.000000e+00> : vector<128x32xf32>
    %243 = tpu.matmul %242, %162, %cst_96 {dimension_numbers = #tpu.dot_dimension_numbers<[1], [0], [0], [1], [0, 0, 1, 1], [], []>} : vector<128x32xf32>, vector<32x32xf32>, vector<128x32xf32> -> vector<128x32xf32>
    %244 = arith.addf %160, %243 : vector<128x32xf32>
    %245 = vector.broadcast %166 : vector<1x32xf32> to vector<128x32xf32>
    %246 = arith.addf %244, %245 : vector<128x32xf32>
    %cst_97 = arith.constant dense<0.000000e+00> : vector<128xf32>
    %247 = vector.multi_reduction <add>, %246, %cst_97 [1] : vector<128x32xf32> to vector<128xf32>
    %248 = vector.shape_cast %247 : vector<128xf32> to vector<128x1xf32>
    %cst_98 = arith.constant 3.200000e+01 : f32
    %249 = vector.broadcast %cst_98 : f32 to vector<128x1xf32>
    %250 = arith.divf %248, %249 : vector<128x1xf32>
    %251 = vector.broadcast %250 : vector<128x1xf32> to vector<128x32xf32>
    %252 = arith.subf %246, %251 : vector<128x32xf32>
    %253 = arith.mulf %252, %252 : vector<128x32xf32>
    %cst_99 = arith.constant dense<0.000000e+00> : vector<128xf32>
    %254 = vector.multi_reduction <add>, %253, %cst_99 [1] : vector<128x32xf32> to vector<128xf32>
    %255 = vector.shape_cast %254 : vector<128xf32> to vector<128x1xf32>
    %cst_100 = arith.constant 3.200000e+01 : f32
    %256 = vector.broadcast %cst_100 : f32 to vector<128x1xf32>
    %257 = arith.divf %255, %256 : vector<128x1xf32>
    %258 = vector.broadcast %250 : vector<128x1xf32> to vector<128x32xf32>
    %259 = arith.subf %246, %258 : vector<128x32xf32>
    %cst_101 = arith.constant 9.99999974E-6 : f32
    %260 = vector.broadcast %cst_101 : f32 to vector<128x1xf32>
    %261 = arith.addf %257, %260 : vector<128x1xf32>
    %262 = math.rsqrt %261 : vector<128x1xf32>
    %263 = vector.broadcast %262 : vector<128x1xf32> to vector<128x32xf32>
    %264 = arith.mulf %259, %263 : vector<128x32xf32>
    %265 = vector.broadcast %169 : vector<1x32xf32> to vector<128x32xf32>
    %266 = arith.mulf %264, %265 : vector<128x32xf32>
    %267 = vector.broadcast %170 : vector<1x32xf32> to vector<128x32xf32>
    %268 = arith.addf %266, %267 : vector<128x32xf32>
    %cst_102 = arith.constant dense<0.000000e+00> : vector<128x16xf32>
    %269 = tpu.matmul %268, %163, %cst_102 {dimension_numbers = #tpu.dot_dimension_numbers<[1], [0], [0], [1], [0, 0, 1, 1], [], []>} : vector<128x32xf32>, vector<32x16xf32>, vector<128x16xf32> -> vector<128x16xf32>
    %270 = vector.broadcast %167 : vector<1x16xf32> to vector<128x16xf32>
    %271 = arith.addf %269, %270 : vector<128x16xf32>
    %cst_103 = arith.constant 0.000000e+00 : f32
    %272 = vector.broadcast %cst_103 : f32 to vector<128x16xf32>
    %273 = arith.maximumf %271, %272 : vector<128x16xf32>
    %cst_104 = arith.constant dense<0.000000e+00> : vector<128x32xf32>
    %274 = tpu.matmul %273, %164, %cst_104 {dimension_numbers = #tpu.dot_dimension_numbers<[1], [0], [0], [1], [0, 0, 1, 1], [], []>} : vector<128x16xf32>, vector<16x32xf32>, vector<128x32xf32> -> vector<128x32xf32>
    %275 = vector.broadcast %168 : vector<1x32xf32> to vector<128x32xf32>
    %276 = arith.addf %274, %275 : vector<128x32xf32>
    %277 = arith.addf %268, %276 : vector<128x32xf32>
    %cst_105 = arith.constant dense<0.000000e+00> : vector<128xf32>
    %278 = vector.multi_reduction <add>, %277, %cst_105 [1] : vector<128x32xf32> to vector<128xf32>
    %279 = vector.shape_cast %278 : vector<128xf32> to vector<128x1xf32>
    %cst_106 = arith.constant 3.200000e+01 : f32
    %280 = vector.broadcast %cst_106 : f32 to vector<128x1xf32>
    %281 = arith.divf %279, %280 : vector<128x1xf32>
    %282 = vector.broadcast %281 : vector<128x1xf32> to vector<128x32xf32>
    %283 = arith.subf %277, %282 : vector<128x32xf32>
    %284 = arith.mulf %283, %283 : vector<128x32xf32>
    %cst_107 = arith.constant dense<0.000000e+00> : vector<128xf32>
    %285 = vector.multi_reduction <add>, %284, %cst_107 [1] : vector<128x32xf32> to vector<128xf32>
    %286 = vector.shape_cast %285 : vector<128xf32> to vector<128x1xf32>
    %cst_108 = arith.constant 3.200000e+01 : f32
    %287 = vector.broadcast %cst_108 : f32 to vector<128x1xf32>
    %288 = arith.divf %286, %287 : vector<128x1xf32>
    %289 = vector.broadcast %281 : vector<128x1xf32> to vector<128x32xf32>
    %290 = arith.subf %277, %289 : vector<128x32xf32>
    %cst_109 = arith.constant 9.99999974E-6 : f32
    %291 = vector.broadcast %cst_109 : f32 to vector<128x1xf32>
    %292 = arith.addf %288, %291 : vector<128x1xf32>
    %293 = math.rsqrt %292 : vector<128x1xf32>
    %294 = vector.broadcast %293 : vector<128x1xf32> to vector<128x32xf32>
    %295 = arith.mulf %290, %294 : vector<128x32xf32>
    %296 = vector.broadcast %171 : vector<1x32xf32> to vector<128x32xf32>
    %297 = arith.mulf %295, %296 : vector<128x32xf32>
    %298 = vector.broadcast %172 : vector<1x32xf32> to vector<128x32xf32>
    %299 = arith.addf %297, %298 : vector<128x32xf32>
    %c18 = arith.constant 18 : index
    %c0_110 = arith.constant 0 : index
    %300 = vector.load %arg6[%c18, %c0_110] : memref<19x96xf32, #tpu.memory_space<vmem>>, vector<1x4xf32>
    %cst_111 = arith.constant dense<0.000000e+00> : vector<128xf32>
    %301 = vector.multi_reduction <add>, %299, %cst_111 [1] : vector<128x32xf32> to vector<128xf32>
    %302 = vector.shape_cast %301 : vector<128xf32> to vector<128x1xf32>
    %cst_112 = arith.constant 3.200000e+01 : f32
    %303 = vector.broadcast %cst_112 : f32 to vector<128x1xf32>
    %304 = arith.divf %302, %303 : vector<128x1xf32>
    %305 = vector.extract_strided_slice %304 {offsets = [0, 0], sizes = [64, 1], strides = [1, 1]} : vector<128x1xf32> to vector<64x1xf32>
    %c0_113 = arith.constant 0 : index
    %c0_114 = arith.constant 0 : index
    %306 = vector.load %arg8[%c0_113, %c0_114] : memref<64x4xf32, #tpu.memory_space<vmem>>, vector<64x4xf32>
    %cst_115 = arith.constant dense<0.000000e+00> : vector<1x4xf32>
    %307 = tpu.matmul %305, %306, %cst_115 {dimension_numbers = #tpu.dot_dimension_numbers<[0], [0], [1], [1], [0, 1, 1, 1], [], []>} : vector<64x1xf32>, vector<64x4xf32>, vector<1x4xf32> -> vector<1x4xf32>
    %308 = vector.extract_strided_slice %304 {offsets = [64, 0], sizes = [64, 1], strides = [1, 1]} : vector<128x1xf32> to vector<64x1xf32>
    %c0_116 = arith.constant 0 : index
    %c0_117 = arith.constant 0 : index
    %309 = vector.load %arg8[%c0_116, %c0_117] : memref<64x4xf32, #tpu.memory_space<vmem>>, vector<64x4xf32>
    %cst_118 = arith.constant dense<0.000000e+00> : vector<1x4xf32>
    %310 = tpu.matmul %308, %309, %cst_118 {dimension_numbers = #tpu.dot_dimension_numbers<[0], [0], [1], [1], [0, 1, 1, 1], [], []>} : vector<64x1xf32>, vector<64x4xf32>, vector<1x4xf32> -> vector<1x4xf32>
    %311 = tpu.concatenate %307, %310 in 0 : vector<1x4xf32>, vector<1x4xf32> -> vector<2x4xf32>
    %312 = vector.broadcast %300 : vector<1x4xf32> to vector<2x4xf32>
    %313 = arith.addf %311, %312 : vector<2x4xf32>
    %cst_119 = arith.constant dense<0xFF800000> : vector<2xf32>
    %314 = vector.multi_reduction <maximumf>, %313, %cst_119 [1] : vector<2x4xf32> to vector<2xf32>
    %315 = vector.shape_cast %314 : vector<2xf32> to vector<2x1xf32>
    %316 = vector.broadcast %315 : vector<2x1xf32> to vector<2x4xf32>
    %317 = arith.subf %313, %316 : vector<2x4xf32>
    %318 = math.exp %317 : vector<2x4xf32>
    %cst_120 = arith.constant dense<0.000000e+00> : vector<2xf32>
    %319 = vector.multi_reduction <add>, %318, %cst_120 [1] : vector<2x4xf32> to vector<2xf32>
    %320 = vector.shape_cast %319 : vector<2xf32> to vector<2x1xf32>
    %321 = vector.broadcast %320 : vector<2x1xf32> to vector<2x4xf32>
    %322 = arith.divf %318, %321 : vector<2x4xf32>
    %c0_121 = arith.constant 0 : index
    %c0_122 = arith.constant 0 : index
    %323 = vector.load %arg9[%c0_121, %c0_122] : memref<2x4xf32, #tpu.memory_space<vmem>>, vector<2x4xf32>
    tpu.vector_store %arg9[%c0_121, %c0_122], %322 {strides = array<i32>} : memref<2x4xf32, #tpu.memory_space<vmem>>, vector<2x4xf32>,
    return
  }
  func.func @transform_0(%arg0: i32) -> (i32, i32) {
    %c0_i32 = arith.constant 0 : i32
    %c0_i32_0 = arith.constant 0 : i32
    %c0_i32_1 = arith.constant 0 : i32
    return %c0_i32, %c0_i32_0 : i32, i32
  }
  func.func @transform_1(%arg0: i32) -> (i32, i32) {
    %c0_i32 = arith.constant 0 : i32
    %c0_i32_0 = arith.constant 0 : i32
    %c0_i32_1 = arith.constant 0 : i32
    return %c0_i32, %c0_i32_0 : i32, i32
  }
  func.func @transform_2(%arg0: i32) -> (i32, i32) {
    %c0_i32 = arith.constant 0 : i32
    %c0_i32_0 = arith.constant 0 : i32
    %c0_i32_1 = arith.constant 0 : i32
    return %c0_i32, %c0_i32_0 : i32, i32
  }
  func.func @transform_3(%arg0: i32) -> (i32, i32) {
    %c0_i32 = arith.constant 0 : i32
    %c0_i32_0 = arith.constant 0 : i32
    %c0_i32_1 = arith.constant 0 : i32
    return %c0_i32, %c0_i32_0 : i32, i32
  }
  func.func @transform_4(%arg0: i32) -> (i32, i32) {
    %c0_i32 = arith.constant 0 : i32
    %c0_i32_0 = arith.constant 0 : i32
    %c0_i32_1 = arith.constant 0 : i32
    return %c0_i32, %c0_i32_0 : i32, i32
  }
  func.func @transform_5(%arg0: i32) -> (i32, i32) {
    %c0_i32 = arith.constant 0 : i32
    %c0_i32_0 = arith.constant 0 : i32
    %c0_i32_1 = arith.constant 0 : i32
    return %c0_i32, %c0_i32_0 : i32, i32
  }
  func.func @transform_6(%arg0: i32) -> (i32, i32) {
    %c0_i32 = arith.constant 0 : i32
    %c0_i32_0 = arith.constant 0 : i32
    %c0_i32_1 = arith.constant 0 : i32
    return %c0_i32, %c0_i32_0 : i32, i32
  }
  func.func @transform_7(%arg0: i32) -> (i32, i32) {
    %c0_i32 = arith.constant 0 : i32
    %c0_i32_0 = arith.constant 0 : i32
    %c0_i32_1 = arith.constant 0 : i32
    return %c0_i32, %c0_i32_0 : i32, i32
  }
  func.func @transform_8(%arg0: i32) -> (i32, i32) {
    %c0_i32 = arith.constant 0 : i32
    %c0_i32_0 = arith.constant 0 : i32
    %c0_i32_1 = arith.constant 0 : i32
    return %c0_i32, %c0_i32_0 : i32, i32
  }
  func.func @transform_9(%arg0: i32) -> (i32, i32) {
    %c0_i32 = arith.constant 0 : i32
    %c0_i32_0 = arith.constant 0 : i32
    %c0_i32_1 = arith.constant 0 : i32
    return %c0_i32, %c0_i32_0 : i32, i32
  }
}

</mosaic_0001>

<bundles_post_ra>
// kernel: _fused_forward.1
= control target key start
LH: loop header
LB: loop body
LE: loop exit
PB: predicated region body
PF: predicated region fallthrough
CT: control target
= control target key end

     0   :  { %vm57_vm0 = vcmask 1044480   ;;  %vm53_vm1 = vcmask 302080   ;;  %s11840_s0 = inlined_call_operand.vmem [shape: f32[37,512], index: 0, kind: input, shape index: {}]   ;;  %s11841_s1 = inlined_call_operand.vmem [shape: f32[256,37], index: 1, kind: input, shape index: {}]   ;;  %s11842_s2 = inlined_call_operand.vmem [shape: f32[4,37], index: 2, kind: input, shape index: {}]   ;;  %s11843_s3 = inlined_call_operand.vmem [shape: f32[37,1], index: 3, kind: input, shape index: {}]   ;;  %s11844_s4 = inlined_call_operand.vmem [shape: f32[128,32], index: 4, kind: input, shape index: {}]   ;;  %s11845_s5 = inlined_call_operand.vmem [shape: f32[19,96], index: 5, kind: input, shape index: {}]   ;;  %s11846_s6 = inlined_call_operand.vmem [shape: f32[32,1024], index: 6, kind: input, shape index: {}]   ;;  %s11847_s7 = inlined_call_operand.vmem [shape: f32[64,4], index: 7, kind: input, shape index: {}]   ;;  %s11848_s8 = inlined_call_operand.hbm [shape: f32[2,4], index: 8, kind: output, shape index: {0}]   ;;  %s11849_s9 = inlined_call_operand.vmem [shape: f32[4,512], index: 9, kind: output, shape index: {1}]  }
   0x1   :  { %v49_v0 = vld [vmem:[%s11840_s0 + $0x80] sm:$0x1f]  ;;  %v50_v1 = vld [vmem:[%s11840_s0 + $0x88] sm:$0x1f]  ;;  %v198_v12 = vld [vmem:[%s11843_s3 + $0x18] sm:$0xff] }
   0x2   :  { %v45_v2 = vld [vmem:[%s11840_s0 + $0x60] sm:$0xff]  ;;  %6842 = vmatpush.msk.msra.mxu0 %vm57_vm0, %v49_v0  ;;  %6844 = vmatpush.msk.msra.mxu1 %vm57_vm0, %v50_v1  ;;  %v46_v3 = vld [vmem:[%s11840_s0 + $0x68] sm:$0xff]  ;;  %v197_v13 = vld [vmem:[%s11843_s3 + $0x10] sm:$0xff] }
   0x3   :  { %v41_v4 = vld [vmem:[%s11840_s0 + $0x40] sm:$0xff]  ;;  %v42_v5 = vld [vmem:[%s11840_s0 + $0x48] sm:$0xff] }
   0x4   :  { %82 = vmatpush.msra.mxu0 %v45_v2  ;;  %102 = vmatpush.msra.mxu1 %v46_v3  ;;  %v37_v6 = vld [vmem:[%s11840_s0 + $0x20] sm:$0xff]  ;;  %v38_v7 = vld [vmem:[%s11840_s0 + $0x28] sm:$0xff] }
   0x5   :  { %v33_v8 = vld [vmem:[%s11840_s0] sm:$0xff]  ;;  %v34_v9 = vld [vmem:[%s11840_s0 + $0x8] sm:$0xff] }
   0x6   :  { %83 = vmatpush.msra.mxu0 %v41_v4  ;;  %103 = vmatpush.msra.mxu1 %v42_v5  ;;  %v7919_v10 = vld [vmem:[%s11842_s2] sm:$0xf]  ;;  %v196_v14 = vld [vmem:[%s11843_s3 + $0x8] sm:$0xff] }
   0x7   :  { %v199_v11 = vld [vmem:[%s11843_s3 + $0x20] sm:$0x1f] }
   0x8   :  { %84 = vmatpush.msra.mxu0 %v37_v6  ;;  %104 = vmatpush.msra.mxu1 %v38_v7 }
   0xa   :  { %85 = vmatpush.msra.mxu0 %v33_v8  ;;  %105 = vmatpush.msra.mxu1 %v34_v9 }
   0xb   :  { %6845 = vmatmul.msk.f32.vlgmr.msra.gmra.mxu1 %vm53_vm1, %v7919_v10  ;;  %6843 = vmatmul.msk.f32.vlgmr.msra.gmra.mxu0 %vm53_vm1, %v7919_v10 }
   0xc   :  { %6850 = vmatpush.msk.msrb.mxu0 %vm57_vm0, %v199_v11 }
   0xe   :  { %311 = vmatpush.msrb.mxu0 %v198_v12 }
   0xf   :  { %15 = vsyncpa [#allocation3], 0  ;;  %v195_v15 = vld [vmem:[%s11843_s3] sm:$0xff]  ;;  %v164_v17 = vld [vmem:[%s11841_s1 + $0x8] sm:$0xff]  ;;  %v7825_v28 = vmov 0   ;;  %vm156_vm2 = vcmask 1043456  }
  0x10   :  { %312 = vmatpush.msrb.mxu0 %v197_v13  ;;  %v163_v16 = vld [vmem:[%s11841_s1] sm:$0xff]  ;;  %v165_v18 = vld [vmem:[%s11841_s1 + $0x10] sm:$0xff]  ;;  %v166_v19 = vld [vmem:[%s11841_s1 + $0x18] sm:$0xff]  ;;  %7227 = vset.pattern.permute.xlu0 %v7825_v28  ;;  %vm711_vm3 = vcmask 261120   ;;  %s7826_s21 = smov 96   ;;  %s7827_s22 = smov 64  }
  0x11   :  { %v167_v20 = vld [vmem:[%s11841_s1 + $0x20] sm:$0xff]  ;;  %v168_v21 = vld [vmem:[%s11841_s1 + $0x28] sm:$0xff]  ;;  %v169_v22 = vld [vmem:[%s11841_s1 + $0x30] sm:$0xff]  ;;  %7228 = vset.pattern.permute.xlu1 %v7825_v28  ;;  %7229 = vset.pattern.permute.xlu2 %v7825_v28  ;;  %s7828_s3 = smov 80   ;;  %vm857_vm4 = vcmask 130048   ;;  %vm939_vm5 = vcmask 523264  }
  0x12   :  { %313 = vmatpush.msrb.mxu0 %v196_v14  ;;  %v170_v23 = vld [vmem:[%s11841_s1 + $0x38] sm:$0xff]  ;;  %v171_v24 = vld [vmem:[%s11841_s1 + $0x40] sm:$0xff]  ;;  %v172_v25 = vld [vmem:[%s11841_s1 + $0x48] sm:$0xff]  ;;  %s7830_s16 = smov 48   ;;  %s7831_s17 = smov 16  }
  0x13   :  { %v173_v26 = vld [vmem:[%s11841_s1 + $0x50] sm:$0xff]  ;;  %v174_v27 = vld [vmem:[%s11841_s1 + $0x58] sm:$0xff]  ;;  %v175_v29 = vld [vmem:[%s11841_s1 + $0x60] sm:$0xff] }
  0x14   :  { %314 = vmatpush.msrb.mxu0 %v195_v15  ;;  %v176_v30 = vld [vmem:[%s11841_s1 + $0x68] sm:$0xff]  ;;  %v177_v31 = vld [vmem:[%s11841_s1 + $0x70] sm:$0xff]  ;;  %v178_v35 = vld [vmem:[%s11841_s1 + $0x78] sm:$0xff] }
  0x15   :  { %6851 = vmatmul.msk.f32.vlgmr.msrb.gmra.mxu0 %vm53_vm1, %v163_v16  ;;  %v179_v38 = vld [vmem:[%s11841_s1 + $0x80] sm:$0xff]  ;;  %v180_v40 = vld [vmem:[%s11841_s1 + $0x88] sm:$0xff]  ;;  %v181_v42 = vld [vmem:[%s11841_s1 + $0x90] sm:$0xff] }
  0x16   :  { %v182_v44 = vld [vmem:[%s11841_s1 + $0x98] sm:$0xff]  ;;  %v183_v46 = vld [vmem:[%s11841_s1 + $0xa0] sm:$0xff]  ;;  %v184_v49 = vld [vmem:[%s11841_s1 + $0xa8] sm:$0xff] }
  0x17   :  { %v691_v47 = vld [vmem:[%s11846_s6 + $0xc0] sm:$0xff]  ;;  %v185_v51 = vld [vmem:[%s11841_s1 + $0xb0] sm:$0xff]  ;;  %v186_v53 = vld [vmem:[%s11841_s1 + $0xb8] sm:$0xff] }
  0x18   :  { %772 = vmatpush.msra.mxu0 %v691_v47  ;;  %7205 = vmatpush.msrb.mxu1 %v691_v47  ;;  %v187_v55 = vld [vmem:[%s11841_s1 + $0xc0] sm:$0xff]  ;;  %v188_v57 = vld [vmem:[%s11841_s1 + $0xc8] sm:$0xff]  ;;  %v189_v59 = vld [vmem:[%s11841_s1 + $0xd0] sm:$0xff] }
  0x19   :  { %v190_v61 = vld [vmem:[%s11841_s1 + $0xd8] sm:$0xff]  ;;  %v191_v63 = vld [vmem:[%s11841_s1 + $0xe0] sm:$0xff]  ;;  %v192_v2 = vld [vmem:[%s11841_s1 + $0xe8] sm:$0xff] }
  0x1a   :  { %v690_v0 = vld [vmem:[%s11846_s6 + $0x80] sm:$0xff]  ;;  %v193_v4 = vld [vmem:[%s11841_s1 + $0xf0] sm:$0xff]  ;;  %v194_v6 = vld [vmem:[%s11841_s1 + $0xf8] sm:$0xff] }
  0x1b   :  { %773 = vmatpush.msra.mxu0 %v690_v0  ;;  %7206 = vmatpush.msrb.mxu1 %v690_v0 }
  0x1d   :  { %6852 = vmatmul.msk.f32.gmra.mxu0 %vm53_vm1, %v164_v17 }
  0x25   :  { %6853 = vmatmul.msk.f32.gmra.mxu0 %vm53_vm1, %v165_v18 }
  0x2d   :  { %6854 = vmatmul.msk.f32.gmra.mxu0 %vm53_vm1, %v166_v19 }
  0x35   :  { %6855 = vmatmul.msk.f32.gmra.mxu0 %vm53_vm1, %v167_v20 }
  0x3d   :  { %6856 = vmatmul.msk.f32.gmra.mxu0 %vm53_vm1, %v168_v21  ;;  %v689_v21 = vld [vmem:[%s11846_s6 + $0x40] sm:$0xff] }
  0x3e   :  { %774 = vmatpush.msra.mxu0 %v689_v21  ;;  %7207 = vmatpush.msrb.mxu1 %v689_v21 }
  0x45   :  { %6857 = vmatmul.msk.f32.gmra.mxu0 %vm53_vm1, %v169_v22 }
  0x4d   :  { %6858 = vmatmul.msk.f32.gmra.mxu0 %vm53_vm1, %v170_v23 }
  0x55   :  { %6859 = vmatmul.msk.f32.gmra.mxu0 %vm53_vm1, %v171_v24 }
  0x5d   :  { %6860 = vmatmul.msk.f32.gmra.mxu0 %vm53_vm1, %v172_v25 }
  0x65   :  { %6861 = vmatmul.msk.f32.gmra.mxu0 %vm53_vm1, %v173_v26 }
  0x6d   :  { %6862 = vmatmul.msk.f32.gmra.mxu0 %vm53_vm1, %v174_v27 }
  0x75   :  { %6863 = vmatmul.msk.f32.gmra.mxu0 %vm53_vm1, %v175_v29 }
  0x7d   :  { %6864 = vmatmul.msk.f32.gmra.mxu0 %vm53_vm1, %v176_v30 }
  0x85   :  { %6865 = vmatmul.msk.f32.gmra.mxu0 %vm53_vm1, %v177_v31 }
  0x88   :  { %v107_v32 = vpop.f32.mrf.mxu1  ;;  %v87_v34 = vpop.f32.mrf.mxu0 }
  0x89   :  { %v154_v33 = vrot.slane %v107_v32, 4 }
  0x8b   :  { %v157_v36 = vsel %vm156_vm2, %v87_v34, %v154_v33  ;;  %v688_v33 = vld [vmem:[%s11846_s6] sm:$0xff] }
  0x8c   :  { %161 = vst [vmem:[%s11849_s9] sm:$0xff] %v157_v36  ;;  %775 = vmatpush.msra.mxu0 %v688_v33  ;;  %7208 = vmatpush.msrb.mxu1 %v688_v33  ;;  %v8121_v36 = vld [vmem:[%s11845_s5 + $0x11] ss:$0 sm:$0xff] }
  0x8d   :  { %6866 = vmatmul.msk.f32.gmra.mxu0 %vm53_vm1, %v178_v35  ;;  %v8116_v35 = vld [vmem:[%s11845_s5 + $0x10] ss:$0 sm:$0xff] }
  0x92   :  { %v316_v37 = vpop.f32.mrf.mxu0 }
  0x93   :  { %448 = vperm.xlu0 %7227, %v316_v37  }
  0x95   :  { %6867 = vmatmul.msk.f32.gmra.mxu0 %vm53_vm1, %v179_v38 }
  0x9a   :  { %v319_v39 = vpop.f32.mrf.mxu0 }
  0x9b   :  { %453 = vperm.xlu1 %7228, %v319_v39  }
  0x9d   :  { %6868 = vmatmul.msk.f32.gmra.mxu0 %vm53_vm1, %v180_v40 }
  0xa2   :  { %v322_v41 = vpop.f32.mrf.mxu0 }
  0xa3   :  { %458 = vperm.xlu2 %7229, %v322_v41  }
  0xa5   :  { %6869 = vmatmul.msk.f32.gmra.mxu0 %vm53_vm1, %v181_v42  ;;  %v656_v42 = vld [vmem:[%s11844_s4] sm:$0xff] }
  0xaa   :  { %v325_v43 = vpop.f32.mrf.mxu0 }
  0xad   :  { %6870 = vmatmul.msk.f32.gmra.mxu0 %vm53_vm1, %v182_v44 }
  0xb2   :  { %v8025_v45 = vpop.f32.mrf.mxu0 }
  0xb5   :  { %6871 = vmatmul.msk.f32.gmra.mxu0 %vm53_vm1, %v183_v46 }
  0xba   :  { %v8034_v48 = vpop.f32.mrf.mxu0 }
  0xbd   :  { %6872 = vmatmul.msk.f32.gmra.mxu0 %vm53_vm1, %v184_v49  ;;  %v657_v49 = vld [vmem:[%s11844_s4 + $0x8] sm:$0xff] }
  0xc2   :  { %v334_v50 = vpop.f32.mrf.mxu0 }
  0xc5   :  { %6873 = vmatmul.msk.f32.gmra.mxu0 %vm53_vm1, %v185_v51 }
  0xca   :  { %v8044_v52 = vpop.f32.mrf.mxu0 }
  0xcd   :  { %6874 = vmatmul.msk.f32.gmra.mxu0 %vm53_vm1, %v186_v53 }
  0xd2   :  { %v8050_v54 = vpop.f32.mrf.mxu0 }
  0xd5   :  { %6875 = vmatmul.msk.f32.gmra.mxu0 %vm53_vm1, %v187_v55 }
  0xda   :  { %v8056_v56 = vpop.f32.mrf.mxu0 }
  0xdd   :  { %6876 = vmatmul.msk.f32.gmra.mxu0 %vm53_vm1, %v188_v57  ;;  %v658_v57 = vld [vmem:[%s11844_s4 + $0x10] sm:$0xff] }
  0xe2   :  { %v8062_v58 = vpop.f32.mrf.mxu0 }
  0xe5   :  { %6877 = vmatmul.msk.f32.gmra.mxu0 %vm53_vm1, %v189_v59 }
  0xea   :  { %v8068_v60 = vpop.f32.mrf.mxu0 }
  0xed   :  { %6878 = vmatmul.msk.f32.gmra.mxu0 %vm53_vm1, %v190_v61 }
  0xf2   :  { %v8074_v62 = vpop.f32.mrf.mxu0 }
  0xf5   :  { %6879 = vmatmul.msk.f32.gmra.mxu0 %vm53_vm1, %v191_v63 }
  0xfa   :  { %v8083_v1 = vpop.f32.mrf.mxu0 }
  0xfd   :  { %6880 = vmatmul.msk.f32.gmra.mxu0 %vm53_vm1, %v192_v2 }
 0x102   :  { %v8089_v3 = vpop.f32.mrf.mxu0 }
 0x105   :  { %6881 = vmatmul.msk.f32.gmra.mxu0 %vm53_vm1, %v193_v4  ;;  %v449_v34 = vpop.permute.xlu0 %448 }
 0x10a   :  { %v8095_v5 = vpop.f32.mrf.mxu0 }
 0x10d   :  { %6882 = vmatmul.msk.f32.gmra.mxu0 %vm53_vm1, %v194_v6  ;;  %v659_v6 = vld [vmem:[%s11844_s4 + $0x18] sm:$0xff] }
 0x112   :  { %v364_v7 = vpop.f32.mrf.mxu0 }
 0x113   :  { %v412_v8 = vand.u32 2147483647, %v364_v7 }
 0x115   :  { %v428_v9 = vadd.f32 %v412_v8, %v316_v37  ;;  %v454_v37 = vpop.permute.xlu1 %453 }
 0x116   :  { %v528_v46 = vmul.f32 %v8116_v35, %v454_v37 }
 0x117   :  { %545 = vperm.xlu0 %7227, %v428_v9  }
 0x11a   :  { %v367_v11 = vpop.f32.mrf.mxu0 }
 0x11b   :  { %v413_v12 = vand.u32 2147483647, %v367_v11 }
 0x11d   :  { %v429_v13 = vadd.f32 %v413_v12, %v319_v39  ;;  %v527_v39 = vmul.f32 %v8116_v35, %v449_v34  ;;  %v661_v34 = vld [vmem:[%s11844_s4 + $0x28] sm:$0xff] }
 0x11f   :  { %463 = vperm.xlu0 %7227, %v325_v43   ;;  %550 = vperm.xlu1 %7228, %v429_v13  }
 0x122   :  { %v370_v14 = vpop.f32.mrf.mxu0 }
 0x123   :  { %v414_v15 = vand.u32 2147483647, %v370_v14  ;;  %v662_v14 = vld [vmem:[%s11844_s4 + $0x30] sm:$0xff] }
 0x125   :  { %v430_v16 = vadd.f32 %v414_v15, %v322_v41  ;;  %v459_v41 = vpop.permute.xlu2 %458 }
 0x126   :  { %v529_v53 = vmul.f32 %v8116_v35, %v459_v41 }
 0x127   :  { %478 = vperm.xlu1 %7228, %v334_v50   ;;  %555 = vperm.xlu2 %7229, %v430_v16  }
 0x12a   :  { %v373_v17 = vpop.f32.mrf.mxu0 }
 0x12b   :  { %v415_v18 = vand.u32 2147483647, %v373_v17 }
 0x12d   :  { %v431_v19 = vadd.f32 %v415_v18, %v325_v43 }
 0x12f   :  { %468 = vperm.xlu1 %7228, %v8025_v45   ;;  %560 = vperm.xlu2 %7229, %v431_v19  }
 0x132   :  { %v376_v20 = vpop.f32.mrf.mxu0 }
 0x133   :  { %v416_v26 = vand.u32 2147483647, %v376_v20 }
 0x135   :  { %v432_v29 = vadd.f32 %v416_v26, %v8025_v45 }
 0x137   :  { %483 = vperm.xlu2 %7229, %v8044_v52  }
 0x13a   :  { %v379_v22 = vpop.f32.mrf.mxu0 }
 0x13b   :  { %v417_v31 = vand.u32 2147483647, %v379_v22 }
 0x13d   :  { %v433_v32 = vadd.f32 %v417_v31, %v8034_v48 }
 0x13f   :  { %473 = vperm.xlu2 %7229, %v8034_v48  }
 0x142   :  { %v382_v23 = vpop.f32.mrf.mxu0 }
 0x143   :  { %v418_v24 = vand.u32 2147483647, %v382_v23 }
 0x145   :  { %v434_v25 = vadd.f32 %v418_v24, %v334_v50  ;;  %v660_v24 = vld [vmem:[%s11844_s4 + $0x20] sm:$0xff] }
 0x147   :  { %575 = vperm.xlu0 %7227, %v434_v25   ;;  %v663_v25 = vld [vmem:[%s11844_s4 + $0x38] sm:$0xff] }
 0x14a   :  { %v385_v27 = vpop.f32.mrf.mxu0 }
 0x14b   :  { %v419_v28 = vand.u32 2147483647, %v385_v27 }
 0x14d   :  { %v435_v30 = vadd.f32 %v419_v28, %v8044_v52 }
 0x14f   :  { %565 = vperm.xlu0 %7227, %v432_v29   ;;  %580 = vperm.xlu1 %7228, %v435_v30  }
 0x157   :  { %570 = vperm.xlu0 %7227, %v433_v32  }
 0x181   :  { %v556_v48 = vpop.permute.xlu2 %555 }
 0x182   :  { %v626_v51 = vmul.f32 %v8121_v36, %v556_v48 }
 0x184   :  { %v642_v55 = vadd.f32 %v626_v51, %v529_v53  ;;  %v8198_v51 = vld [vmem:[%s11845_s5] ss:$0 sm:$0xff] }
 0x186   :  { %v8146_v63 = vadd.f32 %v658_v57, %v642_v55 }
 0x188   :  { %11880 = vst [vmem:[#allocation7_spill] sm:$0xff] %v8146_v63 }
 0x189   :  { %v546_v38 = vpop.permute.xlu0 %545  ;;  %v561_v61 = vpop.permute.xlu2 %560 }
 0x18a   :  { %v624_v40 = vmul.f32 %v8121_v36, %v546_v38  ;;  %v627_v2 = vmul.f32 %v8121_v36, %v561_v61 }
 0x18c   :  { %v640_v43 = vadd.f32 %v624_v40, %v527_v39  ;;  %v388_v39 = vpop.f32.mrf.mxu0 }
 0x18e   :  { %v8128_v44 = vadd.f32 %v656_v42, %v640_v43 }
 0x190   :  { %11878 = vst [vmem:[#allocation5_spill] sm:$0xff] %v8128_v44  ;;  %6883 = vmatmul.msk.f32.vlgmr.msra.gmra.mxu0 %vm711_vm3, %v8128_v44 }
 0x191   :  { %v551_v45 = vpop.permute.xlu1 %550  ;;  %v464_v59 = vpop.permute.xlu0 %463 }
 0x192   :  { %v625_v47 = vmul.f32 %v8121_v36, %v551_v45  ;;  %v530_v0 = vmul.f32 %v8116_v35, %v464_v59  ;;  %v484_v16 = vpop.permute.xlu2 %483 }
 0x193   :  { %v534_v20 = vmul.f32 %v8116_v35, %v484_v16 }
 0x194   :  { %v641_v50 = vadd.f32 %v625_v47, %v528_v46  ;;  %v643_v4 = vadd.f32 %v627_v2, %v530_v0  ;;  %v391_v40 = vpop.f32.mrf.mxu0 }
 0x196   :  { %v8138_v52 = vadd.f32 %v657_v49, %v641_v50  ;;  %v8155_v7 = vadd.f32 %v659_v6, %v643_v4 }
 0x198   :  { %11879 = vst [vmem:[#allocation6_spill] sm:$0xff] %v8138_v52  ;;  %6884 = vmatmul.msk.f32.gmra.mxu0 %vm711_vm3, %v8138_v52 }
 0x199   :  { %11881 = vst [vmem:[#allocation8_spill] sm:$0xff] %v8155_v7  ;;  %v479_v8 = vpop.permute.xlu1 %478 }
 0x19a   :  { %v533_v12 = vmul.f32 %v8116_v35, %v479_v8  ;;  %v474_v30 = vpop.permute.xlu2 %473 }
 0x19b   :  { %v532_v32 = vmul.f32 %v8116_v35, %v474_v30  ;;  %v39_v30 = vld [vmem:[%s11840_s0 + $0x30] sm:$0xff] }
 0x19c   :  { %v394_v41 = vpop.f32.mrf.mxu0 }
 0x1a0   :  { %6885 = vmatmul.msk.f32.gmra.mxu0 %vm711_vm3, %v8146_v63 }
 0x1a1   :  { %v469_v9 = vpop.permute.xlu1 %468 }
 0x1a2   :  { %v531_v21 = vmul.f32 %v8116_v35, %v469_v9 }
 0x1a4   :  { %v397_v42 = vpop.f32.mrf.mxu0 }
 0x1a8   :  { %6886 = vmatmul.msk.f32.gmra.mxu0 %vm711_vm3, %v8155_v7 }
 0x1ac   :  { %v400_v43 = vpop.f32.mrf.mxu0 }
 0x1b4   :  { %v403_v45 = vpop.f32.mrf.mxu0 }
 0x1b9   :  { %v576_v11 = vpop.permute.xlu0 %575 }
 0x1ba   :  { %v630_v13 = vmul.f32 %v8121_v36, %v576_v11 }
 0x1bc   :  { %v646_v15 = vadd.f32 %v630_v13, %v533_v12  ;;  %v406_v46 = vpop.f32.mrf.mxu0  ;;  %v420_v13 = vand.u32 2147483647, %v388_v39  ;;  %v40_v39 = vld [vmem:[%s11840_s0 + $0x38] sm:$0xff] }
 0x1be   :  { %v8164_v17 = vadd.f32 %v662_v14, %v646_v15  ;;  %v422_v14 = vand.u32 2147483647, %v394_v41  ;;  %v436_v15 = vadd.f32 %v420_v13, %v8050_v54 }
 0x1c0   :  { %11882 = vst [vmem:[#allocation9_spill] sm:$0xff] %v8164_v17  ;;  %6889 = vmatmul.msk.f32.vlgmr.msrb.gmra.mxu1 %vm711_vm3, %v8164_v17  ;;  %v438_v16 = vadd.f32 %v422_v14, %v8062_v58 }
 0x1c1   :  { %v566_v18 = vpop.permute.xlu0 %565  ;;  %v581_v19 = vpop.permute.xlu1 %580 }
 0x1c2   :  { %v628_v22 = vmul.f32 %v8121_v36, %v566_v18  ;;  %v631_v23 = vmul.f32 %v8121_v36, %v581_v19  ;;  %v421_v18 = vand.u32 2147483647, %v391_v40  ;;  %v36_v40 = vld [vmem:[%s11840_s0 + $0x18] sm:$0xff] }
 0x1c4   :  { %v644_v26 = vadd.f32 %v628_v22, %v531_v21  ;;  %v647_v27 = vadd.f32 %v631_v23, %v534_v20  ;;  %v409_v47 = vpop.f32.mrf.mxu0  ;;  %v437_v19 = vadd.f32 %v421_v18, %v8056_v56  ;;  %v423_v20 = vand.u32 2147483647, %v397_v42 }
 0x1c5   :  { %v425_v21 = vand.u32 2147483647, %v403_v45 }
 0x1c6   :  { %v8178_v28 = vadd.f32 %v660_v24, %v644_v26  ;;  %v8180_v29 = vadd.f32 %v663_v25, %v647_v27  ;;  %v439_v22 = vadd.f32 %v423_v20, %v8068_v60  ;;  %v43_v27 = vld [vmem:[%s11840_s0 + $0x50] sm:$0xff]  ;;  %v665_v20 = vld [vmem:[%s11844_s4 + $0x48] sm:$0xff] }
 0x1c7   :  { %v441_v23 = vadd.f32 %v425_v21, %v8083_v1 }
 0x1c8   :  { %11883 = vst [vmem:[#allocation10_spill] sm:$0xff] %v8178_v28  ;;  %6887 = vmatmul.msk.f32.gmra.mxu0 %vm711_vm3, %v8178_v28  ;;  %6890 = vmatmul.msk.f32.gmra.mxu1 %vm711_vm3, %v8180_v29 }
 0x1c9   :  { %11884 = vst [vmem:[#allocation11_spill] sm:$0xff] %v8180_v29  ;;  %v571_v31 = vpop.permute.xlu0 %570 }
 0x1ca   :  { %v629_v33 = vmul.f32 %v8121_v36, %v571_v31  ;;  %v35_v31 = vld [vmem:[%s11840_s0 + $0x10] sm:$0xff] }
 0x1cc   :  { %v645_v37 = vadd.f32 %v629_v33, %v532_v32  ;;  %v52_v33 = vld [vmem:[%s11840_s0 + $0x98] sm:$0x1f] }
 0x1cd   :  { %6848 = vmatpush.msk.msra.mxu3 %vm57_vm0, %v52_v33 }
 0x1ce   :  { %v8191_v38 = vadd.f32 %v661_v34, %v645_v37  ;;  %v48_v34 = vld [vmem:[%s11840_s0 + $0x78] sm:$0xff] }
 0x1cf   :  { %142 = vmatpush.msra.mxu3 %v48_v34  ;;  %v44_v37 = vld [vmem:[%s11840_s0 + $0x58] sm:$0xff] }
 0x1d0   :  { %11885 = vst [vmem:[#allocation12_spill] sm:$0xff] %v8191_v38  ;;  %6888 = vmatmul.msk.f32.gmra.mxu0 %vm711_vm3, %v8191_v38 }
 0x1d1   :  { %143 = vmatpush.msra.mxu3 %v44_v37  ;;  %v667_v37 = vld [vmem:[%s11844_s4 + $0x58] sm:$0xff] }
 0x1d3   :  { %144 = vmatpush.msra.mxu3 %v40_v39 }
 0x1d5   :  { %145 = vmatpush.msra.mxu3 %v36_v40 }
 0x1d6   :  { %6849 = vmatmul.msk.f32.vlgmr.msra.gmra.mxu3 %vm53_vm1, %v7919_v10 }
 0x20d   :  { %v777_v48 = vpop.f32.mrf.mxu0 }
 0x20e   :  { %v8222_v9 = vadd.f32 %v8198_v51, %v777_v48 }
 0x210   :  { %v8346_v14 = vmul.f32 0.25, %v8222_v9 }
 0x215   :  { %v780_v49 = vpop.f32.mrf.mxu0 }
 0x216   :  { %v8231_v11 = vadd.f32 %v8198_v51, %v780_v49 }
 0x218   :  { %v8268_v26 = vpack.i.bf16 %v8222_v9, %v8231_v11 }
 0x21d   :  { %v783_v50 = vpop.f32.mrf.mxu0 }
 0x21e   :  { %v8234_v12 = vadd.f32 %v8198_v51, %v783_v50 }
 0x225   :  { %v786_v53 = vpop.f32.mrf.mxu0 }
 0x226   :  { %v8206_v0 = vadd.f32 %v8198_v51, %v786_v53 }
 0x23d   :  { %v795_v55 = vpop.f32.mrf.mxu1 }
 0x23e   :  { %v8201_v57 = vadd.f32 %v8198_v51, %v795_v55 }
 0x240   :  { %853 = vrot.lane.b32.xlu2 %v8201_v57, %s7826_s21 }
 0x245   :  { %v789_v59 = vpop.f32.mrf.mxu0  ;;  %v798_v61 = vpop.f32.mrf.mxu1 }
 0x246   :  { %v8209_v2 = vadd.f32 %v8198_v51, %v798_v61  ;;  %v8216_v6 = vadd.f32 %v8198_v51, %v789_v59  ;;  %v664_v61 = vld [vmem:[%s11844_s4 + $0x40] sm:$0xff] }
 0x248   :  { %855 = vrot.lane.b32.xlu1 %v8209_v2, %s7826_s21  ;;  %847 = vrot.lane.b32.xlu2 %v8206_v0, %s7826_s21  ;;  %v8306_v32 = vpack.i.bf16 %v8201_v57, %v8209_v2 }
 0x24d   :  { %v792_v4 = vpop.f32.mrf.mxu0 }
 0x24e   :  { %v8219_v8 = vadd.f32 %v8198_v51, %v792_v4 }
 0x250   :  { %851 = vrot.lane.b32.xlu0 %v8219_v8, %s7826_s21  ;;  %849 = vrot.lane.b32.xlu1 %v8216_v6, %s7826_s21  ;;  %v8256_v25 = vpack.i.bf16 %v8216_v6, %v8219_v8 }
 0x251   :  { %841 = vrot.lane.b32.xlu2 %v8222_v9, %s7826_s21 }
 0x258   :  { %845 = vrot.lane.b32.xlu0 %v8234_v12, %s7826_s21  ;;  %843 = vrot.lane.b32.xlu1 %v8231_v11, %s7826_s21 }
 0x259   :  { %493 = vperm.xlu2 %7229, %v8056_v56   ;;  %v426_v56 = vand.u32 2147483647, %v406_v46 }
 0x260   :  { %488 = vperm.xlu0 %7227, %v8050_v54   ;;  %585 = vperm.xlu1 %7228, %v436_v15   ;;  %v424_v54 = vand.u32 2147483647, %v400_v43 }
 0x261   :  { %595 = vperm.xlu2 %7229, %v438_v16  }
 0x262   :  { %v440_v24 = vadd.f32 %v424_v54, %v8074_v62 }
 0x268   :  { %590 = vperm.xlu0 %7227, %v437_v19   ;;  %498 = vperm.xlu1 %7228, %v8062_v58   ;;  %v442_v58 = vadd.f32 %v426_v56, %v8089_v3 }
 0x269   :  { %508 = vperm.xlu2 %7229, %v8074_v62  }
 0x270   :  { %503 = vperm.xlu0 %7227, %v8068_v60   ;;  %600 = vperm.xlu1 %7228, %v439_v22   ;;  %v427_v60 = vand.u32 2147483647, %v409_v47 }
 0x271   :  { %610 = vperm.xlu2 %7229, %v441_v23  }
 0x272   :  { %v443_v62 = vadd.f32 %v427_v60, %v8095_v5 }
 0x278   :  { %605 = vperm.xlu0 %7227, %v440_v24   ;;  %513 = vperm.xlu1 %7228, %v8083_v1   ;;  %v8264_v1 = vpack.i.bf16 %v8234_v12, %v8206_v0  ;;  %v8361_v24 = vmul.f32 0.25, %v8231_v11 }
 0x279   :  { %523 = vperm.xlu2 %7229, %v8095_v5   ;;  %v47_v5 = vld [vmem:[%s11840_s0 + $0x70] sm:$0xff] }
 0x280   :  { %518 = vperm.xlu0 %7227, %v8089_v3   ;;  %615 = vperm.xlu1 %7228, %v442_v58   ;;  %v51_v3 = vld [vmem:[%s11840_s0 + $0x90] sm:$0x1f] }
 0x281   :  { %7231 = vrot.lane.b32.xlu2 %v8256_v25, %s7827_s22  ;;  %6846 = vmatpush.msk.msra.mxu2 %vm57_vm0, %v51_v3  ;;  %v666_v3 = vld [vmem:[%s11844_s4 + $0x50] sm:$0xff] }
 0x283   :  { %122 = vmatpush.msra.mxu2 %v47_v5 }
 0x285   :  { %123 = vmatpush.msra.mxu2 %v43_v27 }
 0x287   :  { %124 = vmatpush.msra.mxu2 %v39_v30  ;;  %v8376_v30 = vmul.f32 0.25, %v8234_v12 }
 0x288   :  { %7236 = vrot.lane.b32.xlu1 %v8264_v1, %s7827_s22  ;;  %620 = vperm.xlu0 %7227, %v443_v62  }
 0x289   :  { %7241 = vrot.lane.b32.xlu2 %v8268_v26, %s7827_s22  ;;  %125 = vmatpush.msra.mxu2 %v35_v31 }
 0x28a   :  { %6847 = vmatmul.msk.f32.vlgmr.msra.gmra.mxu2 %vm53_vm1, %v7919_v10 }
 0x290   :  { %1245 = vrot.lane.b32.xlu1 %v8216_v6, %s7828_s3  ;;  %1247 = vrot.lane.b32.xlu0 %v8219_v8, %s7828_s3 }
 0x291   :  { %1249 = vrot.lane.b32.xlu2 %v8201_v57, %s7828_s3 }
 0x298   :  { %1239 = vrot.lane.b32.xlu1 %v8231_v11, %s7828_s3  ;;  %1241 = vrot.lane.b32.xlu0 %v8234_v12, %s7828_s3  ;;  %v8389_v12 = vmul.f32 0.25, %v8206_v0 }
 0x299   :  { %1243 = vrot.lane.b32.xlu2 %v8206_v0, %s7828_s3 }
 0x29a   :  { %v854_v41 = vpop.permute.xlu2 %853 }
 0x2a0   :  { %1251 = vrot.lane.b32.xlu1 %v8209_v2, %s7828_s3  ;;  %7246 = vrot.lane.b32.xlu0 %v8306_v32, %s7827_s22 }
 0x2a2   :  { %v848_v43 = vpop.permute.xlu2 %847 }
 0x2ab   :  { %v842_v47 = vpop.permute.xlu2 %841 }
 0x2b3   :  { %v494_v59 = vpop.permute.xlu2 %493 }
 0x2b4   :  { %v536_v18 = vmul.f32 %v8116_v35, %v494_v59  ;;  %v669_v59 = vld [vmem:[%s11844_s4 + $0x68] sm:$0xff] }
 0x2ba   :  { %v856_v42 = vpop.permute.xlu1 %855 }
 0x2bb   :  { %6899 = vmatpush.xpose.msk.msrb.mxu2 %vm857_vm4, %v856_v42  ;;  %v596_v22 = vpop.permute.xlu2 %595 }
 0x2bc   :  { %v634_v56 = vmul.f32 %v8121_v36, %v596_v22 }
 0x2bf   :  { %6900 = vmatpush.xpose.msk.msrb.mxu2 %vm857_vm4, %v854_v41 }
 0x2c2   :  { %v852_v45 = vpop.permute.xlu0 %851  ;;  %v850_v46 = vpop.permute.xlu1 %849 }
 0x2c3   :  { %6901 = vmatpush.xpose.msk.msrb.mxu2 %vm857_vm4, %v852_v45  ;;  %v509_v34 = vpop.permute.xlu2 %508 }
 0x2c4   :  { %v539_v41 = vmul.f32 %v8116_v35, %v509_v34 }
 0x2c7   :  { %6902 = vmatpush.xpose.msk.msrb.mxu2 %vm857_vm4, %v850_v46  ;;  %v668_v46 = vld [vmem:[%s11844_s4 + $0x60] sm:$0xff] }
 0x2ca   :  { %v846_v48 = vpop.permute.xlu0 %845  ;;  %v844_v49 = vpop.permute.xlu1 %843 }
 0x2cb   :  { %6903 = vmatpush.xpose.msk.msrb.mxu2 %vm857_vm4, %v848_v43 }
 0x2cf   :  { %6904 = vmatpush.xpose.msk.msrb.mxu2 %vm857_vm4, %v846_v48 }
 0x2d2   :  { %v489_v10 = vpop.permute.xlu0 %488  ;;  %v586_v50 = vpop.permute.xlu1 %585 }
 0x2d3   :  { %v535_v53 = vmul.f32 %v8116_v35, %v489_v10  ;;  %v632_v55 = vmul.f32 %v8121_v36, %v586_v50  ;;  %6905 = vmatpush.xpose.msk.msrb.mxu2 %vm857_vm4, %v844_v49  ;;  %v8403_v49 = vmul.f32 0.25, %v8216_v6 }
 0x2d5   :  { %v648_v4 = vadd.f32 %v632_v55, %v535_v53 }
 0x2d7   :  { %6906 = vmatpush.xpose.msk.msrb.mxu2 %vm857_vm4, %v842_v47  ;;  %v8343_v13 = vadd.f32 %v664_v61, %v648_v4  ;;  %v611_v47 = vpop.permute.xlu2 %610 }
 0x2d8   :  { %v637_v10 = vmul.f32 %v8121_v36, %v611_v47 }
 0x2d9   :  { %11886 = vst [vmem:[#allocation13_spill] sm:$0xff] %v8343_v13  ;;  %6891 = vmatmul.msk.f32.gmra.mxu1 %vm711_vm3, %v8343_v13 }
 0x2da   :  { %v591_v15 = vpop.permute.xlu0 %590  ;;  %v499_v16 = vpop.permute.xlu1 %498  ;;  %6907 = vmatmul.msk.f32.vlgmr.msrb.gmra.mxu2 %vm857_vm4, %v8346_v14 }
 0x2db   :  { %v633_v19 = vmul.f32 %v8121_v36, %v591_v15  ;;  %v537_v23 = vmul.f32 %v8116_v35, %v499_v16  ;;  %v8418_v15 = vmul.f32 0.25, %v8219_v8  ;;  %v8431_v8 = vmul.f32 0.25, %v8201_v57 }
 0x2dc   :  { %v8444_v57 = vmul.f32 0.25, %v8209_v2 }
 0x2dd   :  { %v649_v21 = vadd.f32 %v633_v19, %v536_v18  ;;  %v650_v60 = vadd.f32 %v634_v56, %v537_v23  ;;  %v670_v19 = vld [vmem:[%s11844_s4 + $0x70] sm:$0xff] }
 0x2df   :  { %v8358_v54 = vadd.f32 %v665_v20, %v649_v21  ;;  %v8373_v27 = vadd.f32 %v666_v3, %v650_v60  ;;  %v524_v21 = vpop.permute.xlu2 %523 }
 0x2e0   :  { %v542_v56 = vmul.f32 %v8116_v35, %v524_v21 }
 0x2e1   :  { %11887 = vst [vmem:[#allocation14_spill] sm:$0xff] %v8358_v54  ;;  %6892 = vmatmul.msk.f32.gmra.mxu1 %vm711_vm3, %v8358_v54 }
 0x2e2   :  { %v504_v58 = vpop.permute.xlu0 %503  ;;  %6908 = vmatmul.msk.f32.gmra.mxu2 %vm857_vm4, %v8361_v24  ;;  %v601_v62 = vpop.permute.xlu1 %600  ;;  %11888 = vst [vmem:[#allocation15_spill] sm:$0xff] %v8373_v27 }
 0x2e3   :  { %v538_v5 = vmul.f32 %v8116_v35, %v504_v58  ;;  %v635_v11 = vmul.f32 %v8121_v36, %v601_v62  ;;  %v671_v62 = vld [vmem:[%s11844_s4 + $0x78] sm:$0xff] }
 0x2e5   :  { %v651_v33 = vadd.f32 %v635_v11, %v538_v5 }
 0x2e7   :  { %v8386_v40 = vadd.f32 %v667_v37, %v651_v33 }
 0x2e9   :  { %6893 = vmatmul.msk.f32.gmra.mxu1 %vm711_vm3, %v8373_v27  ;;  %11889 = vst [vmem:[#allocation16_spill] sm:$0xff] %v8386_v40 }
 0x2ea   :  { %v606_v31 = vpop.permute.xlu0 %605  ;;  %6909 = vmatmul.msk.f32.gmra.mxu2 %vm857_vm4, %v8376_v30  ;;  %v514_v42 = vpop.permute.xlu1 %513 }
 0x2eb   :  { %v636_v39 = vmul.f32 %v8121_v36, %v606_v31  ;;  %v540_v48 = vmul.f32 %v8116_v35, %v514_v42 }
 0x2ed   :  { %v652_v45 = vadd.f32 %v636_v39, %v539_v41  ;;  %v653_v53 = vadd.f32 %v637_v10, %v540_v48  ;;  %v147_v48 = vpop.f32.mrf.mxu3 }
 0x2ef   :  { %v8400_v0 = vadd.f32 %v668_v46, %v652_v45  ;;  %v8415_v4 = vadd.f32 %v669_v59, %v653_v53 }
 0x2f1   :  { %6894 = vmatmul.msk.f32.gmra.mxu1 %vm711_vm3, %v8386_v40  ;;  %11890 = vst [vmem:[#allocation17_spill] sm:$0xff] %v8400_v0 }
 0x2f2   :  { %v519_v43 = vpop.permute.xlu0 %518  ;;  %6910 = vmatmul.msk.f32.gmra.mxu2 %vm857_vm4, %v8389_v12  ;;  %v616_v55 = vpop.permute.xlu1 %615  ;;  %11891 = vst [vmem:[#allocation18_spill] sm:$0xff] %v8415_v4 }
 0x2f3   :  { %v541_v61 = vmul.f32 %v8116_v35, %v519_v43  ;;  %v638_v6 = vmul.f32 %v8121_v36, %v616_v55  ;;  %v7232_v35 = vpop.permute.xlu2 %7231 }
 0x2f4   :  { %v7233_v33 = vunpack.i.l.bf16 %v7232_v35  ;;  %v7234_v37 = vunpack.i.h.bf16 %v7232_v35 }
 0x2f5   :  { %v654_v18 = vadd.f32 %v638_v6, %v541_v61 }
 0x2f7   :  { %v8428_v23 = vadd.f32 %v670_v19, %v654_v18 }
 0x2f9   :  { %6895 = vmatmul.msk.f32.gmra.mxu1 %vm711_vm3, %v8400_v0  ;;  %11892 = vst [vmem:[#allocation19_spill] sm:$0xff] %v8428_v23 }
 0x2fa   :  { %6911 = vmatmul.msk.f32.gmra.mxu2 %vm857_vm4, %v8403_v49  ;;  %v621_v50 = vpop.permute.xlu0 %620  ;;  %v7237_v20 = vpop.permute.xlu1 %7236 }
 0x2fb   :  { %v639_v22 = vmul.f32 %v8121_v36, %v621_v50  ;;  %v7238_v39 = vunpack.i.l.bf16 %v7237_v20  ;;  %v7242_v2 = vpop.permute.xlu2 %7241  ;;  %v7239_v41 = vunpack.i.h.bf16 %v7237_v20  ;;  %v155_v50 = vrot.slane %v147_v48, 4 }
 0x2fc   :  { %v7243_v42 = vunpack.i.l.bf16 %v7242_v2  ;;  %v7244_v43 = vunpack.i.h.bf16 %v7242_v2 }
 0x2fd   :  { %v655_v60 = vadd.f32 %v639_v22, %v542_v56 }
 0x2ff   :  { %v8441_v3 = vadd.f32 %v671_v62, %v655_v60 }
 0x301   :  { %6896 = vmatmul.msk.f32.gmra.mxu1 %vm711_vm3, %v8415_v4  ;;  %11893 = vst [vmem:[#allocation20_spill] sm:$0xff] %v8441_v3 }
 0x302   :  { %6912 = vmatmul.msk.f32.gmra.mxu2 %vm857_vm4, %v8418_v15  ;;  %v1248_v16 = vpop.permute.xlu0 %1247  ;;  %v1246_v36 = vpop.permute.xlu1 %1245 }
 0x303   :  { %v1250_v46 = vpop.permute.xlu2 %1249 }
 0x309   :  { %6897 = vmatmul.msk.f32.gmra.mxu1 %vm711_vm3, %v8428_v23 }
 0x30a   :  { %6913 = vmatmul.msk.f32.gmra.mxu2 %vm857_vm4, %v8431_v8  ;;  %v1242_v58 = vpop.permute.xlu0 %1241  ;;  %v1240_v34 = vpop.permute.xlu1 %1239 }
 0x30b   :  { %v1244_v47 = vpop.permute.xlu2 %1243 }
 0x30d   :  { %v127_v10 = vpop.f32.mrf.mxu2 }
 0x30e   :  { %v158_v53 = vsel %vm156_vm2, %v127_v10, %v155_v50 }
 0x30f   :  { %162 = vst [vmem:[%s11849_s9 + $0x8] sm:$0xff] %v158_v53  ;;  %s7829_s9 = smov 112  }
 0x311   :  { %6898 = vmatmul.msk.f32.gmra.mxu1 %vm711_vm3, %v8441_v3 }
 0x312   :  { %6914 = vmatmul.msk.f32.gmra.mxu2 %vm857_vm4, %v8444_v57  ;;  %v7247_v5 = vpop.permute.xlu0 %7246  ;;  %v1252_v45 = vpop.permute.xlu1 %1251 }
 0x313   :  { %v7248_v11 = vunpack.i.l.bf16 %v7247_v5  ;;  %v7249_v31 = vunpack.i.h.bf16 %v7247_v5 }
 0x315   :  { %1188 = vmatpush.msrb.mxu3 %v7248_v11 }
 0x317   :  { %1189 = vmatpush.msrb.mxu3 %v7249_v31 }
 0x319   :  { %1190 = vmatpush.msrb.mxu3 %v7233_v33 }
 0x31b   :  { %1191 = vmatpush.msrb.mxu3 %v7234_v37 }
 0x31d   :  { %1192 = vmatpush.msrb.mxu3 %v7238_v39 }
 0x31f   :  { %1193 = vmatpush.msrb.mxu3 %v7239_v41 }
 0x321   :  { %1194 = vmatpush.msrb.mxu3 %v7243_v42 }
 0x323   :  { %1195 = vmatpush.msrb.mxu3 %v7244_v43 }
 0x325   :  { %6923 = vmatpush.xpose.msk.msra.mxu3 %vm857_vm4, %v1252_v45 }
 0x329   :  { %6924 = vmatpush.xpose.msk.msra.mxu3 %vm857_vm4, %v1250_v46 }
 0x32d   :  { %6925 = vmatpush.xpose.msk.msra.mxu3 %vm857_vm4, %v1248_v16 }
 0x331   :  { %6926 = vmatpush.xpose.msk.msra.mxu3 %vm857_vm4, %v1246_v36 }
 0x335   :  { %6927 = vmatpush.xpose.msk.msra.mxu3 %vm857_vm4, %v1244_v47 }
 0x339   :  { %6928 = vmatpush.xpose.msk.msra.mxu3 %vm857_vm4, %v1242_v58 }
 0x33d   :  { %6929 = vmatpush.xpose.msk.msra.mxu3 %vm857_vm4, %v1240_v34 }
 0x356   :  { %v801_v5 = vpop.f32.mrf.mxu1 }
 0x35d   :  { %v915_v55 = vpop.f32.mrf.mxu2 }
 0x35e   :  { %v940_v59 = vsel %vm939_vm5, %v915_v55, -inf  ;;  %v8484_v11 = vpop.f32.mrf.mxu1 }
 0x35f   :  { %941 = vmax.xlane.f32.xlu1 %v940_v59 }
 0x365   :  { %v918_v61 = vpop.f32.mrf.mxu2 }
 0x366   :  { %v943_v6 = vsel %vm939_vm5, %v918_v61, -inf  ;;  %v807_v37 = vpop.f32.mrf.mxu1 }
 0x367   :  { %944 = vmax.xlane.f32.xlu2 %v943_v6 }
 0x36d   :  { %v921_v16 = vpop.f32.mrf.mxu2 }
 0x36e   :  { %v946_v18 = vsel %vm939_vm5, %v921_v16, -inf }
 0x36f   :  { %947 = vmax.xlane.f32.xlu0 %v946_v18 }
 0x375   :  { %v924_v19 = vpop.f32.mrf.mxu2 }
 0x376   :  { %v949_v20 = vsel %vm939_vm5, %v924_v19, -inf }
 0x377   :  { %950 = vmax.xlane.f32.xlu2 %v949_v20 }
 0x37d   :  { %v927_v21 = vpop.f32.mrf.mxu2 }
 0x37e   :  { %v952_v22 = vsel %vm939_vm5, %v927_v21, -inf }
 0x37f   :  { %953 = vmax.xlane.f32.xlu1 %v952_v22 }
 0x385   :  { %v8466_v56 = vpop.f32.mrf.mxu2 }
 0x386   :  { %v955_v58 = vsel %vm939_vm5, %v8466_v56, -inf }
 0x387   :  { %956 = vmax.xlane.f32.xlu2 %v955_v58 }
 0x38d   :  { %v8470_v60 = vpop.f32.mrf.mxu2 }
 0x38e   :  { %v958_v62 = vsel %vm939_vm5, %v8470_v60, -inf }
 0x38f   :  { %959 = vmax.xlane.f32.xlu0 %v958_v62 }
 0x395   :  { %v8474_v36 = vpop.f32.mrf.mxu2 }
 0x396   :  { %v961_v35 = vsel %vm939_vm5, %v8474_v36, -inf }
 0x397   :  { %962 = vmax.xlane.f32.xlu2 %v961_v35 }
 0x398   :  { %1223 = vrot.lane.b32.xlu1 %v8361_v24, %s7829_s9 }
 0x3a3   :  { %1221 = vrot.lane.b32.xlu0 %v8346_v14, %s7829_s9 }
 0x3af   :  { %1237 = vrot.lane.b32.xlu2 %v8222_v9, %s7828_s3  ;;  %v810_v9 = vpop.f32.mrf.mxu1 }
 0x3b7   :  { %v813_v53 = vpop.f32.mrf.mxu1 }
 0x3bf   :  { %v816_v22 = vpop.f32.mrf.mxu1 }
 0x3c7   :  { %v819_v62 = vpop.f32.mrf.mxu1 }
 0x3d2   :  { %v942_v31 = vpop.xlane.xlu1 %941 }
 0x3d3   :  { %v964_v33 = vsub.f32 %v915_v55, %v942_v31 }
 0x3d5   :  { %v972_v34 = vmul.f32 1.442695, %v964_v33  ;;  %v822_v33 = vpop.f32.mrf.mxu1 }
 0x3d7   :  { %7409 = vpow2.f32 %v972_v34  ;;  %v8518_v34 = vadd.f32 %v8198_v51, %v822_v33 }
 0x3da   :  { %v945_v39 = vpop.xlane.xlu2 %944 }
 0x3db   :  { %v965_v2 = vsub.f32 %v918_v61, %v945_v39  ;;  %v8523_v39 = vadd.f32 %v8198_v51, %v813_v53 }
 0x3dd   :  { %v8486_v41 = vpop.eup %7409  ;;  %v974_v42 = vmul.f32 1.442695, %v965_v2 }
 0x3de   :  { %v988_v24 = vsel %vm939_vm5, %v8486_v41, 0.0 }
 0x3df   :  { %7411 = vpow2.f32 %v974_v42  ;;  %989 = vadd.xlane.f32.xlu1 %v988_v24  ;;  %v8536_v42 = vadd.f32 %v8198_v51, %v807_v37  ;;  %v8541_v24 = vadd.f32 %v8198_v51, %v810_v9  ;;  %v8554_v37 = vadd.f32 %v8198_v51, %v8484_v11 }
 0x3e2   :  { %v948_v14 = vpop.xlane.xlu0 %947 }
 0x3e3   :  { %v966_v43 = vsub.f32 %v921_v16, %v948_v14 }
 0x3e5   :  { %v8490_v45 = vpop.eup %7411  ;;  %v976_v46 = vmul.f32 1.442695, %v966_v43 }
 0x3e6   :  { %v991_v47 = vsel %vm939_vm5, %v8490_v45, 0.0 }
 0x3e7   :  { %7413 = vpow2.f32 %v976_v46  ;;  %992 = vadd.xlane.f32.xlu1 %v991_v47 }
 0x3ea   :  { %v951_v48 = vpop.xlane.xlu2 %950 }
 0x3eb   :  { %v967_v10 = vsub.f32 %v924_v19, %v951_v48 }
 0x3ed   :  { %v8494_v50 = vpop.eup %7413  ;;  %v978_v55 = vmul.f32 1.442695, %v967_v10 }
 0x3ee   :  { %v994_v59 = vsel %vm939_vm5, %v8494_v50, 0.0 }
 0x3ef   :  { %7415 = vpow2.f32 %v978_v55  ;;  %995 = vadd.xlane.f32.xlu0 %v994_v59 }
 0x3f2   :  { %v954_v61 = vpop.xlane.xlu1 %953 }
 0x3f3   :  { %v968_v6 = vsub.f32 %v927_v21, %v954_v61  ;;  %v8511_v21 = vadd.f32 %v8198_v51, %v819_v62 }
 0x3f5   :  { %v8498_v16 = vpop.eup %7415  ;;  %v980_v18 = vmul.f32 1.442695, %v968_v6 }
 0x3f6   :  { %v997_v20 = vsel %vm939_vm5, %v8498_v16, 0.0 }
 0x3f7   :  { %7417 = vpow2.f32 %v980_v18  ;;  %998 = vadd.xlane.f32.xlu1 %v997_v20 }
 0x3fa   :  { %v8506_v35 = vpop.xlane.xlu2 %956 }
 0x3fd   :  { %v8502_v19 = vpop.eup %7417 }
 0x3fe   :  { %v1000_v58 = vsel %vm939_vm5, %v8502_v19, 0.0 }
 0x3ff   :  { %1001 = vadd.xlane.f32.xlu2 %v1000_v58 }
 0x403   :  { %1227 = vrot.lane.b32.xlu0 %v8389_v12, %s7829_s9  ;;  %v8529_v12 = vadd.f32 %v8198_v51, %v816_v22 }
 0x40a   :  { %v8513_v31 = vpop.xlane.xlu2 %962 }
 0x40b   :  { %1675 = vrot.lane.b32.xlu0 %v8511_v21, %s7826_s21 }
 0x410   :  { %1677 = vrot.lane.b32.xlu1 %v8518_v34, %s7826_s21 }
 0x412   :  { %v1238_v2 = vpop.permute.xlu2 %1237 }
 0x413   :  { %1671 = vrot.lane.b32.xlu0 %v8523_v39, %s7826_s21  ;;  %6930 = vmatpush.xpose.msk.msra.mxu3 %vm857_vm4, %v1238_v2 }
 0x417   :  { %1225 = vrot.lane.b32.xlu2 %v8376_v30, %s7829_s9  ;;  %v8548_v30 = vadd.f32 %v8198_v51, %v801_v5  ;;  %v8568_v51 = vpop.xlane.xlu0 %959 }
 0x418   :  { %1673 = vrot.lane.b32.xlu1 %v8529_v12, %s7826_s21 }
 0x41b   :  { %1667 = vrot.lane.b32.xlu0 %v8536_v42, %s7826_s21 }
 0x41f   :  { %1229 = vrot.lane.b32.xlu2 %v8403_v49, %s7829_s9  ;;  %v8566_v49 = vpop.permute.xlu1 %1223  ;;  %v8570_v11 = vpop.permute.xlu0 %1221 }
 0x420   :  { %1669 = vrot.lane.b32.xlu1 %v8541_v24, %s7826_s21 }
 0x423   :  { %1663 = vrot.lane.b32.xlu0 %v8548_v30, %s7826_s21 }
 0x427   :  { %1231 = vrot.lane.b32.xlu2 %v8418_v15, %s7829_s9 }
 0x428   :  { %1665 = vrot.lane.b32.xlu1 %v8554_v37, %s7826_s21 }
 0x42f   :  { %1233 = vrot.lane.b32.xlu2 %v8431_v8, %s7829_s9 }
 0x437   :  { %1235 = vrot.lane.b32.xlu2 %v8444_v57, %s7829_s9 }
 0x43f   :  { %7251 = vrot.lane.b32.xlu2 %v8306_v32, %s7830_s16 }
 0x452   :  { %v990_v5 = vpop.xlane.xlu1 %989 }
 0x453   :  { %7419 = vrcp.f32 %v990_v5  ;;  %v1023_v43 = vand.u32 2147483648, %v990_v5  ;;  %v1021_v57 = vand.u32 2147483647, %v990_v5  ;;  %vm1017_vm7 = vweird.f32 %v990_v5 }
 0x455   :  { %v1024_v48 = vor.u32 1.1754944e-38, %v1023_v43  ;;  %vm1022_vm9 = vcmp.eq.f32.partialorder %v1021_v57, 8.507059e+37 }
 0x459   :  { %v7420_v15 = vpop.eup %7419 }
 0x45a   :  { %v1013_v14 = vmul.f32 %v7420_v15, %v990_v5  ;;  %v993_v9 = vpop.xlane.xlu1 %992  ;;  %vm1018_vm6 = vweird.f32 %v7420_v15 }
 0x45b   :  { %7421 = vrcp.f32 %v993_v9  ;;  %vm1019_vm8 = vmor %vm1017_vm7, %vm1018_vm6  ;;  %v1038_v18 = vand.u32 2147483648, %v993_v9  ;;  %v1036_v22 = vand.u32 2147483647, %v993_v9  ;;  %vm1032_vm11 = vweird.f32 %v993_v9 }
 0x45c   :  { %v1014_v8 = vsub.f32 1.0, %v1013_v14 }
 0x45d   :  { %v1039_v33 = vor.u32 1.1754944e-38, %v1038_v18  ;;  %vm1037_vm13 = vcmp.eq.f32.partialorder %v1036_v22, 8.507059e+37 }
 0x45e   :  { %v1015_v46 = vmul.f32 %v7420_v15, %v1014_v8 }
 0x460   :  { %v1016_v47 = vadd.f32 %v7420_v15, %v1015_v46 }
 0x461   :  { %v7422_v32 = vpop.eup %7421 }
 0x462   :  { %v1028_v10 = vmul.f32 %v7422_v32, %v993_v9  ;;  %v996_v53 = vpop.xlane.xlu0 %995  ;;  %v1020_v55 = vsel %vm1019_vm8, %v7420_v15, %v1016_v47  ;;  %vm1033_vm10 = vweird.f32 %v7422_v32 }
 0x463   :  { %7423 = vrcp.f32 %v996_v53  ;;  %v1025_v59 = vsel %vm1022_vm9, %v1024_v48, %v1020_v55  ;;  %vm1034_vm12 = vmor %vm1032_vm11, %vm1033_vm10  ;;  %v1053_v43 = vand.u32 2147483648, %v996_v53  ;;  %v1051_v57 = vand.u32 2147483647, %v996_v53 }
 0x464   :  { %v1029_v61 = vsub.f32 1.0, %v1028_v10  ;;  %v1026_v6 = vmul.f32 %v8486_v41, %v1025_v59  ;;  %vm1047_vm15 = vweird.f32 %v996_v53 }
 0x465   :  { %v1054_v48 = vor.u32 1.1754944e-38, %v1053_v43  ;;  %vm1052_vm1 = vcmp.eq.f32.partialorder %v1051_v57, 8.507059e+37 }
 0x466   :  { %6915 = vmatmul.msk.f32.vlgmr.msrb.gmra.mxu3 %vm939_vm5, %v1026_v6  ;;  %v1030_v20 = vmul.f32 %v7422_v32, %v1029_v61 }
 0x468   :  { %v1031_v58 = vadd.f32 %v7422_v32, %v1030_v20 }
 0x469   :  { %v7424_v62 = vpop.eup %7423 }
 0x46a   :  { %v1043_v2 = vmul.f32 %v7424_v62, %v996_v53  ;;  %v999_v5 = vpop.xlane.xlu1 %998  ;;  %v1035_v15 = vsel %vm1034_vm12, %v7422_v32, %v1031_v58  ;;  %vm1048_vm14 = vweird.f32 %v7424_v62 }
 0x46b   :  { %7425 = vrcp.f32 %v999_v5  ;;  %v1040_v14 = vsel %vm1037_vm13, %v1039_v33, %v1035_v15  ;;  %vm1049_vm0 = vmor %vm1047_vm15, %vm1048_vm14  ;;  %v1068_v18 = vand.u32 2147483648, %v999_v5  ;;  %v1066_v53 = vand.u32 2147483647, %v999_v5 }
 0x46c   :  { %v1044_v8 = vsub.f32 1.0, %v1043_v2  ;;  %v1041_v41 = vmul.f32 %v8490_v45, %v1040_v14  ;;  %vm1062_vm6 = vweird.f32 %v999_v5 }
 0x46d   :  { %v1069_v33 = vor.u32 1.1754944e-38, %v1068_v18  ;;  %vm1067_vm8 = vcmp.eq.f32.partialorder %v1066_v53, 8.507059e+37 }
 0x46e   :  { %6916 = vmatmul.msk.f32.gmra.mxu3 %vm939_vm5, %v1041_v41  ;;  %v1045_v46 = vmul.f32 %v7424_v62, %v1044_v8 }
 0x470   :  { %v1046_v47 = vadd.f32 %v7424_v62, %v1045_v46 }
 0x471   :  { %v7426_v9 = vpop.eup %7425 }
 0x472   :  { %v1058_v10 = vmul.f32 %v7426_v9, %v999_v5  ;;  %v1002_v55 = vpop.xlane.xlu2 %1001  ;;  %v1050_v32 = vsel %vm1049_vm0, %v7424_v62, %v1046_v47  ;;  %vm1063_vm2 = vweird.f32 %v7426_v9 }
 0x473   :  { %7427 = vrcp.f32 %v1002_v55  ;;  %v1055_v59 = vsel %vm1052_vm1, %v1054_v48, %v1050_v32  ;;  %vm1064_vm7 = vmor %vm1062_vm6, %vm1063_vm2  ;;  %v1083_v41 = vand.u32 2147483648, %v1002_v55  ;;  %v1081_v46 = vand.u32 2147483647, %v1002_v55 }
 0x474   :  { %v1059_v61 = vsub.f32 1.0, %v1058_v10  ;;  %v1056_v45 = vmul.f32 %v8494_v50, %v1055_v59  ;;  %vm1077_vm10 = vweird.f32 %v1002_v55 }
 0x475   :  { %v8577_v6 = vpop.permute.xlu0 %1227  ;;  %v1084_v47 = vor.u32 1.1754944e-38, %v1083_v41  ;;  %vm1082_vm12 = vcmp.eq.f32.partialorder %v1081_v46, 8.507059e+37  ;;  %v8623_v41 = vmul.f32 0.25, %v8523_v39  ;;  %v8633_v46 = vmul.f32 0.25, %v8511_v21 }
 0x476   :  { %6917 = vmatmul.msk.f32.gmra.mxu3 %vm939_vm5, %v1056_v45  ;;  %v1060_v20 = vmul.f32 %v7426_v9, %v1059_v61 }
 0x478   :  { %v1061_v22 = vadd.f32 %v7426_v9, %v1060_v20 }
 0x479   :  { %v7428_v58 = vpop.eup %7427 }
 0x47a   :  { %v1073_v62 = vmul.f32 %v7428_v58, %v1002_v55  ;;  %v8580_v2 = vpop.permute.xlu2 %1225  ;;  %v1065_v15 = vsel %vm1064_vm7, %v7426_v9, %v1061_v22  ;;  %vm1078_vm9 = vweird.f32 %v7428_v58 }
 0x47b   :  { %v1070_v14 = vsel %vm1067_vm8, %v1069_v33, %v1065_v15  ;;  %vm1079_vm11 = vmor %vm1077_vm10, %vm1078_vm9 }
 0x47c   :  { %v1074_v50 = vsub.f32 1.0, %v1073_v62  ;;  %v1071_v8 = vmul.f32 %v8498_v16, %v1070_v14  ;;  %v8608_v14 = vmul.f32 0.25, %v8554_v37 }
 0x47d   :  { %v1676_v57 = vpop.permute.xlu0 %1675 }
 0x47e   :  { %6918 = vmatmul.msk.f32.gmra.mxu3 %vm939_vm5, %v1071_v8  ;;  %v1075_v43 = vmul.f32 %v7428_v58, %v1074_v50  ;;  %v8613_v50 = vmul.f32 0.25, %v8536_v42  ;;  %v8618_v8 = vmul.f32 0.25, %v8541_v24 }
 0x480   :  { %v1076_v5 = vadd.f32 %v7428_v58, %v1075_v43  ;;  %v8628_v43 = vmul.f32 0.25, %v8529_v12 }
 0x482   :  { %v8584_v48 = vpop.permute.xlu2 %1229  ;;  %v1678_v10 = vpop.permute.xlu1 %1677  ;;  %v1080_v9 = vsel %vm1079_vm11, %v7428_v58, %v1076_v5  ;;  %v8603_v58 = vmul.f32 0.25, %v8548_v30  ;;  %v969_v5 = vsub.f32 %v8466_v56, %v8506_v35  ;;  %v971_v56 = vsub.f32 %v8474_v36, %v8513_v31 }
 0x483   :  { %6947 = vmatpush.xpose.msk.msra.mxu1 %vm857_vm4, %v1678_v10  ;;  %v1085_v32 = vsel %vm1082_vm12, %v1084_v47, %v1080_v9 }
 0x484   :  { %v1086_v16 = vmul.f32 %v8502_v19, %v1085_v32  ;;  %v982_v9 = vmul.f32 1.442695, %v969_v5  ;;  %v970_v32 = vsub.f32 %v8470_v60, %v8568_v51 }
 0x485   :  { %v1672_v59 = vpop.permute.xlu0 %1671 }
 0x486   :  { %6919 = vmatmul.msk.f32.gmra.mxu3 %vm939_vm5, %v1086_v16  ;;  %7429 = vpow2.f32 %v982_v9 }
 0x487   :  { %6948 = vmatpush.xpose.msk.msra.mxu1 %vm857_vm4, %v1676_v57  ;;  %v8638_v57 = vmul.f32 0.25, %v8518_v34 }
 0x48a   :  { %v8590_v61 = vpop.permute.xlu2 %1231  ;;  %v1674_v55 = vpop.permute.xlu1 %1673 }
 0x48b   :  { %6949 = vmatpush.xpose.msk.msra.mxu1 %vm857_vm4, %v1674_v55  ;;  %v984_v55 = vmul.f32 1.442695, %v970_v32 }
 0x48d   :  { %v1668_v20 = vpop.permute.xlu0 %1667  ;;  %7431 = vpow2.f32 %v984_v55  ;;  %v8709_v55 = vpack.i.bf16 %v8511_v21, %v8518_v34 }
 0x48f   :  { %6950 = vmatpush.xpose.msk.msra.mxu1 %vm857_vm4, %v1672_v59 }
 0x492   :  { %v8594_v45 = vpop.permute.xlu2 %1233  ;;  %v1670_v18 = vpop.permute.xlu1 %1669 }
 0x493   :  { %6951 = vmatpush.xpose.msk.msra.mxu1 %vm857_vm4, %v1670_v18  ;;  %v8651_v18 = vpop.eup %7429 }
 0x495   :  { %v1664_v22 = vpop.permute.xlu0 %1663 }
 0x497   :  { %6952 = vmatpush.xpose.msk.msra.mxu1 %vm857_vm4, %v1668_v20  ;;  %v1003_v20 = vsel %vm939_vm5, %v8651_v18, 0.0 }
 0x49a   :  { %v8598_v19 = vpop.permute.xlu2 %1235  ;;  %v1666_v53 = vpop.permute.xlu1 %1665 }
 0x49b   :  { %6953 = vmatpush.xpose.msk.msra.mxu1 %vm857_vm4, %v1666_v53  ;;  %v986_v53 = vmul.f32 1.442695, %v971_v56 }
 0x49d   :  { %7433 = vpow2.f32 %v986_v53 }
 0x49f   :  { %6954 = vmatpush.xpose.msk.msra.mxu1 %vm857_vm4, %v1664_v22  ;;  %v8659_v22 = vpop.eup %7431 }
 0x4a0   :  { %v1006_v51 = vsel %vm939_vm5, %v8659_v22, 0.0 }
 0x4a2   :  { %v7252_v33 = vpop.permute.xlu2 %7251  ;;  %6955 = vmatmul.msk.f32.vlgmr.msra.gmra.mxu1 %vm857_vm4, %v8603_v58 }
 0x4a3   :  { %v7253_v62 = vunpack.i.l.bf16 %v7252_v33  ;;  %v7254_v15 = vunpack.i.h.bf16 %v7252_v33  ;;  %v8669_v36 = vpop.eup %7433 }
 0x4a5   :  { %1574 = vmatpush.msra.mxu2 %v7253_v62  ;;  %v1009_v62 = vsel %vm939_vm5, %v8669_v36, 0.0 }
 0x4a7   :  { %1575 = vmatpush.msra.mxu2 %v7254_v15 }
 0x4aa   :  { %6956 = vmatmul.msk.f32.gmra.mxu1 %vm857_vm4, %v8608_v14 }
 0x4b2   :  { %6957 = vmatmul.msk.f32.gmra.mxu1 %vm857_vm4, %v8613_v50 }
 0x4ba   :  { %6958 = vmatmul.msk.f32.gmra.mxu1 %vm857_vm4, %v8618_v8 }
 0x4c2   :  { %6959 = vmatmul.msk.f32.gmra.mxu1 %vm857_vm4, %v8623_v41 }
 0x4ca   :  { %6960 = vmatmul.msk.f32.gmra.mxu1 %vm857_vm4, %v8628_v43 }
 0x4d2   :  { %6961 = vmatmul.msk.f32.gmra.mxu1 %vm857_vm4, %v8633_v46 }
 0x4da   :  { %6962 = vmatmul.msk.f32.gmra.mxu1 %vm857_vm4, %v8638_v57 }
 0x51f   :  { %v8644_v47 = vpop.f32.mrf.mxu1 }
 0x520   :  { %v1760_v10 = vsel %vm939_vm5, %v8644_v47, -inf }
 0x521   :  { %1761 = vmax.xlane.f32.xlu1 %v1760_v10 }
 0x527   :  { %v1739_v16 = vpop.f32.mrf.mxu1 }
 0x528   :  { %v1763_v59 = vsel %vm939_vm5, %v1739_v16, -inf }
 0x529   :  { %1764 = vmax.xlane.f32.xlu0 %v1763_v59  ;;  %v8703_v59 = vpack.i.bf16 %v8523_v39, %v8529_v12 }
 0x52f   :  { %v8655_v35 = vpop.f32.mrf.mxu1 }
 0x531   :  { %1004 = vadd.xlane.f32.xlu0 %v1003_v20 }
 0x537   :  { %v8661_v60 = vpop.f32.mrf.mxu1 }
 0x538   :  { %v1769_v33 = vsel %vm939_vm5, %v8661_v60, -inf }
 0x539   :  { %1007 = vadd.xlane.f32.xlu0 %v1006_v51  ;;  %1770 = vmax.xlane.f32.xlu2 %v1769_v33 }
 0x53a   :  { %7256 = vrot.lane.b32.xlu1 %v8256_v25, %s7830_s16  ;;  %v1766_v25 = vsel %vm939_vm5, %v8655_v35, -inf }
 0x53f   :  { %v8671_v31 = vpop.f32.mrf.mxu1 }
 0x541   :  { %1010 = vadd.xlane.f32.xlu0 %v1009_v62 }
 0x542   :  { %7266 = vrot.lane.b32.xlu1 %v8268_v26, %s7830_s16  ;;  %v1772_v26 = vsel %vm939_vm5, %v8671_v31, -inf }
 0x547   :  { %v8677_v15 = vpop.f32.mrf.mxu1 }
 0x548   :  { %v1775_v5 = vsel %vm939_vm5, %v8677_v15, -inf }
 0x549   :  { %1776 = vmax.xlane.f32.xlu2 %v1775_v5 }
 0x54f   :  { %v8691_v10 = vpop.f32.mrf.mxu1 }
 0x550   :  { %v1778_v9 = vsel %vm939_vm5, %v8691_v10, -inf }
 0x555   :  { %7261 = vrot.lane.b32.xlu0 %v8264_v1, %s7830_s16 }
 0x557   :  { %v8695_v1 = vpop.f32.mrf.mxu1 }
 0x558   :  { %v1781_v32 = vsel %vm939_vm5, %v8695_v1, -inf }
 0x561   :  { %2071 = vrot.lane.b32.xlu2 %v8518_v34, %s7828_s3 }
 0x569   :  { %2067 = vrot.lane.b32.xlu2 %v8529_v12, %s7828_s3 }
 0x56c   :  { %1767 = vmax.xlane.f32.xlu1 %v1766_v25 }
 0x574   :  { %1773 = vmax.xlane.f32.xlu1 %v1772_v26 }
 0x57f   :  { %1779 = vmax.xlane.f32.xlu0 %v1778_v9 }
 0x587   :  { %1782 = vmax.xlane.f32.xlu0 %v1781_v32 }
 0x58d   :  { %2069 = vrot.lane.b32.xlu1 %v8511_v21, %s7828_s3 }
 0x594   :  { %v1762_v51 = vpop.xlane.xlu1 %1761 }
 0x595   :  { %7276 = vrot.lane.b32.xlu1 %v8703_v59, %s7827_s22 }
 0x59b   :  { %7271 = vrot.lane.b32.xlu0 %v8709_v55, %s7827_s22 }
 0x59c   :  { %v1765_v56 = vpop.xlane.xlu0 %1764 }
 0x59d   :  { %v1785_v20 = vsub.f32 %v1739_v16, %v1765_v56 }
 0x59f   :  { %v1794_v53 = vmul.f32 1.442695, %v1785_v20 }
 0x5a1   :  { %7435 = vpow2.f32 %v1794_v53 }
 0x5a3   :  { %2065 = vrot.lane.b32.xlu0 %v8523_v39, %s7828_s3 }
 0x5a4   :  { %v1005_v12 = vpop.xlane.xlu0 %1004 }
 0x5a5   :  { %7437 = vrcp.f32 %v1005_v12  ;;  %v1098_v32 = vand.u32 2147483648, %v1005_v12  ;;  %v1096_v56 = vand.u32 2147483647, %v1005_v12  ;;  %vm1092_vm14 = vweird.f32 %v1005_v12 }
 0x5a7   :  { %v8715_v33 = vpop.eup %7435  ;;  %v1099_v3 = vor.u32 1.1754944e-38, %v1098_v32  ;;  %vm1097_vm0 = vcmp.eq.f32.partialorder %v1096_v56, 8.507059e+37  ;;  %v1784_v32 = vsub.f32 %v8644_v47, %v1762_v51 }
 0x5a8   :  { %v1811_v62 = vsel %vm939_vm5, %v8715_v33, 0.0 }
 0x5a9   :  { %1812 = vadd.xlane.f32.xlu2 %v1811_v62 }
 0x5ab   :  { %v7438_v21 = vpop.eup %7437 }
 0x5ac   :  { %v1088_v34 = vmul.f32 %v7438_v21, %v1005_v12  ;;  %v7257_v5 = vpop.permute.xlu1 %7256  ;;  %v1008_v25 = vpop.xlane.xlu0 %1007  ;;  %vm1093_vm13 = vweird.f32 %v7438_v21 }
 0x5ad   :  { %v7258_v26 = vunpack.i.l.bf16 %v7257_v5  ;;  %7439 = vrcp.f32 %v1008_v25  ;;  %v7259_v9 = vunpack.i.h.bf16 %v7257_v5  ;;  %vm1094_vm15 = vmor %vm1092_vm14, %vm1093_vm13  ;;  %v1113_v5 = vand.u32 2147483648, %v1008_v25 }
 0x5ae   :  { %v1089_v16 = vsub.f32 1.0, %v1088_v34  ;;  %vm1107_vm2 = vweird.f32 %v1008_v25 }
 0x5af   :  { %1576 = vmatpush.msra.mxu2 %v7258_v26 }
 0x5b0   :  { %v1090_v39 = vmul.f32 %v7438_v21, %v1089_v16  ;;  %v1111_v16 = vand.u32 2147483647, %v1008_v25 }
 0x5b1   :  { %1577 = vmatpush.msra.mxu2 %v7259_v9 }
 0x5b2   :  { %v1091_v20 = vadd.f32 %v7438_v21, %v1090_v39  ;;  %v1114_v39 = vor.u32 1.1754944e-38, %v1113_v5  ;;  %vm1112_vm7 = vcmp.eq.f32.partialorder %v1111_v16, 8.507059e+37 }
 0x5b3   :  { %v7440_v53 = vpop.eup %7439 }
 0x5b4   :  { %v1103_v62 = vmul.f32 %v7440_v53, %v1008_v25  ;;  %v1011_v23 = vpop.xlane.xlu0 %1010  ;;  %v1095_v4 = vsel %vm1094_vm15, %v7438_v21, %v1091_v20  ;;  %vm1108_vm1 = vweird.f32 %v7440_v53  ;;  %v1792_v20 = vmul.f32 1.442695, %v1784_v32  ;;  %v7267_v32 = vpop.permute.xlu1 %7266 }
 0x5b5   :  { %7441 = vrcp.f32 %v1011_v23  ;;  %v1100_v0 = vsel %vm1097_vm0, %v1099_v3, %v1095_v4  ;;  %vm1109_vm6 = vmor %vm1107_vm2, %vm1108_vm1  ;;  %v8722_v3 = vpop.xlane.xlu2 %1770  ;;  %v1126_v25 = vand.u32 2147483647, %v1011_v23  ;;  %vm1122_vm9 = vweird.f32 %v1011_v23 }
 0x5b6   :  { %v1104_v40 = vsub.f32 1.0, %v1103_v62  ;;  %v1101_v34 = vmul.f32 %v8651_v18, %v1100_v0  ;;  %7443 = vpow2.f32 %v1792_v20 }
 0x5b7   :  { %vm1127_vm11 = vcmp.eq.f32.partialorder %v1126_v25, 8.507059e+37 }
 0x5b8   :  { %6920 = vmatmul.msk.f32.gmra.mxu3 %vm939_vm5, %v1101_v34  ;;  %v1105_v26 = vmul.f32 %v7440_v53, %v1104_v40  ;;  %v1128_v40 = vand.u32 2147483648, %v1011_v23 }
 0x5ba   :  { %v1106_v9 = vadd.f32 %v7440_v53, %v1105_v26  ;;  %v1129_v47 = vor.u32 1.1754944e-38, %v1128_v40 }
 0x5bb   :  { %v7442_v12 = vpop.eup %7441 }
 0x5bc   :  { %v1118_v21 = vmul.f32 %v7442_v12, %v1011_v23  ;;  %v1110_v56 = vsel %vm1109_vm6, %v7440_v53, %v1106_v9  ;;  %vm1123_vm8 = vweird.f32 %v7442_v12  ;;  %v8730_v9 = vpop.eup %7443  ;;  %v7268_v23 = vunpack.i.l.bf16 %v7267_v32 }
 0x5bd   :  { %v1115_v4 = vsel %vm1112_vm7, %v1114_v39, %v1110_v56  ;;  %vm1124_vm10 = vmor %vm1122_vm9, %vm1123_vm8  ;;  %v8726_v5 = vpop.xlane.xlu2 %1776 }
 0x5be   :  { %v1119_v0 = vsub.f32 1.0, %v1118_v21  ;;  %v1116_v18 = vmul.f32 %v8659_v22, %v1115_v4  ;;  %v7269_v21 = vunpack.i.h.bf16 %v7267_v32 }
 0x5c0   :  { %6921 = vmatmul.msk.f32.gmra.mxu3 %vm939_vm5, %v1116_v18  ;;  %v1120_v62 = vmul.f32 %v7442_v12, %v1119_v0 }
 0x5c2   :  { %v1121_v34 = vadd.f32 %v7442_v12, %v1120_v62 }
 0x5c4   :  { %v1125_v51 = vsel %vm1124_vm10, %v7442_v12, %v1121_v34  ;;  %v1808_v12 = vsel %vm939_vm5, %v8730_v9, 0.0 }
 0x5c5   :  { %v1130_v53 = vsel %vm1127_vm11, %v1129_v47, %v1125_v51  ;;  %v8734_v56 = vpop.permute.xlu2 %2071 }
 0x5c6   :  { %v1131_v26 = vmul.f32 %v8669_v36, %v1130_v53 }
 0x5c7   :  { %v7262_v22 = vpop.permute.xlu0 %7261 }
 0x5c8   :  { %v7263_v16 = vunpack.i.l.bf16 %v7262_v22  ;;  %6922 = vmatmul.msk.f32.gmra.mxu3 %vm939_vm5, %v1131_v26  ;;  %v7264_v39 = vunpack.i.h.bf16 %v7262_v22 }
 0x5ca   :  { %1578 = vmatpush.msra.mxu2 %v7263_v16 }
 0x5cc   :  { %1579 = vmatpush.msra.mxu2 %v7264_v39 }
 0x5cd   :  { %1809 = vadd.xlane.f32.xlu0 %v1808_v12 }
 0x5ce   :  { %1580 = vmatpush.msra.mxu2 %v7268_v23 }
 0x5d0   :  { %6931 = vmatmul.msk.f32.vlgmr.msra.gmra.mxu3 %vm857_vm4, %v8570_v11  ;;  %1581 = vmatpush.msra.mxu2 %v7269_v21 }
 0x5d2   :  { %6971 = vmatpush.xpose.msk.msrb.mxu2 %vm857_vm4, %v8734_v56 }
 0x5d8   :  { %6932 = vmatmul.msk.f32.gmra.mxu3 %vm857_vm4, %v8566_v49  ;;  %v8760_v49 = vpop.permute.xlu2 %2067 }
 0x5df   :  { %v1768_v36 = vpop.xlane.xlu1 %1767 }
 0x5e0   :  { %6933 = vmatmul.msk.f32.gmra.mxu3 %vm857_vm4, %v8580_v2  ;;  %v8768_v2 = vpop.f32.mrf.mxu3 }
 0x5e7   :  { %v8748_v4 = vpop.xlane.xlu1 %1773 }
 0x5e8   :  { %6934 = vmatmul.msk.f32.gmra.mxu3 %vm857_vm4, %v8577_v6  ;;  %v8770_v62 = vpop.f32.mrf.mxu3 }
 0x5f0   :  { %6935 = vmatmul.msk.f32.gmra.mxu3 %vm857_vm4, %v8584_v48 }
 0x5f2   :  { %v8752_v11 = vpop.xlane.xlu0 %1779 }
 0x5f8   :  { %6936 = vmatmul.msk.f32.gmra.mxu3 %vm857_vm4, %v8590_v61 }
 0x5fa   :  { %v8764_v6 = vpop.xlane.xlu0 %1782 }
 0x5ff   :  { %v8754_v0 = vpop.permute.xlu1 %2069 }
 0x600   :  { %6937 = vmatmul.msk.f32.gmra.mxu3 %vm857_vm4, %v8594_v45  ;;  %6972 = vmatpush.xpose.msk.msrb.mxu2 %vm857_vm4, %v8754_v0 }
 0x604   :  { %6973 = vmatpush.xpose.msk.msrb.mxu2 %vm857_vm4, %v8760_v49 }
 0x607   :  { %v7277_v18 = vpop.permute.xlu1 %7276 }
 0x608   :  { %6938 = vmatmul.msk.f32.gmra.mxu3 %vm857_vm4, %v8598_v19  ;;  %v7278_v45 = vunpack.i.l.bf16 %v7277_v18  ;;  %v7279_v40 = vunpack.i.h.bf16 %v7277_v18  ;;  %v8776_v19 = vpop.f32.mrf.mxu3 }
 0x60d   :  { %v7272_v48 = vpop.permute.xlu0 %7271 }
 0x60e   :  { %v7273_v61 = vunpack.i.l.bf16 %v7272_v48  ;;  %v7274_v20 = vunpack.i.h.bf16 %v7272_v48 }
 0x610   :  { %2008 = vmatpush.msrb.mxu3 %v7273_v61  ;;  %v8778_v34 = vpop.f32.mrf.mxu3 }
 0x611   :  { %11894 = vst [vmem:[#allocation21_spill] sm:$0xff] %v8778_v34 }
 0x612   :  { %2009 = vmatpush.msrb.mxu3 %v7274_v20  ;;  %v8806_v20 = vpack.i.bf16 %v8548_v30, %v8554_v37 }
 0x614   :  { %2010 = vmatpush.msrb.mxu3 %v7278_v45  ;;  %v8812_v45 = vpack.i.bf16 %v8536_v42, %v8541_v24 }
 0x615   :  { %v8772_v25 = vpop.permute.xlu0 %2065 }
 0x616   :  { %2011 = vmatpush.msrb.mxu3 %v7279_v40  ;;  %6974 = vmatpush.xpose.msk.msrb.mxu2 %vm857_vm4, %v8772_v25 }
 0x618   :  { %v8780_v47 = vpop.f32.mrf.mxu3 }
 0x619   :  { %11895 = vst [vmem:[#allocation22_spill] sm:$0xff] %v8780_v47 }
 0x63b   :  { %v8782_v51 = vpop.f32.mrf.mxu3 }
 0x63c   :  { %11896 = vst [vmem:[#allocation23_spill] sm:$0xff] %v8782_v51 }
 0x640   :  { %v1810_v63 = vpop.xlane.xlu0 %1809 }
 0x641   :  { %v1843_v52 = vand.u32 2147483648, %v1810_v63  ;;  %vm1837_vm13 = vweird.f32 %v1810_v63  ;;  %v1841_v7 = vand.u32 2147483647, %v1810_v63 }
 0x643   :  { %v8784_v53 = vpop.f32.mrf.mxu3  ;;  %v1844_v51 = vor.u32 1.1754944e-38, %v1843_v52  ;;  %vm1842_vm15 = vcmp.eq.f32.partialorder %v1841_v7, 8.507059e+37 }
 0x644   :  { %11897 = vst [vmem:[#allocation24_spill] sm:$0xff] %v8784_v53 }
 0x64b   :  { %v8786_v26 = vpop.f32.mrf.mxu3 }
 0x64c   :  { %11898 = vst [vmem:[#allocation25_spill] sm:$0xff] %v8786_v26 }
 0x653   :  { %v1302_v22 = vpop.f32.mrf.mxu3 }
 0x654   :  { %v1326_v16 = vsel %vm939_vm5, %v1302_v22, -inf }
 0x655   :  { %1327 = vmax.xlane.f32.xlu1 %v1326_v16  ;;  %v1786_v16 = vsub.f32 %v8655_v35, %v1768_v36  ;;  %v8833_v36 = vpop.xlane.xlu2 %1812 }
 0x656   :  { %vm1852_vm1 = vweird.f32 %v8833_v36 }
 0x65b   :  { %v1305_v32 = vpop.f32.mrf.mxu3 }
 0x65c   :  { %v1329_v39 = vsel %vm939_vm5, %v1305_v32, -inf }
 0x65d   :  { %1330 = vmax.xlane.f32.xlu2 %v1329_v39  ;;  %v1796_v39 = vmul.f32 1.442695, %v1786_v16 }
 0x65f   :  { %7445 = vpow2.f32 %v1796_v39 }
 0x663   :  { %v8790_v23 = vpop.f32.mrf.mxu3 }
 0x664   :  { %v1332_v12 = vsel %vm939_vm5, %v8790_v23, -inf }
 0x665   :  { %1333 = vmax.xlane.f32.xlu0 %v1332_v12 }
 0x66b   :  { %v8794_v21 = vpop.f32.mrf.mxu3 }
 0x66c   :  { %v1335_v48 = vsel %vm939_vm5, %v8794_v21, -inf }
 0x66d   :  { %1336 = vmax.xlane.f32.xlu1 %v1335_v48 }
 0x673   :  { %v8798_v61 = vpop.f32.mrf.mxu3 }
 0x674   :  { %v1338_v18 = vsel %vm939_vm5, %v8798_v61, -inf }
 0x675   :  { %1339 = vmax.xlane.f32.xlu2 %v1338_v18  ;;  %v8823_v18 = vpop.eup %7445 }
 0x679   :  { %2063 = vrot.lane.b32.xlu0 %v8541_v24, %s7828_s3  ;;  %v1814_v24 = vsel %vm939_vm5, %v8823_v18, 0.0 }
 0x67b   :  { %v8816_v40 = vpop.f32.mrf.mxu3 }
 0x67c   :  { %v1341_v48 = vsel %vm939_vm5, %v8816_v40, -inf }
 0x681   :  { %7286 = vrot.lane.b32.xlu0 %v8806_v20, %s7827_s22 }
 0x683   :  { %v8819_v12 = vpop.f32.mrf.mxu3 }
 0x684   :  { %v1344_v35 = vsel %vm939_vm5, %v8819_v12, -inf }
 0x686   :  { %7281 = vrot.lane.b32.xlu1 %v8812_v45, %s7827_s22 }
 0x68b   :  { %v8825_v27 = vpop.f32.mrf.mxu3 }
 0x68c   :  { %v1347_v54 = vsel %vm939_vm5, %v8825_v27, -inf }
 0x6ab   :  { %1342 = vmax.xlane.f32.xlu0 %v1341_v48 }
 0x6b0   :  { %1815 = vadd.xlane.f32.xlu1 %v1814_v24 }
 0x6b3   :  { %1348 = vmax.xlane.f32.xlu0 %v1347_v54 }
 0x6b8   :  { %1345 = vmax.xlane.f32.xlu1 %v1344_v35 }
 0x6c8   :  { %v1328_v16 = vpop.xlane.xlu1 %1327 }
 0x6c9   :  { %v1350_v39 = vsub.f32 %v1302_v22, %v1328_v16 }
 0x6cb   :  { %v1358_v48 = vmul.f32 1.442695, %v1350_v39 }
 0x6cd   :  { %7447 = vpow2.f32 %v1358_v48 }
 0x6d0   :  { %v1331_v13 = vpop.xlane.xlu2 %1330 }
 0x6d1   :  { %v1351_v29 = vsub.f32 %v1305_v32, %v1331_v13 }
 0x6d3   :  { %v8835_v17 = vpop.eup %7447  ;;  %v1360_v28 = vmul.f32 1.442695, %v1351_v29 }
 0x6d4   :  { %v1374_v24 = vsel %vm939_vm5, %v8835_v17, 0.0 }
 0x6d5   :  { %7449 = vpow2.f32 %v1360_v28  ;;  %1375 = vadd.xlane.f32.xlu2 %v1374_v24 }
 0x6d6   :  { %7451 = vrcp.f32 %v1810_v63 }
 0x6d7   :  { %7453 = vrcp.f32 %v8833_v36 }
 0x6d8   :  { %v1334_v22 = vpop.xlane.xlu0 %1333 }
 0x6d9   :  { %v1352_v7 = vsub.f32 %v8790_v23, %v1334_v22 }
 0x6db   :  { %v8839_v54 = vpop.eup %7449 }
 0x6dc   :  { %v1377_v35 = vsel %vm939_vm5, %v8839_v54, 0.0  ;;  %v7452_v16 = vpop.eup %7451 }
 0x6dd   :  { %1378 = vadd.xlane.f32.xlu0 %v1377_v35  ;;  %v1833_v13 = vmul.f32 %v7452_v16, %v1810_v63  ;;  %v7454_v29 = vpop.eup %7453  ;;  %vm1838_vm12 = vweird.f32 %v7452_v16 }
 0x6de   :  { %v1848_v48 = vmul.f32 %v7454_v29, %v8833_v36  ;;  %vm1839_vm14 = vmor %vm1837_vm13, %vm1838_vm12  ;;  %vm1853_vm0 = vweird.f32 %v7454_v29 }
 0x6df   :  { %v1834_v28 = vsub.f32 1.0, %v1833_v13  ;;  %vm1854_vm2 = vmor %vm1852_vm1, %vm1853_vm0 }
 0x6e0   :  { %v1337_v39 = vpop.xlane.xlu1 %1336  ;;  %v1849_v35 = vsub.f32 1.0, %v1848_v48 }
 0x6e1   :  { %v1835_v24 = vmul.f32 %v7452_v16, %v1834_v28 }
 0x6e2   :  { %v1850_v13 = vmul.f32 %v7454_v29, %v1849_v35 }
 0x6e3   :  { %v1836_v38 = vadd.f32 %v7452_v16, %v1835_v24  ;;  %v1858_v24 = vand.u32 2147483648, %v8833_v36 }
 0x6e4   :  { %v1851_v28 = vadd.f32 %v7454_v29, %v1850_v13 }
 0x6e5   :  { %v1840_v53 = vsel %vm1839_vm14, %v7452_v16, %v1836_v38  ;;  %v1856_v38 = vand.u32 2147483647, %v8833_v36  ;;  %v1859_v52 = vor.u32 1.1754944e-38, %v1858_v24 }
 0x6e6   :  { %v1845_v34 = vsel %vm1842_vm15, %v1844_v51, %v1840_v53  ;;  %v1353_v51 = vsub.f32 %v8794_v21, %v1337_v39 }
 0x6e7   :  { %v1846_v63 = vmul.f32 %v8730_v9, %v1845_v34  ;;  %vm1857_vm6 = vcmp.eq.f32.partialorder %v1856_v38, 8.507059e+37  ;;  %v1362_v9 = vmul.f32 1.442695, %v1352_v7 }
 0x6e8   :  { %v1340_v53 = vpop.xlane.xlu2 %1339 }
 0x6e9   :  { %7455 = vpow2.f32 %v1362_v9 }
 0x6eb   :  { %v2064_v32 = vpop.permute.xlu0 %2063 }
 0x6ec   :  { %6975 = vmatpush.xpose.msk.msrb.mxu2 %vm857_vm4, %v2064_v32 }
 0x6ed   :  { %2059 = vrot.lane.b32.xlu2 %v8554_v37, %s7828_s3 }
 0x6f1   :  { %2061 = vrot.lane.b32.xlu0 %v8536_v42, %s7828_s3 }
 0x6f3   :  { %v7287_v37 = vpop.permute.xlu0 %7286 }
 0x6f4   :  { %v7288_v42 = vunpack.i.l.bf16 %v7287_v37  ;;  %v7289_v48 = vunpack.i.h.bf16 %v7287_v37 }
 0x6f8   :  { %v7282_v44 = vpop.permute.xlu1 %7281 }
 0x6f9   :  { %v7283_v26 = vunpack.i.l.bf16 %v7282_v44  ;;  %v7284_v47 = vunpack.i.h.bf16 %v7282_v44  ;;  %v1855_v44 = vsel %vm1854_vm2, %v7454_v29, %v1851_v28 }
 0x6fb   :  { %2012 = vmatpush.msrb.mxu3 %v7283_v26  ;;  %v1364_v26 = vmul.f32 1.442695, %v1353_v51 }
 0x6fd   :  { %2013 = vmatpush.msrb.mxu3 %v7284_v47  ;;  %v1860_v47 = vsel %vm1857_vm6, %v1859_v52, %v1855_v44  ;;  %7457 = vpow2.f32 %v1364_v26 }
 0x6fe   :  { %v1861_v34 = vmul.f32 %v8715_v33, %v1860_v47  ;;  %v8870_v33 = vpop.eup %7455 }
 0x6ff   :  { %2014 = vmatpush.msrb.mxu3 %v7288_v42 }
 0x701   :  { %2015 = vmatpush.msrb.mxu3 %v7289_v48 }
 0x702   :  { %6963 = vmatmul.msk.f32.vlgmr.msrb.gmra.mxu3 %vm939_vm5, %v1846_v63 }
 0x703   :  { %7209 = vmatpush.xpose.msk.msra.mxu3 %vm857_vm4, %v8734_v56  ;;  %v1354_v56 = vsub.f32 %v8798_v61, %v1340_v53  ;;  %v8875_v61 = vpop.eup %7457 }
 0x705   :  { %v1366_v23 = vmul.f32 1.442695, %v1354_v56 }
 0x707   :  { %7210 = vmatpush.xpose.msk.msra.mxu3 %vm857_vm4, %v8754_v0  ;;  %v1787_v0 = vsub.f32 %v8661_v60, %v8722_v3  ;;  %7459 = vpow2.f32 %v1366_v23 }
 0x709   :  { %v1798_v21 = vmul.f32 1.442695, %v1787_v0 }
 0x70a   :  { %6964 = vmatmul.msk.f32.gmra.mxu3 %vm939_vm5, %v1861_v34 }
 0x70b   :  { %7211 = vmatpush.xpose.msk.msra.mxu3 %vm857_vm4, %v8760_v49  ;;  %v1380_v49 = vsel %vm939_vm5, %v8870_v33, 0.0  ;;  %7461 = vpow2.f32 %v1798_v21 }
 0x70d   :  { %v8877_v36 = vpop.eup %7459 }
 0x70e   :  { %v1386_v60 = vsel %vm939_vm5, %v8877_v36, 0.0 }
 0x70f   :  { %7212 = vmatpush.xpose.msk.msra.mxu3 %vm857_vm4, %v8772_v25  ;;  %v1383_v25 = vsel %vm939_vm5, %v8875_v61, 0.0 }
 0x711   :  { %v8883_v22 = vpop.eup %7461 }
 0x712   :  { %v1817_v29 = vsel %vm939_vm5, %v8883_v22, 0.0 }
 0x713   :  { %7213 = vmatpush.xpose.msk.msra.mxu3 %vm857_vm4, %v2064_v32 }
 0x716   :  { %1381 = vadd.xlane.f32.xlu2 %v1380_v49 }
 0x71b   :  { %1384 = vadd.xlane.f32.xlu0 %v1383_v25 }
 0x71e   :  { %1387 = vadd.xlane.f32.xlu2 %v1386_v60  ;;  %v1343_v3 = vpop.xlane.xlu0 %1342 }
 0x71f   :  { %v1355_v16 = vsub.f32 %v8816_v40, %v1343_v3 }
 0x721   :  { %v1368_v32 = vmul.f32 1.442695, %v1355_v16 }
 0x723   :  { %7463 = vpow2.f32 %v1368_v32  ;;  %v1816_v39 = vpop.xlane.xlu1 %1815  ;;  %1818 = vadd.xlane.f32.xlu0 %v1817_v29 }
 0x724   :  { %7465 = vrcp.f32 %v1816_v39  ;;  %v1873_v44 = vand.u32 2147483648, %v1816_v39  ;;  %v1871_v7 = vand.u32 2147483647, %v1816_v39  ;;  %vm1867_vm8 = vweird.f32 %v1816_v39 }
 0x726   :  { %v1349_v28 = vpop.xlane.xlu0 %1348  ;;  %v1874_v34 = vor.u32 1.1754944e-38, %v1873_v44  ;;  %vm1872_vm10 = vcmp.eq.f32.partialorder %v1871_v7, 8.507059e+37 }
 0x727   :  { %v1357_v63 = vsub.f32 %v8825_v27, %v1349_v28 }
 0x729   :  { %v8888_v35 = vpop.eup %7463  ;;  %v1372_v9 = vmul.f32 1.442695, %v1357_v63 }
 0x72a   :  { %v7466_v37 = vpop.eup %7465  ;;  %v1389_v13 = vsel %vm939_vm5, %v8888_v35, 0.0 }
 0x72b   :  { %v1863_v42 = vmul.f32 %v7466_v37, %v1816_v39  ;;  %v1346_v48 = vpop.xlane.xlu1 %1345  ;;  %1390 = vadd.xlane.f32.xlu0 %v1389_v13  ;;  %vm1868_vm7 = vweird.f32 %v7466_v37 }
 0x72c   :  { %v1356_v40 = vsub.f32 %v8819_v12, %v1346_v48  ;;  %vm1869_vm9 = vmor %vm1867_vm8, %vm1868_vm7 }
 0x72d   :  { %v1864_v24 = vsub.f32 1.0, %v1863_v42 }
 0x72e   :  { %v1370_v38 = vmul.f32 1.442695, %v1356_v40 }
 0x72f   :  { %v1865_v52 = vmul.f32 %v7466_v37, %v1864_v24 }
 0x730   :  { %7467 = vpow2.f32 %v1370_v38 }
 0x731   :  { %v1866_v47 = vadd.f32 %v7466_v37, %v1865_v52  ;;  %7469 = vpow2.f32 %v1372_v9 }
 0x733   :  { %v1870_v51 = vsel %vm1869_vm9, %v7466_v37, %v1866_v47 }
 0x734   :  { %v1875_v53 = vsel %vm1872_vm10, %v1874_v34, %v1870_v51  ;;  %v1791_v51 = vsub.f32 %v8695_v1, %v8764_v6 }
 0x735   :  { %v1876_v56 = vmul.f32 %v8823_v18, %v1875_v53 }
 0x736   :  { %v8895_v12 = vpop.eup %7467  ;;  %2057 = vrot.lane.b32.xlu2 %v8548_v30, %s7828_s3  ;;  %v1788_v30 = vsub.f32 %v8671_v31, %v8748_v4  ;;  %v1806_v53 = vmul.f32 1.442695, %v1791_v51 }
 0x737   :  { %6965 = vmatmul.msk.f32.gmra.mxu3 %vm939_vm5, %v1876_v56  ;;  %v1392_v27 = vsel %vm939_vm5, %v8895_v12, 0.0  ;;  %v8902_v26 = vpop.eup %7469 }
 0x738   :  { %1393 = vadd.xlane.f32.xlu1 %v1392_v27  ;;  %v1395_v18 = vsel %vm939_vm5, %v8902_v26, 0.0  ;;  %v1800_v25 = vmul.f32 1.442695, %v1788_v30 }
 0x73f   :  { %2043 = vrot.lane.b32.xlu0 %v8608_v14, %s7829_s9 }
 0x740   :  { %1396 = vadd.xlane.f32.xlu1 %v1395_v18 }
 0x747   :  { %2045 = vrot.lane.b32.xlu0 %v8613_v50, %s7829_s9 }
 0x748   :  { %v1376_v23 = vpop.xlane.xlu2 %1375 }
 0x749   :  { %7471 = vrcp.f32 %v1376_v23  ;;  %v1409_v3 = vand.u32 2147483648, %v1376_v23  ;;  %v1407_v16 = vand.u32 2147483647, %v1376_v23  ;;  %vm1403_vm12 = vweird.f32 %v1376_v23 }
 0x74b   :  { %v1410_v50 = vor.u32 1.1754944e-38, %v1409_v3  ;;  %vm1408_vm14 = vcmp.eq.f32.partialorder %v1407_v16, 8.507059e+37 }
 0x74f   :  { %v7472_v0 = vpop.eup %7471 }
 0x750   :  { %v1399_v21 = vmul.f32 %v7472_v0, %v1376_v23  ;;  %v1379_v49 = vpop.xlane.xlu0 %1378  ;;  %vm1404_vm11 = vweird.f32 %v7472_v0  ;;  %v2060_v9 = vpop.permute.xlu2 %2059 }
 0x751   :  { %7473 = vrcp.f32 %v1379_v49  ;;  %vm1405_vm13 = vmor %vm1403_vm12, %vm1404_vm11  ;;  %v1424_v28 = vand.u32 2147483648, %v1379_v49  ;;  %v1422_v40 = vand.u32 2147483647, %v1379_v49  ;;  %vm1418_vm0 = vweird.f32 %v1379_v49 }
 0x752   :  { %v1400_v60 = vsub.f32 1.0, %v1399_v21  ;;  %7475 = vpow2.f32 %v1800_v25 }
 0x753   :  { %v1425_v38 = vor.u32 1.1754944e-38, %v1424_v28  ;;  %vm1423_vm2 = vcmp.eq.f32.partialorder %v1422_v40, 8.507059e+37 }
 0x754   :  { %v1401_v14 = vmul.f32 %v7472_v0, %v1400_v60 }
 0x756   :  { %v1402_v32 = vadd.f32 %v7472_v0, %v1401_v14 }
 0x757   :  { %v7474_v29 = vpop.eup %7473 }
 0x758   :  { %v1406_v39 = vsel %vm1405_vm13, %v7472_v0, %v1402_v32  ;;  %v1414_v37 = vmul.f32 %v7474_v29, %v1379_v49  ;;  %v8915_v42 = vpop.eup %7475  ;;  %vm1419_vm15 = vweird.f32 %v7474_v29 }
 0x759   :  { %2041 = vrot.lane.b32.xlu1 %v8603_v58, %s7829_s9  ;;  %v1411_v31 = vsel %vm1408_vm14, %v1410_v50, %v1406_v39  ;;  %v1820_v24 = vsel %vm939_vm5, %v8915_v42, 0.0  ;;  %v1790_v58 = vsub.f32 %v8691_v10, %v8752_v11  ;;  %vm1420_vm1 = vmor %vm1418_vm0, %vm1419_vm15 }
 0x75a   :  { %v1415_v4 = vsub.f32 1.0, %v1414_v37  ;;  %v1412_v13 = vmul.f32 %v8835_v17, %v1411_v31 }
 0x75b   :  { %v1804_v7 = vmul.f32 1.442695, %v1790_v58 }
 0x75c   :  { %6939 = vmatmul.msk.f32.vlgmr.msra.gmra.mxu2 %vm939_vm5, %v1412_v13  ;;  %v1416_v48 = vmul.f32 %v7474_v29, %v1415_v4 }
 0x75d   :  { %7477 = vpow2.f32 %v1804_v7 }
 0x75e   :  { %v1417_v63 = vadd.f32 %v7474_v29, %v1416_v48 }
 0x75f   :  { %1821 = vadd.xlane.f32.xlu2 %v1820_v24 }
 0x760   :  { %v1421_v17 = vsel %vm1420_vm1, %v7474_v29, %v1417_v63 }
 0x761   :  { %v1426_v44 = vsel %vm1423_vm2, %v1425_v38, %v1421_v17 }
 0x762   :  { %v1427_v52 = vmul.f32 %v8839_v54, %v1426_v44  ;;  %v1789_v54 = vsub.f32 %v8677_v15, %v8726_v5 }
 0x763   :  { %v2062_v47 = vpop.permute.xlu0 %2061  ;;  %v8928_v10 = vpop.eup %7477 }
 0x764   :  { %6940 = vmatmul.msk.f32.gmra.mxu2 %vm939_vm5, %v1427_v52  ;;  %7214 = vmatpush.xpose.msk.msra.mxu3 %vm857_vm4, %v2062_v47  ;;  %v1826_v11 = vsel %vm939_vm5, %v8928_v10, 0.0  ;;  %v1802_v34 = vmul.f32 1.442695, %v1789_v54 }
 0x765   :  { %6976 = vmatpush.xpose.msk.msrb.mxu2 %vm857_vm4, %v2062_v47 }
 0x766   :  { %7479 = vpow2.f32 %v1802_v34 }
 0x767   :  { %7481 = vpow2.f32 %v1806_v53 }
 0x768   :  { %7215 = vmatpush.xpose.msk.msra.mxu3 %vm857_vm4, %v2060_v9 }
 0x769   :  { %6977 = vmatpush.xpose.msk.msrb.mxu2 %vm857_vm4, %v2060_v9 }
 0x76c   :  { %v8938_v56 = vpop.eup %7479 }
 0x76d   :  { %v1823_v27 = vsel %vm939_vm5, %v8938_v56, 0.0  ;;  %v8944_v15 = vpop.eup %7481 }
 0x76e   :  { %v1829_v1 = vsel %vm939_vm5, %v8944_v15, 0.0 }
 0x771   :  { %1827 = vadd.xlane.f32.xlu0 %v1826_v11 }
 0x777   :  { %2047 = vrot.lane.b32.xlu2 %v8618_v8, %s7829_s9 }
 0x77f   :  { %2049 = vrot.lane.b32.xlu2 %v8623_v41, %s7829_s9 }
 0x783   :  { %1824 = vadd.xlane.f32.xlu1 %v1823_v27 }
 0x787   :  { %2053 = vrot.lane.b32.xlu2 %v8633_v46, %s7829_s9 }
 0x789   :  { %v1382_v8 = vpop.xlane.xlu2 %1381 }
 0x78a   :  { %7483 = vrcp.f32 %v1382_v8  ;;  %v1439_v30 = vand.u32 2147483648, %v1382_v8  ;;  %v1437_v21 = vand.u32 2147483647, %v1382_v8  ;;  %vm1433_vm7 = vweird.f32 %v1382_v8 }
 0x78b   :  { %1830 = vadd.xlane.f32.xlu1 %v1829_v1 }
 0x78c   :  { %vm1438_vm9 = vcmp.eq.f32.partialorder %v1437_v21, 8.507059e+37 }
 0x78e   :  { %v1385_v5 = vpop.xlane.xlu0 %1384 }
 0x78f   :  { %7485 = vrcp.f32 %v1385_v5  ;;  %2055 = vrot.lane.b32.xlu2 %v8638_v57, %s7829_s9  ;;  %v1440_v57 = vor.u32 1.1754944e-38, %v1439_v30  ;;  %v1454_v37 = vand.u32 2147483648, %v1385_v5  ;;  %v1452_v13 = vand.u32 2147483647, %v1385_v5 }
 0x790   :  { %v7484_v41 = vpop.eup %7483  ;;  %vm1448_vm11 = vweird.f32 %v1385_v5 }
 0x791   :  { %v1429_v6 = vmul.f32 %v7484_v41, %v1382_v8  ;;  %v8952_v18 = vpop.xlane.xlu2 %1387  ;;  %vm1434_vm6 = vweird.f32 %v7484_v41  ;;  %v1455_v38 = vor.u32 1.1754944e-38, %v1454_v37  ;;  %vm1453_vm13 = vcmp.eq.f32.partialorder %v1452_v13, 8.507059e+37 }
 0x792   :  { %7487 = vrcp.f32 %v8952_v18  ;;  %vm1435_vm8 = vmor %vm1433_vm7, %vm1434_vm6  ;;  %v1469_v9 = vand.u32 2147483648, %v8952_v18  ;;  %vm1463_vm0 = vweird.f32 %v8952_v18  ;;  %v1467_v54 = vand.u32 2147483647, %v8952_v18 }
 0x793   :  { %v1430_v23 = vsub.f32 1.0, %v1429_v6 }
 0x795   :  { %v7486_v46 = vpop.eup %7485  ;;  %v1431_v0 = vmul.f32 %v7484_v41, %v1430_v23 }
 0x796   :  { %v1444_v49 = vmul.f32 %v7486_v46, %v1385_v5  ;;  %v1819_v25 = vpop.xlane.xlu0 %1818  ;;  %vm1449_vm10 = vweird.f32 %v7486_v46 }
 0x797   :  { %7489 = vrcp.f32 %v1819_v25  ;;  %v1432_v60 = vadd.f32 %v7484_v41, %v1431_v0  ;;  %vm1450_vm12 = vmor %vm1448_vm11, %vm1449_vm10  ;;  %v1888_v52 = vand.u32 2147483648, %v1819_v25  ;;  %v1886_v47 = vand.u32 2147483647, %v1819_v25 }
 0x798   :  { %v7488_v3 = vpop.eup %7487  ;;  %v1445_v14 = vsub.f32 1.0, %v1444_v49  ;;  %vm1882_vm1 = vweird.f32 %v1819_v25 }
 0x799   :  { %v1459_v16 = vmul.f32 %v7488_v3, %v8952_v18  ;;  %v2058_v32 = vpop.permute.xlu2 %2057  ;;  %v1436_v29 = vsel %vm1435_vm8, %v7484_v41, %v1432_v60  ;;  %vm1464_vm14 = vweird.f32 %v7488_v3  ;;  %v1889_v53 = vor.u32 1.1754944e-38, %v1888_v52 }
 0x79a   :  { %6978 = vmatpush.xpose.msk.msrb.mxu2 %vm857_vm4, %v2058_v32  ;;  %7216 = vmatpush.xpose.msk.msra.mxu3 %vm857_vm4, %v2058_v32  ;;  %v1441_v50 = vsel %vm1438_vm9, %v1440_v57, %v1436_v29  ;;  %v1446_v39 = vmul.f32 %v7486_v46, %v1445_v14  ;;  %vm1465_vm2 = vmor %vm1463_vm0, %vm1464_vm14  ;;  %vm1887_vm7 = vcmp.eq.f32.partialorder %v1886_v47, 8.507059e+37  ;;  %vm1468_vm8 = vcmp.eq.f32.partialorder %v1467_v54, 8.507059e+37 }
 0x79b   :  { %v1460_v31 = vsub.f32 1.0, %v1459_v16  ;;  %v1442_v4 = vmul.f32 %v8870_v33, %v1441_v50 }
 0x79c   :  { %v1447_v28 = vadd.f32 %v7486_v46, %v1446_v39 }
 0x79d   :  { %v7490_v48 = vpop.eup %7489  ;;  %6941 = vmatmul.msk.f32.gmra.mxu2 %vm939_vm5, %v1442_v4  ;;  %v1461_v40 = vmul.f32 %v7488_v3, %v1460_v31 }
 0x79e   :  { %v1878_v24 = vmul.f32 %v7490_v48, %v1819_v25  ;;  %v1391_v63 = vpop.xlane.xlu0 %1390  ;;  %v1451_v58 = vsel %vm1450_vm12, %v7486_v46, %v1447_v28  ;;  %vm1883_vm15 = vweird.f32 %v7490_v48 }
 0x79f   :  { %7491 = vrcp.f32 %v1391_v63  ;;  %v1456_v44 = vsel %vm1453_vm13, %v1455_v38, %v1451_v58  ;;  %v1462_v7 = vadd.f32 %v7488_v3, %v1461_v40  ;;  %vm1884_vm6 = vmor %vm1882_vm1, %vm1883_vm15  ;;  %v1484_v23 = vand.u32 2147483648, %v1391_v63 }
 0x7a0   :  { %v1879_v17 = vsub.f32 1.0, %v1878_v24  ;;  %v1457_v11 = vmul.f32 %v8875_v61, %v1456_v44  ;;  %v1470_v61 = vor.u32 1.1754944e-38, %v1469_v9  ;;  %v1482_v0 = vand.u32 2147483647, %v1391_v63 }
 0x7a1   :  { %v1466_v27 = vsel %vm1465_vm2, %v7488_v3, %v1462_v7  ;;  %vm1478_vm10 = vweird.f32 %v1391_v63  ;;  %v1485_v25 = vor.u32 1.1754944e-38, %v1484_v23 }
 0x7a2   :  { %v1880_v33 = vmul.f32 %v7490_v48, %v1879_v17  ;;  %v1471_v18 = vsel %vm1468_vm8, %v1470_v61, %v1466_v27  ;;  %vm1483_vm12 = vcmp.eq.f32.partialorder %v1482_v0, 8.507059e+37 }
 0x7a3   :  { %v1472_v46 = vmul.f32 %v8877_v36, %v1471_v18 }
 0x7a4   :  { %2051 = vrot.lane.b32.xlu1 %v8628_v43, %s7829_s9  ;;  %v1881_v34 = vadd.f32 %v7490_v48, %v1880_v33 }
 0x7a5   :  { %v7492_v51 = vpop.eup %7491  ;;  %6942 = vmatmul.msk.f32.gmra.mxu2 %vm939_vm5, %v1457_v11 }
 0x7a6   :  { %v1474_v8 = vmul.f32 %v7492_v51, %v1391_v63  ;;  %v1885_v1 = vsel %vm1884_vm6, %v7490_v48, %v1881_v34  ;;  %vm1479_vm9 = vweird.f32 %v7492_v51 }
 0x7a7   :  { %v1890_v5 = vsel %vm1887_vm7, %v1889_v53, %v1885_v1  ;;  %vm1480_vm11 = vmor %vm1478_vm10, %vm1479_vm9 }
 0x7a8   :  { %v1475_v41 = vsub.f32 1.0, %v1474_v8  ;;  %v1891_v6 = vmul.f32 %v8883_v22, %v1890_v5 }
 0x7aa   :  { %6966 = vmatmul.msk.f32.gmra.mxu3 %vm939_vm5, %v1891_v6  ;;  %v1476_v43 = vmul.f32 %v7492_v51, %v1475_v41 }
 0x7ab   :  { %v1394_v30 = vpop.xlane.xlu1 %1393 }
 0x7ac   :  { %7493 = vrcp.f32 %v1394_v30  ;;  %v1477_v21 = vadd.f32 %v7492_v51, %v1476_v43  ;;  %v1499_v36 = vand.u32 2147483648, %v1394_v30  ;;  %v1497_v29 = vand.u32 2147483647, %v1394_v30 }
 0x7ad   :  { %6943 = vmatmul.msk.f32.gmra.mxu2 %vm939_vm5, %v1472_v46  ;;  %vm1493_vm14 = vweird.f32 %v1394_v30 }
 0x7ae   :  { %v1481_v49 = vsel %vm1480_vm11, %v7492_v51, %v1477_v21  ;;  %v1500_v37 = vor.u32 1.1754944e-38, %v1499_v36  ;;  %vm1498_vm0 = vcmp.eq.f32.partialorder %v1497_v29, 8.507059e+37 }
 0x7af   :  { %v1486_v22 = vsel %vm1483_vm12, %v1485_v25, %v1481_v49 }
 0x7b0   :  { %v1487_v57 = vmul.f32 %v8888_v35, %v1486_v22 }
 0x7b1   :  { %v2044_v7 = vpop.permute.xlu0 %2043 }
 0x7b2   :  { %v7494_v60 = vpop.eup %7493 }
 0x7b3   :  { %v1489_v3 = vmul.f32 %v7494_v60, %v1394_v30  ;;  %v1397_v14 = vpop.xlane.xlu1 %1396  ;;  %vm1494_vm13 = vweird.f32 %v7494_v60 }
 0x7b4   :  { %7495 = vrcp.f32 %v1397_v14  ;;  %vm1495_vm15 = vmor %vm1493_vm14, %vm1494_vm13  ;;  %v1514_v48 = vand.u32 2147483648, %v1397_v14  ;;  %v1512_v24 = vand.u32 2147483647, %v1397_v14  ;;  %vm1508_vm2 = vweird.f32 %v1397_v14 }
 0x7b5   :  { %v1490_v16 = vsub.f32 1.0, %v1489_v3  ;;  %6944 = vmatmul.msk.f32.gmra.mxu2 %vm939_vm5, %v1487_v57 }
 0x7b6   :  { %v1515_v58 = vor.u32 1.1754944e-38, %v1514_v48  ;;  %vm1513_vm7 = vcmp.eq.f32.partialorder %v1512_v24, 8.507059e+37 }
 0x7b7   :  { %v1491_v32 = vmul.f32 %v7494_v60, %v1490_v16 }
 0x7b9   :  { %v1492_v50 = vadd.f32 %v7494_v60, %v1491_v32  ;;  %v2046_v54 = vpop.permute.xlu0 %2045 }
 0x7ba   :  { %v7496_v39 = vpop.eup %7495 }
 0x7bb   :  { %v1504_v31 = vmul.f32 %v7496_v39, %v1397_v14  ;;  %v1496_v4 = vsel %vm1495_vm15, %v7494_v60, %v1492_v50  ;;  %vm1509_vm1 = vweird.f32 %v7496_v39 }
 0x7bc   :  { %v1501_v13 = vsel %vm1498_vm0, %v1500_v37, %v1496_v4  ;;  %vm1510_vm6 = vmor %vm1508_vm2, %vm1509_vm1 }
 0x7bd   :  { %v1505_v28 = vsub.f32 1.0, %v1504_v31  ;;  %v1502_v35 = vmul.f32 %v8895_v12, %v1501_v13 }
 0x7bf   :  { %6945 = vmatmul.msk.f32.gmra.mxu2 %vm939_vm5, %v1502_v35  ;;  %v1506_v40 = vmul.f32 %v7496_v39, %v1505_v28 }
 0x7c1   :  { %v1507_v63 = vadd.f32 %v7496_v39, %v1506_v40 }
 0x7c3   :  { %v1511_v38 = vsel %vm1510_vm6, %v7496_v39, %v1507_v63 }
 0x7c4   :  { %v1516_v17 = vsel %vm1513_vm7, %v1515_v58, %v1511_v38 }
 0x7c5   :  { %v1517_v44 = vmul.f32 %v8902_v26, %v1516_v17 }
 0x7c7   :  { %6946 = vmatmul.msk.f32.gmra.mxu2 %vm939_vm5, %v1517_v44 }
 0x7cb   :  { %v2042_v52 = vpop.permute.xlu1 %2041 }
 0x7cf   :  { %6979 = vmatmul.msk.f32.vlgmr.msrb.gmra.mxu2 %vm857_vm4, %v2042_v52 }
 0x7d2   :  { %v1822_v12 = vpop.xlane.xlu2 %1821 }
 0x7d3   :  { %7497 = vrcp.f32 %v1822_v12  ;;  %v1903_v11 = vand.u32 2147483648, %v1822_v12  ;;  %v1901_v51 = vand.u32 2147483647, %v1822_v12  ;;  %vm1897_vm9 = vweird.f32 %v1822_v12 }
 0x7d5   :  { %v1904_v53 = vor.u32 1.1754944e-38, %v1903_v11  ;;  %vm1902_vm11 = vcmp.eq.f32.partialorder %v1901_v51, 8.507059e+37 }
 0x7d7   :  { %6980 = vmatmul.msk.f32.gmra.mxu2 %vm857_vm4, %v2044_v7 }
 0x7d9   :  { %v7498_v33 = vpop.eup %7497 }
 0x7da   :  { %v1893_v47 = vmul.f32 %v7498_v33, %v1822_v12  ;;  %vm1898_vm8 = vweird.f32 %v7498_v33  ;;  %v2048_v1 = vpop.permute.xlu2 %2047 }
 0x7db   :  { %vm1899_vm10 = vmor %vm1897_vm9, %vm1898_vm8 }
 0x7dc   :  { %v1894_v9 = vsub.f32 1.0, %v1893_v47 }
 0x7de   :  { %v1895_v34 = vmul.f32 %v7498_v33, %v1894_v9 }
 0x7df   :  { %6981 = vmatmul.msk.f32.gmra.mxu2 %vm857_vm4, %v2046_v54  ;;  %v8986_v35 = vpop.f32.mrf.mxu2 }
 0x7e0   :  { %v1896_v26 = vadd.f32 %v7498_v33, %v1895_v34 }
 0x7e2   :  { %v1900_v27 = vsel %vm1899_vm10, %v7498_v33, %v1896_v26  ;;  %v2050_v5 = vpop.permute.xlu2 %2049 }
 0x7e3   :  { %v1905_v8 = vsel %vm1902_vm11, %v1904_v53, %v1900_v27  ;;  %v9011_v27 = vpop.f32.mrf.mxu3 }
 0x7e4   :  { %v1906_v61 = vmul.f32 %v8915_v42, %v1905_v8  ;;  %v1828_v41 = vpop.xlane.xlu0 %1827 }
 0x7e5   :  { %7499 = vrcp.f32 %v1828_v41  ;;  %v1933_v29 = vand.u32 2147483648, %v1828_v41  ;;  %vm1927_vm1 = vweird.f32 %v1828_v41  ;;  %v1931_v37 = vand.u32 2147483647, %v1828_v41 }
 0x7e6   :  { %6967 = vmatmul.msk.f32.gmra.mxu3 %vm939_vm5, %v1906_v61 }
 0x7e7   :  { %6982 = vmatmul.msk.f32.gmra.mxu2 %vm857_vm4, %v2048_v1  ;;  %v1934_v13 = vor.u32 1.1754944e-38, %v1933_v29  ;;  %vm1932_vm6 = vcmp.eq.f32.partialorder %v1931_v37, 8.507059e+37  ;;  %v8991_v52 = vpop.f32.mrf.mxu2 }
 0x7ea   :  { %v2054_v44 = vpop.permute.xlu2 %2053 }
 0x7eb   :  { %v7500_v18 = vpop.eup %7499 }
 0x7ec   :  { %v1923_v43 = vmul.f32 %v7500_v18, %v1828_v41  ;;  %vm1928_vm15 = vweird.f32 %v7500_v18 }
 0x7ed   :  { %vm1929_vm2 = vmor %vm1927_vm1, %vm1928_vm15 }
 0x7ee   :  { %v1924_v30 = vsub.f32 1.0, %v1923_v43 }
 0x7ef   :  { %6983 = vmatmul.msk.f32.gmra.mxu2 %vm857_vm4, %v2050_v5  ;;  %v9015_v5 = vpop.f32.mrf.mxu3 }
 0x7f0   :  { %v1925_v22 = vmul.f32 %v7500_v18, %v1924_v30 }
 0x7f2   :  { %v1926_v36 = vadd.f32 %v7500_v18, %v1925_v22  ;;  %v2056_v7 = vpop.permute.xlu2 %2055 }
 0x7f4   :  { %v1930_v4 = vsel %vm1929_vm2, %v7500_v18, %v1926_v36 }
 0x7f5   :  { %v1935_v28 = vsel %vm1932_vm6, %v1934_v13, %v1930_v4 }
 0x7f6   :  { %v1825_v6 = vpop.xlane.xlu1 %1824  ;;  %v1936_v24 = vmul.f32 %v8928_v10, %v1935_v28 }
 0x7f7   :  { %7501 = vrcp.f32 %v1825_v6  ;;  %v1918_v42 = vand.u32 2147483648, %v1825_v6  ;;  %v1916_v25 = vand.u32 2147483647, %v1825_v6  ;;  %vm1912_vm13 = vweird.f32 %v1825_v6  ;;  %v9018_v18 = vpop.f32.mrf.mxu3 }
 0x7f9   :  { %v1919_v14 = vor.u32 1.1754944e-38, %v1918_v42  ;;  %vm1917_vm0 = vcmp.eq.f32.partialorder %v1916_v25, 8.507059e+37 }
 0x7fd   :  { %v7502_v23 = vpop.eup %7501 }
 0x7fe   :  { %v1908_v46 = vmul.f32 %v7502_v23, %v1825_v6  ;;  %v1831_v0 = vpop.xlane.xlu1 %1830  ;;  %vm1913_vm12 = vweird.f32 %v7502_v23 }
 0x7ff   :  { %7503 = vrcp.f32 %v1831_v0  ;;  %vm1914_vm14 = vmor %vm1912_vm13, %vm1913_vm12  ;;  %v1948_v40 = vand.u32 2147483648, %v1831_v0  ;;  %vm1942_vm8 = vweird.f32 %v1831_v0  ;;  %v1946_v63 = vand.u32 2147483647, %v1831_v0 }
 0x800   :  { %v1909_v21 = vsub.f32 1.0, %v1908_v46 }
 0x801   :  { %v1949_v58 = vor.u32 1.1754944e-38, %v1948_v40  ;;  %vm1947_vm10 = vcmp.eq.f32.partialorder %v1946_v63, 8.507059e+37 }
 0x802   :  { %v1910_v49 = vmul.f32 %v7502_v23, %v1909_v21 }
 0x804   :  { %v1911_v60 = vadd.f32 %v7502_v23, %v1910_v49 }
 0x805   :  { %v7504_v3 = vpop.eup %7503 }
 0x806   :  { %v1938_v57 = vmul.f32 %v7504_v3, %v1831_v0  ;;  %v1915_v16 = vsel %vm1914_vm14, %v7502_v23, %v1911_v60  ;;  %vm1943_vm7 = vweird.f32 %v7504_v3 }
 0x807   :  { %v1920_v32 = vsel %vm1917_vm0, %v1919_v14, %v1915_v16  ;;  %vm1944_vm9 = vmor %vm1942_vm8, %vm1943_vm7 }
 0x808   :  { %v1939_v50 = vsub.f32 1.0, %v1938_v57  ;;  %v1921_v39 = vmul.f32 %v8938_v56, %v1920_v32 }
 0x80a   :  { %v1940_v31 = vmul.f32 %v7504_v3, %v1939_v50  ;;  %6968 = vmatmul.msk.f32.gmra.mxu3 %vm939_vm5, %v1921_v39 }
 0x80c   :  { %v1941_v48 = vadd.f32 %v7504_v3, %v1940_v31 }
 0x80e   :  { %v1945_v56 = vsel %vm1944_vm9, %v7504_v3, %v1941_v48 }
 0x80f   :  { %v1950_v38 = vsel %vm1947_vm10, %v1949_v58, %v1945_v56 }
 0x810   :  { %v1951_v12 = vmul.f32 %v8944_v15, %v1950_v38 }
 0x812   :  { %6969 = vmatmul.msk.f32.gmra.mxu3 %vm939_vm5, %v1936_v24 }
 0x816   :  { %v2052_v17 = vpop.permute.xlu1 %2051 }
 0x817   :  { %6984 = vmatmul.msk.f32.gmra.mxu2 %vm857_vm4, %v2052_v17 }
 0x81a   :  { %6970 = vmatmul.msk.f32.gmra.mxu3 %vm939_vm5, %v1951_v12 }
 0x81f   :  { %6985 = vmatmul.msk.f32.gmra.mxu2 %vm857_vm4, %v2054_v44 }
 0x820   :  { %v8996_v10 = vpop.f32.mrf.mxu2 }
 0x822   :  { %6986 = vmatmul.msk.f32.vlgmr.msra.gmra.mxu3 %vm857_vm4, %v2056_v7 }
 0x828   :  { %v8999_v33 = vpop.f32.mrf.mxu2 }
 0x82d   :  { %v9020_v43 = vpop.f32.mrf.mxu3 }
 0x830   :  { %v9001_v47 = vpop.f32.mrf.mxu2 }
 0x838   :  { %v9003_v9 = vpop.f32.mrf.mxu2 }
 0x842   :  { %v9005_v11 = vpop.f32.mrf.mxu2 }
 0x84a   :  { %v9007_v54 = vpop.f32.mrf.mxu2 }
 0x852   :  { %v2122_v15 = vpop.f32.mrf.mxu2 }
 0x853   :  { %v2146_v34 = vsel %vm939_vm5, %v2122_v15, -inf }
 0x854   :  { %2147 = vmax.xlane.f32.xlu0 %v2146_v34 }
 0x85a   :  { %v2125_v51 = vpop.f32.mrf.mxu2 }
 0x85b   :  { %v2149_v26 = vsel %vm939_vm5, %v2125_v51, -inf }
 0x85c   :  { %2150 = vmax.xlane.f32.xlu2 %v2149_v26 }
 0x862   :  { %v2128_v53 = vpop.f32.mrf.mxu2 }
 0x863   :  { %v2152_v8 = vsel %vm939_vm5, %v2128_v53, -inf }
 0x864   :  { %2153 = vmax.xlane.f32.xlu0 %v2152_v8 }
 0x869   :  { %v9022_v23 = vpop.f32.mrf.mxu3 }
 0x86a   :  { %v2131_v1 = vpop.f32.mrf.mxu2 }
 0x86b   :  { %v2155_v61 = vsel %vm939_vm5, %v2131_v1, -inf }
 0x86c   :  { %2156 = vmax.xlane.f32.xlu1 %v2155_v61 }
 0x872   :  { %v2134_v41 = vpop.f32.mrf.mxu2 }
 0x873   :  { %v2158_v6 = vsel %vm939_vm5, %v2134_v41, -inf }
 0x874   :  { %2159 = vmax.xlane.f32.xlu0 %v2158_v6 }
 0x88d   :  { %v9024_v30 = vpop.f32.mrf.mxu3 }
 0x895   :  { %v9026_v46 = vpop.f32.mrf.mxu3 }
 0x89a   :  { %v2137_v0 = vpop.f32.mrf.mxu2 }
 0x89b   :  { %v2161_v21 = vsel %vm939_vm5, %v2137_v0, -inf }
 0x89c   :  { %2162 = vmax.xlane.f32.xlu0 %v2161_v21 }
 0x89d   :  { %v9029_v42 = vpop.f32.mrf.mxu3 }
 0x8a2   :  { %v2140_v49 = vpop.f32.mrf.mxu2 }
 0x8a3   :  { %v2164_v25 = vsel %vm939_vm5, %v2140_v49, -inf }
 0x8a4   :  { %2165 = vmax.xlane.f32.xlu0 %v2164_v25 }
 0x8a5   :  { %v2143_v22 = vpop.f32.mrf.mxu3 }
 0x8a6   :  { %v2167_v60 = vsel %vm939_vm5, %v2143_v22, -inf }
 0x8a7   :  { %2168 = vmax.xlane.f32.xlu2 %v2167_v60 }
 0x8bf   :  { %7296 = vrot.lane.b32.xlu2 %v8703_v59, %s7830_s16 }
 0x8c7   :  { %7306 = vrot.lane.b32.xlu2 %v8806_v20, %s7830_s16  ;;  %v2148_v3 = vpop.xlane.xlu0 %2147 }
 0x8c8   :  { %v2170_v14 = vsub.f32 %v2122_v15, %v2148_v3 }
 0x8ca   :  { %v2178_v57 = vmul.f32 1.442695, %v2170_v14 }
 0x8cc   :  { %7505 = vpow2.f32 %v2178_v57 }
 0x8cf   :  { %v2151_v16 = vpop.xlane.xlu2 %2150 }
 0x8d0   :  { %v2171_v36 = vsub.f32 %v2125_v51, %v2151_v16 }
 0x8d2   :  { %v9037_v32 = vpop.eup %7505  ;;  %v2180_v29 = vmul.f32 1.442695, %v2171_v36 }
 0x8d3   :  { %v2194_v50 = vsel %vm939_vm5, %v9037_v32, 0.0 }
 0x8d4   :  { %7507 = vpow2.f32 %v2180_v29  ;;  %2195 = vadd.xlane.f32.xlu0 %v2194_v50 }
 0x8d7   :  { %v2154_v20 = vpop.xlane.xlu0 %2153 }
 0x8d8   :  { %v2172_v48 = vsub.f32 %v2128_v53, %v2154_v20 }
 0x8da   :  { %v9041_v39 = vpop.eup %7507  ;;  %v2182_v40 = vmul.f32 1.442695, %v2172_v48 }
 0x8db   :  { %v2197_v59 = vsel %vm939_vm5, %v9041_v39, 0.0 }
 0x8dc   :  { %2198 = vadd.xlane.f32.xlu1 %v2197_v59 }
 0x8df   :  { %v2157_v24 = vpop.xlane.xlu1 %2156 }
 0x8e7   :  { %v2160_v37 = vpop.xlane.xlu0 %2159 }
 0x8e8   :  { %v2174_v31 = vsub.f32 %v2134_v41, %v2160_v37  ;;  %7291 = vrot.lane.b32.xlu0 %v8709_v55, %s7830_s16  ;;  %v2173_v55 = vsub.f32 %v2131_v1, %v2157_v24 }
 0x8ea   :  { %v2186_v4 = vmul.f32 1.442695, %v2174_v31  ;;  %v2184_v38 = vmul.f32 1.442695, %v2173_v55 }
 0x8ec   :  { %7509 = vpow2.f32 %v2186_v4 }
 0x8ed   :  { %7511 = vpow2.f32 %v2182_v40 }
 0x8f2   :  { %v9047_v13 = vpop.eup %7509 }
 0x8f3   :  { %v2206_v28 = vsel %vm939_vm5, %v9047_v13, 0.0  ;;  %v9055_v63 = vpop.eup %7511 }
 0x8f4   :  { %2207 = vadd.xlane.f32.xlu2 %v2206_v28  ;;  %v2200_v17 = vsel %vm939_vm5, %v9055_v63, 0.0 }
 0x8f5   :  { %7301 = vrot.lane.b32.xlu1 %v8812_v45, %s7830_s16 }
 0x90c   :  { %1617 = vrot.lane.b32.xlu2 %v8991_v52, %s7831_s17 }
 0x90f   :  { %v2163_v56 = vpop.xlane.xlu0 %2162 }
 0x910   :  { %v2175_v58 = vsub.f32 %v2137_v0, %v2163_v56 }
 0x912   :  { %v2188_v44 = vmul.f32 1.442695, %v2175_v58  ;;  %2201 = vadd.xlane.f32.xlu0 %v2200_v17 }
 0x914   :  { %7513 = vpow2.f32 %v2188_v44  ;;  %1623 = vrot.lane.b32.xlu2 %v9001_v47, %s7831_s17 }
 0x915   :  { %7515 = vpow2.f32 %v2184_v38 }
 0x917   :  { %v2166_v45 = vpop.xlane.xlu0 %2165 }
 0x918   :  { %v2176_v12 = vsub.f32 %v2140_v49, %v2166_v45 }
 0x91a   :  { %v9061_v7 = vpop.eup %7513  ;;  %v2190_v52 = vmul.f32 1.442695, %v2176_v12  ;;  %v2169_v15 = vpop.xlane.xlu2 %2168 }
 0x91b   :  { %v9063_v34 = vpop.eup %7515  ;;  %v2177_v51 = vsub.f32 %v2143_v22, %v2169_v15  ;;  %v2209_v26 = vsel %vm939_vm5, %v9061_v7, 0.0 }
 0x91c   :  { %7517 = vpow2.f32 %v2190_v52  ;;  %1629 = vrot.lane.b32.xlu2 %v9007_v54, %s7831_s17  ;;  %2210 = vadd.xlane.f32.xlu0 %v2209_v26  ;;  %v2203_v47 = vsel %vm939_vm5, %v9063_v34, 0.0  ;;  %v694_v52 = vld [vmem:[%s11846_s6 + $0x88] sm:$0xff] }
 0x91d   :  { %v2192_v53 = vmul.f32 1.442695, %v2177_v51  ;;  %v692_v51 = vld [vmem:[%s11846_s6 + $0x8] sm:$0xff] }
 0x91f   :  { %2204 = vadd.xlane.f32.xlu1 %v2203_v47  ;;  %7519 = vpow2.f32 %v2192_v53 }
 0x922   :  { %v9071_v8 = vpop.eup %7517  ;;  %v7297_v25 = vpop.permute.xlu2 %7296 }
 0x923   :  { %v2212_v1 = vsel %vm939_vm5, %v9071_v8, 0.0  ;;  %v7299_v3 = vunpack.i.h.bf16 %v7297_v25 }
 0x924   :  { %2213 = vadd.xlane.f32.xlu0 %v2212_v1 }
 0x925   :  { %v9075_v61 = vpop.eup %7519 }
 0x926   :  { %v2215_v41 = vsel %vm939_vm5, %v9075_v61, 0.0 }
 0x92a   :  { %v7307_v59 = vpop.permute.xlu2 %7306 }
 0x92b   :  { %v7308_v28 = vunpack.i.l.bf16 %v7307_v59  ;;  %v7309_v24 = vunpack.i.h.bf16 %v7307_v59 }
 0x92c   :  { %2216 = vadd.xlane.f32.xlu0 %v2215_v41 }
 0x938   :  { %1615 = vrot.lane.b32.xlu1 %v8986_v35, %s7831_s17 }
 0x940   :  { %1621 = vrot.lane.b32.xlu1 %v8999_v33, %s7831_s17  ;;  %1619 = vrot.lane.b32.xlu0 %v8996_v10, %s7831_s17  ;;  %v7298_v10 = vunpack.i.l.bf16 %v7297_v25 }
 0x947   :  { %v2196_v54 = vpop.xlane.xlu0 %2195 }
 0x948   :  { %1627 = vrot.lane.b32.xlu1 %v9005_v11, %s7831_s17  ;;  %1625 = vrot.lane.b32.xlu0 %v9003_v9, %s7831_s17  ;;  %7521 = vrcp.f32 %v2196_v54  ;;  %v2229_v16 = vand.u32 2147483648, %v2196_v54  ;;  %vm2223_vm12 = vweird.f32 %v2196_v54  ;;  %v2227_v36 = vand.u32 2147483647, %v2196_v54 }
 0x94a   :  { %v2230_v31 = vor.u32 1.1754944e-38, %v2229_v16  ;;  %vm2228_vm14 = vcmp.eq.f32.partialorder %v2227_v36, 8.507059e+37 }
 0x94e   :  { %v7522_v0 = vpop.eup %7521 }
 0x94f   :  { %v2199_v6 = vpop.xlane.xlu1 %2198  ;;  %v2219_v21 = vmul.f32 %v7522_v0, %v2196_v54  ;;  %vm2224_vm11 = vweird.f32 %v7522_v0 }
 0x950   :  { %7523 = vrcp.f32 %v2199_v6  ;;  %vm2225_vm13 = vmor %vm2223_vm12, %vm2224_vm11  ;;  %v2244_v55 = vand.u32 2147483648, %v2199_v6  ;;  %vm2238_vm0 = vweird.f32 %v2199_v6  ;;  %v2242_v58 = vand.u32 2147483647, %v2199_v6 }
 0x951   :  { %v2220_v22 = vsub.f32 1.0, %v2219_v21 }
 0x952   :  { %v2245_v17 = vor.u32 1.1754944e-38, %v2244_v55  ;;  %vm2243_vm2 = vcmp.eq.f32.partialorder %v2242_v58, 8.507059e+37 }
 0x953   :  { %v2221_v11 = vmul.f32 %v7522_v0, %v2220_v22 }
 0x955   :  { %v2222_v9 = vadd.f32 %v7522_v0, %v2221_v11 }
 0x956   :  { %v7524_v60 = vpop.eup %7523 }
 0x957   :  { %v2234_v14 = vmul.f32 %v7524_v60, %v2199_v6  ;;  %v2226_v20 = vsel %vm2225_vm13, %v7522_v0, %v2222_v9  ;;  %vm2239_vm15 = vweird.f32 %v7524_v60 }
 0x958   :  { %v2231_v48 = vsel %vm2228_vm14, %v2230_v31, %v2226_v20  ;;  %vm2240_vm1 = vmor %vm2238_vm0, %vm2239_vm15 }
 0x959   :  { %v2235_v57 = vsub.f32 1.0, %v2234_v14  ;;  %v2232_v56 = vmul.f32 %v9037_v32, %v2231_v48  ;;  %v695_v32 = vld [vmem:[%s11846_s6 + $0xc8] sm:$0xff] }
 0x95a   :  { %v7292_v49 = vpop.permute.xlu0 %7291  ;;  %2527 = vmatpush.msrb.mxu3 %v695_v32 }
 0x95b   :  { %v7293_v35 = vunpack.i.l.bf16 %v7292_v49  ;;  %v7294_v33 = vunpack.i.h.bf16 %v7292_v49  ;;  %v2236_v37 = vmul.f32 %v7524_v60, %v2235_v57 }
 0x95c   :  { %2528 = vmatpush.msrb.mxu3 %v694_v52 }
 0x95d   :  { %2394 = vmatpush.msrb.mxu1 %v7293_v35  ;;  %v2237_v40 = vadd.f32 %v7524_v60, %v2236_v37 }
 0x95f   :  { %2395 = vmatpush.msrb.mxu1 %v7294_v33  ;;  %v2241_v38 = vsel %vm2240_vm1, %v7524_v60, %v2237_v40 }
 0x960   :  { %v2246_v44 = vsel %vm2243_vm2, %v2245_v17, %v2241_v38 }
 0x961   :  { %2396 = vmatpush.msrb.mxu1 %v7298_v10  ;;  %v2247_v45 = vmul.f32 %v9041_v39, %v2246_v44  ;;  %v693_v39 = vld [vmem:[%s11846_s6 + $0x48] sm:$0xff] }
 0x962   :  { %2529 = vmatpush.msrb.mxu3 %v693_v39 }
 0x963   :  { %2397 = vmatpush.msrb.mxu1 %v7299_v3 }
 0x964   :  { %2530 = vmatpush.msrb.mxu3 %v692_v51 }
 0x967   :  { %v7302_v29 = vpop.permute.xlu1 %7301  ;;  %v9099_v15 = vpop.xlane.xlu2 %2207 }
 0x968   :  { %v7303_v50 = vunpack.i.l.bf16 %v7302_v29  ;;  %v7304_v4 = vunpack.i.h.bf16 %v7302_v29  ;;  %vm2283_vm15 = vweird.f32 %v9099_v15 }
 0x96a   :  { %2398 = vmatpush.msrb.mxu1 %v7303_v50 }
 0x96c   :  { %2399 = vmatpush.msrb.mxu1 %v7304_v4 }
 0x96e   :  { %2400 = vmatpush.msrb.mxu1 %v7308_v28 }
 0x970   :  { %2401 = vmatpush.msrb.mxu1 %v7309_v24  ;;  %v2289_v24 = vand.u32 2147483648, %v9099_v15 }
 0x971   :  { %6987 = vmatmul.msk.f32.vlgmr.msrb.gmra.mxu1 %vm939_vm5, %v2232_v56  ;;  %v2287_v56 = vand.u32 2147483647, %v9099_v15 }
 0x972   :  { %v2290_v44 = vor.u32 1.1754944e-38, %v2289_v24 }
 0x973   :  { %vm2288_vm1 = vcmp.eq.f32.partialorder %v2287_v56, 8.507059e+37 }
 0x979   :  { %6988 = vmatmul.msk.f32.gmra.mxu1 %vm939_vm5, %v2247_v45 }
 0x985   :  { %v2202_v12 = vpop.xlane.xlu0 %2201 }
 0x986   :  { %7525 = vrcp.f32 %v2202_v12  ;;  %v2259_v41 = vand.u32 2147483648, %v2202_v12  ;;  %v2257_v6 = vand.u32 2147483647, %v2202_v12  ;;  %vm2253_vm7 = vweird.f32 %v2202_v12 }
 0x987   :  { %7527 = vrcp.f32 %v9099_v15 }
 0x988   :  { %v2260_v35 = vor.u32 1.1754944e-38, %v2259_v41  ;;  %vm2258_vm9 = vcmp.eq.f32.partialorder %v2257_v6, 8.507059e+37  ;;  %v1618_v6 = vpop.permute.xlu2 %1617 }
 0x98c   :  { %v7526_v26 = vpop.eup %7525 }
 0x98d   :  { %v2249_v53 = vmul.f32 %v7526_v26, %v2202_v12  ;;  %vm2254_vm6 = vweird.f32 %v7526_v26  ;;  %v7528_v0 = vpop.eup %7527 }
 0x98e   :  { %vm2255_vm8 = vmor %vm2253_vm7, %vm2254_vm6  ;;  %v2279_v25 = vmul.f32 %v7528_v0, %v9099_v15  ;;  %vm2284_vm13 = vweird.f32 %v7528_v0 }
 0x98f   :  { %v2250_v47 = vsub.f32 1.0, %v2249_v53  ;;  %v9108_v1 = vpop.xlane.xlu0 %2210  ;;  %vm2285_vm0 = vmor %vm2283_vm15, %vm2284_vm13 }
 0x990   :  { %v2280_v11 = vsub.f32 1.0, %v2279_v25  ;;  %v2304_v39 = vand.u32 2147483648, %v9108_v1  ;;  %vm2298_vm6 = vweird.f32 %v9108_v1 }
 0x991   :  { %v2251_v54 = vmul.f32 %v7526_v26, %v2250_v47 }
 0x992   :  { %v2205_v21 = vpop.xlane.xlu1 %2204  ;;  %v2281_v36 = vmul.f32 %v7528_v0, %v2280_v11 }
 0x993   :  { %7529 = vrcp.f32 %v2205_v21  ;;  %v2252_v49 = vadd.f32 %v7526_v26, %v2251_v54  ;;  %v2274_v16 = vand.u32 2147483648, %v2205_v21  ;;  %v2272_v59 = vand.u32 2147483647, %v2205_v21 }
 0x994   :  { %7531 = vrcp.f32 %v9108_v1  ;;  %vm2268_vm11 = vweird.f32 %v2205_v21  ;;  %v2282_v28 = vadd.f32 %v7528_v0, %v2281_v36  ;;  %v2305_v54 = vor.u32 1.1754944e-38, %v2304_v39 }
 0x995   :  { %v2256_v22 = vsel %vm2255_vm8, %v7526_v26, %v2252_v49  ;;  %vm2273_vm14 = vcmp.eq.f32.partialorder %v2272_v59, 8.507059e+37  ;;  %v2302_v26 = vand.u32 2147483647, %v9108_v1  ;;  %v1640_v49 = vsel %vm857_vm4, %v8770_v62, %v1618_v6  ;;  %v11900_v59 = vld [vmem:[#allocation22_spill] sm:$0xff] }
 0x996   :  { %v2261_v33 = vsel %vm2258_vm9, %v2260_v35, %v2256_v22  ;;  %v2286_v17 = vsel %vm2285_vm0, %v7528_v0, %v2282_v28  ;;  %v11902_v28 = vld [vmem:[#allocation24_spill] sm:$0xff] }
 0x997   :  { %v2262_v60 = vmul.f32 %v9055_v63, %v2261_v33  ;;  %v9113_v10 = vpop.xlane.xlu0 %2213  ;;  %v2275_v63 = vor.u32 1.1754944e-38, %v2274_v16  ;;  %v2291_v45 = vsel %vm2288_vm1, %v2290_v44, %v2286_v17  ;;  %vm2303_vm8 = vcmp.eq.f32.partialorder %v2302_v26, 8.507059e+37  ;;  %v9181_v26 = vld [vmem:[%s11845_s5 + $0x1] ss:$0 sm:$0xff] }
 0x998   :  { %7533 = vrcp.f32 %v9113_v10  ;;  %v2292_v51 = vmul.f32 %v9047_v13, %v2291_v45  ;;  %v2319_v13 = vand.u32 2147483648, %v9113_v10  ;;  %v2317_v35 = vand.u32 2147483647, %v9113_v10 }
 0x999   :  { %v7530_v3 = vpop.eup %7529  ;;  %6989 = vmatmul.msk.f32.gmra.mxu1 %vm939_vm5, %v2262_v60 }
 0x99a   :  { %v2264_v14 = vmul.f32 %v7530_v3, %v2205_v21  ;;  %v7532_v9 = vpop.eup %7531  ;;  %vm2269_vm10 = vweird.f32 %v7530_v3  ;;  %v2320_v33 = vor.u32 1.1754944e-38, %v2319_v13 }
 0x99b   :  { %v2294_v29 = vmul.f32 %v7532_v9, %v9108_v1  ;;  %vm2270_vm12 = vmor %vm2268_vm11, %vm2269_vm10  ;;  %vm2299_vm2 = vweird.f32 %v7532_v9  ;;  %vm2313_vm10 = vweird.f32 %v9113_v10 }
 0x99c   :  { %v2265_v57 = vsub.f32 1.0, %v2264_v14  ;;  %vm2300_vm7 = vmor %vm2298_vm6, %vm2299_vm2 }
 0x99d   :  { %v2295_v37 = vsub.f32 1.0, %v2294_v29  ;;  %v11899_v29 = vld [vmem:[#allocation21_spill] sm:$0xff] }
 0x99e   :  { %v2266_v50 = vmul.f32 %v7530_v3, %v2265_v57  ;;  %v7534_v48 = vpop.eup %7533 }
 0x99f   :  { %v9118_v31 = vpop.xlane.xlu0 %2216  ;;  %v2296_v58 = vmul.f32 %v7532_v9, %v2295_v37  ;;  %v2309_v38 = vmul.f32 %v7534_v48, %v9113_v10  ;;  %vm2314_vm9 = vweird.f32 %v7534_v48  ;;  %v11901_v37 = vld [vmem:[#allocation23_spill] sm:$0xff] }
 0x9a0   :  { %v2267_v20 = vadd.f32 %v7530_v3, %v2266_v50  ;;  %7535 = vrcp.f32 %v9118_v31  ;;  %vm2315_vm11 = vmor %vm2313_vm10, %vm2314_vm9  ;;  %v2334_v11 = vand.u32 2147483648, %v9118_v31  ;;  %v2332_v10 = vand.u32 2147483647, %v9118_v31 }
 0x9a1   :  { %v2310_v12 = vsub.f32 1.0, %v2309_v38 }
 0x9a2   :  { %v2271_v4 = vsel %vm2270_vm12, %v7530_v3, %v2267_v20  ;;  %vm2318_vm12 = vcmp.eq.f32.partialorder %v2317_v35, 8.507059e+37  ;;  %v2335_v57 = vor.u32 1.1754944e-38, %v2334_v11  ;;  %vm2333_vm0 = vcmp.eq.f32.partialorder %v2332_v10, 8.507059e+37 }
 0x9a3   :  { %v2276_v40 = vsel %vm2273_vm14, %v2275_v63, %v2271_v4  ;;  %v2311_v53 = vmul.f32 %v7534_v48, %v2310_v12  ;;  %vm2328_vm14 = vweird.f32 %v9118_v31 }
 0x9a4   :  { %v2277_v55 = vmul.f32 %v9063_v34, %v2276_v40  ;;  %v2297_v34 = vadd.f32 %v7532_v9, %v2296_v58  ;;  %v11903_v40 = vld [vmem:[#allocation25_spill] sm:$0xff] }
 0x9a5   :  { %v2312_v21 = vadd.f32 %v7534_v48, %v2311_v53 }
 0x9a6   :  { %6990 = vmatmul.msk.f32.gmra.mxu1 %vm939_vm5, %v2277_v55  ;;  %v7536_v52 = vpop.eup %7535  ;;  %v2301_v41 = vsel %vm2300_vm7, %v7532_v9, %v2297_v34 }
 0x9a7   :  { %v2324_v47 = vmul.f32 %v7536_v52, %v9118_v31  ;;  %v2306_v0 = vsel %vm2303_vm8, %v2305_v54, %v2301_v41  ;;  %v2316_v22 = vsel %vm2315_vm11, %v7534_v48, %v2312_v21  ;;  %vm2329_vm13 = vweird.f32 %v7536_v52  ;;  %v11905_v41 = vld [vmem:[#allocation8_spill] sm:$0xff] }
 0x9a8   :  { %v2307_v1 = vmul.f32 %v9061_v7, %v2306_v0  ;;  %v2321_v3 = vsel %vm2318_vm12, %v2320_v33, %v2316_v22  ;;  %vm2330_vm15 = vmor %vm2328_vm14, %vm2329_vm13  ;;  %v11906_v0 = vld [vmem:[#allocation6_spill] sm:$0xff] }
 0x9a9   :  { %v2322_v7 = vmul.f32 %v9071_v8, %v2321_v3  ;;  %v1624_v8 = vpop.permute.xlu2 %1623 }
 0x9aa   :  { %v1616_v32 = vpop.permute.xlu1 %1615  ;;  %v1643_v20 = vsel %vm857_vm4, %v11900_v59, %v1624_v8 }
 0x9ab   :  { %v1639_v15 = vsel %vm857_vm4, %v8768_v2, %v1616_v32  ;;  %v2325_v2 = vsub.f32 1.0, %v2324_v47 }
 0x9ac   :  { %6995 = vmatmul.msk.f32.vlgmr.msrb.gmra.mxu3 %vm711_vm3, %v1639_v15  ;;  %v11904_v15 = vld [vmem:[#allocation5_spill] sm:$0xff] }
 0x9ad   :  { %v2326_v25 = vmul.f32 %v7536_v52, %v2325_v2 }
 0x9ae   :  { %6991 = vmatmul.msk.f32.gmra.mxu1 %vm939_vm5, %v2292_v51 }
 0x9af   :  { %v2327_v62 = vadd.f32 %v7536_v52, %v2326_v25  ;;  %v11907_v25 = vld [vmem:[#allocation12_spill] sm:$0xff] }
 0x9b1   :  { %v2331_v9 = vsel %vm2330_vm15, %v7536_v52, %v2327_v62  ;;  %v11909_v62 = vld [vmem:[#allocation10_spill] sm:$0xff] }
 0x9b2   :  { %v1620_v60 = vpop.permute.xlu0 %1619  ;;  %v1622_v16 = vpop.permute.xlu1 %1621  ;;  %v2336_v36 = vsel %vm2333_vm0, %v2335_v57, %v2331_v9 }
 0x9b3   :  { %v1641_v14 = vsel %vm857_vm4, %v8776_v19, %v1620_v60  ;;  %v1642_v50 = vsel %vm857_vm4, %v11899_v29, %v1622_v16  ;;  %v2337_v19 = vmul.f32 %v9075_v61, %v2336_v36  ;;  %v1630_v61 = vpop.permute.xlu2 %1629  ;;  %v11908_v60 = vld [vmem:[#allocation7_spill] sm:$0xff]  ;;  %v11910_v29 = vld [vmem:[#allocation9_spill] sm:$0xff] }
 0x9b4   :  { %6996 = vmatmul.msk.f32.gmra.mxu3 %vm711_vm3, %v1640_v49  ;;  %v1646_v24 = vsel %vm857_vm4, %v11903_v40, %v1630_v61 }
 0x9b6   :  { %6992 = vmatmul.msk.f32.gmra.mxu1 %vm939_vm5, %v2307_v1 }
 0x9ba   :  { %v1626_v63 = vpop.permute.xlu0 %1625  ;;  %v1628_v4 = vpop.permute.xlu1 %1627 }
 0x9bb   :  { %v1644_v31 = vsel %vm857_vm4, %v11901_v37, %v1626_v63  ;;  %v1645_v48 = vsel %vm857_vm4, %v11902_v28, %v1628_v4 }
 0x9bc   :  { %6997 = vmatmul.msk.f32.gmra.mxu3 %vm711_vm3, %v1641_v14 }
 0x9be   :  { %6993 = vmatmul.msk.f32.gmra.mxu1 %vm939_vm5, %v2322_v7 }
 0x9c4   :  { %6998 = vmatmul.msk.f32.gmra.mxu3 %vm711_vm3, %v1642_v50 }
 0x9c6   :  { %6994 = vmatmul.msk.f32.gmra.mxu1 %vm939_vm5, %v2337_v19 }
 0x9cc   :  { %6999 = vmatmul.msk.f32.gmra.mxu3 %vm711_vm3, %v1643_v20 }
 0x9d4   :  { %7000 = vmatmul.msk.f32.gmra.mxu3 %vm711_vm3, %v1644_v31 }
 0x9dc   :  { %7001 = vmatmul.msk.f32.gmra.mxu3 %vm711_vm3, %v1645_v48 }
 0x9e4   :  { %7002 = vmatmul.msk.f32.gmra.mxu3 %vm711_vm3, %v1646_v24 }
 0x9ee   :  { %v2403_v55 = vpop.f32.mrf.mxu1 }
 0x9ef   :  { %2435 = vrot.lane.b32.xlu0 %v2403_v55, %s7831_s17 }
 0x9f6   :  { %v2406_v56 = vpop.f32.mrf.mxu1 }
 0x9f7   :  { %2437 = vrot.lane.b32.xlu1 %v2406_v56, %s7831_s17 }
 0xa16   :  { %v2409_v58 = vpop.f32.mrf.mxu1 }
 0xa17   :  { %2439 = vrot.lane.b32.xlu2 %v2409_v58, %s7831_s17 }
 0xa23   :  { %v2412_v38 = vpop.f32.mrf.mxu1 }
 0xa24   :  { %2441 = vrot.lane.b32.xlu0 %v2412_v38, %s7831_s17 }
 0xa2b   :  { %v2415_v17 = vpop.f32.mrf.mxu1 }
 0xa2c   :  { %2443 = vrot.lane.b32.xlu1 %v2415_v17, %s7831_s17 }
 0xa2f   :  { %v2532_v44 = vpop.f32.mrf.mxu3 }
 0xa30   :  { %v2580_v51 = vadd.f32 %v2532_v44, %v11904_v15 }
 0xa32   :  { %v9184_v47 = vadd.f32 %v9181_v26, %v2580_v51 }
 0xa33   :  { %v2418_v45 = vpop.f32.mrf.mxu1 }
 0xa34   :  { %2445 = vrot.lane.b32.xlu2 %v2418_v45, %s7831_s17  ;;  %v2613_v6 = vsel %vm711_vm3, %v9184_v47, 0.0 }
 0xa37   :  { %v2535_v12 = vpop.f32.mrf.mxu3 }
 0xa38   :  { %v2581_v2 = vadd.f32 %v2535_v12, %v11906_v0 }
 0xa3a   :  { %v9194_v1 = vadd.f32 %v9181_v26, %v2581_v2 }
 0xa3b   :  { %v2421_v32 = vpop.f32.mrf.mxu1 }
 0xa3c   :  { %2447 = vrot.lane.b32.xlu0 %v2421_v32, %s7831_s17  ;;  %v2616_v14 = vsel %vm711_vm3, %v9194_v1, 0.0  ;;  %v11912_v32 = vld [vmem:[#allocation11_spill] sm:$0xff] }
 0xa3f   :  { %v2538_v34 = vpop.f32.mrf.mxu3 }
 0xa40   :  { %v2582_v3 = vadd.f32 %v2538_v34, %v11908_v60  ;;  %v11913_v60 = vld [vmem:[#allocation13_spill] sm:$0xff] }
 0xa42   :  { %v9213_v9 = vadd.f32 %v9181_v26, %v2582_v3 }
 0xa43   :  { %v2424_v52 = vpop.f32.mrf.mxu1 }
 0xa44   :  { %2449 = vrot.lane.b32.xlu1 %v2424_v52, %s7831_s17  ;;  %v2619_v8 = vsel %vm711_vm3, %v9213_v9, 0.0 }
 0xa47   :  { %v2541_v39 = vpop.f32.mrf.mxu3 }
 0xa48   :  { %v2583_v54 = vadd.f32 %v2541_v39, %v11905_v41 }
 0xa4a   :  { %v9191_v49 = vadd.f32 %v9181_v26, %v2583_v54 }
 0xa4c   :  { %v2622_v33 = vsel %vm711_vm3, %v9191_v49, 0.0 }
 0xa4f   :  { %v2544_v53 = vpop.f32.mrf.mxu3 }
 0xa50   :  { %v2584_v11 = vadd.f32 %v2544_v53, %v11909_v62 }
 0xa52   :  { %v9210_v10 = vadd.f32 %v9181_v26, %v2584_v11 }
 0xa54   :  { %v2625_v19 = vsel %vm711_vm3, %v9210_v10, 0.0 }
 0xa57   :  { %v2547_v21 = vpop.f32.mrf.mxu3 }
 0xa58   :  { %v2585_v22 = vadd.f32 %v2547_v21, %v11907_v25 }
 0xa5a   :  { %v9207_v7 = vadd.f32 %v9181_v26, %v2585_v22 }
 0xa5c   :  { %v2628_v36 = vsel %vm711_vm3, %v9207_v7, 0.0 }
 0xa5d   :  { %2614 = vadd.xlane.f32.xlu2 %v2613_v6 }
 0xa5f   :  { %v2550_v57 = vpop.f32.mrf.mxu3 }
 0xa60   :  { %v2586_v50 = vadd.f32 %v2550_v57, %v11910_v29  ;;  %v11914_v29 = vld [vmem:[#allocation14_spill] sm:$0xff] }
 0xa61   :  { %v2436_v13 = vpop.permute.xlu0 %2435 }
 0xa62   :  { %v2459_v35 = vsel %vm857_vm4, %v9011_v27, %v2436_v13  ;;  %v9226_v20 = vadd.f32 %v9181_v26, %v2586_v50 }
 0xa63   :  { %7003 = vmatmul.msk.f32.gmra.mxu3 %vm711_vm3, %v2459_v35 }
 0xa64   :  { %v2631_v63 = vsel %vm711_vm3, %v9226_v20, 0.0 }
 0xa65   :  { %2623 = vadd.xlane.f32.xlu2 %v2622_v33 }
 0xa66   :  { %2617 = vadd.xlane.f32.xlu0 %v2616_v14 }
 0xa67   :  { %v2553_v12 = vpop.f32.mrf.mxu3 }
 0xa68   :  { %v2587_v34 = vadd.f32 %v2553_v12, %v11912_v32  ;;  %v11918_v32 = vld [vmem:[#allocation18_spill] sm:$0xff] }
 0xa69   :  { %v2438_v27 = vpop.permute.xlu1 %2437 }
 0xa6a   :  { %v2460_v16 = vsel %vm857_vm4, %v9015_v5, %v2438_v27  ;;  %v9261_v41 = vadd.f32 %v9181_v26, %v2587_v34 }
 0xa6b   :  { %7004 = vmatmul.msk.f32.gmra.mxu3 %vm711_vm3, %v2460_v16 }
 0xa6c   :  { %v2634_v0 = vsel %vm711_vm3, %v9261_v41, 0.0 }
 0xa6d   :  { %2629 = vadd.xlane.f32.xlu2 %v2628_v36 }
 0xa6e   :  { %2626 = vadd.xlane.f32.xlu0 %v2625_v19  ;;  %2620 = vadd.xlane.f32.xlu1 %v2619_v8 }
 0xa71   :  { %v2440_v59 = vpop.permute.xlu2 %2439 }
 0xa72   :  { %v2461_v5 = vsel %vm857_vm4, %v9018_v18, %v2440_v59 }
 0xa73   :  { %7005 = vmatmul.msk.f32.gmra.mxu3 %vm711_vm3, %v2461_v5 }
 0xa76   :  { %2632 = vadd.xlane.f32.xlu0 %v2631_v63 }
 0xa8e   :  { %v2446_v48 = vpop.permute.xlu2 %2445 }
 0xa8f   :  { %v2464_v18 = vsel %vm857_vm4, %v9024_v30, %v2446_v48 }
 0xa96   :  { %v2442_v37 = vpop.permute.xlu0 %2441 }
 0xa97   :  { %v2462_v31 = vsel %vm857_vm4, %v9020_v43, %v2442_v37  ;;  %v7832_v43 = vmov 32.0  }
 0xa98   :  { %7006 = vmatmul.msk.f32.gmra.mxu3 %vm711_vm3, %v2462_v31  ;;  %7537 = vrcp.f32 %v7832_v43 }
 0xa9e   :  { %v2444_v4 = vpop.permute.xlu1 %2443  ;;  %v7538_v55 = vpop.eup %7537 }
 0xa9f   :  { %v2463_v28 = vsel %vm857_vm4, %v9022_v23, %v2444_v4  ;;  %v2662_v56 = vmul.f32 32.0, %v7538_v55  ;;  %vm2666_vm1 = vweird.f32 %v7538_v55  ;;  %v11915_v4 = vld [vmem:[#allocation15_spill] sm:$0xff] }
 0xaa0   :  { %7007 = vmatmul.msk.f32.gmra.mxu3 %vm711_vm3, %v2463_v28 }
 0xaa1   :  { %v2663_v58 = vsub.f32 1.0, %v2662_v56 }
 0xaa3   :  { %v2664_v30 = vmul.f32 %v7538_v55, %v2663_v58 }
 0xaa5   :  { %v2665_v38 = vadd.f32 %v7538_v55, %v2664_v30 }
 0xaa7   :  { %v9248_v17 = vsel %vm2666_vm1, %v7538_v55, %v2665_v38  ;;  %v11916_v55 = vld [vmem:[#allocation16_spill] sm:$0xff]  ;;  %v11917_v38 = vld [vmem:[#allocation17_spill] sm:$0xff] }
 0xaa8   :  { %7008 = vmatmul.msk.f32.gmra.mxu3 %vm711_vm3, %v2464_v18  ;;  %11911 = vst [vmem:[#allocation21_spill] sm:$0xff] %v9248_v17 }
 0xaae   :  { %v2448_v61 = vpop.permute.xlu0 %2447 }
 0xaaf   :  { %v2465_v40 = vsel %vm857_vm4, %v9026_v46, %v2448_v61 }
 0xab0   :  { %7009 = vmatmul.msk.f32.gmra.mxu3 %vm711_vm3, %v2465_v40 }
 0xab6   :  { %v2450_v24 = vpop.permute.xlu1 %2449 }
 0xab7   :  { %v2466_v23 = vsel %vm857_vm4, %v9029_v42, %v2450_v24 }
 0xab8   :  { %7010 = vmatmul.msk.f32.gmra.mxu3 %vm711_vm3, %v2466_v23 }
 0xad0   :  { %v2615_v44 = vpop.xlane.xlu2 %2614 }
 0xad1   :  { %v2668_v46 = vmul.f32 %v9248_v17, %v2615_v44 }
 0xad3   :  { %v9252_v45 = vsub.f32 %v9184_v47, %v2668_v46 }
 0xad5   :  { %v2700_v42 = vmul.f32 %v9252_v45, %v9252_v45 }
 0xad7   :  { %v2716_v52 = vsel %vm711_vm3, %v2700_v42, 0.0 }
 0xad8   :  { %v2624_v39 = vpop.xlane.xlu2 %2623  ;;  %2717 = vadd.xlane.f32.xlu1 %v2716_v52 }
 0xad9   :  { %v2618_v15 = vpop.xlane.xlu0 %2617  ;;  %v2671_v53 = vmul.f32 %v9248_v17, %v2624_v39 }
 0xada   :  { %v2669_v51 = vmul.f32 %v9248_v17, %v2618_v15  ;;  %v699_v15 = vld [vmem:[%s11846_s6 + $0xd0] sm:$0xff] }
 0xadb   :  { %v9269_v6 = vsub.f32 %v9191_v49, %v2671_v53  ;;  %3067 = vmatpush.msra.mxu2 %v699_v15  ;;  %v697_v53 = vld [vmem:[%s11846_s6 + $0x50] sm:$0xff] }
 0xadc   :  { %v9264_v47 = vsub.f32 %v9194_v1, %v2669_v51  ;;  %v698_v51 = vld [vmem:[%s11846_s6 + $0x90] sm:$0xff] }
 0xadd   :  { %v2703_v1 = vmul.f32 %v9269_v6, %v9269_v6  ;;  %3068 = vmatpush.msra.mxu2 %v698_v51 }
 0xade   :  { %v2701_v54 = vmul.f32 %v9264_v47, %v9264_v47 }
 0xadf   :  { %v2725_v62 = vsel %vm711_vm3, %v2703_v1, 0.0  ;;  %3069 = vmatpush.msra.mxu2 %v697_v53 }
 0xae0   :  { %2635 = vadd.xlane.f32.xlu1 %v2634_v0  ;;  %v2719_v2 = vsel %vm711_vm3, %v2701_v54, 0.0  ;;  %v2630_v57 = vpop.xlane.xlu2 %2629  ;;  %v696_v54 = vld [vmem:[%s11846_s6 + $0x10] sm:$0xff] }
 0xae1   :  { %2720 = vadd.xlane.f32.xlu2 %v2719_v2  ;;  %v2621_v21 = vpop.xlane.xlu1 %2620  ;;  %v2627_v35 = vpop.xlane.xlu0 %2626  ;;  %v2673_v36 = vmul.f32 %v9248_v17, %v2630_v57  ;;  %3070 = vmatpush.msra.mxu2 %v696_v54  ;;  %v11919_v57 = vld [vmem:[#allocation19_spill] sm:$0xff] }
 0xae2   :  { %v2670_v13 = vmul.f32 %v9248_v17, %v2621_v21  ;;  %v2672_v33 = vmul.f32 %v9248_v17, %v2627_v35 }
 0xae3   :  { %v9302_v59 = vsub.f32 %v9207_v7, %v2673_v36 }
 0xae4   :  { %v9278_v25 = vsub.f32 %v9213_v9, %v2670_v13  ;;  %v9290_v27 = vsub.f32 %v9210_v10, %v2672_v33 }
 0xae5   :  { %v2705_v48 = vmul.f32 %v9302_v59, %v9302_v59 }
 0xae6   :  { %v2556_v22 = vpop.f32.mrf.mxu3  ;;  %v2702_v49 = vmul.f32 %v9278_v25, %v9278_v25  ;;  %v2704_v19 = vmul.f32 %v9290_v27, %v9290_v27 }
 0xae7   :  { %v2588_v3 = vadd.f32 %v2556_v22, %v11913_v60  ;;  %v2731_v40 = vsel %vm711_vm3, %v2705_v48, 0.0 }
 0xae8   :  { %2726 = vadd.xlane.f32.xlu1 %v2725_v62  ;;  %v2722_v11 = vsel %vm711_vm3, %v2702_v49, 0.0  ;;  %v2728_v10 = vsel %vm711_vm3, %v2704_v19, 0.0 }
 0xae9   :  { %2723 = vadd.xlane.f32.xlu0 %v2722_v11  ;;  %v9287_v14 = vadd.f32 %v9181_v26, %v2588_v3  ;;  %v2633_v63 = vpop.xlane.xlu0 %2632 }
 0xaea   :  { %v2674_v31 = vmul.f32 %v9248_v17, %v2633_v63 }
 0xaeb   :  { %v2637_v9 = vsel %vm711_vm3, %v9287_v14, 0.0 }
 0xaec   :  { %2638 = vadd.xlane.f32.xlu2 %v2637_v9  ;;  %v9315_v7 = vsub.f32 %v9226_v20, %v2674_v31 }
 0xaee   :  { %v2559_v16 = vpop.f32.mrf.mxu3  ;;  %v2706_v43 = vmul.f32 %v9315_v7, %v9315_v7 }
 0xaef   :  { %v2589_v50 = vadd.f32 %v2559_v16, %v11914_v29 }
 0xaf0   :  { %v2734_v24 = vsel %vm711_vm3, %v2706_v43, 0.0 }
 0xaf1   :  { %v9299_v8 = vadd.f32 %v9181_v26, %v2589_v50 }
 0xaf3   :  { %v2640_v5 = vsel %vm711_vm3, %v9299_v8, 0.0 }
 0xaf4   :  { %2729 = vadd.xlane.f32.xlu2 %v2728_v10  ;;  %2641 = vadd.xlane.f32.xlu0 %v2640_v5 }
 0xaf6   :  { %v2562_v37 = vpop.f32.mrf.mxu3 }
 0xaf7   :  { %v2590_v28 = vadd.f32 %v2562_v37, %v11915_v4 }
 0xaf9   :  { %v9312_v18 = vadd.f32 %v9181_v26, %v2590_v28 }
 0xafb   :  { %v2643_v61 = vsel %vm711_vm3, %v9312_v18, 0.0 }
 0xafc   :  { %2644 = vadd.xlane.f32.xlu1 %v2643_v61  ;;  %2732 = vadd.xlane.f32.xlu0 %v2731_v40  ;;  %v9375_v61 = vld [vmem:[%s11845_s5 + $0x4] ss:$0 sm:$0xff] }
 0xb04   :  { %2735 = vadd.xlane.f32.xlu1 %v2734_v24 }
 0xb1b   :  { %v2565_v23 = vpop.f32.mrf.mxu3 }
 0xb1c   :  { %v2591_v56 = vadd.f32 %v2565_v23, %v11916_v55  ;;  %v9383_v23 = vld [vmem:[%s11845_s5 + $0x5] ss:$0 sm:$0xff] }
 0xb1e   :  { %v9325_v58 = vadd.f32 %v9181_v26, %v2591_v56 }
 0xb20   :  { %v2646_v20 = vsel %vm711_vm3, %v9325_v58, 0.0 }
 0xb21   :  { %2647 = vadd.xlane.f32.xlu2 %v2646_v20 }
 0xb23   :  { %v2568_v30 = vpop.f32.mrf.mxu3 }
 0xb24   :  { %v2592_v44 = vadd.f32 %v2568_v30, %v11917_v38 }
 0xb26   :  { %v9331_v46 = vadd.f32 %v9181_v26, %v2592_v44 }
 0xb28   :  { %v2649_v12 = vsel %vm711_vm3, %v9331_v46, 0.0 }
 0xb29   :  { %2650 = vadd.xlane.f32.xlu0 %v2649_v12 }
 0xb2b   :  { %v2571_v42 = vpop.f32.mrf.mxu3 }
 0xb2c   :  { %v2593_v34 = vadd.f32 %v2571_v42, %v11918_v32 }
 0xb2e   :  { %v9337_v52 = vadd.f32 %v9181_v26, %v2593_v34  ;;  %v11920_v34 = vld [vmem:[#allocation20_spill] sm:$0xff] }
 0xb30   :  { %v2652_v39 = vsel %vm711_vm3, %v9337_v52, 0.0 }
 0xb31   :  { %2653 = vadd.xlane.f32.xlu1 %v2652_v39 }
 0xb33   :  { %v2574_v60 = vpop.f32.mrf.mxu3 }
 0xb34   :  { %v2594_v16 = vadd.f32 %v2574_v60, %v11919_v57 }
 0xb36   :  { %v9368_v37 = vadd.f32 %v9181_v26, %v2594_v16 }
 0xb38   :  { %v2655_v20 = vsel %vm711_vm3, %v9368_v37, 0.0 }
 0xb3b   :  { %v2577_v30 = vpop.f32.mrf.mxu3 }
 0xb3c   :  { %v2595_v39 = vadd.f32 %v2577_v30, %v11920_v34 }
 0xb4b   :  { %v2718_v0 = vpop.xlane.xlu1 %2717 }
 0xb4c   :  { %v2764_v2 = vmul.f32 %v2718_v0, %v9248_v17 }
 0xb4e   :  { %v2780_v21 = vadd.f32 1e-05, %v2764_v2 }
 0xb50   :  { %7539 = vrsqrt.f32 %v2780_v21  ;;  %vm2802_vm6 = vweird.f32 %v2780_v21 }
 0xb53   :  { %v2636_v13 = vpop.xlane.xlu1 %2635 }
 0xb54   :  { %v2675_v1 = vmul.f32 %v9248_v17, %v2636_v13  ;;  %v2721_v35 = vpop.xlane.xlu2 %2720 }
 0xb55   :  { %v2765_v22 = vmul.f32 %v2721_v35, %v9248_v17 }
 0xb56   :  { %v7540_v49 = vpop.eup %7539  ;;  %v9357_v33 = vsub.f32 %v9261_v41, %v2675_v1 }
 0xb57   :  { %v2797_v3 = vmul.f32 %v7540_v49, %v2780_v21  ;;  %v2781_v62 = vadd.f32 1e-05, %v2765_v22  ;;  %vm2803_vm2 = vweird.f32 %v7540_v49 }
 0xb58   :  { %v2707_v11 = vmul.f32 %v9357_v33, %v9357_v33  ;;  %vm2804_vm7 = vmor %vm2802_vm6, %vm2803_vm2 }
 0xb59   :  { %v2798_v9 = vmul.f32 %v7540_v49, %v2797_v3  ;;  %7541 = vrsqrt.f32 %v2781_v62  ;;  %vm2812_vm9 = vweird.f32 %v2781_v62  ;;  %v9410_v3 = vadd.f32 %v9181_v26, %v2595_v39 }
 0xb5a   :  { %v2737_v36 = vsel %vm711_vm3, %v2707_v11, 0.0 }
 0xb5b   :  { %v2799_v29 = vmul.f32 0.5, %v2798_v9  ;;  %2738 = vadd.xlane.f32.xlu2 %v2737_v36  ;;  %v2727_v50 = vpop.xlane.xlu1 %2726  ;;  %v2658_v26 = vsel %vm711_vm3, %v9410_v3, 0.0 }
 0xb5c   :  { %v2767_v19 = vmul.f32 %v2727_v50, %v9248_v17  ;;  %v2724_v10 = vpop.xlane.xlu0 %2723 }
 0xb5d   :  { %v2800_v41 = vsub.f32 1.5, %v2799_v29  ;;  %v2766_v5 = vmul.f32 %v2724_v10, %v9248_v17 }
 0xb5e   :  { %v9365_v63 = vadd.f32 1e-05, %v2767_v19 }
 0xb5f   :  { %v7542_v31 = vpop.eup %7541  ;;  %v2801_v4 = vmul.f32 %v7540_v49, %v2800_v41  ;;  %v9370_v28 = vadd.f32 1e-05, %v2766_v5  ;;  %v2639_v48 = vpop.xlane.xlu2 %2638 }
 0xb60   :  { %v2807_v40 = vmul.f32 %v7542_v31, %v2781_v62  ;;  %7543 = vrsqrt.f32 %v9365_v63  ;;  %v2676_v24 = vmul.f32 %v9248_v17, %v2639_v48  ;;  %vm2813_vm8 = vweird.f32 %v7542_v31 }
 0xb61   :  { %v2805_v43 = vsel %vm2804_vm7, %v7540_v49, %v2801_v4  ;;  %7545 = vrsqrt.f32 %v9370_v28  ;;  %vm2814_vm10 = vmor %vm2812_vm9, %vm2813_vm8  ;;  %vm2822_vm12 = vweird.f32 %v9370_v28  ;;  %vm2832_vm15 = vweird.f32 %v9365_v63 }
 0xb62   :  { %v2956_v55 = vmul.f32 %v2805_v43, %v9252_v45  ;;  %v2808_v56 = vmul.f32 %v7542_v31, %v2807_v40  ;;  %v9389_v38 = vsub.f32 %v9287_v14, %v2676_v24 }
 0xb63   :  { %2656 = vadd.xlane.f32.xlu2 %v2655_v20 }
 0xb64   :  { %v2973_v44 = vmul.f32 %v9375_v61, %v2956_v55  ;;  %v2809_v12 = vmul.f32 0.5, %v2808_v56  ;;  %v2708_v42 = vmul.f32 %v9389_v38, %v9389_v38 }
 0xb66   :  { %v9394_v32 = vpop.eup %7543  ;;  %v9398_v45 = vadd.f32 %v9383_v23, %v2973_v44  ;;  %v2810_v15 = vsub.f32 1.5, %v2809_v12  ;;  %v2740_v54 = vsel %vm711_vm3, %v2708_v42, 0.0 }
 0xb67   :  { %v7546_v51 = vpop.eup %7545  ;;  %v2827_v14 = vmul.f32 %v9394_v32, %v9365_v63  ;;  %v2730_v53 = vpop.xlane.xlu2 %2729  ;;  %2741 = vadd.xlane.f32.xlu0 %v2740_v54  ;;  %vm2833_vm13 = vweird.f32 %v9394_v32 }
 0xb68   :  { %v2642_v0 = vpop.xlane.xlu0 %2641  ;;  %v2811_v2 = vmul.f32 %v7542_v31, %v2810_v15  ;;  %v2817_v21 = vmul.f32 %v7546_v51, %v9370_v28  ;;  %v2768_v13 = vmul.f32 %v2730_v53, %v9248_v17  ;;  %7011 = vmatmul.msk.f32.vlgmr.msra.gmra.mxu2 %vm711_vm3, %v9398_v45  ;;  %vm2823_vm11 = vweird.f32 %v7546_v51  ;;  %vm2834_vm0 = vmor %vm2832_vm15, %vm2833_vm13 }
 0xb69   :  { %v2828_v1 = vmul.f32 %v9394_v32, %v2827_v14  ;;  %v2677_v35 = vmul.f32 %v9248_v17, %v2642_v0  ;;  %vm2824_vm14 = vmor %vm2822_vm12, %vm2823_vm11 }
 0xb6a   :  { %v2815_v22 = vsel %vm2814_vm10, %v7542_v31, %v2811_v2  ;;  %v2818_v49 = vmul.f32 %v7546_v51, %v2817_v21  ;;  %v2784_v60 = vadd.f32 1e-05, %v2768_v13 }
 0xb6b   :  { %v2957_v62 = vmul.f32 %v2815_v22, %v9264_v47  ;;  %v2829_v11 = vmul.f32 0.5, %v2828_v1  ;;  %v9414_v9 = vsub.f32 %v9299_v8, %v2677_v35 }
 0xb6c   :  { %v2819_v57 = vmul.f32 0.5, %v2818_v49  ;;  %7547 = vrsqrt.f32 %v2784_v60  ;;  %vm2842_vm2 = vweird.f32 %v2784_v60 }
 0xb6d   :  { %v2830_v16 = vsub.f32 1.5, %v2829_v11  ;;  %v2709_v36 = vmul.f32 %v9414_v9, %v9414_v9  ;;  %v2974_v29 = vmul.f32 %v9375_v61, %v2957_v62 }
 0xb6e   :  { %v2820_v50 = vsub.f32 1.5, %v2819_v57 }
 0xb6f   :  { %v2831_v19 = vmul.f32 %v9394_v32, %v2830_v16  ;;  %v2743_v47 = vsel %vm711_vm3, %v2709_v36, 0.0  ;;  %v2645_v10 = vpop.xlane.xlu1 %2644  ;;  %v9425_v41 = vadd.f32 %v9383_v23, %v2974_v29  ;;  %2659 = vadd.xlane.f32.xlu0 %v2658_v26 }
 0xb70   :  { %v2733_v8 = vpop.xlane.xlu0 %2732  ;;  %v2821_v5 = vmul.f32 %v7546_v51, %v2820_v50  ;;  %2744 = vadd.xlane.f32.xlu1 %v2743_v47  ;;  %v2678_v4 = vmul.f32 %v9248_v17, %v2645_v10 }
 0xb71   :  { %v2769_v31 = vmul.f32 %v2733_v8, %v9248_v17  ;;  %7012 = vmatmul.msk.f32.gmra.mxu2 %vm711_vm3, %v9425_v41  ;;  %v2835_v56 = vsel %vm2834_vm0, %v9394_v32, %v2831_v19 }
 0xb72   :  { %v7548_v28 = vpop.eup %7547  ;;  %v2825_v48 = vsel %vm2824_vm14, %v7546_v51, %v2821_v5  ;;  %v9434_v43 = vsub.f32 %v9312_v18, %v2678_v4  ;;  %v2959_v12 = vmul.f32 %v2835_v56, %v9269_v6 }
 0xb73   :  { %v2785_v40 = vadd.f32 1e-05, %v2769_v31  ;;  %v2958_v24 = vmul.f32 %v2825_v48, %v9278_v25  ;;  %v2837_v55 = vmul.f32 %v7548_v28, %v2784_v60  ;;  %vm2843_vm1 = vweird.f32 %v7548_v28 }
 0xb74   :  { %v2710_v20 = vmul.f32 %v9434_v43, %v9434_v43  ;;  %v2976_v6 = vmul.f32 %v9375_v61, %v2959_v12  ;;  %vm2844_vm6 = vmor %vm2842_vm2, %vm2843_vm1  ;;  %v700_v12 = vld [vmem:[%s11846_s6 + $0x18] sm:$0xff] }
 0xb75   :  { %7549 = vrsqrt.f32 %v2785_v40  ;;  %v2838_v30 = vmul.f32 %v7548_v28, %v2837_v55  ;;  %v2975_v44 = vmul.f32 %v9375_v61, %v2958_v24  ;;  %vm2852_vm8 = vweird.f32 %v2785_v40 }
 0xb76   :  { %v2746_v63 = vsel %vm711_vm3, %v2710_v20, 0.0  ;;  %v9452_v21 = vadd.f32 %v9383_v23, %v2976_v6 }
 0xb77   :  { %v2839_v42 = vmul.f32 0.5, %v2838_v30  ;;  %2747 = vadd.xlane.f32.xlu2 %v2746_v63  ;;  %v2736_v18 = vpop.xlane.xlu1 %2735  ;;  %v9444_v34 = vadd.f32 %v9383_v23, %v2975_v44  ;;  %v701_v44 = vld [vmem:[%s11846_s6 + $0x58] sm:$0xff] }
 0xb78   :  { %v2770_v25 = vmul.f32 %v2736_v18, %v9248_v17  ;;  %3199 = vmatpush.msra.mxu1 %v701_v44 }
 0xb79   :  { %v2840_v32 = vsub.f32 1.5, %v2839_v42  ;;  %7013 = vmatmul.msk.f32.gmra.mxu2 %vm711_vm3, %v9444_v34 }
 0xb7a   :  { %v2786_v15 = vadd.f32 1e-05, %v2770_v25  ;;  %3200 = vmatpush.msra.mxu1 %v700_v12 }
 0xb7b   :  { %v7550_v39 = vpop.eup %7549  ;;  %v2841_v51 = vmul.f32 %v7548_v28, %v2840_v32 }
 0xb7c   :  { %v2847_v14 = vmul.f32 %v7550_v39, %v2785_v40  ;;  %7551 = vrsqrt.f32 %v2786_v15  ;;  %vm2853_vm7 = vweird.f32 %v7550_v39  ;;  %vm2862_vm11 = vweird.f32 %v2786_v15 }
 0xb7d   :  { %v2845_v53 = vsel %vm2844_vm6, %v7548_v28, %v2841_v51  ;;  %vm2854_vm9 = vmor %vm2852_vm8, %vm2853_vm7 }
 0xb7e   :  { %v2848_v54 = vmul.f32 %v7550_v39, %v2847_v14  ;;  %v2960_v0 = vmul.f32 %v2845_v53, %v9290_v27 }
 0xb80   :  { %v2849_v2 = vmul.f32 0.5, %v2848_v54  ;;  %v2977_v49 = vmul.f32 %v9375_v61, %v2960_v0 }
 0xb81   :  { %7014 = vmatmul.msk.f32.gmra.mxu2 %vm711_vm3, %v9452_v21 }
 0xb82   :  { %v2850_v13 = vsub.f32 1.5, %v2849_v2  ;;  %v7552_v1 = vpop.eup %7551  ;;  %v9459_v57 = vadd.f32 %v9383_v23, %v2977_v49 }
 0xb83   :  { %v2857_v22 = vmul.f32 %v7552_v1, %v2786_v15  ;;  %vm2863_vm10 = vweird.f32 %v7552_v1 }
 0xb84   :  { %v2851_v35 = vmul.f32 %v7550_v39, %v2850_v13  ;;  %vm2864_vm12 = vmor %vm2862_vm11, %vm2863_vm10 }
 0xb85   :  { %v2858_v62 = vmul.f32 %v7552_v1, %v2857_v22 }
 0xb86   :  { %v2855_v60 = vsel %vm2854_vm9, %v7550_v39, %v2851_v35 }
 0xb87   :  { %v2961_v27 = vmul.f32 %v2855_v60, %v9302_v59  ;;  %v2859_v11 = vmul.f32 0.5, %v2858_v62 }
 0xb89   :  { %v2860_v16 = vsub.f32 1.5, %v2859_v11  ;;  %7015 = vmatmul.msk.f32.gmra.mxu2 %vm711_vm3, %v9459_v57  ;;  %v2978_v29 = vmul.f32 %v9375_v61, %v2961_v27 }
 0xb8b   :  { %v2861_v36 = vmul.f32 %v7552_v1, %v2860_v16  ;;  %v9466_v19 = vadd.f32 %v9383_v23, %v2978_v29 }
 0xb8d   :  { %v2865_v50 = vsel %vm2864_vm12, %v7552_v1, %v2861_v36 }
 0xb8e   :  { %v2962_v26 = vmul.f32 %v2865_v50, %v9315_v7  ;;  %v9524_v50 = vld [vmem:[%s11845_s5 + $0x2] ss:$0 sm:$0xff] }
 0xb90   :  { %v2979_v59 = vmul.f32 %v9375_v61, %v2962_v26 }
 0xb91   :  { %7016 = vmatmul.msk.f32.gmra.mxu2 %vm711_vm3, %v9466_v19 }
 0xb92   :  { %v9476_v5 = vadd.f32 %v9383_v23, %v2979_v59 }
 0xb94   :  { %v2648_v47 = vpop.xlane.xlu2 %2647 }
 0xb95   :  { %v2679_v8 = vmul.f32 %v9248_v17, %v2648_v47 }
 0xb97   :  { %v9473_v10 = vsub.f32 %v9325_v58, %v2679_v8 }
 0xb99   :  { %7017 = vmatmul.msk.f32.gmra.mxu2 %vm711_vm3, %v9476_v5  ;;  %v2711_v7 = vmul.f32 %v9473_v10, %v9473_v10 }
 0xb9b   :  { %v2749_v31 = vsel %vm711_vm3, %v2711_v7, 0.0 }
 0xb9c   :  { %2750 = vadd.xlane.f32.xlu1 %v2749_v31  ;;  %v2651_v4 = vpop.xlane.xlu0 %2650 }
 0xb9d   :  { %v2680_v28 = vmul.f32 %v9248_v17, %v2651_v4 }
 0xb9f   :  { %v9485_v48 = vsub.f32 %v9331_v46, %v2680_v28 }
 0xba1   :  { %v2712_v58 = vmul.f32 %v9485_v48, %v9485_v48 }
 0xba3   :  { %v2752_v40 = vsel %vm711_vm3, %v2712_v58, 0.0 }
 0xba4   :  { %2753 = vadd.xlane.f32.xlu0 %v2752_v40  ;;  %v2654_v24 = vpop.xlane.xlu1 %2653 }
 0xba5   :  { %v2681_v55 = vmul.f32 %v9248_v17, %v2654_v24 }
 0xba7   :  { %v9492_v56 = vsub.f32 %v9337_v52, %v2681_v55 }
 0xba9   :  { %v2713_v20 = vmul.f32 %v9492_v56, %v9492_v56 }
 0xbab   :  { %v2755_v30 = vsel %vm711_vm3, %v2713_v20, 0.0 }
 0xbac   :  { %2756 = vadd.xlane.f32.xlu2 %v2755_v30 }
 0xbce   :  { %v2739_v46 = vpop.xlane.xlu2 %2738 }
 0xbcf   :  { %v2771_v63 = vmul.f32 %v2739_v46, %v9248_v17 }
 0xbd1   :  { %v2787_v52 = vadd.f32 1e-05, %v2771_v63 }
 0xbd3   :  { %7553 = vrsqrt.f32 %v2787_v52  ;;  %vm2872_vm14 = vweird.f32 %v2787_v52 }
 0xbd6   :  { %v2657_v42 = vpop.xlane.xlu2 %2656 }
 0xbd7   :  { %v2682_v18 = vmul.f32 %v9248_v17, %v2657_v42 }
 0xbd9   :  { %v7554_v25 = vpop.eup %7553  ;;  %v9506_v32 = vsub.f32 %v9368_v37, %v2682_v18 }
 0xbda   :  { %v2867_v39 = vmul.f32 %v7554_v25, %v2787_v52  ;;  %v2742_v15 = vpop.xlane.xlu0 %2741  ;;  %vm2873_vm13 = vweird.f32 %v7554_v25 }
 0xbdb   :  { %v2714_v51 = vmul.f32 %v9506_v32, %v9506_v32  ;;  %v2772_v6 = vmul.f32 %v2742_v15, %v9248_v17  ;;  %vm2874_vm15 = vmor %vm2872_vm14, %vm2873_vm13 }
 0xbdc   :  { %v2868_v14 = vmul.f32 %v7554_v25, %v2867_v39 }
 0xbdd   :  { %v2758_v53 = vsel %vm711_vm3, %v2714_v51, 0.0  ;;  %v2788_v0 = vadd.f32 1e-05, %v2772_v6 }
 0xbde   :  { %v2869_v54 = vmul.f32 0.5, %v2868_v14  ;;  %2759 = vadd.xlane.f32.xlu1 %v2758_v53 }
 0xbdf   :  { %7555 = vrsqrt.f32 %v2788_v0  ;;  %vm2882_vm1 = vweird.f32 %v2788_v0 }
 0xbe0   :  { %v2870_v2 = vsub.f32 1.5, %v2869_v54 }
 0xbe2   :  { %v2871_v13 = vmul.f32 %v7554_v25, %v2870_v2  ;;  %v2660_v37 = vpop.xlane.xlu0 %2659 }
 0xbe3   :  { %v2745_v1 = vpop.xlane.xlu1 %2744  ;;  %v2683_v22 = vmul.f32 %v9248_v17, %v2660_v37 }
 0xbe4   :  { %v2875_v35 = vsel %vm2874_vm15, %v7554_v25, %v2871_v13  ;;  %v2773_v49 = vmul.f32 %v2745_v1, %v9248_v17 }
 0xbe5   :  { %v2963_v60 = vmul.f32 %v2875_v35, %v9357_v33  ;;  %v7556_v62 = vpop.eup %7555  ;;  %v9516_v27 = vsub.f32 %v9410_v3, %v2683_v22 }
 0xbe6   :  { %v2789_v11 = vadd.f32 1e-05, %v2773_v49  ;;  %v2877_v16 = vmul.f32 %v7556_v62, %v2788_v0  ;;  %vm2883_vm0 = vweird.f32 %v7556_v62 }
 0xbe7   :  { %v2980_v36 = vmul.f32 %v9375_v61, %v2963_v60  ;;  %v2715_v29 = vmul.f32 %v9516_v27, %v9516_v27  ;;  %vm2884_vm2 = vmor %vm2882_vm1, %vm2883_vm0 }
 0xbe8   :  { %7557 = vrsqrt.f32 %v2789_v11  ;;  %v2878_v26 = vmul.f32 %v7556_v62, %v2877_v16  ;;  %vm2892_vm7 = vweird.f32 %v2789_v11 }
 0xbe9   :  { %v9527_v33 = vadd.f32 %v9383_v23, %v2980_v36  ;;  %v2761_v3 = vsel %vm711_vm3, %v2715_v29, 0.0 }
 0xbea   :  { %v2748_v59 = vpop.xlane.xlu2 %2747  ;;  %v2879_v47 = vmul.f32 0.5, %v2878_v26  ;;  %2762 = vadd.xlane.f32.xlu0 %v2761_v3 }
 0xbeb   :  { %v2774_v8 = vmul.f32 %v2748_v59, %v9248_v17  ;;  %v3072_v7 = vpop.f32.mrf.mxu2  ;;  %7018 = vmatmul.msk.f32.gmra.mxu2 %vm711_vm3, %v9527_v33 }
 0xbec   :  { %v3073_v31 = vadd.f32 %v9524_v50, %v3072_v7  ;;  %v2880_v4 = vsub.f32 1.5, %v2879_v47 }
 0xbed   :  { %v2790_v28 = vadd.f32 1e-05, %v2774_v8 }
 0xbee   :  { %v7558_v58 = vpop.eup %7557  ;;  %v3120_v40 = vmax.f32 %v3073_v31, 0.0  ;;  %v2881_v24 = vmul.f32 %v7556_v62, %v2880_v4 }
 0xbef   :  { %v2887_v55 = vmul.f32 %v7558_v58, %v2789_v11  ;;  %7559 = vrsqrt.f32 %v2790_v28  ;;  %vm2893_vm6 = vweird.f32 %v7558_v58  ;;  %vm2902_vm10 = vweird.f32 %v2790_v28 }
 0xbf0   :  { %7027 = vmatmul.msk.f32.vlgmr.msra.gmra.mxu1 %vm857_vm4, %v3120_v40  ;;  %v2885_v20 = vsel %vm2884_vm2, %v7556_v62, %v2881_v24  ;;  %vm2894_vm8 = vmor %vm2892_vm7, %vm2893_vm6 }
 0xbf1   :  { %v2888_v30 = vmul.f32 %v7558_v58, %v2887_v55  ;;  %v2964_v46 = vmul.f32 %v2885_v20, %v9389_v38 }
 0xbf3   :  { %v2889_v44 = vmul.f32 0.5, %v2888_v30  ;;  %v2981_v12 = vmul.f32 %v9375_v61, %v2964_v46 }
 0xbf4   :  { %v3075_v63 = vpop.f32.mrf.mxu2 }
 0xbf5   :  { %v7560_v52 = vpop.eup %7559  ;;  %v2890_v42 = vsub.f32 1.5, %v2889_v44  ;;  %v3076_v18 = vadd.f32 %v9524_v50, %v3075_v63  ;;  %v9539_v39 = vadd.f32 %v9383_v23, %v2981_v12 }
 0xbf6   :  { %v2897_v25 = vmul.f32 %v7560_v52, %v2790_v28  ;;  %vm2903_vm9 = vweird.f32 %v7560_v52 }
 0xbf7   :  { %v2891_v15 = vmul.f32 %v7558_v58, %v2890_v42  ;;  %v3121_v51 = vmax.f32 %v3076_v18, 0.0  ;;  %7019 = vmatmul.msk.f32.gmra.mxu2 %vm711_vm3, %v9539_v39  ;;  %vm2904_vm11 = vmor %vm2902_vm10, %vm2903_vm9 }
 0xbf8   :  { %v2898_v14 = vmul.f32 %v7560_v52, %v2897_v25 }
 0xbf9   :  { %v2895_v38 = vsel %vm2894_vm8, %v7558_v58, %v2891_v15  ;;  %7028 = vmatmul.msk.f32.gmra.mxu1 %vm857_vm4, %v3121_v51 }
 0xbfa   :  { %v2965_v6 = vmul.f32 %v2895_v38, %v9414_v9  ;;  %v2899_v53 = vmul.f32 0.5, %v2898_v14 }
 0xbfc   :  { %v2900_v54 = vsub.f32 1.5, %v2899_v53  ;;  %v3078_v0 = vpop.f32.mrf.mxu2  ;;  %v2982_v2 = vmul.f32 %v9375_v61, %v2965_v6 }
 0xbfd   :  { %v3079_v13 = vadd.f32 %v9524_v50, %v3078_v0 }
 0xbfe   :  { %v2901_v37 = vmul.f32 %v7560_v52, %v2900_v54  ;;  %v9548_v1 = vadd.f32 %v9383_v23, %v2982_v2 }
 0xbff   :  { %v3122_v35 = vmax.f32 %v3079_v13, 0.0 }
 0xc00   :  { %v2905_v22 = vsel %vm2904_vm11, %v7560_v52, %v2901_v37  ;;  %7020 = vmatmul.msk.f32.gmra.mxu2 %vm711_vm3, %v9548_v1 }
 0xc01   :  { %v2966_v9 = vmul.f32 %v2905_v22, %v9434_v43  ;;  %7029 = vmatmul.msk.f32.gmra.mxu1 %vm857_vm4, %v3122_v35 }
 0xc03   :  { %v2983_v49 = vmul.f32 %v9375_v61, %v2966_v9 }
 0xc04   :  { %v3081_v60 = vpop.f32.mrf.mxu2 }
 0xc05   :  { %v3082_v62 = vadd.f32 %v9524_v50, %v3081_v60  ;;  %v9557_v11 = vadd.f32 %v9383_v23, %v2983_v49 }
 0xc07   :  { %v3123_v16 = vmax.f32 %v3082_v62, 0.0 }
 0xc08   :  { %7021 = vmatmul.msk.f32.gmra.mxu2 %vm711_vm3, %v9557_v11 }
 0xc09   :  { %7030 = vmatmul.msk.f32.gmra.mxu1 %vm857_vm4, %v3123_v16 }
 0xc0c   :  { %v3084_v36 = vpop.f32.mrf.mxu2 }
 0xc0d   :  { %v3085_v29 = vadd.f32 %v9524_v50, %v3084_v36 }
 0xc0f   :  { %v3124_v43 = vmax.f32 %v3085_v29, 0.0  ;;  %v2751_v26 = vpop.xlane.xlu1 %2750 }
 0xc10   :  { %v2775_v3 = vmul.f32 %v2751_v26, %v9248_v17 }
 0xc11   :  { %7031 = vmatmul.msk.f32.gmra.mxu1 %vm857_vm4, %v3124_v43 }
 0xc12   :  { %v2791_v59 = vadd.f32 1e-05, %v2775_v3 }
 0xc14   :  { %7561 = vrsqrt.f32 %v2791_v59  ;;  %v3087_v47 = vpop.f32.mrf.mxu2  ;;  %vm2912_vm13 = vweird.f32 %v2791_v59 }
 0xc15   :  { %v3088_v8 = vadd.f32 %v9524_v50, %v3087_v47 }
 0xc17   :  { %v3125_v7 = vmax.f32 %v3088_v8, 0.0  ;;  %v2754_v31 = vpop.xlane.xlu0 %2753 }
 0xc18   :  { %v2776_v4 = vmul.f32 %v2754_v31, %v9248_v17 }
 0xc19   :  { %7032 = vmatmul.msk.f32.gmra.mxu1 %vm857_vm4, %v3125_v7 }
 0xc1a   :  { %v7562_v28 = vpop.eup %7561  ;;  %v2792_v58 = vadd.f32 1e-05, %v2776_v4 }
 0xc1b   :  { %v2907_v40 = vmul.f32 %v7562_v28, %v2791_v59  ;;  %vm2913_vm12 = vweird.f32 %v7562_v28 }
 0xc1c   :  { %7563 = vrsqrt.f32 %v2792_v58  ;;  %v3090_v24 = vpop.f32.mrf.mxu2  ;;  %vm2914_vm14 = vmor %vm2912_vm13, %vm2913_vm12  ;;  %vm2922_vm0 = vweird.f32 %v2792_v58 }
 0xc1d   :  { %v2908_v55 = vmul.f32 %v7562_v28, %v2907_v40  ;;  %v3091_v20 = vadd.f32 %v9524_v50, %v3090_v24 }
 0xc1f   :  { %v2909_v30 = vmul.f32 0.5, %v2908_v55  ;;  %v3126_v46 = vmax.f32 %v3091_v20, 0.0  ;;  %v2757_v44 = vpop.xlane.xlu2 %2756 }
 0xc20   :  { %v2777_v63 = vmul.f32 %v2757_v44, %v9248_v17 }
 0xc21   :  { %v2910_v12 = vsub.f32 1.5, %v2909_v30  ;;  %7033 = vmatmul.msk.f32.gmra.mxu1 %vm857_vm4, %v3126_v46  ;;  %v9598_v30 = vld [vmem:[%s11845_s5 + $0x3] ss:$0 sm:$0xff] }
 0xc22   :  { %v7564_v52 = vpop.eup %7563  ;;  %v2793_v42 = vadd.f32 1e-05, %v2777_v63 }
 0xc23   :  { %v2911_v18 = vmul.f32 %v7562_v28, %v2910_v12  ;;  %v2917_v25 = vmul.f32 %v7564_v52, %v2792_v58  ;;  %vm2923_vm15 = vweird.f32 %v7564_v52 }
 0xc24   :  { %7565 = vrsqrt.f32 %v2793_v42  ;;  %vm2924_vm1 = vmor %vm2922_vm0, %vm2923_vm15  ;;  %vm2932_vm6 = vweird.f32 %v2793_v42 }
 0xc25   :  { %v2915_v15 = vsel %vm2914_vm14, %v7562_v28, %v2911_v18  ;;  %v2918_v51 = vmul.f32 %v7564_v52, %v2917_v25 }
 0xc26   :  { %v2967_v14 = vmul.f32 %v2915_v15, %v9473_v10 }
 0xc27   :  { %v2919_v38 = vmul.f32 0.5, %v2918_v51 }
 0xc28   :  { %v2984_v6 = vmul.f32 %v9375_v61, %v2967_v14 }
 0xc29   :  { %v2920_v53 = vsub.f32 1.5, %v2919_v38 }
 0xc2a   :  { %v7566_v54 = vpop.eup %7565  ;;  %v9574_v0 = vadd.f32 %v9383_v23, %v2984_v6 }
 0xc2b   :  { %v2921_v2 = vmul.f32 %v7564_v52, %v2920_v53  ;;  %v2927_v13 = vmul.f32 %v7566_v54, %v2793_v42  ;;  %vm2933_vm2 = vweird.f32 %v7566_v54 }
 0xc2c   :  { %7022 = vmatmul.msk.f32.gmra.mxu2 %vm711_vm3, %v9574_v0  ;;  %vm2934_vm7 = vmor %vm2932_vm6, %vm2933_vm2 }
 0xc2d   :  { %v2925_v37 = vsel %vm2924_vm1, %v7564_v52, %v2921_v2  ;;  %v2928_v35 = vmul.f32 %v7566_v54, %v2927_v13 }
 0xc2e   :  { %v2968_v10 = vmul.f32 %v2925_v37, %v9485_v48 }
 0xc2f   :  { %v2929_v22 = vmul.f32 0.5, %v2928_v35 }
 0xc30   :  { %v2985_v9 = vmul.f32 %v9375_v61, %v2968_v10 }
 0xc31   :  { %v2930_v49 = vsub.f32 1.5, %v2929_v22 }
 0xc32   :  { %v9581_v60 = vadd.f32 %v9383_v23, %v2985_v9 }
 0xc33   :  { %v2931_v62 = vmul.f32 %v7566_v54, %v2930_v49 }
 0xc34   :  { %7023 = vmatmul.msk.f32.gmra.mxu2 %vm711_vm3, %v9581_v60 }
 0xc35   :  { %v2935_v16 = vsel %vm2934_vm7, %v7566_v54, %v2931_v62 }
 0xc36   :  { %v2969_v36 = vmul.f32 %v2935_v16, %v9492_v56 }
 0xc38   :  { %v2986_v29 = vmul.f32 %v9375_v61, %v2969_v36 }
 0xc3a   :  { %v9588_v48 = vadd.f32 %v9383_v23, %v2986_v29 }
 0xc3c   :  { %7024 = vmatmul.msk.f32.gmra.mxu2 %vm711_vm3, %v9588_v48 }
 0xc51   :  { %v2760_v43 = vpop.xlane.xlu1 %2759 }
 0xc52   :  { %v2778_v26 = vmul.f32 %v2760_v43, %v9248_v17 }
 0xc54   :  { %v2794_v3 = vadd.f32 1e-05, %v2778_v26 }
 0xc56   :  { %7567 = vrsqrt.f32 %v2794_v3  ;;  %vm2942_vm9 = vweird.f32 %v2794_v3 }
 0xc5c   :  { %v7568_v59 = vpop.eup %7567 }
 0xc5d   :  { %v2937_v47 = vmul.f32 %v7568_v59, %v2794_v3  ;;  %v2763_v8 = vpop.xlane.xlu0 %2762  ;;  %vm2943_vm8 = vweird.f32 %v7568_v59 }
 0xc5e   :  { %v2779_v31 = vmul.f32 %v2763_v8, %v9248_v17  ;;  %vm2944_vm10 = vmor %vm2942_vm9, %vm2943_vm8 }
 0xc5f   :  { %v2938_v7 = vmul.f32 %v7568_v59, %v2937_v47 }
 0xc60   :  { %v2795_v4 = vadd.f32 1e-05, %v2779_v31 }
 0xc61   :  { %v2939_v56 = vmul.f32 0.5, %v2938_v7 }
 0xc62   :  { %7569 = vrsqrt.f32 %v2795_v4  ;;  %vm2952_vm12 = vweird.f32 %v2795_v4 }
 0xc63   :  { %v2940_v28 = vsub.f32 1.5, %v2939_v56 }
 0xc65   :  { %v2941_v58 = vmul.f32 %v7568_v59, %v2940_v28 }
 0xc67   :  { %v2945_v40 = vsel %vm2944_vm10, %v7568_v59, %v2941_v58 }
 0xc68   :  { %v2970_v24 = vmul.f32 %v2945_v40, %v9506_v32  ;;  %v7570_v55 = vpop.eup %7569 }
 0xc69   :  { %v2947_v20 = vmul.f32 %v7570_v55, %v2795_v4  ;;  %vm2953_vm11 = vweird.f32 %v7570_v55 }
 0xc6a   :  { %v2987_v46 = vmul.f32 %v9375_v61, %v2970_v24  ;;  %vm2954_vm13 = vmor %vm2952_vm12, %vm2953_vm11 }
 0xc6b   :  { %v2948_v44 = vmul.f32 %v7570_v55, %v2947_v20 }
 0xc6c   :  { %v9602_v63 = vadd.f32 %v9383_v23, %v2987_v46 }
 0xc6d   :  { %v3202_v12 = vpop.f32.mrf.mxu1  ;;  %v2949_v52 = vmul.f32 0.5, %v2948_v44 }
 0xc6e   :  { %v3203_v42 = vadd.f32 %v9598_v30, %v3202_v12  ;;  %v3093_v18 = vpop.f32.mrf.mxu2  ;;  %7025 = vmatmul.msk.f32.gmra.mxu2 %vm711_vm3, %v9602_v63 }
 0xc6f   :  { %v3094_v32 = vadd.f32 %v9524_v50, %v3093_v18  ;;  %v2950_v25 = vsub.f32 1.5, %v2949_v52 }
 0xc70   :  { %v9609_v15 = vadd.f32 %v3203_v42, %v9398_v45 }
 0xc71   :  { %v3127_v51 = vmax.f32 %v3094_v32, 0.0  ;;  %v2951_v14 = vmul.f32 %v7570_v55, %v2950_v25 }
 0xc72   :  { %v3266_v38 = vsel %vm711_vm3, %v9609_v15, 0.0 }
 0xc73   :  { %7034 = vmatmul.msk.f32.gmra.mxu1 %vm857_vm4, %v3127_v51  ;;  %3267 = vadd.xlane.f32.xlu2 %v3266_v38  ;;  %v2955_v6 = vsel %vm2954_vm13, %v7570_v55, %v2951_v14 }
 0xc74   :  { %v2971_v53 = vmul.f32 %v2955_v6, %v9516_v27 }
 0xc76   :  { %v3205_v54 = vpop.f32.mrf.mxu1  ;;  %v2988_v13 = vmul.f32 %v9375_v61, %v2971_v53 }
 0xc77   :  { %v3206_v2 = vadd.f32 %v9598_v30, %v3205_v54 }
 0xc78   :  { %v9618_v45 = vadd.f32 %v9383_v23, %v2988_v13 }
 0xc79   :  { %v3251_v37 = vadd.f32 %v3206_v2, %v9425_v41 }
 0xc7a   :  { %v3096_v35 = vpop.f32.mrf.mxu2  ;;  %7026 = vmatmul.msk.f32.gmra.mxu2 %vm711_vm3, %v9618_v45 }
 0xc7b   :  { %v3269_v10 = vsel %vm711_vm3, %v3251_v37, 0.0  ;;  %v3097_v22 = vadd.f32 %v9524_v50, %v3096_v35 }
 0xc7c   :  { %3270 = vadd.xlane.f32.xlu1 %v3269_v10 }
 0xc7d   :  { %v3128_v27 = vmax.f32 %v3097_v22, 0.0 }
 0xc7e   :  { %v3208_v9 = vpop.f32.mrf.mxu1 }
 0xc7f   :  { %v3209_v49 = vadd.f32 %v9598_v30, %v3208_v9  ;;  %7035 = vmatmul.msk.f32.gmra.mxu1 %vm857_vm4, %v3128_v27 }
 0xc81   :  { %v9628_v61 = vadd.f32 %v3209_v49, %v9444_v34 }
 0xc83   :  { %v3099_v23 = vpop.f32.mrf.mxu2  ;;  %v3272_v41 = vsel %vm711_vm3, %v9628_v61, 0.0 }
 0xc84   :  { %v3100_v62 = vadd.f32 %v9524_v50, %v3099_v23  ;;  %3273 = vadd.xlane.f32.xlu0 %v3272_v41 }
 0xc86   :  { %v3129_v16 = vmax.f32 %v3100_v62, 0.0  ;;  %v3211_v36 = vpop.f32.mrf.mxu1 }
 0xc87   :  { %v3212_v29 = vadd.f32 %v9598_v30, %v3211_v36 }
 0xc88   :  { %7036 = vmatmul.msk.f32.gmra.mxu1 %vm857_vm4, %v3129_v16 }
 0xc89   :  { %v9636_v43 = vadd.f32 %v3212_v29, %v9452_v21 }
 0xc8b   :  { %v3102_v26 = vpop.f32.mrf.mxu2  ;;  %v3275_v34 = vsel %vm711_vm3, %v9636_v43, 0.0 }
 0xc8c   :  { %v3103_v3 = vadd.f32 %v9524_v50, %v3102_v26  ;;  %3276 = vadd.xlane.f32.xlu2 %v3275_v34 }
 0xc8e   :  { %v3130_v59 = vmax.f32 %v3103_v3, 0.0  ;;  %v3214_v47 = vpop.f32.mrf.mxu1 }
 0xc8f   :  { %v3215_v8 = vadd.f32 %v9598_v30, %v3214_v47 }
 0xc90   :  { %7037 = vmatmul.msk.f32.gmra.mxu1 %vm857_vm4, %v3130_v59 }
 0xc91   :  { %v9644_v7 = vadd.f32 %v3215_v8, %v9459_v57 }
 0xc93   :  { %v3278_v21 = vsel %vm711_vm3, %v9644_v7, 0.0 }
 0xc94   :  { %3279 = vadd.xlane.f32.xlu1 %v3278_v21 }
 0xc96   :  { %v3217_v31 = vpop.f32.mrf.mxu1 }
 0xc97   :  { %v3218_v56 = vadd.f32 %v9598_v30, %v3217_v31 }
 0xc99   :  { %v9650_v4 = vadd.f32 %v3218_v56, %v9466_v19 }
 0xc9b   :  { %v3281_v28 = vsel %vm711_vm3, %v9650_v4, 0.0 }
 0xc9c   :  { %3282 = vadd.xlane.f32.xlu0 %v3281_v28 }
 0xc9e   :  { %v3220_v58 = vpop.f32.mrf.mxu1 }
 0xc9f   :  { %v3221_v40 = vadd.f32 %v9598_v30, %v3220_v58 }
 0xca1   :  { %v9656_v57 = vadd.f32 %v3221_v40, %v9476_v5 }
 0xca3   :  { %v3284_v24 = vsel %vm711_vm3, %v9656_v57, 0.0 }
 0xca4   :  { %3285 = vadd.xlane.f32.xlu1 %v3284_v24 }
 0xcaf   :  { %v3105_v55 = vpop.f32.mrf.mxu2 }
 0xcb0   :  { %v3106_v20 = vadd.f32 %v9524_v50, %v3105_v55 }
 0xcb2   :  { %v3131_v46 = vmax.f32 %v3106_v20, 0.0 }
 0xcb4   :  { %7038 = vmatmul.msk.f32.gmra.mxu1 %vm857_vm4, %v3131_v46 }
 0xcb7   :  { %v3108_v19 = vpop.f32.mrf.mxu2 }
 0xcb8   :  { %v3109_v44 = vadd.f32 %v9524_v50, %v3108_v19 }
 0xcba   :  { %v3132_v12 = vmax.f32 %v3109_v44, 0.0 }
 0xcbc   :  { %7039 = vmatmul.msk.f32.gmra.mxu1 %vm857_vm4, %v3132_v12 }
 0xcbf   :  { %v3111_v52 = vpop.f32.mrf.mxu2 }
 0xcc0   :  { %v3112_v5 = vadd.f32 %v9524_v50, %v3111_v52 }
 0xcc2   :  { %v3133_v42 = vmax.f32 %v3112_v5, 0.0  ;;  %v3653_v5 = vld [vmem:[%s11846_s6 + $0x60] sm:$0xff] }
 0xcc4   :  { %7040 = vmatmul.msk.f32.gmra.mxu1 %vm857_vm4, %v3133_v42 }
 0xce6   :  { %v3268_v18 = vpop.xlane.xlu2 %3267 }
 0xce7   :  { %v3314_v14 = vmul.f32 %v3268_v18, %v9248_v17 }
 0xce9   :  { %v9676_v10 = vsub.f32 %v9609_v15, %v3314_v14 }
 0xcef   :  { %v3271_v32 = vpop.xlane.xlu1 %3270 }
 0xcf0   :  { %v3315_v25 = vmul.f32 %v3271_v32, %v9248_v17  ;;  %v3223_v51 = vpop.f32.mrf.mxu1  ;;  %v3652_v32 = vld [vmem:[%s11846_s6 + $0x20] sm:$0xff] }
 0xcf1   :  { %v3224_v38 = vadd.f32 %v9598_v30, %v3223_v51  ;;  %v3114_v6 = vpop.f32.mrf.mxu2 }
 0xcf2   :  { %v9669_v53 = vsub.f32 %v3251_v37, %v3315_v25  ;;  %v3115_v54 = vadd.f32 %v9524_v50, %v3114_v6 }
 0xcf3   :  { %v3257_v2 = vadd.f32 %v3224_v38, %v9527_v33  ;;  %v3346_v33 = vmul.f32 %v9676_v10, %v9676_v10 }
 0xcf4   :  { %v3134_v13 = vmax.f32 %v3115_v54, 0.0  ;;  %v3347_v35 = vmul.f32 %v9669_v53, %v9669_v53 }
 0xcf5   :  { %v3287_v22 = vsel %vm711_vm3, %v3257_v2, 0.0  ;;  %v3362_v23 = vsel %vm711_vm3, %v3346_v33, 0.0 }
 0xcf6   :  { %3288 = vadd.xlane.f32.xlu2 %v3287_v22  ;;  %7041 = vmatmul.msk.f32.gmra.mxu1 %vm857_vm4, %v3134_v13  ;;  %v3365_v27 = vsel %vm711_vm3, %v3347_v35, 0.0 }
 0xcf7   :  { %v3274_v37 = vpop.xlane.xlu0 %3273  ;;  %3366 = vadd.xlane.f32.xlu0 %v3365_v27 }
 0xcf8   :  { %v3316_v9 = vmul.f32 %v3274_v37, %v9248_v17 }
 0xcfa   :  { %v9685_v49 = vsub.f32 %v9628_v61, %v3316_v9 }
 0xcfc   :  { %v3348_v15 = vmul.f32 %v9685_v49, %v9685_v49 }
 0xcfd   :  { %v3117_v41 = vpop.f32.mrf.mxu2 }
 0xcfe   :  { %3363 = vadd.xlane.f32.xlu2 %v3362_v23  ;;  %v3368_v62 = vsel %vm711_vm3, %v3348_v15, 0.0  ;;  %v3118_v16 = vadd.f32 %v9524_v50, %v3117_v41 }
 0xcff   :  { %3369 = vadd.xlane.f32.xlu1 %v3368_v62  ;;  %v3277_v36 = vpop.xlane.xlu2 %3276 }
 0xd00   :  { %v3317_v29 = vmul.f32 %v3277_v36, %v9248_v17  ;;  %v3135_v26 = vmax.f32 %v3118_v16, 0.0 }
 0xd02   :  { %v9694_v34 = vsub.f32 %v9636_v43, %v3317_v29  ;;  %7042 = vmatmul.msk.f32.gmra.mxu1 %vm857_vm4, %v3135_v26 }
 0xd04   :  { %v3349_v61 = vmul.f32 %v9694_v34, %v9694_v34 }
 0xd06   :  { %v3371_v3 = vsel %vm711_vm3, %v3349_v61, 0.0 }
 0xd07   :  { %3372 = vadd.xlane.f32.xlu2 %v3371_v3  ;;  %v3280_v59 = vpop.xlane.xlu1 %3279 }
 0xd08   :  { %v3318_v47 = vmul.f32 %v3280_v59, %v9248_v17 }
 0xd0a   :  { %v9702_v50 = vsub.f32 %v9644_v7, %v3318_v47 }
 0xd0c   :  { %v3350_v8 = vmul.f32 %v9702_v50, %v9702_v50 }
 0xd0e   :  { %v3374_v43 = vsel %vm711_vm3, %v3350_v8, 0.0 }
 0xd0f   :  { %v3283_v21 = vpop.xlane.xlu0 %3282  ;;  %3375 = vadd.xlane.f32.xlu0 %v3374_v43 }
 0xd10   :  { %v3319_v31 = vmul.f32 %v3283_v21, %v9248_v17 }
 0xd12   :  { %v9709_v56 = vsub.f32 %v9650_v4, %v3319_v31  ;;  %v3655_v4 = vld [vmem:[%s11846_s6 + $0xe0] sm:$0xff] }
 0xd13   :  { %3735 = vmatpush.msrb.mxu0 %v3655_v4 }
 0xd14   :  { %v3351_v28 = vmul.f32 %v9709_v56, %v9709_v56 }
 0xd16   :  { %v3377_v58 = vsel %vm711_vm3, %v3351_v28, 0.0 }
 0xd17   :  { %3378 = vadd.xlane.f32.xlu1 %v3377_v58  ;;  %v3286_v7 = vpop.xlane.xlu1 %3285 }
 0xd18   :  { %v3320_v40 = vmul.f32 %v3286_v7, %v9248_v17  ;;  %v9747_v7 = vld [vmem:[%s11845_s5 + $0x6] ss:$0 sm:$0xff] }
 0xd1a   :  { %v9716_v24 = vsub.f32 %v9656_v57, %v3320_v40  ;;  %v3654_v57 = vld [vmem:[%s11846_s6 + $0xa0] sm:$0xff] }
 0xd1b   :  { %3736 = vmatpush.msrb.mxu0 %v3654_v57 }
 0xd1c   :  { %v3352_v55 = vmul.f32 %v9716_v24, %v9716_v24 }
 0xd1d   :  { %3737 = vmatpush.msrb.mxu0 %v3653_v5 }
 0xd1e   :  { %v3380_v20 = vsel %vm711_vm3, %v3352_v55, 0.0 }
 0xd1f   :  { %3381 = vadd.xlane.f32.xlu2 %v3380_v20  ;;  %3738 = vmatpush.msrb.mxu0 %v3652_v32 }
 0xd69   :  { %v3289_v46 = vpop.xlane.xlu2 %3288 }
 0xd6a   :  { %v3321_v19 = vmul.f32 %v3289_v46, %v9248_v17  ;;  %v3367_v44 = vpop.xlane.xlu0 %3366  ;;  %v9753_v46 = vld [vmem:[%s11845_s5 + $0x7] ss:$0 sm:$0xff] }
 0xd6b   :  { %v3411_v12 = vmul.f32 %v3367_v44, %v9248_v17 }
 0xd6c   :  { %v9729_v52 = vsub.f32 %v3257_v2, %v3321_v19 }
 0xd6d   :  { %v3427_v42 = vadd.f32 1e-05, %v3411_v12 }
 0xd6e   :  { %v3353_v18 = vmul.f32 %v9729_v52, %v9729_v52 }
 0xd6f   :  { %7571 = vrsqrt.f32 %v3427_v42  ;;  %vm3458_vm2 = vweird.f32 %v3427_v42 }
 0xd70   :  { %v3383_v25 = vsel %vm711_vm3, %v3353_v18, 0.0 }
 0xd71   :  { %v3364_v51 = vpop.xlane.xlu2 %3363  ;;  %3384 = vadd.xlane.f32.xlu0 %v3383_v25 }
 0xd72   :  { %v3410_v14 = vmul.f32 %v3364_v51, %v9248_v17  ;;  %v3370_v38 = vpop.xlane.xlu1 %3369 }
 0xd73   :  { %v3412_v6 = vmul.f32 %v3370_v38, %v9248_v17 }
 0xd74   :  { %v3426_v54 = vadd.f32 1e-05, %v3410_v14 }
 0xd75   :  { %v7572_v2 = vpop.eup %7571  ;;  %v3428_v13 = vadd.f32 1e-05, %v3412_v6 }
 0xd76   :  { %v3453_v35 = vmul.f32 %v7572_v2, %v3427_v42  ;;  %7573 = vrsqrt.f32 %v3426_v54  ;;  %vm3459_vm15 = vweird.f32 %v7572_v2  ;;  %vm3448_vm0 = vweird.f32 %v3426_v54 }
 0xd77   :  { %7575 = vrsqrt.f32 %v3428_v13  ;;  %vm3460_vm6 = vmor %vm3458_vm2, %vm3459_vm15  ;;  %vm3468_vm8 = vweird.f32 %v3428_v13 }
 0xd78   :  { %v3454_v22 = vmul.f32 %v7572_v2, %v3453_v35 }
 0xd7a   :  { %v3373_v27 = vpop.xlane.xlu2 %3372  ;;  %v3455_v15 = vmul.f32 0.5, %v3454_v22 }
 0xd7b   :  { %v3413_v37 = vmul.f32 %v3373_v27, %v9248_v17 }
 0xd7c   :  { %v7574_v9 = vpop.eup %7573  ;;  %v3456_v36 = vsub.f32 1.5, %v3455_v15 }
 0xd7d   :  { %v7576_v33 = vpop.eup %7575  ;;  %v3443_v23 = vmul.f32 %v7574_v9, %v3426_v54  ;;  %v3429_v41 = vadd.f32 1e-05, %v3413_v37  ;;  %vm3449_vm14 = vweird.f32 %v7574_v9 }
 0xd7e   :  { %v3463_v62 = vmul.f32 %v7576_v33, %v3428_v13  ;;  %v3457_v8 = vmul.f32 %v7572_v2, %v3456_v36  ;;  %vm3450_vm1 = vmor %vm3448_vm0, %vm3449_vm14  ;;  %vm3469_vm7 = vweird.f32 %v7576_v33 }
 0xd7f   :  { %v3444_v16 = vmul.f32 %v7574_v9, %v3443_v23  ;;  %7577 = vrsqrt.f32 %v3429_v41  ;;  %vm3470_vm9 = vmor %vm3468_vm8, %vm3469_vm7  ;;  %vm3478_vm11 = vweird.f32 %v3429_v41 }
 0xd80   :  { %v3464_v26 = vmul.f32 %v7576_v33, %v3463_v62  ;;  %v3461_v55 = vsel %vm3460_vm6, %v7572_v2, %v3457_v8 }
 0xd81   :  { %v3445_v29 = vmul.f32 0.5, %v3444_v16  ;;  %v3603_v12 = vmul.f32 %v3461_v55, %v9669_v53 }
 0xd82   :  { %v3376_v61 = vpop.xlane.xlu0 %3375  ;;  %v3465_v21 = vmul.f32 0.5, %v3464_v26 }
 0xd83   :  { %v3446_v3 = vsub.f32 1.5, %v3445_v29  ;;  %v3414_v59 = vmul.f32 %v3376_v61, %v9248_v17  ;;  %v3620_v51 = vmul.f32 %v9747_v7, %v3603_v12 }
 0xd84   :  { %v3466_v20 = vsub.f32 1.5, %v3465_v21 }
 0xd85   :  { %v7578_v47 = vpop.eup %7577  ;;  %v3447_v43 = vmul.f32 %v7574_v9, %v3446_v3  ;;  %v3430_v31 = vadd.f32 1e-05, %v3414_v59  ;;  %v9767_v35 = vadd.f32 %v9753_v46, %v3620_v51 }
 0xd86   :  { %v3473_v28 = vmul.f32 %v7578_v47, %v3429_v41  ;;  %vm3479_vm10 = vweird.f32 %v7578_v47 }
 0xd87   :  { %v3451_v58 = vsel %vm3450_vm1, %v7574_v9, %v3447_v43  ;;  %7579 = vrsqrt.f32 %v3430_v31  ;;  %vm3480_vm12 = vmor %vm3478_vm11, %vm3479_vm10  ;;  %vm3488_vm14 = vweird.f32 %v3430_v31 }
 0xd88   :  { %v3602_v40 = vmul.f32 %v3451_v58, %v9676_v10  ;;  %v3474_v4 = vmul.f32 %v7578_v47, %v3473_v28  ;;  %v3467_v10 = vmul.f32 %v7576_v33, %v3466_v20 }
 0xd8a   :  { %v3619_v19 = vmul.f32 %v9747_v7, %v3602_v40  ;;  %v3379_v44 = vpop.xlane.xlu1 %3378  ;;  %v3475_v18 = vmul.f32 0.5, %v3474_v4  ;;  %v3471_v14 = vsel %vm3470_vm9, %v7576_v33, %v3467_v10 }
 0xd8b   :  { %v3415_v57 = vmul.f32 %v3379_v44, %v9248_v17  ;;  %v3604_v2 = vmul.f32 %v3471_v14, %v9685_v49 }
 0xd8c   :  { %v9759_v5 = vadd.f32 %v9753_v46, %v3619_v19  ;;  %v3476_v38 = vsub.f32 1.5, %v3475_v18 }
 0xd8d   :  { %v7580_v42 = vpop.eup %7579  ;;  %v3431_v32 = vadd.f32 1e-05, %v3415_v57  ;;  %v3621_v33 = vmul.f32 %v9747_v7, %v3604_v2  ;;  %v9816_v2 = vld [vmem:[%s11845_s5 + $0x8] ss:$0 sm:$0xff] }
 0xd8e   :  { %v3483_v25 = vmul.f32 %v7580_v42, %v3430_v31  ;;  %7043 = vmatmul.msk.f32.vlgmr.msrb.gmra.mxu0 %vm711_vm3, %v9759_v5  ;;  %v3477_v27 = vmul.f32 %v7578_v47, %v3476_v38  ;;  %vm3489_vm13 = vweird.f32 %v7580_v42 }
 0xd8f   :  { %7581 = vrsqrt.f32 %v3431_v32  ;;  %v9774_v16 = vadd.f32 %v9753_v46, %v3621_v33  ;;  %vm3490_vm15 = vmor %vm3488_vm14, %vm3489_vm13  ;;  %vm3498_vm1 = vweird.f32 %v3431_v32 }
 0xd90   :  { %v3484_v53 = vmul.f32 %v7580_v42, %v3483_v25  ;;  %v3481_v15 = vsel %vm3480_vm12, %v7578_v47, %v3477_v27 }
 0xd91   :  { %v3605_v62 = vmul.f32 %v3481_v15, %v9694_v34 }
 0xd92   :  { %v3382_v6 = vpop.xlane.xlu2 %3381  ;;  %v3485_v37 = vmul.f32 0.5, %v3484_v53 }
 0xd93   :  { %v3416_v54 = vmul.f32 %v3382_v6, %v9248_v17  ;;  %v3622_v41 = vmul.f32 %v9747_v7, %v3605_v62  ;;  %v3226_v62 = vpop.f32.mrf.mxu1 }
 0xd94   :  { %v3486_v23 = vsub.f32 1.5, %v3485_v37 }
 0xd95   :  { %v7582_v22 = vpop.eup %7581  ;;  %v3432_v13 = vadd.f32 1e-05, %v3416_v54  ;;  %v9781_v8 = vadd.f32 %v9753_v46, %v3622_v41 }
 0xd96   :  { %v3493_v9 = vmul.f32 %v7582_v22, %v3431_v32  ;;  %7044 = vmatmul.msk.f32.gmra.mxu0 %vm711_vm3, %v9767_v35  ;;  %v3487_v29 = vmul.f32 %v7580_v42, %v3486_v23  ;;  %vm3499_vm0 = vweird.f32 %v7582_v22 }
 0xd97   :  { %7583 = vrsqrt.f32 %v3432_v13  ;;  %vm3500_vm2 = vmor %vm3498_vm1, %vm3499_vm0  ;;  %vm3508_vm7 = vweird.f32 %v3432_v13 }
 0xd98   :  { %v3494_v49 = vmul.f32 %v7582_v22, %v3493_v9  ;;  %v3491_v3 = vsel %vm3490_vm15, %v7580_v42, %v3487_v29 }
 0xd99   :  { %v3606_v34 = vmul.f32 %v3491_v3, %v9702_v50 }
 0xd9a   :  { %v3495_v26 = vmul.f32 0.5, %v3494_v49 }
 0xd9b   :  { %v3623_v31 = vmul.f32 %v9747_v7, %v3606_v34 }
 0xd9c   :  { %v3496_v59 = vsub.f32 1.5, %v3495_v26 }
 0xd9d   :  { %v7584_v36 = vpop.eup %7583  ;;  %v9788_v55 = vadd.f32 %v9753_v46, %v3623_v31 }
 0xd9e   :  { %v3503_v61 = vmul.f32 %v7584_v36, %v3432_v13  ;;  %7045 = vmatmul.msk.f32.gmra.mxu0 %vm711_vm3, %v9774_v16  ;;  %v3497_v43 = vmul.f32 %v7582_v22, %v3496_v59  ;;  %vm3509_vm6 = vweird.f32 %v7584_v36 }
 0xd9f   :  { %vm3510_vm8 = vmor %vm3508_vm7, %vm3509_vm6 }
 0xda0   :  { %v3504_v47 = vmul.f32 %v7584_v36, %v3503_v61  ;;  %v3501_v28 = vsel %vm3500_vm2, %v7582_v22, %v3497_v43  ;;  %v3229_v61 = vpop.f32.mrf.mxu1 }
 0xda1   :  { %v3607_v40 = vmul.f32 %v3501_v28, %v9709_v56  ;;  %v3230_v31 = vadd.f32 %v9598_v30, %v3229_v61 }
 0xda2   :  { %v3505_v21 = vmul.f32 0.5, %v3504_v47 }
 0xda3   :  { %v3624_v20 = vmul.f32 %v9747_v7, %v3607_v40 }
 0xda4   :  { %v3506_v58 = vsub.f32 1.5, %v3505_v21 }
 0xda5   :  { %v9795_v44 = vadd.f32 %v9753_v46, %v3624_v20 }
 0xda6   :  { %7046 = vmatmul.msk.f32.gmra.mxu0 %vm711_vm3, %v9781_v8  ;;  %v3507_v50 = vmul.f32 %v7584_v36, %v3506_v58  ;;  %v3259_v58 = vadd.f32 %v3230_v31, %v9548_v1 }
 0xda8   :  { %v3511_v4 = vsel %vm3510_vm8, %v7584_v36, %v3507_v50  ;;  %v3232_v59 = vpop.f32.mrf.mxu1 }
 0xda9   :  { %v3608_v19 = vmul.f32 %v3511_v4, %v9716_v24  ;;  %v3233_v21 = vadd.f32 %v9598_v30, %v3232_v59 }
 0xdab   :  { %v3625_v56 = vmul.f32 %v9747_v7, %v3608_v19  ;;  %v3260_v28 = vadd.f32 %v3233_v21, %v9557_v11  ;;  %v3293_v19 = vsel %vm711_vm3, %v3259_v58, 0.0 }
 0xdad   :  { %v9801_v57 = vadd.f32 %v9753_v46, %v3625_v56  ;;  %v3296_v20 = vsel %vm711_vm3, %v3260_v28, 0.0 }
 0xdae   :  { %7047 = vmatmul.msk.f32.gmra.mxu0 %vm711_vm3, %v9788_v55 }
 0xdaf   :  { %11921 = vst [vmem:[#allocation22_spill] sm:$0xff] %v9801_v57 }
 0xdb0   :  { %v3235_v47 = vpop.f32.mrf.mxu1 }
 0xdb6   :  { %7048 = vmatmul.msk.f32.gmra.mxu0 %vm711_vm3, %v9795_v44 }
 0xdb8   :  { %v3238_v34 = vpop.f32.mrf.mxu1 }
 0xdb9   :  { %v3239_v4 = vadd.f32 %v9598_v30, %v3238_v34 }
 0xdbe   :  { %7049 = vmatmul.msk.f32.gmra.mxu0 %vm711_vm3, %v9801_v57 }
 0xdc0   :  { %v3241_v43 = vpop.f32.mrf.mxu1 }
 0xdc1   :  { %v3242_v50 = vadd.f32 %v9598_v30, %v3241_v43 }
 0xdc3   :  { %v9871_v56 = vadd.f32 %v3242_v50, %v9588_v48 }
 0xdc5   :  { %v3305_v1 = vsel %vm711_vm3, %v9871_v56, 0.0 }
 0xdc8   :  { %v3244_v40 = vpop.f32.mrf.mxu1 }
 0xdd0   :  { %v3247_v11 = vpop.f32.mrf.mxu1 }
 0xde4   :  { %v3385_v12 = vpop.xlane.xlu0 %3384 }
 0xde5   :  { %v3417_v42 = vmul.f32 %v3385_v12, %v9248_v17  ;;  %v9874_v12 = vadd.f32 %v3239_v4, %v9581_v60 }
 0xde7   :  { %v3433_v10 = vadd.f32 1e-05, %v3417_v42  ;;  %v3248_v42 = vadd.f32 %v9598_v30, %v3247_v11 }
 0xde9   :  { %7585 = vrsqrt.f32 %v3433_v10  ;;  %vm3518_vm10 = vweird.f32 %v3433_v10 }
 0xdef   :  { %v7586_v24 = vpop.eup %7585 }
 0xdf0   :  { %v3513_v18 = vmul.f32 %v7586_v24, %v3433_v10  ;;  %vm3519_vm9 = vweird.f32 %v7586_v24  ;;  %v3302_v10 = vsel %vm711_vm3, %v9874_v12, 0.0 }
 0xdf1   :  { %vm3520_vm11 = vmor %vm3518_vm10, %vm3519_vm9 }
 0xdf2   :  { %v3514_v32 = vmul.f32 %v7586_v24, %v3513_v18 }
 0xdf4   :  { %v3515_v25 = vmul.f32 0.5, %v3514_v32  ;;  %v3227_v32 = vadd.f32 %v9598_v30, %v3226_v62 }
 0xdf6   :  { %v3516_v51 = vsub.f32 1.5, %v3515_v25  ;;  %v3258_v25 = vadd.f32 %v3227_v32, %v9539_v39 }
 0xdf8   :  { %v3517_v14 = vmul.f32 %v7586_v24, %v3516_v51  ;;  %v3290_v51 = vsel %vm711_vm3, %v3258_v25, 0.0 }
 0xdfa   :  { %v3521_v38 = vsel %vm3520_vm11, %v7586_v24, %v3517_v14  ;;  %v9882_v24 = vadd.f32 %v3248_v42, %v9618_v45  ;;  %v3236_v45 = vadd.f32 %v9598_v30, %v3235_v47 }
 0xdfb   :  { %v3609_v53 = vmul.f32 %v3521_v38, %v9729_v52 }
 0xdfc   :  { %v3311_v48 = vsel %vm711_vm3, %v9882_v24, 0.0  ;;  %v3261_v14 = vadd.f32 %v3236_v45, %v9574_v0 }
 0xdfd   :  { %v3626_v6 = vmul.f32 %v9747_v7, %v3609_v53  ;;  %v3245_v53 = vadd.f32 %v9598_v30, %v3244_v40 }
 0xdff   :  { %v9809_v54 = vadd.f32 %v9753_v46, %v3626_v6  ;;  %v3299_v6 = vsel %vm711_vm3, %v3261_v14, 0.0 }
 0xe01   :  { %11922 = vst [vmem:[#allocation23_spill] sm:$0xff] %v9809_v54  ;;  %7050 = vmatmul.msk.f32.gmra.mxu0 %vm711_vm3, %v9809_v54 }
 0xe0b   :  { %v3740_v22 = vpop.f32.mrf.mxu0 }
 0xe0c   :  { %v9819_v27 = vadd.f32 %v9816_v2, %v3740_v22  ;;  %v9901_v22 = vadd.f32 %v3245_v53, %v9602_v63 }
 0xe0e   :  { %4198 = vrot.lane.b32.xlu2 %v9819_v27, %s7828_s3  ;;  %v9824_v52 = vmul.f32 0.25, %v9819_v27  ;;  %v3308_v39 = vsel %vm711_vm3, %v9901_v22, 0.0 }
 0xe10   :  { %4182 = vrot.lane.b32.xlu0 %v9824_v52, %s7829_s9 }
 0xe13   :  { %v3743_v37 = vpop.f32.mrf.mxu0 }
 0xe14   :  { %v9829_v13 = vadd.f32 %v9816_v2, %v3743_v37 }
 0xe16   :  { %4200 = vrot.lane.b32.xlu1 %v9829_v13, %s7828_s3 }
 0xe1b   :  { %v3746_v9 = vpop.f32.mrf.mxu0 }
 0xe1c   :  { %v9834_v33 = vadd.f32 %v9816_v2, %v3746_v9 }
 0xe1e   :  { %4202 = vrot.lane.b32.xlu2 %v9834_v33, %s7828_s3 }
 0xe23   :  { %v3749_v15 = vpop.f32.mrf.mxu0 }
 0xe24   :  { %v9839_v23 = vadd.f32 %v9816_v2, %v3749_v15 }
 0xe26   :  { %4204 = vrot.lane.b32.xlu0 %v9839_v23, %s7828_s3 }
 0xe2b   :  { %v3752_v49 = vpop.f32.mrf.mxu0 }
 0xe2c   :  { %v9844_v36 = vadd.f32 %v9816_v2, %v3752_v49 }
 0xe2e   :  { %4206 = vrot.lane.b32.xlu0 %v9844_v36, %s7828_s3 }
 0xe33   :  { %v3755_v29 = vpop.f32.mrf.mxu0 }
 0xe34   :  { %v9849_v26 = vadd.f32 %v9816_v2, %v3755_v29 }
 0xe36   :  { %3814 = vrot.lane.b32.xlu2 %v9849_v26, %s7826_s21  ;;  %4208 = vrot.lane.b32.xlu1 %v9849_v26, %s7828_s3 }
 0xe3b   :  { %v3758_v41 = vpop.f32.mrf.mxu0 }
 0xe3c   :  { %v9856_v3 = vadd.f32 %v9816_v2, %v3758_v41 }
 0xe3e   :  { %4210 = vrot.lane.b32.xlu2 %v9856_v3, %s7828_s3  ;;  %3816 = vrot.lane.b32.xlu1 %v9856_v3, %s7826_s21 }
 0xe67   :  { %3297 = vadd.xlane.f32.xlu2 %v3296_v20 }
 0xe68   :  { %3294 = vadd.xlane.f32.xlu1 %v3293_v19  ;;  %v4199_v38 = vpop.permute.xlu2 %4198 }
 0xe6f   :  { %3306 = vadd.xlane.f32.xlu2 %v3305_v1 }
 0xe70   :  { %3303 = vadd.xlane.f32.xlu1 %v3302_v10 }
 0xe78   :  { %3312 = vadd.xlane.f32.xlu1 %v3311_v48  ;;  %v4203_v37 = vpop.permute.xlu2 %4202 }
 0xe7e   :  { %v3761_v60 = vpop.f32.mrf.mxu0 }
 0xe7f   :  { %v9887_v18 = vadd.f32 %v9816_v2, %v3761_v60 }
 0xe81   :  { %4212 = vrot.lane.b32.xlu0 %v9887_v18, %s7828_s3 }
 0xe82   :  { %v4183_v0 = vpop.permute.xlu0 %4182 }
 0xe88   :  { %v4201_v9 = vpop.permute.xlu1 %4200 }
 0xe89   :  { %3818 = vrot.lane.b32.xlu0 %v9887_v18, %s7826_s21 }
 0xe90   :  { %v3815_v15 = vpop.permute.xlu2 %3814 }
 0xe98   :  { %v4211_v62 = vpop.permute.xlu2 %4210  ;;  %v4205_v21 = vpop.permute.xlu0 %4204 }
 0xea0   :  { %v4207_v50 = vpop.permute.xlu0 %4206 }
 0xea8   :  { %v4209_v49 = vpop.permute.xlu1 %4208 }
 0xeb0   :  { %v3817_v29 = vpop.permute.xlu1 %3816 }
 0xeb3   :  { %3291 = vadd.xlane.f32.xlu0 %v3290_v51 }
 0xebb   :  { %3300 = vadd.xlane.f32.xlu0 %v3299_v6 }
 0xec3   :  { %3309 = vadd.xlane.f32.xlu0 %v3308_v39 }
 0xeda   :  { %v3298_v61 = vpop.xlane.xlu2 %3297 }
 0xedb   :  { %v3324_v30 = vmul.f32 %v3298_v61, %v9248_v17  ;;  %v3295_v41 = vpop.xlane.xlu1 %3294 }
 0xedc   :  { %v3323_v59 = vmul.f32 %v3295_v41, %v9248_v17 }
 0xedd   :  { %v9907_v47 = vsub.f32 %v3260_v28, %v3324_v30  ;;  %v9919_v28 = vmul.f32 0.25, %v9829_v13 }
 0xede   :  { %v9909_v63 = vsub.f32 %v3259_v58, %v3323_v59 }
 0xedf   :  { %v3356_v34 = vmul.f32 %v9907_v47, %v9907_v47 }
 0xee0   :  { %v3355_v43 = vmul.f32 %v9909_v63, %v9909_v63 }
 0xee1   :  { %v3392_v31 = vsel %vm711_vm3, %v3356_v34, 0.0 }
 0xee2   :  { %3393 = vadd.xlane.f32.xlu0 %v3392_v31  ;;  %v3389_v40 = vsel %vm711_vm3, %v3355_v43, 0.0  ;;  %v3307_v4 = vpop.xlane.xlu2 %3306 }
 0xee3   :  { %3390 = vadd.xlane.f32.xlu2 %v3389_v40  ;;  %v3327_v19 = vmul.f32 %v3307_v4, %v9248_v17  ;;  %v3304_v10 = vpop.xlane.xlu1 %3303  ;;  %v9995_v40 = vmul.f32 0.25, %v9844_v36 }
 0xee4   :  { %v3326_v32 = vmul.f32 %v3304_v10, %v9248_v17 }
 0xee5   :  { %v9936_v11 = vsub.f32 %v9871_v56, %v3327_v19 }
 0xee6   :  { %v9948_v56 = vsub.f32 %v9874_v12, %v3326_v32  ;;  %v10012_v32 = vmul.f32 0.25, %v9856_v3 }
 0xee7   :  { %v3359_v1 = vmul.f32 %v9936_v11, %v9936_v11 }
 0xee9   :  { %v3401_v42 = vsel %vm711_vm3, %v3359_v1, 0.0 }
 0xef3   :  { %v4213_v20 = vpop.permute.xlu0 %4212 }
 0xef4   :  { %7083 = vmatpush.xpose.msk.msrb.mxu1 %vm857_vm4, %v4213_v20 }
 0xef6   :  { %4184 = vrot.lane.b32.xlu0 %v9919_v28, %s7829_s9 }
 0xef8   :  { %7084 = vmatpush.xpose.msk.msrb.mxu1 %vm857_vm4, %v4211_v62 }
 0xefb   :  { %v3819_v58 = vpop.permute.xlu0 %3818 }
 0xefc   :  { %7059 = vmatpush.xpose.msk.msra.mxu3 %vm857_vm4, %v3819_v58  ;;  %7085 = vmatpush.xpose.msk.msrb.mxu1 %vm857_vm4, %v4209_v49  ;;  %v10003_v58 = vmul.f32 0.25, %v9849_v26 }
 0xf00   :  { %7060 = vmatpush.xpose.msk.msra.mxu3 %vm857_vm4, %v3817_v29  ;;  %7086 = vmatpush.xpose.msk.msrb.mxu1 %vm857_vm4, %v4207_v50 }
 0xf04   :  { %7061 = vmatpush.xpose.msk.msra.mxu3 %vm857_vm4, %v3815_v15  ;;  %7087 = vmatpush.xpose.msk.msrb.mxu1 %vm857_vm4, %v4205_v21 }
 0xf08   :  { %7088 = vmatpush.xpose.msk.msrb.mxu1 %vm857_vm4, %v4203_v37 }
 0xf0c   :  { %7089 = vmatpush.xpose.msk.msrb.mxu1 %vm857_vm4, %v4201_v9  ;;  %v3358_v9 = vmul.f32 %v9948_v56, %v9948_v56 }
 0xf0e   :  { %v3398_v15 = vsel %vm711_vm3, %v3358_v9, 0.0 }
 0xf10   :  { %7090 = vmatpush.xpose.msk.msrb.mxu1 %vm857_vm4, %v4199_v38 }
 0xf13   :  { %7091 = vmatmul.msk.f32.vlgmr.msrb.gmra.mxu1 %vm857_vm4, %v4183_v0  ;;  %v3313_v0 = vpop.xlane.xlu1 %3312 }
 0xf14   :  { %v3329_v30 = vmul.f32 %v3313_v0, %v9248_v17 }
 0xf16   :  { %v9981_v59 = vsub.f32 %v9882_v24, %v3329_v30 }
 0xf18   :  { %v3361_v43 = vmul.f32 %v9981_v59, %v9981_v59 }
 0xf1a   :  { %v3407_v31 = vsel %vm711_vm3, %v3361_v43, 0.0 }
 0xf20   :  { %3402 = vadd.xlane.f32.xlu0 %v3401_v42 }
 0xf26   :  { %v3292_v48 = vpop.xlane.xlu0 %3291 }
 0xf27   :  { %v3322_v60 = vmul.f32 %v3292_v48, %v9248_v17 }
 0xf29   :  { %v9943_v45 = vsub.f32 %v3258_v25, %v3322_v60  ;;  %v9957_v25 = vmul.f32 0.25, %v9834_v33 }
 0xf2b   :  { %v3354_v51 = vmul.f32 %v9943_v45, %v9943_v45 }
 0xf2d   :  { %v3386_v38 = vsel %vm711_vm3, %v3354_v51, 0.0 }
 0xf2e   :  { %v3301_v53 = vpop.xlane.xlu0 %3300  ;;  %3387 = vadd.xlane.f32.xlu1 %v3386_v38 }
 0xf2f   :  { %v3325_v6 = vmul.f32 %v3301_v53, %v9248_v17 }
 0xf31   :  { %v9952_v37 = vsub.f32 %v3261_v14, %v3325_v6  ;;  %v9966_v14 = vmul.f32 0.25, %v9839_v23 }
 0xf33   :  { %v3357_v39 = vmul.f32 %v9952_v37, %v9952_v37 }
 0xf34   :  { %4186 = vrot.lane.b32.xlu0 %v9957_v25, %s7829_s9 }
 0xf35   :  { %v3395_v12 = vsel %vm711_vm3, %v3357_v39, 0.0 }
 0xf36   :  { %3396 = vadd.xlane.f32.xlu2 %v3395_v12  ;;  %3399 = vadd.xlane.f32.xlu1 %v3398_v15  ;;  %v3310_v49 = vpop.xlane.xlu0 %3309 }
 0xf37   :  { %v3328_v61 = vmul.f32 %v3310_v49, %v9248_v17 }
 0xf39   :  { %v9978_v41 = vsub.f32 %v9901_v22, %v3328_v61  ;;  %v10026_v61 = vmul.f32 0.25, %v9887_v18 }
 0xf3b   :  { %v3360_v34 = vmul.f32 %v9978_v41, %v9978_v41 }
 0xf3c   :  { %4188 = vrot.lane.b32.xlu0 %v9966_v14, %s7829_s9 }
 0xf3d   :  { %v3404_v21 = vsel %vm711_vm3, %v3360_v34, 0.0 }
 0xf4e   :  { %3810 = vrot.lane.b32.xlu2 %v9839_v23, %s7826_s21 }
 0xf4f   :  { %3812 = vrot.lane.b32.xlu1 %v9844_v36, %s7826_s21 }
 0xf55   :  { %v3394_v62 = vpop.xlane.xlu0 %3393 }
 0xf56   :  { %v3391_v22 = vpop.xlane.xlu2 %3390  ;;  %v3420_v20 = vmul.f32 %v3394_v62, %v9248_v17 }
 0xf57   :  { %v3419_v24 = vmul.f32 %v3391_v22, %v9248_v17 }
 0xf58   :  { %v10005_v19 = vadd.f32 1e-05, %v3420_v20 }
 0xf59   :  { %v3435_v50 = vadd.f32 1e-05, %v3419_v24 }
 0xf5a   :  { %vm3548_vm6 = vweird.f32 %v10005_v19 }
 0xf5b   :  { %7587 = vrsqrt.f32 %v3435_v50  ;;  %vm3538_vm0 = vweird.f32 %v3435_v50 }
 0xf5c   :  { %7589 = vrsqrt.f32 %v10005_v19 }
 0xf61   :  { %v7588_v42 = vpop.eup %7587 }
 0xf62   :  { %v3533_v60 = vmul.f32 %v7588_v42, %v3435_v50  ;;  %v10017_v38 = vpop.eup %7589  ;;  %vm3539_vm13 = vweird.f32 %v7588_v42 }
 0xf63   :  { %v3543_v15 = vmul.f32 %v10017_v38, %v10005_v19  ;;  %vm3540_vm1 = vmor %vm3538_vm0, %vm3539_vm13  ;;  %vm3549_vm2 = vweird.f32 %v10017_v38 }
 0xf64   :  { %v3534_v53 = vmul.f32 %v7588_v42, %v3533_v60  ;;  %vm3550_vm7 = vmor %vm3548_vm6, %vm3549_vm2 }
 0xf65   :  { %v3544_v43 = vmul.f32 %v10017_v38, %v3543_v15 }
 0xf68   :  { %v4185_v29 = vpop.permute.xlu0 %4184 }
 0xf69   :  { %7092 = vmatmul.msk.f32.gmra.mxu1 %vm857_vm4, %v4185_v29  ;;  %v3535_v29 = vmul.f32 0.5, %v3534_v53 }
 0xf77   :  { %3405 = vadd.xlane.f32.xlu2 %v3404_v21 }
 0xf79   :  { %3408 = vadd.xlane.f32.xlu1 %v3407_v31  ;;  %v3536_v31 = vsub.f32 1.5, %v3535_v29 }
 0xf7b   :  { %v3537_v60 = vmul.f32 %v7588_v42, %v3536_v31 }
 0xf8f   :  { %3806 = vrot.lane.b32.xlu2 %v9829_v13, %s7826_s21 }
 0xf92   :  { %3808 = vrot.lane.b32.xlu1 %v9834_v33, %s7826_s21 }
 0xf93   :  { %v3403_v4 = vpop.xlane.xlu0 %3402 }
 0xf97   :  { %4190 = vrot.lane.b32.xlu2 %v9995_v40, %s7829_s9 }
 0xf9a   :  { %3804 = vrot.lane.b32.xlu1 %v9819_v27, %s7826_s21 }
 0xf9f   :  { %4192 = vrot.lane.b32.xlu2 %v10003_v58, %s7829_s9 }
 0xfa1   :  { %v3388_v1 = vpop.xlane.xlu1 %3387 }
 0xfa2   :  { %v3418_v10 = vmul.f32 %v3388_v1, %v9248_v17  ;;  %v3545_v1 = vmul.f32 0.5, %v3544_v43 }
 0xfa4   :  { %v3434_v48 = vadd.f32 1e-05, %v3418_v10  ;;  %v3423_v10 = vmul.f32 %v3403_v4, %v9248_v17  ;;  %v3546_v15 = vsub.f32 1.5, %v3545_v1 }
 0xfa6   :  { %7591 = vrsqrt.f32 %v3434_v48  ;;  %v4187_v51 = vpop.permute.xlu0 %4186  ;;  %vm3528_vm14 = vweird.f32 %v3434_v48 }
 0xfa7   :  { %7093 = vmatmul.msk.f32.gmra.mxu1 %vm857_vm4, %v4187_v51  ;;  %4194 = vrot.lane.b32.xlu2 %v10012_v32, %s7829_s9 }
 0xfa9   :  { %v3397_v6 = vpop.xlane.xlu2 %3396  ;;  %v3400_v9 = vpop.xlane.xlu1 %3399 }
 0xfaa   :  { %v3421_v39 = vmul.f32 %v3397_v6, %v9248_v17  ;;  %v3422_v62 = vmul.f32 %v3400_v9, %v9248_v17  ;;  %v3439_v9 = vadd.f32 1e-05, %v3423_v10 }
 0xfac   :  { %v7592_v12 = vpop.eup %7591  ;;  %v10022_v49 = vadd.f32 1e-05, %v3421_v39  ;;  %v10033_v21 = vadd.f32 1e-05, %v3422_v62  ;;  %v3541_v62 = vsel %vm3540_vm1, %v7588_v42, %v3537_v60 }
 0xfad   :  { %v3523_v0 = vmul.f32 %v7592_v12, %v3434_v48  ;;  %vm3529_vm12 = vweird.f32 %v7592_v12 }
 0xfae   :  { %7593 = vrsqrt.f32 %v10022_v49  ;;  %v4189_v30 = vpop.permute.xlu0 %4188  ;;  %vm3530_vm15 = vmor %vm3528_vm14, %vm3529_vm12  ;;  %vm3558_vm9 = vweird.f32 %v10022_v49  ;;  %vm3568_vm12 = vweird.f32 %v10033_v21 }
 0xfaf   :  { %v3524_v34 = vmul.f32 %v7592_v12, %v3523_v0  ;;  %7094 = vmatmul.msk.f32.gmra.mxu1 %vm857_vm4, %v4189_v30  ;;  %4196 = vrot.lane.b32.xlu2 %v10026_v61, %s7829_s9  ;;  %7595 = vrsqrt.f32 %v10033_v21  ;;  %v3611_v30 = vmul.f32 %v3541_v62, %v9909_v63 }
 0xfb0   :  { %7597 = vrsqrt.f32 %v3439_v9 }
 0xfb1   :  { %v3525_v22 = vmul.f32 0.5, %v3524_v34  ;;  %v3547_v34 = vmul.f32 %v10017_v38, %v3546_v15  ;;  %v3628_v63 = vmul.f32 %v9747_v7, %v3611_v30 }
 0xfb3   :  { %v3526_v24 = vsub.f32 1.5, %v3525_v22  ;;  %v3551_v42 = vsel %vm3550_vm7, %v10017_v38, %v3547_v34  ;;  %v10059_v19 = vadd.f32 %v9753_v46, %v3628_v63  ;;  %v3811_v38 = vpop.permute.xlu2 %3810 }
 0xfb4   :  { %v7594_v20 = vpop.eup %7593  ;;  %v3612_v10 = vmul.f32 %v3551_v42, %v9907_v47 }
 0xfb5   :  { %v3527_v51 = vmul.f32 %v7592_v12, %v3526_v24  ;;  %v3553_v53 = vmul.f32 %v7594_v20, %v10022_v49  ;;  %v7596_v0 = vpop.eup %7595  ;;  %11924 = vst [vmem:[#allocation25_spill] sm:$0xff] %v10059_v19  ;;  %vm3559_vm8 = vweird.f32 %v7594_v20 }
 0xfb6   :  { %v7598_v24 = vpop.eup %7597  ;;  %vm3560_vm10 = vmor %vm3558_vm9, %vm3559_vm8  ;;  %vm3569_vm11 = vweird.f32 %v7596_v0 }
 0xfb7   :  { %v3531_v6 = vsel %vm3530_vm15, %v7592_v12, %v3527_v51  ;;  %v3554_v29 = vmul.f32 %v7594_v20, %v3553_v53  ;;  %v3563_v12 = vmul.f32 %v7596_v0, %v10033_v21  ;;  %v3573_v60 = vmul.f32 %v7598_v24, %v3439_v9  ;;  %vm3570_vm13 = vmor %vm3568_vm12, %vm3569_vm11 }
 0xfb8   :  { %v3610_v39 = vmul.f32 %v3531_v6, %v9943_v45  ;;  %v10050_v45 = vpop.f32.mrf.mxu1  ;;  %v3629_v6 = vmul.f32 %v9747_v7, %v3612_v10  ;;  %vm3579_vm14 = vweird.f32 %v7598_v24  ;;  %vm3578_vm15 = vweird.f32 %v3439_v9 }
 0xfb9   :  { %v3555_v50 = vmul.f32 0.5, %v3554_v29  ;;  %v3564_v31 = vmul.f32 %v7596_v0, %v3563_v12  ;;  %v4287_v1 = vsel %vm939_vm5, %v10050_v45, -inf  ;;  %v3574_v47 = vmul.f32 %v7598_v24, %v3573_v60  ;;  %vm3580_vm0 = vmor %vm3578_vm15, %vm3579_vm14 }
 0xfba   :  { %v3627_v4 = vmul.f32 %v9747_v7, %v3610_v39  ;;  %v10068_v29 = vadd.f32 %v9753_v46, %v3629_v6 }
 0xfbb   :  { %v3556_v43 = vsub.f32 1.5, %v3555_v50  ;;  %v3565_v53 = vmul.f32 0.5, %v3564_v31 }
 0xfbc   :  { %v10042_v48 = vadd.f32 %v9753_v46, %v3627_v4  ;;  %11925 = vst [vmem:[#allocation5_spill] sm:$0xff] %v10068_v29  ;;  %v3575_v4 = vmul.f32 0.5, %v3574_v47 }
 0xfbd   :  { %v3557_v51 = vmul.f32 %v7594_v20, %v3556_v43  ;;  %v3566_v15 = vsub.f32 1.5, %v3565_v53 }
 0xfbe   :  { %11923 = vst [vmem:[#allocation24_spill] sm:$0xff] %v10042_v48  ;;  %7051 = vmatmul.msk.f32.gmra.mxu0 %vm711_vm3, %v10042_v48  ;;  %v3576_v34 = vsub.f32 1.5, %v3575_v4 }
 0xfbf   :  { %v3561_v39 = vsel %vm3560_vm10, %v7594_v20, %v3557_v51  ;;  %v3567_v30 = vmul.f32 %v7596_v0, %v3566_v15 }
 0xfc0   :  { %v3613_v62 = vmul.f32 %v3561_v39, %v9952_v37  ;;  %v3577_v12 = vmul.f32 %v7598_v24, %v3576_v34 }
 0xfc1   :  { %v3813_v22 = vpop.permute.xlu1 %3812  ;;  %v3571_v50 = vsel %vm3570_vm13, %v7596_v0, %v3567_v30 }
 0xfc2   :  { %7062 = vmatpush.xpose.msk.msra.mxu3 %vm857_vm4, %v3813_v22  ;;  %v3630_v49 = vmul.f32 %v9747_v7, %v3613_v62  ;;  %v3614_v20 = vmul.f32 %v3571_v50, %v9948_v56  ;;  %v3581_v21 = vsel %vm3580_vm0, %v7598_v24, %v3577_v12 }
 0xfc3   :  { %v3615_v42 = vmul.f32 %v3581_v21, %v9936_v11 }
 0xfc4   :  { %4288 = vmax.xlane.f32.xlu1 %v4287_v1  ;;  %v10076_v37 = vadd.f32 %v9753_v46, %v3630_v49  ;;  %v3631_v63 = vmul.f32 %v9747_v7, %v3614_v20 }
 0xfc5   :  { %v3632_v56 = vmul.f32 %v9747_v7, %v3615_v42 }
 0xfc6   :  { %7052 = vmatmul.msk.f32.gmra.mxu0 %vm711_vm3, %v10059_v19  ;;  %7063 = vmatpush.xpose.msk.msra.mxu3 %vm857_vm4, %v3811_v38  ;;  %11926 = vst [vmem:[#allocation8_spill] sm:$0xff] %v10076_v37  ;;  %v10083_v43 = vadd.f32 %v9753_v46, %v3631_v63 }
 0xfc7   :  { %v10089_v0 = vadd.f32 %v9753_v46, %v3632_v56 }
 0xfc8   :  { %11927 = vst [vmem:[#allocation6_spill] sm:$0xff] %v10083_v43 }
 0xfc9   :  { %11928 = vst [vmem:[#allocation12_spill] sm:$0xff] %v10089_v0 }
 0xfce   :  { %7053 = vmatmul.msk.f32.gmra.mxu0 %vm711_vm3, %v10068_v29 }
 0xfd6   :  { %7054 = vmatmul.msk.f32.gmra.mxu0 %vm711_vm3, %v10076_v37 }
 0xfde   :  { %7055 = vmatmul.msk.f32.gmra.mxu0 %vm711_vm3, %v10083_v43 }
 0xfe6   :  { %7056 = vmatmul.msk.f32.gmra.mxu0 %vm711_vm3, %v10089_v0  ;;  %v10093_v9 = vpop.f32.mrf.mxu1 }
 0xfe7   :  { %v4290_v31 = vsel %vm939_vm5, %v10093_v9, -inf }
 0xfe8   :  { %4291 = vmax.xlane.f32.xlu0 %v4290_v31 }
 0xfea   :  { %v3406_v11 = vpop.xlane.xlu2 %3405 }
 0xfeb   :  { %v3424_v22 = vmul.f32 %v3406_v11, %v9248_v17 }
 0xfec   :  { %v3409_v24 = vpop.xlane.xlu1 %3408 }
 0xfed   :  { %v3440_v1 = vadd.f32 1e-05, %v3424_v22  ;;  %v3425_v10 = vmul.f32 %v3409_v24, %v9248_v17 }
 0xfef   :  { %7599 = vrsqrt.f32 %v3440_v1  ;;  %v3441_v60 = vadd.f32 1e-05, %v3425_v10  ;;  %vm3588_vm2 = vweird.f32 %v3440_v1 }
 0xff1   :  { %7601 = vrsqrt.f32 %v3441_v60  ;;  %vm3598_vm8 = vweird.f32 %v3441_v60 }
 0xff2   :  { %v3807_v51 = vpop.permute.xlu2 %3806 }
 0xff5   :  { %v7600_v53 = vpop.eup %7599 }
 0xff6   :  { %v3583_v38 = vmul.f32 %v7600_v53, %v3440_v1  ;;  %vm3589_vm1 = vweird.f32 %v7600_v53 }
 0xff7   :  { %v7602_v6 = vpop.eup %7601  ;;  %vm3590_vm7 = vmor %vm3588_vm2, %vm3589_vm1 }
 0xff8   :  { %v3584_v47 = vmul.f32 %v7600_v53, %v3583_v38  ;;  %v3593_v39 = vmul.f32 %v7602_v6, %v3441_v60  ;;  %vm3599_vm6 = vweird.f32 %v7602_v6 }
 0xff9   :  { %vm3600_vm9 = vmor %vm3598_vm8, %vm3599_vm6 }
 0xffa   :  { %v3585_v15 = vmul.f32 0.5, %v3584_v47  ;;  %v3594_v62 = vmul.f32 %v7602_v6, %v3593_v39  ;;  %v4191_v4 = vpop.permute.xlu2 %4190 }
 0xffb   :  { %7095 = vmatmul.msk.f32.gmra.mxu1 %vm857_vm4, %v4191_v4 }
 0xffc   :  { %v3586_v30 = vsub.f32 1.5, %v3585_v15  ;;  %v3595_v49 = vmul.f32 0.5, %v3594_v62 }
 0xffe   :  { %v3587_v34 = vmul.f32 %v7600_v53, %v3586_v30  ;;  %v3596_v50 = vsub.f32 1.5, %v3595_v49 }
0x1000   :  { %v3591_v20 = vsel %vm3590_vm7, %v7600_v53, %v3587_v34  ;;  %v3597_v12 = vmul.f32 %v7602_v6, %v3596_v50 }
0x1001   :  { %v3616_v63 = vmul.f32 %v3591_v20, %v9978_v41 }
0x1002   :  { %v3601_v21 = vsel %vm3600_vm9, %v7602_v6, %v3597_v12  ;;  %v4193_v42 = vpop.permute.xlu2 %4192 }
0x1003   :  { %7096 = vmatmul.msk.f32.gmra.mxu1 %vm857_vm4, %v4193_v42  ;;  %v3633_v56 = vmul.f32 %v9747_v7, %v3616_v63  ;;  %v3617_v11 = vmul.f32 %v3601_v21, %v9981_v59 }
0x1004   :  { %v3809_v31 = vpop.permute.xlu1 %3808 }
0x1005   :  { %7064 = vmatpush.xpose.msk.msra.mxu3 %vm857_vm4, %v3809_v31  ;;  %v10106_v22 = vadd.f32 %v9753_v46, %v3633_v56  ;;  %v3634_v41 = vmul.f32 %v9747_v7, %v3617_v11 }
0x1007   :  { %11929 = vst [vmem:[#allocation7_spill] sm:$0xff] %v10106_v22  ;;  %7057 = vmatmul.msk.f32.gmra.mxu0 %vm711_vm3, %v10106_v22  ;;  %v10115_v59 = vadd.f32 %v9753_v46, %v3634_v41 }
0x1009   :  { %7065 = vmatpush.xpose.msk.msra.mxu3 %vm857_vm4, %v3807_v51  ;;  %11930 = vst [vmem:[#allocation10_spill] sm:$0xff] %v10115_v59 }
0x100a   :  { %v4195_v24 = vpop.permute.xlu2 %4194 }
0x100b   :  { %7097 = vmatmul.msk.f32.gmra.mxu1 %vm857_vm4, %v4195_v24 }
0x100c   :  { %v3805_v1 = vpop.permute.xlu1 %3804 }
0x100d   :  { %7066 = vmatpush.xpose.msk.msra.mxu3 %vm857_vm4, %v3805_v1 }
0x100f   :  { %7058 = vmatmul.msk.f32.gmra.mxu0 %vm711_vm3, %v10115_v59 }
0x1010   :  { %7067 = vmatmul.msk.f32.vlgmr.msra.gmra.mxu3 %vm857_vm4, %v9824_v52 }
0x1012   :  { %v4197_v10 = vpop.permute.xlu2 %4196 }
0x1013   :  { %7098 = vmatmul.msk.f32.gmra.mxu1 %vm857_vm4, %v4197_v10 }
0x1018   :  { %7068 = vmatmul.msk.f32.gmra.mxu3 %vm857_vm4, %v9919_v28 }
0x1020   :  { %7069 = vmatmul.msk.f32.gmra.mxu3 %vm857_vm4, %v9957_v25 }
0x1024   :  { %v10126_v7 = vpop.f32.mrf.mxu1 }
0x1025   :  { %v4293_v53 = vsel %vm939_vm5, %v10126_v7, -inf }
0x1028   :  { %7070 = vmatmul.msk.f32.gmra.mxu3 %vm857_vm4, %v9966_v14 }
0x102c   :  { %v10130_v46 = vpop.f32.mrf.mxu1 }
0x102d   :  { %v4296_v60 = vsel %vm939_vm5, %v10130_v46, -inf }
0x102e   :  { %4297 = vmax.xlane.f32.xlu1 %v4296_v60 }
0x1030   :  { %7071 = vmatmul.msk.f32.gmra.mxu3 %vm857_vm4, %v9995_v40 }
0x1038   :  { %7072 = vmatmul.msk.f32.gmra.mxu3 %vm857_vm4, %v10003_v58 }
0x103b   :  { %v3764_v14 = vpop.f32.mrf.mxu0 }
0x1040   :  { %7073 = vmatmul.msk.f32.gmra.mxu3 %vm857_vm4, %v10012_v32  ;;  %v10153_v32 = vadd.f32 %v9816_v2, %v3764_v14 }
0x1042   :  { %v10185_v50 = vmul.f32 0.25, %v10153_v32 }
0x1043   :  { %v3767_v58 = vpop.f32.mrf.mxu0 }
0x1044   :  { %v10164_v47 = vadd.f32 %v9816_v2, %v3767_v58 }
0x1046   :  { %v10197_v63 = vmul.f32 0.25, %v10164_v47 }
0x1048   :  { %7074 = vmatmul.msk.f32.gmra.mxu3 %vm857_vm4, %v10026_v61 }
0x104b   :  { %v3770_v6 = vpop.f32.mrf.mxu0 }
0x104c   :  { %v10175_v4 = vadd.f32 %v9816_v2, %v3770_v6 }
0x104e   :  { %v10218_v31 = vmul.f32 0.25, %v10175_v4 }
0x1053   :  { %v3773_v30 = vpop.f32.mrf.mxu0 }
0x1054   :  { %v10180_v49 = vadd.f32 %v9816_v2, %v3773_v30 }
0x1056   :  { %v10233_v1 = vmul.f32 0.25, %v10180_v49 }
0x105b   :  { %v3776_v34 = vpop.f32.mrf.mxu0 }
0x105c   :  { %v10188_v20 = vadd.f32 %v9816_v2, %v3776_v34 }
0x105e   :  { %v10228_v41 = vmul.f32 0.25, %v10188_v20 }
0x1063   :  { %v3779_v12 = vpop.f32.mrf.mxu0 }
0x1064   :  { %v10200_v21 = vadd.f32 %v9816_v2, %v3779_v12 }
0x1066   :  { %v10211_v42 = vmul.f32 0.25, %v10200_v21 }
0x1078   :  { %v10142_v52 = vpop.f32.mrf.mxu1 }
0x1079   :  { %v4299_v62 = vsel %vm939_vm5, %v10142_v52, -inf }
0x1080   :  { %v10144_v28 = vpop.f32.mrf.mxu1 }
0x1081   :  { %v4302_v25 = vsel %vm939_vm5, %v10144_v28, -inf }
0x1082   :  { %4303 = vmax.xlane.f32.xlu1 %v4302_v25  ;;  %v4292_v25 = vpop.xlane.xlu0 %4291 }
0x1083   :  { %v4312_v14 = vsub.f32 %v10093_v9, %v4292_v25 }
0x1084   :  { %v3782_v56 = vpop.f32.mrf.mxu0 }
0x1085   :  { %v10221_v11 = vadd.f32 %v9816_v2, %v3782_v56 }
0x1087   :  { %v10249_v60 = vmul.f32 0.25, %v10221_v11 }
0x1088   :  { %v10166_v39 = vpop.f32.mrf.mxu1 }
0x1089   :  { %v4305_v15 = vsel %vm939_vm5, %v10166_v39, -inf }
0x108c   :  { %v3785_v24 = vpop.f32.mrf.mxu0 }
0x108d   :  { %v10236_v10 = vadd.f32 %v9816_v2, %v3785_v24  ;;  %v4289_v2 = vpop.xlane.xlu1 %4288 }
0x108e   :  { %v4311_v34 = vsub.f32 %v10050_v45, %v4289_v2 }
0x1090   :  { %v4319_v24 = vmul.f32 1.442695, %v4311_v34 }
0x1093   :  { %v10148_v51 = vpop.f32.mrf.mxu3 }
0x1094   :  { %v3901_v40 = vsel %vm939_vm5, %v10148_v51, -inf }
0x1095   :  { %3902 = vmax.xlane.f32.xlu2 %v3901_v40 }
0x109b   :  { %4624 = vrot.lane.b32.xlu1 %v10153_v32, %s7826_s21  ;;  %v10157_v61 = vpop.f32.mrf.mxu3 }
0x109c   :  { %v3904_v38 = vsel %vm939_vm5, %v10157_v61, -inf }
0x109d   :  { %4294 = vmax.xlane.f32.xlu2 %v4293_v53  ;;  %3905 = vmax.xlane.f32.xlu0 %v3904_v38  ;;  %v4321_v53 = vmul.f32 1.442695, %v4312_v14  ;;  %v10258_v38 = vpop.f32.mrf.mxu1 }
0x109f   :  { %7603 = vpow2.f32 %v4321_v53 }
0x10a0   :  { %7605 = vpow2.f32 %v4319_v24 }
0x10a1   :  { %v10254_v40 = vpop.xlane.xlu1 %4297 }
0x10a3   :  { %5020 = vrot.lane.b32.xlu1 %v10164_v47, %s7828_s3  ;;  %v10256_v58 = vpop.f32.mrf.mxu3 }
0x10a4   :  { %v3907_v6 = vsel %vm939_vm5, %v10256_v58, -inf }
0x10a5   :  { %4306 = vmax.xlane.f32.xlu2 %v4305_v15  ;;  %4300 = vmax.xlane.f32.xlu0 %v4299_v62  ;;  %v4308_v62 = vsel %vm939_vm5, %v10258_v38, -inf  ;;  %v10269_v12 = vpop.eup %7603 }
0x10a6   :  { %v4338_v14 = vsel %vm939_vm5, %v10269_v12, 0.0 }
0x10ab   :  { %4628 = vrot.lane.b32.xlu1 %v10175_v4, %s7826_s21  ;;  %v10266_v30 = vpop.f32.mrf.mxu3 }
0x10ac   :  { %v3910_v56 = vsel %vm939_vm5, %v10266_v30, -inf }
0x10b3   :  { %5024 = vrot.lane.b32.xlu1 %v10180_v49, %s7828_s3 }
0x10b9   :  { %5002 = vrot.lane.b32.xlu0 %v10185_v50, %s7829_s9 }
0x10bb   :  { %4632 = vrot.lane.b32.xlu1 %v10188_v20, %s7826_s21 }
0x10bd   :  { %5018 = vrot.lane.b32.xlu2 %v10153_v32, %s7828_s3 }
0x10c1   :  { %5004 = vrot.lane.b32.xlu0 %v10197_v63, %s7829_s9 }
0x10c3   :  { %5028 = vrot.lane.b32.xlu1 %v10200_v21, %s7828_s3 }
0x10c5   :  { %4626 = vrot.lane.b32.xlu2 %v10164_v47, %s7826_s21 }
0x10c9   :  { %5022 = vrot.lane.b32.xlu0 %v10175_v4, %s7828_s3 }
0x10cb   :  { %5012 = vrot.lane.b32.xlu1 %v10211_v42, %s7829_s9 }
0x10cd   :  { %4630 = vrot.lane.b32.xlu2 %v10180_v49, %s7826_s21 }
0x10d1   :  { %5006 = vrot.lane.b32.xlu0 %v10218_v31, %s7829_s9 }
0x10d3   :  { %4636 = vrot.lane.b32.xlu1 %v10221_v11, %s7826_s21 }
0x10d5   :  { %5010 = vrot.lane.b32.xlu2 %v10228_v41, %s7829_s9 }
0x10d9   :  { %5008 = vrot.lane.b32.xlu0 %v10233_v1, %s7829_s9 }
0x10db   :  { %5032 = vrot.lane.b32.xlu1 %v10236_v10, %s7828_s3 }
0x10dd   :  { %4634 = vrot.lane.b32.xlu2 %v10200_v21, %s7826_s21 }
0x10e1   :  { %5026 = vrot.lane.b32.xlu0 %v10188_v20, %s7828_s3 }
0x10e9   :  { %5030 = vrot.lane.b32.xlu0 %v10221_v11, %s7828_s3 }
0x10f1   :  { %5014 = vrot.lane.b32.xlu0 %v10249_v60, %s7829_s9 }
0x10f5   :  { %v10262_v15 = vpop.xlane.xlu1 %4303 }
0x10f6   :  { %v4316_v29 = vsub.f32 %v10144_v28, %v10262_v15  ;;  %v7325_v28 = vpack.i.bf16 %v9819_v27, %v9829_v13 }
0x10f8   :  { %v4329_v48 = vmul.f32 1.442695, %v4316_v29 }
0x1105   :  { %3908 = vmax.xlane.f32.xlu1 %v3907_v6 }
0x1106   :  { %4309 = vmax.xlane.f32.xlu2 %v4308_v62  ;;  %v10278_v62 = vpop.f32.mrf.mxu3 }
0x1107   :  { %v3913_v34 = vsel %vm939_vm5, %v10278_v62, -inf }
0x1108   :  { %v3903_v9 = vpop.xlane.xlu2 %3902 }
0x110d   :  { %3911 = vmax.xlane.f32.xlu1 %v3910_v56  ;;  %v10273_v25 = vpop.permute.xlu1 %4624  ;;  %v10284_v56 = vpop.eup %7605 }
0x110e   :  { %4339 = vadd.xlane.f32.xlu2 %v4338_v14  ;;  %v4335_v14 = vsel %vm939_vm5, %v10284_v56, 0.0 }
0x1110   :  { %v4295_v53 = vpop.xlane.xlu2 %4294  ;;  %v3906_v59 = vpop.xlane.xlu0 %3905 }
0x1111   :  { %v4313_v6 = vsub.f32 %v10126_v7, %v4295_v53  ;;  %v10294_v53 = vpop.f32.mrf.mxu3 }
0x1113   :  { %v4323_v45 = vmul.f32 1.442695, %v4313_v6 }
0x1115   :  { %7607 = vpow2.f32 %v4323_v45  ;;  %v10280_v2 = vpop.permute.xlu1 %5020 }
0x1116   :  { %3914 = vmax.xlane.f32.xlu2 %v3913_v34  ;;  %v10299_v34 = vpack.i.bf16 %v9844_v36, %v9849_v26  ;;  %v10318_v26 = vpack.i.bf16 %v9856_v3, %v9887_v18 }
0x1118   :  { %v4301_v6 = vpop.xlane.xlu0 %4300 }
0x1119   :  { %v4315_v45 = vsub.f32 %v10142_v52, %v4301_v6  ;;  %v3925_v52 = vsub.f32 %v10148_v51, %v3903_v9  ;;  %v10330_v9 = vpack.i.bf16 %v9834_v33, %v9839_v23  ;;  %v4307_v33 = vpop.xlane.xlu2 %4306 }
0x111b   :  { %v10288_v22 = vpop.eup %7607  ;;  %4336 = vadd.xlane.f32.xlu0 %v4335_v14  ;;  %v3916_v14 = vsel %vm939_vm5, %v10294_v53, -inf  ;;  %v4327_v43 = vmul.f32 1.442695, %v4315_v45  ;;  %v3933_v45 = vmul.f32 1.442695, %v3925_v52  ;;  %v3926_v52 = vsub.f32 %v10157_v61, %v3906_v59 }
0x111c   :  { %v4341_v7 = vsel %vm939_vm5, %v10288_v22, 0.0  ;;  %v4317_v59 = vsub.f32 %v10166_v39, %v4307_v33 }
0x111d   :  { %v10292_v24 = vpop.permute.xlu1 %4628  ;;  %7609 = vpow2.f32 %v4327_v43  ;;  %v3935_v23 = vmul.f32 1.442695, %v3926_v52 }
0x111e   :  { %4342 = vadd.xlane.f32.xlu2 %v4341_v7  ;;  %v10307_v7 = vpop.f32.mrf.mxu3  ;;  %7611 = vpow2.f32 %v3933_v45  ;;  %v4331_v15 = vmul.f32 1.442695, %v4317_v59 }
0x111f   :  { %v3919_v36 = vsel %vm939_vm5, %v10307_v7, -inf  ;;  %7613 = vpow2.f32 %v3935_v23 }
0x1120   :  { %7615 = vpow2.f32 %v4329_v48 }
0x1121   :  { %v5019_v52 = vpop.permute.xlu2 %5018  ;;  %7617 = vpow2.f32 %v4331_v15 }
0x1125   :  { %v10301_v0 = vpop.permute.xlu1 %5024 }
0x1126   :  { %7316 = vrot.lane.b32.xlu1 %v10299_v34, %s7830_s16  ;;  %3917 = vmax.xlane.f32.xlu2 %v3916_v14  ;;  %v10322_v14 = vpop.eup %7609 }
0x1127   :  { %v4347_v51 = vsel %vm939_vm5, %v10322_v14, 0.0  ;;  %v10334_v3 = vpop.eup %7611 }
0x1128   :  { %v3949_v45 = vsel %vm939_vm5, %v10334_v3, 0.0 }
0x1129   :  { %v10366_v13 = vpop.permute.xlu2 %4626 }
0x112b   :  { %v10309_v19 = vpop.permute.xlu0 %5002 }
0x112d   :  { %v10312_v6 = vpop.permute.xlu1 %4632 }
0x112e   :  { %3920 = vmax.xlane.f32.xlu2 %v3919_v36 }
0x112f   :  { %7311 = vrot.lane.b32.xlu0 %v10318_v26, %s7830_s16 }
0x1131   :  { %v10371_v57 = vpop.permute.xlu2 %4630 }
0x1133   :  { %v10324_v37 = vpop.permute.xlu0 %5004 }
0x1135   :  { %v5029_v43 = vpop.permute.xlu1 %5028 }
0x1136   :  { %4348 = vadd.xlane.f32.xlu2 %v4347_v51  ;;  %v10345_v51 = vpop.f32.mrf.mxu3 }
0x1137   :  { %7321 = vrot.lane.b32.xlu0 %v10330_v9, %s7830_s16  ;;  %v3922_v17 = vsel %vm939_vm5, %v10345_v51, -inf }
0x113b   :  { %v5023_v18 = vpop.permute.xlu0 %5022 }
0x113d   :  { %v10337_v36 = vpop.permute.xlu1 %5012 }
0x113e   :  { %3950 = vadd.xlane.f32.xlu2 %v3949_v45  ;;  %v10355_v45 = vpop.eup %7613 }
0x113f   :  { %4638 = vrot.lane.b32.xlu0 %v10236_v10, %s7826_s21  ;;  %v10357_v23 = vpop.eup %7615  ;;  %v3952_v33 = vsel %vm939_vm5, %v10355_v45, 0.0 }
0x1140   :  { %v10364_v27 = vpop.eup %7617 }
0x1141   :  { %v4353_v59 = vsel %vm939_vm5, %v10364_v27, 0.0 }
0x1143   :  { %v5007_v54 = vpop.permute.xlu0 %5006 }
0x1145   :  { %v10348_v61 = vpop.permute.xlu1 %4636 }
0x1146   :  { %3923 = vmax.xlane.f32.xlu2 %v3922_v17  ;;  %v4350_v17 = vsel %vm939_vm5, %v10357_v23, 0.0 }
0x1147   :  { %7326 = vrot.lane.b32.xlu0 %v7325_v28, %s7830_s16 }
0x114b   :  { %v5009_v29 = vpop.permute.xlu0 %5008 }
0x114d   :  { %v5033_v39 = vpop.permute.xlu1 %5032 }
0x114e   :  { %3953 = vadd.xlane.f32.xlu2 %v3952_v33  ;;  %7131 = vmatpush.xpose.msk.msra.mxu1 %vm857_vm4, %v5033_v39  ;;  %v4314_v39 = vsub.f32 %v10130_v46, %v10254_v40 }
0x1150   :  { %4351 = vadd.xlane.f32.xlu1 %v4350_v17  ;;  %v4325_v33 = vmul.f32 1.442695, %v4314_v39  ;;  %v5011_v17 = vpop.permute.xlu2 %5010 }
0x1152   :  { %7619 = vpow2.f32 %v4325_v33 }
0x1153   :  { %v5027_v48 = vpop.permute.xlu0 %5026 }
0x1156   :  { %4354 = vadd.xlane.f32.xlu2 %v4353_v59 }
0x1158   :  { %v10382_v59 = vpop.eup %7619  ;;  %v10388_v40 = vpop.permute.xlu2 %4634 }
0x1159   :  { %v4344_v46 = vsel %vm939_vm5, %v10382_v59, 0.0 }
0x115b   :  { %v5031_v15 = vpop.permute.xlu0 %5030 }
0x115c   :  { %7132 = vmatpush.xpose.msk.msra.mxu1 %vm857_vm4, %v5031_v15 }
0x1160   :  { %7133 = vmatpush.xpose.msk.msra.mxu1 %vm857_vm4, %v5029_v43 }
0x1164   :  { %7134 = vmatpush.xpose.msk.msra.mxu1 %vm857_vm4, %v5027_v48 }
0x1168   :  { %7135 = vmatpush.xpose.msk.msra.mxu1 %vm857_vm4, %v10301_v0  ;;  %v10396_v0 = vpack.i.bf16 %v10221_v11, %v10236_v10 }
0x1169   :  { %7336 = vrot.lane.b32.xlu1 %v10299_v34, %s7827_s22 }
0x116c   :  { %7136 = vmatpush.xpose.msk.msra.mxu1 %vm857_vm4, %v5023_v18 }
0x1170   :  { %7137 = vmatpush.xpose.msk.msra.mxu1 %vm857_vm4, %v10280_v2 }
0x1171   :  { %4345 = vadd.xlane.f32.xlu0 %v4344_v46  ;;  %7346 = vrot.lane.b32.xlu1 %v7325_v28, %s7827_s22 }
0x1174   :  { %7138 = vmatpush.xpose.msk.msra.mxu1 %vm857_vm4, %v5019_v52 }
0x1177   :  { %7139 = vmatmul.msk.f32.vlgmr.msra.gmra.mxu1 %vm857_vm4, %v10309_v19 }
0x1178   :  { %v3909_v34 = vpop.xlane.xlu1 %3908 }
0x1179   :  { %v10398_v43 = vpop.xlane.xlu2 %4309  ;;  %7366 = vrot.lane.b32.xlu1 %v10396_v0, %s7830_s16 }
0x117f   :  { %7140 = vmatmul.msk.f32.gmra.mxu1 %vm857_vm4, %v10324_v37 }
0x1180   :  { %v3912_v2 = vpop.xlane.xlu1 %3911 }
0x1181   :  { %v3928_v18 = vsub.f32 %v10266_v30, %v3912_v2  ;;  %v10405_v28 = vpop.xlane.xlu2 %4339  ;;  %v5015_v30 = vpop.permute.xlu0 %5014 }
0x1182   :  { %vm4379_vm15 = vweird.f32 %v10405_v28 }
0x1183   :  { %v3939_v52 = vmul.f32 1.442695, %v3928_v18 }
0x1185   :  { %7621 = vpow2.f32 %v3939_v52  ;;  %7331 = vrot.lane.b32.xlu0 %v10318_v26, %s7827_s22 }
0x1187   :  { %7141 = vmatmul.msk.f32.gmra.mxu1 %vm857_vm4, %v5007_v54 }
0x1189   :  { %v3915_v19 = vpop.xlane.xlu2 %3914 }
0x118a   :  { %v3929_v11 = vsub.f32 %v10278_v62, %v3915_v19 }
0x118b   :  { %v10411_v48 = vpop.eup %7621 }
0x118c   :  { %v3941_v15 = vmul.f32 1.442695, %v3929_v11  ;;  %v3958_v37 = vsel %vm939_vm5, %v10411_v48, 0.0 }
0x118d   :  { %7341 = vrot.lane.b32.xlu0 %v10330_v9, %s7827_s22  ;;  %3959 = vadd.xlane.f32.xlu2 %v3958_v37 }
0x118e   :  { %7623 = vpow2.f32 %v3941_v15  ;;  %v4337_v39 = vpop.xlane.xlu0 %4336 }
0x118f   :  { %7142 = vmatmul.msk.f32.gmra.mxu1 %vm857_vm4, %v5009_v29  ;;  %vm4364_vm11 = vweird.f32 %v4337_v39 }
0x1191   :  { %v10418_v26 = vpop.xlane.xlu2 %4342 }
0x1192   :  { %vm4394_vm6 = vweird.f32 %v10418_v26 }
0x1194   :  { %v10420_v54 = vpop.eup %7623 }
0x1195   :  { %v3961_v62 = vsel %vm939_vm5, %v10420_v54, 0.0 }
0x1196   :  { %3962 = vadd.xlane.f32.xlu2 %v3961_v62 }
0x1197   :  { %7143 = vmatmul.msk.f32.gmra.mxu1 %vm857_vm4, %v5011_v17  ;;  %v3927_v17 = vsub.f32 %v10256_v58, %v3909_v34 }
0x1198   :  { %v7317_v18 = vpop.permute.xlu1 %7316 }
0x1199   :  { %v3918_v33 = vpop.xlane.xlu2 %3917  ;;  %v7319_v37 = vunpack.i.h.bf16 %v7317_v18  ;;  %v3937_v62 = vmul.f32 1.442695, %v3927_v17 }
0x119a   :  { %v3930_v46 = vsub.f32 %v10294_v53, %v3918_v33  ;;  %v7318_v53 = vunpack.i.l.bf16 %v7317_v18 }
0x119c   :  { %v3943_v9 = vmul.f32 1.442695, %v3930_v46 }
0x119e   :  { %7625 = vpow2.f32 %v3943_v9 }
0x119f   :  { %7627 = vrcp.f32 %v4337_v39  ;;  %7144 = vmatmul.msk.f32.gmra.mxu1 %vm857_vm4, %v10337_v36 }
0x11a0   :  { %7629 = vrcp.f32 %v10405_v28 }
0x11a1   :  { %v7312_v29 = vpop.permute.xlu0 %7311  ;;  %7631 = vpow2.f32 %v3937_v62 }
0x11a2   :  { %v7313_v2 = vunpack.i.l.bf16 %v7312_v29  ;;  %v7314_v19 = vunpack.i.h.bf16 %v7312_v29  ;;  %7633 = vrcp.f32 %v10418_v26 }
0x11a4   :  { %v10428_v52 = vpop.eup %7625  ;;  %4535 = vmatpush.msra.mxu0 %v7313_v2 }
0x11a5   :  { %v7628_v11 = vpop.eup %7627  ;;  %v3964_v15 = vsel %vm939_vm5, %v10428_v52, 0.0 }
0x11a6   :  { %4536 = vmatpush.msra.mxu0 %v7314_v19  ;;  %3965 = vadd.xlane.f32.xlu2 %v3964_v15  ;;  %v4360_v36 = vmul.f32 %v7628_v11, %v4337_v39  ;;  %v7630_v29 = vpop.eup %7629  ;;  %vm4365_vm10 = vweird.f32 %v7628_v11 }
0x11a7   :  { %7145 = vmatmul.msk.f32.gmra.mxu1 %vm857_vm4, %v5015_v30  ;;  %v4375_v34 = vmul.f32 %v7630_v29, %v10405_v28  ;;  %v10438_v30 = vpop.eup %7631  ;;  %vm4366_vm12 = vmor %vm4364_vm11, %vm4365_vm10  ;;  %vm4380_vm14 = vweird.f32 %v7630_v29 }
0x11a8   :  { %4537 = vmatpush.msra.mxu0 %v7318_v53  ;;  %v4361_v9 = vsub.f32 1.0, %v4360_v36  ;;  %v7634_v15 = vpop.eup %7633  ;;  %v4370_v53 = vand.u32 2147483648, %v4337_v39  ;;  %v4368_v36 = vand.u32 2147483647, %v4337_v39  ;;  %vm4381_vm0 = vmor %vm4379_vm15, %vm4380_vm14 }
0x11a9   :  { %v7322_v33 = vpop.permute.xlu0 %7321  ;;  %v4376_v18 = vsub.f32 1.0, %v4375_v34  ;;  %v10445_v34 = vpop.xlane.xlu2 %3920  ;;  %vm4395_vm2 = vweird.f32 %v7634_v15 }
0x11aa   :  { %4538 = vmatpush.msra.mxu0 %v7319_v37  ;;  %v7323_v46 = vunpack.i.l.bf16 %v7322_v33  ;;  %v7324_v58 = vunpack.i.h.bf16 %v7322_v33  ;;  %v4362_v2 = vmul.f32 %v7628_v11, %v4361_v9  ;;  %v3955_v37 = vsel %vm939_vm5, %v10438_v30, 0.0  ;;  %vm4396_vm7 = vmor %vm4394_vm6, %vm4395_vm2 }
0x11ab   :  { %v4377_v62 = vmul.f32 %v7630_v29, %v4376_v18  ;;  %v4371_v9 = vor.u32 1.1754944e-38, %v4370_v53  ;;  %vm4369_vm13 = vcmp.eq.f32.partialorder %v4368_v36, 8.507059e+37  ;;  %v4385_v18 = vand.u32 2147483648, %v10405_v28 }
0x11ac   :  { %4539 = vmatpush.msra.mxu0 %v7323_v46  ;;  %v4363_v17 = vadd.f32 %v7628_v11, %v4362_v2  ;;  %v4390_v46 = vmul.f32 %v7634_v15, %v10418_v26 }
0x11ad   :  { %v4386_v36 = vor.u32 1.1754944e-38, %v4385_v18 }
0x11ae   :  { %4540 = vmatpush.msra.mxu0 %v7324_v58  ;;  %v4367_v33 = vsel %vm4366_vm12, %v7628_v11, %v4363_v17  ;;  %v4378_v11 = vadd.f32 %v7630_v29, %v4377_v62  ;;  %v4400_v62 = vand.u32 2147483648, %v10418_v26 }
0x11af   :  { %v4372_v39 = vsel %vm4369_vm13, %v4371_v9, %v4367_v33  ;;  %v10481_v33 = vpack.i.bf16 %v10188_v20, %v10200_v21 }
0x11b0   :  { %v4373_v53 = vmul.f32 %v10284_v56, %v4372_v39 }
0x11b1   :  { %v4639_v19 = vpop.permute.xlu0 %4638 }
0x11b2   :  { %7107 = vmatpush.xpose.msk.msrb.mxu3 %vm857_vm4, %v4639_v19  ;;  %v10451_v19 = vpack.i.bf16 %v10175_v4, %v10180_v49  ;;  %v4382_v49 = vsel %vm4381_vm0, %v7630_v29, %v4378_v11  ;;  %v4398_v29 = vand.u32 2147483647, %v10418_v26 }
0x11b4   :  { %vm4399_vm8 = vcmp.eq.f32.partialorder %v4398_v29, 8.507059e+37 }
0x11b6   :  { %7108 = vmatpush.xpose.msk.msrb.mxu3 %vm857_vm4, %v10348_v61  ;;  %v4391_v61 = vsub.f32 1.0, %v4390_v46 }
0x11b7   :  { %3956 = vadd.xlane.f32.xlu0 %v3955_v37  ;;  %v10464_v37 = vpop.xlane.xlu2 %4348 }
0x11b8   :  { %v4392_v4 = vmul.f32 %v7634_v15, %v4391_v61  ;;  %7635 = vrcp.f32 %v10464_v37  ;;  %vm4424_vm12 = vweird.f32 %v10464_v37 }
0x11b9   :  { %v7327_v58 = vpop.permute.xlu0 %7326 }
0x11ba   :  { %v7328_v2 = vunpack.i.l.bf16 %v7327_v58  ;;  %7109 = vmatpush.xpose.msk.msrb.mxu3 %vm857_vm4, %v10388_v40  ;;  %v7329_v17 = vunpack.i.h.bf16 %v7327_v58  ;;  %v4383_v40 = vand.u32 2147483647, %v10405_v28  ;;  %v4393_v28 = vadd.f32 %v7634_v15, %v4392_v4 }
0x11bc   :  { %4541 = vmatpush.msra.mxu0 %v7328_v2  ;;  %vm4384_vm1 = vcmp.eq.f32.partialorder %v4383_v40, 8.507059e+37 }
0x11bd   :  { %v4387_v56 = vsel %vm4384_vm1, %v4386_v36, %v4382_v49 }
0x11be   :  { %7110 = vmatpush.xpose.msk.msrb.mxu3 %vm857_vm4, %v10312_v6  ;;  %7356 = vrot.lane.b32.xlu2 %v10451_v19, %s7830_s16  ;;  %v10468_v6 = vpack.i.bf16 %v10153_v32, %v10164_v47  ;;  %v4397_v32 = vsel %vm4396_vm7, %v7634_v15, %v4393_v28  ;;  %v4401_v47 = vor.u32 1.1754944e-38, %v4400_v62 }
0x11bf   :  { %4542 = vmatpush.msra.mxu0 %v7329_v17  ;;  %v10490_v26 = vpop.xlane.xlu2 %3950 }
0x11c0   :  { %7099 = vmatmul.msk.f32.vlgmr.msra.gmra.mxu0 %vm939_vm5, %v4373_v53  ;;  %vm3978_vm7 = vweird.f32 %v10490_v26 }
0x11c2   :  { %7111 = vmatpush.xpose.msk.msrb.mxu3 %vm857_vm4, %v10371_v57  ;;  %v4388_v57 = vmul.f32 %v10269_v12, %v4387_v56  ;;  %v10488_v12 = vmul.f32 0.25, %v10236_v10 }
0x11c3   :  { %v10500_v21 = vpop.xlane.xlu1 %4351 }
0x11c4   :  { %vm4439_vm6 = vweird.f32 %v10500_v21 }
0x11c6   :  { %7112 = vmatpush.xpose.msk.msrb.mxu3 %vm857_vm4, %v10292_v24  ;;  %7361 = vrot.lane.b32.xlu2 %v10468_v6, %s7830_s16  ;;  %v4402_v24 = vsel %vm4399_vm8, %v4401_v47, %v4397_v32 }
0x11c7   :  { %v4403_v20 = vmul.f32 %v10288_v22, %v4402_v24  ;;  %v4428_v24 = vand.u32 2147483647, %v10464_v37 }
0x11c8   :  { %7100 = vmatmul.msk.f32.gmra.mxu0 %vm939_vm5, %v4388_v57  ;;  %v4430_v57 = vand.u32 2147483648, %v10464_v37 }
0x11c9   :  { %vm4429_vm0 = vcmp.eq.f32.partialorder %v4428_v24, 8.507059e+37 }
0x11ca   :  { %7113 = vmatpush.xpose.msk.msrb.mxu3 %vm857_vm4, %v10366_v13  ;;  %v3924_v13 = vpop.xlane.xlu2 %3923 }
0x11cb   :  { %7351 = vrot.lane.b32.xlu0 %v10481_v33, %s7830_s16 }
0x11ce   :  { %7114 = vmatpush.xpose.msk.msrb.mxu3 %vm857_vm4, %v10273_v25  ;;  %5016 = vrot.lane.b32.xlu2 %v10488_v12, %s7829_s9  ;;  %v10509_v25 = vpop.eup %7635 }
0x11cf   :  { %v4420_v9 = vmul.f32 %v10509_v25, %v10464_v37  ;;  %vm4425_vm10 = vweird.f32 %v10509_v25 }
0x11d0   :  { %7101 = vmatmul.msk.f32.gmra.mxu0 %vm939_vm5, %v4403_v20  ;;  %vm10552_vm14 = vmor %vm4424_vm12, %vm4425_vm10 }
0x11d1   :  { %7115 = vmatmul.msk.f32.vlgmr.msrb.gmra.mxu3 %vm857_vm4, %v10185_v50  ;;  %v3931_v50 = vsub.f32 %v10307_v7, %v10445_v34  ;;  %v4421_v2 = vsub.f32 1.0, %v4420_v9  ;;  %v3932_v7 = vsub.f32 %v10345_v51, %v3924_v13 }
0x11d2   :  { %v10511_v22 = vpop.xlane.xlu2 %3953 }
0x11d3   :  { %v3945_v58 = vmul.f32 1.442695, %v3931_v50  ;;  %v4422_v18 = vmul.f32 %v10509_v25, %v4421_v2  ;;  %v3947_v53 = vmul.f32 1.442695, %v3932_v7  ;;  %v4431_v2 = vor.u32 1.1754944e-38, %v4430_v57 }
0x11d5   :  { %v4423_v62 = vadd.f32 %v10509_v25, %v4422_v18 }
0x11d7   :  { %v4427_v37 = vsel %vm10552_vm14, %v10509_v25, %v4423_v62 }
0x11d8   :  { %v4432_v25 = vsel %vm4429_vm0, %v4431_v2, %v4427_v37 }
0x11d9   :  { %7116 = vmatmul.msk.f32.gmra.mxu3 %vm857_vm4, %v10197_v63  ;;  %v4318_v63 = vsub.f32 %v10258_v38, %v10398_v43 }
0x11da   :  { %v10526_v38 = vpop.xlane.xlu2 %4354 }
0x11db   :  { %v10504_v10 = vpop.permute.xlu1 %7336  ;;  %vm4454_vm14 = vweird.f32 %v10526_v38 }
0x11e1   :  { %7117 = vmatmul.msk.f32.gmra.mxu3 %vm857_vm4, %v10218_v31  ;;  %v4333_v31 = vmul.f32 1.442695, %v4318_v63 }
0x11e3   :  { %v10515_v15 = vpop.permute.xlu1 %7346 }
0x11e4   :  { %v4346_v46 = vpop.xlane.xlu0 %4345 }
0x11e5   :  { %7637 = vrcp.f32 %v4346_v46  ;;  %v4415_v51 = vand.u32 2147483648, %v4346_v46  ;;  %v4413_v36 = vand.u32 2147483647, %v4346_v46  ;;  %vm4409_vm11 = vweird.f32 %v4346_v46 }
0x11e6   :  { %7639 = vrcp.f32 %v10500_v21 }
0x11e7   :  { %7641 = vrcp.f32 %v10490_v26  ;;  %v4416_v47 = vor.u32 1.1754944e-38, %v4415_v51  ;;  %vm4414_vm15 = vcmp.eq.f32.partialorder %v4413_v36, 8.507059e+37  ;;  %v3984_v51 = vand.u32 2147483648, %v10490_v26 }
0x11e8   :  { %7643 = vpow2.f32 %v3945_v58 }
0x11e9   :  { %7118 = vmatmul.msk.f32.gmra.mxu3 %vm857_vm4, %v10233_v1  ;;  %7645 = vpow2.f32 %v4333_v31 }
0x11ea   :  { %7647 = vrcp.f32 %v10511_v22 }
0x11eb   :  { %v7638_v34 = vpop.eup %7637  ;;  %v7367_v39 = vpop.permute.xlu1 %7366  ;;  %7649 = vrcp.f32 %v10526_v38 }
0x11ec   :  { %v4405_v43 = vmul.f32 %v7638_v34, %v4346_v46  ;;  %v7368_v61 = vunpack.i.l.bf16 %v7367_v39  ;;  %v10528_v11 = vpop.eup %7639  ;;  %v7369_v40 = vunpack.i.h.bf16 %v7367_v39  ;;  %vm4410_vm9 = vweird.f32 %v7638_v34 }
0x11ed   :  { %v10531_v17 = vpop.eup %7641  ;;  %v4435_v4 = vmul.f32 %v10528_v11, %v10500_v21  ;;  %7651 = vpow2.f32 %v3947_v53  ;;  %vm4411_vm13 = vmor %vm4409_vm11, %vm4410_vm9  ;;  %vm4440_vm2 = vweird.f32 %v10528_v11 }
0x11ee   :  { %v4406_v1 = vsub.f32 1.0, %v4405_v43  ;;  %5355 = vmatpush.msrb.mxu0 %v7368_v61  ;;  %v10537_v56 = vpop.eup %7643  ;;  %v3974_v28 = vmul.f32 %v10531_v17, %v10490_v26  ;;  %vm3979_vm1 = vweird.f32 %v10531_v17  ;;  %vm10602_vm8 = vmor %vm4439_vm6, %vm4440_vm2 }
0x11ef   :  { %v10546_v32 = vpop.eup %7645  ;;  %v3967_v46 = vsel %vm939_vm5, %v10537_v56, 0.0  ;;  %vm10608_vm9 = vmor %vm3978_vm7, %vm3979_vm1 }
0x11f0   :  { %v4407_v49 = vmul.f32 %v7638_v34, %v4406_v1  ;;  %5356 = vmatpush.msrb.mxu0 %v7369_v40  ;;  %v10550_v20 = vpop.eup %7647  ;;  %v3975_v58 = vsub.f32 1.0, %v3974_v28  ;;  %v4356_v7 = vsel %vm939_vm5, %v10546_v32, 0.0  ;;  %v7338_v28 = vunpack.i.l.bf16 %v10504_v10 }
0x11f1   :  { %7119 = vmatmul.msk.f32.gmra.mxu3 %vm857_vm4, %v10228_v41  ;;  %v4436_v41 = vsub.f32 1.0, %v4435_v4  ;;  %v10560_v9 = vpop.eup %7649  ;;  %v3989_v40 = vmul.f32 %v10550_v20, %v10511_v22 }
0x11f2   :  { %v4408_v29 = vadd.f32 %v7638_v34, %v4407_v49  ;;  %v4450_v18 = vmul.f32 %v10560_v9, %v10526_v38  ;;  %v3976_v1 = vmul.f32 %v10531_v17, %v3975_v58  ;;  %v4433_v49 = vmul.f32 %v10322_v14, %v4432_v25 }
0x11f3   :  { %v4437_v61 = vmul.f32 %v10528_v11, %v4436_v41  ;;  %v7339_v14 = vunpack.i.h.bf16 %v10504_v10  ;;  %v4443_v41 = vand.u32 2147483647, %v10500_v21  ;;  %vm4455_vm12 = vweird.f32 %v10560_v9 }
0x11f4   :  { %v10556_v50 = vpop.f32.mrf.mxu1  ;;  %v4412_v63 = vsel %vm4411_vm13, %v7638_v34, %v4408_v29  ;;  %v10568_v34 = vpop.eup %7651  ;;  %v4451_v36 = vsub.f32 1.0, %v4450_v18  ;;  %v3977_v57 = vadd.f32 %v10531_v17, %v3976_v1  ;;  %v3990_v29 = vsub.f32 1.0, %v3989_v40  ;;  %vm4456_vm0 = vmor %vm4454_vm14, %vm4455_vm12 }
0x11f5   :  { %3968 = vadd.xlane.f32.xlu0 %v3967_v46  ;;  %v4417_v31 = vsel %vm4414_vm15, %v4416_v47, %v4412_v63  ;;  %v3970_v4 = vsel %vm939_vm5, %v10568_v34, 0.0  ;;  %v4445_v47 = vand.u32 2147483648, %v10500_v21  ;;  %v5107_v13 = vsel %vm939_vm5, %v10556_v50, -inf }
0x11f6   :  { %v4418_v39 = vmul.f32 %v10382_v59, %v4417_v31  ;;  %v3982_v46 = vand.u32 2147483647, %v10490_v26  ;;  %v4452_v21 = vmul.f32 %v10560_v9, %v4451_v36  ;;  %v3981_v37 = vsel %vm10608_vm9, %v10531_v17, %v3977_v57 }
0x11f7   :  { %v7332_v43 = vpop.permute.xlu0 %7331  ;;  %4357 = vadd.xlane.f32.xlu2 %v4356_v7  ;;  %v3991_v2 = vmul.f32 %v10550_v20, %v3990_v29  ;;  %v4446_v7 = vor.u32 1.1754944e-38, %v4445_v47  ;;  %vm4444_vm10 = vcmp.eq.f32.partialorder %v4443_v41, 8.507059e+37  ;;  %vm3994_vm13 = vweird.f32 %v10550_v20 }
0x11f8   :  { %v7333_v53 = vunpack.i.l.bf16 %v7332_v43  ;;  %7102 = vmatmul.msk.f32.gmra.mxu0 %vm939_vm5, %v4418_v39  ;;  %v7334_v59 = vunpack.i.h.bf16 %v7332_v43  ;;  %v3985_v39 = vor.u32 1.1754944e-38, %v3984_v51  ;;  %vm3983_vm11 = vcmp.eq.f32.partialorder %v3982_v46, 8.507059e+37 }
0x11f9   :  { %7120 = vmatmul.msk.f32.gmra.mxu3 %vm857_vm4, %v10211_v42  ;;  %v4438_v42 = vadd.f32 %v10528_v11, %v4437_v61  ;;  %v4453_v17 = vadd.f32 %v10560_v9, %v4452_v21  ;;  %v3992_v25 = vadd.f32 %v10550_v20, %v3991_v2  ;;  %v7349_v1 = vunpack.i.h.bf16 %v10515_v15 }
0x11fa   :  { %4149 = vmatpush.msrb.mxu2 %v7333_v53  ;;  %v3986_v18 = vsel %vm3983_vm11, %v3985_v39, %v3981_v37  ;;  %v3999_v53 = vand.u32 2147483648, %v10511_v22  ;;  %vm3993_vm15 = vweird.f32 %v10511_v22 }
0x11fb   :  { %v4442_v26 = vsel %vm10602_vm8, %v10528_v11, %v4438_v42  ;;  %v7348_v11 = vunpack.i.l.bf16 %v10515_v15  ;;  %v3987_v51 = vmul.f32 %v10334_v3, %v3986_v18  ;;  %vm3995_vm1 = vmor %vm3993_vm15, %vm3994_vm13  ;;  %v4457_v15 = vsel %vm4456_vm0, %v10560_v9, %v4453_v17 }
0x11fc   :  { %4150 = vmatpush.msrb.mxu2 %v7334_v59  ;;  %v10586_v62 = vpop.f32.mrf.mxu1  ;;  %v4447_v61 = vsel %vm4444_vm10, %v4446_v7, %v4442_v26  ;;  %v4458_v59 = vand.u32 2147483647, %v10526_v38  ;;  %v3996_v3 = vsel %vm3995_vm1, %v10550_v20, %v3992_v25 }
0x11fd   :  { %3971 = vadd.xlane.f32.xlu0 %v3970_v4  ;;  %v5110_v24 = vsel %vm939_vm5, %v10586_v62, -inf  ;;  %v4448_v40 = vmul.f32 %v10357_v23, %v4447_v61 }
0x11fe   :  { %5111 = vmax.xlane.f32.xlu1 %v5110_v24  ;;  %4151 = vmatpush.msrb.mxu2 %v7338_v28  ;;  %vm4459_vm2 = vcmp.eq.f32.partialorder %v4458_v59, 8.507059e+37 }
0x11ff   :  { %v7342_v58 = vpop.permute.xlu0 %7341  ;;  %5108 = vmax.xlane.f32.xlu2 %v5107_v13 }
0x1200   :  { %v7343_v31 = vunpack.i.l.bf16 %v7342_v58  ;;  %4152 = vmatpush.msrb.mxu2 %v7339_v14  ;;  %7103 = vmatmul.msk.f32.gmra.mxu0 %vm939_vm5, %v4433_v49  ;;  %v7344_v43 = vunpack.i.h.bf16 %v7342_v58  ;;  %v10638_v4 = vpop.xlane.xlu2 %3959  ;;  %v3997_v49 = vand.u32 2147483647, %v10511_v22 }
0x1201   :  { %7121 = vmatmul.msk.f32.gmra.mxu3 %vm857_vm4, %v10249_v60  ;;  %v4460_v60 = vand.u32 2147483648, %v10526_v38  ;;  %v4000_v38 = vor.u32 1.1754944e-38, %v3999_v53  ;;  %7653 = vrcp.f32 %v10638_v4  ;;  %v4029_v61 = vand.u32 2147483648, %v10638_v4 }
0x1202   :  { %4153 = vmatpush.msrb.mxu2 %v7343_v31  ;;  %vm3998_vm6 = vcmp.eq.f32.partialorder %v3997_v49, 8.507059e+37  ;;  %vm4023_vm12 = vweird.f32 %v10638_v4  ;;  %v4027_v17 = vand.u32 2147483647, %v10638_v4 }
0x1203   :  { %v4461_v23 = vor.u32 1.1754944e-38, %v4460_v60  ;;  %v4001_v28 = vsel %vm3998_vm6, %v4000_v38, %v3996_v3  ;;  %v4030_v59 = vor.u32 1.1754944e-38, %v4029_v61 }
0x1204   :  { %4154 = vmatpush.msrb.mxu2 %v7344_v43  ;;  %v4002_v42 = vmul.f32 %v10355_v45, %v4001_v28  ;;  %vm4028_vm14 = vcmp.eq.f32.partialorder %v4027_v17, 8.507059e+37 }
0x1205   :  { %v4462_v36 = vsel %vm4459_vm2, %v4461_v23, %v4457_v15 }
0x1206   :  { %4155 = vmatpush.msrb.mxu2 %v7348_v11  ;;  %v4463_v22 = vmul.f32 %v10364_v27, %v4462_v36 }
0x1207   :  { %v7654_v29 = vpop.eup %7653 }
0x1208   :  { %4156 = vmatpush.msrb.mxu2 %v7349_v1  ;;  %7104 = vmatmul.msk.f32.gmra.mxu0 %vm939_vm5, %v4448_v40  ;;  %v4019_v27 = vmul.f32 %v7654_v29, %v10638_v4  ;;  %vm4024_vm9 = vweird.f32 %v7654_v29 }
0x1209   :  { %7122 = vmatmul.msk.f32.gmra.mxu3 %vm857_vm4, %v10488_v12  ;;  %7075 = vmatmul.msk.f32.vlgmr.msrb.gmra.mxu2 %vm939_vm5, %v3987_v51  ;;  %v10650_v9 = vpop.xlane.xlu2 %3962  ;;  %vm4025_vm13 = vmor %vm4023_vm12, %vm4024_vm9 }
0x120a   :  { %v4020_v24 = vsub.f32 1.0, %v4019_v27  ;;  %v4044_v23 = vand.u32 2147483648, %v10650_v9  ;;  %vm4038_vm0 = vweird.f32 %v10650_v9  ;;  %v4042_v36 = vand.u32 2147483647, %v10650_v9 }
0x120c   :  { %v4021_v63 = vmul.f32 %v7654_v29, %v4020_v24  ;;  %vm4043_vm2 = vcmp.eq.f32.partialorder %v4042_v36, 8.507059e+37 }
0x120e   :  { %v4022_v39 = vadd.f32 %v7654_v29, %v4021_v63 }
0x1210   :  { %7105 = vmatmul.msk.f32.gmra.mxu0 %vm939_vm5, %v4463_v22  ;;  %v4026_v40 = vsel %vm4025_vm13, %v7654_v29, %v4022_v39  ;;  %v4045_v29 = vor.u32 1.1754944e-38, %v4044_v23 }
0x1211   :  { %7076 = vmatmul.msk.f32.gmra.mxu2 %vm939_vm5, %v4002_v42  ;;  %v4031_v49 = vsel %vm4028_vm14, %v4030_v59, %v4026_v40 }
0x1212   :  { %v4032_v38 = vmul.f32 %v10411_v48, %v4031_v49 }
0x1219   :  { %v10653_v12 = vpop.xlane.xlu2 %3965 }
0x121a   :  { %v4059_v48 = vand.u32 2147483648, %v10653_v12 }
0x1221   :  { %v10655_v57 = vpop.permute.xlu2 %7356 }
0x1222   :  { %v7359_v3 = vunpack.i.h.bf16 %v10655_v57 }
0x1229   :  { %v10658_v20 = vpop.permute.xlu2 %7361 }
0x122a   :  { %v3957_v47 = vpop.xlane.xlu0 %3956  ;;  %v7363_v22 = vunpack.i.l.bf16 %v10658_v20 }
0x122b   :  { %7655 = vrcp.f32 %v3957_v47  ;;  %v4014_v58 = vand.u32 2147483648, %v3957_v47  ;;  %v4012_v31 = vand.u32 2147483647, %v3957_v47  ;;  %vm4008_vm8 = vweird.f32 %v3957_v47 }
0x122c   :  { %7657 = vrcp.f32 %v10650_v9 }
0x122d   :  { %7659 = vrcp.f32 %v10653_v12  ;;  %v4015_v37 = vor.u32 1.1754944e-38, %v4014_v58  ;;  %vm4013_vm11 = vcmp.eq.f32.partialorder %v4012_v31, 8.507059e+37 }
0x1231   :  { %v7656_v45 = vpop.eup %7655  ;;  %v5017_v14 = vpop.permute.xlu2 %5016 }
0x1232   :  { %v4004_v13 = vmul.f32 %v7656_v45, %v3957_v47  ;;  %7146 = vmatmul.msk.f32.gmra.mxu1 %vm857_vm4, %v5017_v14  ;;  %v7658_v41 = vpop.eup %7657  ;;  %vm4009_vm7 = vweird.f32 %v7656_v45  ;;  %v7364_v47 = vunpack.i.h.bf16 %v10658_v20  ;;  %v4060_v14 = vor.u32 1.1754944e-38, %v4059_v48 }
0x1233   :  { %v4034_v10 = vmul.f32 %v7658_v41, %v10650_v9  ;;  %vm4010_vm10 = vmor %vm4008_vm8, %vm4009_vm7  ;;  %v7660_v43 = vpop.eup %7659  ;;  %vm4039_vm15 = vweird.f32 %v7658_v41  ;;  %vm4053_vm7 = vweird.f32 %v10653_v12 }
0x1234   :  { %v4005_v46 = vsub.f32 1.0, %v4004_v13  ;;  %v4049_v25 = vmul.f32 %v7660_v43, %v10653_v12  ;;  %vm4040_vm1 = vmor %vm4038_vm0, %vm4039_vm15  ;;  %vm4054_vm6 = vweird.f32 %v7660_v43 }
0x1235   :  { %v4035_v2 = vsub.f32 1.0, %v4034_v10  ;;  %vm4055_vm8 = vmor %vm4053_vm7, %vm4054_vm6 }
0x1236   :  { %v4006_v21 = vmul.f32 %v7656_v45, %v4005_v46  ;;  %v4050_v15 = vsub.f32 1.0, %v4049_v25 }
0x1237   :  { %v4036_v60 = vmul.f32 %v7658_v41, %v4035_v2 }
0x1238   :  { %v4007_v26 = vadd.f32 %v7656_v45, %v4006_v21  ;;  %v4051_v28 = vmul.f32 %v7660_v43, %v4050_v15 }
0x1239   :  { %v4037_v4 = vadd.f32 %v7658_v41, %v4036_v60 }
0x123a   :  { %v4011_v7 = vsel %vm4010_vm10, %v7656_v45, %v4007_v26  ;;  %v4057_v45 = vand.u32 2147483647, %v10653_v12 }
0x123b   :  { %v4016_v18 = vsel %vm4013_vm11, %v4015_v37, %v4011_v7  ;;  %v4041_v42 = vsel %vm4040_vm1, %v7658_v41, %v4037_v4 }
0x123c   :  { %v4017_v11 = vmul.f32 %v10438_v30, %v4016_v18  ;;  %v7358_v30 = vunpack.i.l.bf16 %v10655_v57  ;;  %v4046_v27 = vsel %vm4043_vm2, %v4045_v29, %v4041_v42  ;;  %v4052_v57 = vadd.f32 %v7660_v43, %v4051_v28 }
0x123d   :  { %v7352_v53 = vpop.permute.xlu0 %7351  ;;  %v4047_v9 = vmul.f32 %v10420_v54, %v4046_v27  ;;  %vm4058_vm9 = vcmp.eq.f32.partialorder %v4057_v45, 8.507059e+37  ;;  %v10691_v54 = vpop.f32.mrf.mxu1 }
0x123e   :  { %v7353_v1 = vunpack.i.l.bf16 %v7352_v53  ;;  %7077 = vmatmul.msk.f32.gmra.mxu2 %vm939_vm5, %v4017_v11  ;;  %v7354_v51 = vunpack.i.h.bf16 %v7352_v53  ;;  %v4056_v24 = vsel %vm4055_vm8, %v7660_v43, %v4052_v57  ;;  %v5113_v58 = vsel %vm939_vm5, %v10691_v54, -inf }
0x123f   :  { %v4061_v20 = vsel %vm4058_vm9, %v4060_v14, %v4056_v24 }
0x1240   :  { %5357 = vmatpush.msrb.mxu0 %v7353_v1  ;;  %v4062_v41 = vmul.f32 %v10428_v52, %v4061_v20 }
0x1242   :  { %5358 = vmatpush.msrb.mxu0 %v7354_v51 }
0x1244   :  { %5359 = vmatpush.msrb.mxu0 %v7358_v30 }
0x1245   :  { %v10699_v10 = vpop.f32.mrf.mxu1 }
0x1246   :  { %7078 = vmatmul.msk.f32.gmra.mxu2 %vm939_vm5, %v4032_v38  ;;  %5360 = vmatpush.msrb.mxu0 %v7359_v3  ;;  %v5116_v21 = vsel %vm939_vm5, %v10699_v10, -inf }
0x1248   :  { %5361 = vmatpush.msrb.mxu0 %v7363_v22 }
0x124a   :  { %5362 = vmatpush.msrb.mxu0 %v7364_v47 }
0x124d   :  { %v10711_v11 = vpop.f32.mrf.mxu1 }
0x124e   :  { %7079 = vmatmul.msk.f32.gmra.mxu2 %vm939_vm5, %v4047_v9  ;;  %v5119_v49 = vsel %vm939_vm5, %v10711_v11, -inf }
0x1254   :  { %v10685_v13 = vpop.f32.mrf.mxu3 }
0x1255   :  { %v4721_v46 = vsel %vm939_vm5, %v10685_v13, -inf }
0x1256   :  { %4722 = vmax.xlane.f32.xlu2 %v4721_v46  ;;  %7080 = vmatmul.msk.f32.gmra.mxu2 %vm939_vm5, %v4062_v41 }
0x125c   :  { %v10693_v12 = vpop.f32.mrf.mxu3 }
0x125d   :  { %v4724_v63 = vsel %vm939_vm5, %v10693_v12, -inf }
0x125e   :  { %4725 = vmax.xlane.f32.xlu1 %v4724_v63  ;;  %5114 = vmax.xlane.f32.xlu2 %v5113_v58  ;;  %v10725_v58 = vpop.f32.mrf.mxu1 }
0x1264   :  { %v10701_v52 = vpop.f32.mrf.mxu3 }
0x1265   :  { %v4727_v31 = vsel %vm939_vm5, %v10701_v52, -inf }
0x1266   :  { %5117 = vmax.xlane.f32.xlu1 %v5116_v21  ;;  %4728 = vmax.xlane.f32.xlu2 %v4727_v31 }
0x1268   :  { %v3969_v26 = vpop.xlane.xlu0 %3968 }
0x1269   :  { %7661 = vrcp.f32 %v3969_v26  ;;  %v4072_v60 = vand.u32 2147483647, %v3969_v26  ;;  %v4074_v25 = vand.u32 2147483648, %v3969_v26  ;;  %vm4068_vm11 = vweird.f32 %v3969_v26 }
0x126a   :  { %v4358_v37 = vpop.xlane.xlu2 %4357 }
0x126b   :  { %7663 = vrcp.f32 %v4358_v37  ;;  %v4475_v51 = vand.u32 2147483648, %v4358_v37  ;;  %v4473_v4 = vand.u32 2147483647, %v4358_v37  ;;  %vm4073_vm14 = vcmp.eq.f32.partialorder %v4072_v60, 8.507059e+37 }
0x126c   :  { %v10707_v2 = vpop.f32.mrf.mxu3  ;;  %v4075_v3 = vor.u32 1.1754944e-38, %v4074_v25  ;;  %vm4469_vm15 = vweird.f32 %v4358_v37 }
0x126d   :  { %v4730_v7 = vsel %vm939_vm5, %v10707_v2, -inf  ;;  %v4476_v22 = vor.u32 1.1754944e-38, %v4475_v51  ;;  %vm4474_vm1 = vcmp.eq.f32.partialorder %v4473_v4, 8.507059e+37 }
0x126e   :  { %4731 = vmax.xlane.f32.xlu2 %v4730_v7  ;;  %v10737_v7 = vpop.f32.mrf.mxu1 }
0x126f   :  { %v7662_v39 = vpop.eup %7661 }
0x1270   :  { %v4064_v43 = vmul.f32 %v7662_v39, %v3969_v26  ;;  %v3972_v61 = vpop.xlane.xlu0 %3971  ;;  %vm4069_vm10 = vweird.f32 %v7662_v39  ;;  %v5122_v26 = vsel %vm939_vm5, %v10725_v58, -inf }
0x1271   :  { %v7664_v18 = vpop.eup %7663  ;;  %7665 = vrcp.f32 %v3972_v61  ;;  %vm4070_vm13 = vmor %vm4068_vm11, %vm4069_vm10  ;;  %v4089_v57 = vand.u32 2147483648, %v3972_v61  ;;  %v4087_v45 = vand.u32 2147483647, %v3972_v61  ;;  %vm4083_vm6 = vweird.f32 %v3972_v61 }
0x1272   :  { %v4065_v17 = vsub.f32 1.0, %v4064_v43  ;;  %v4465_v53 = vmul.f32 %v7664_v18, %v4358_v37  ;;  %vm4470_vm12 = vweird.f32 %v7664_v18 }
0x1273   :  { %vm4471_vm0 = vmor %vm4469_vm15, %vm4470_vm12  ;;  %vm4088_vm8 = vcmp.eq.f32.partialorder %v4087_v45, 8.507059e+37 }
0x1274   :  { %v4066_v1 = vmul.f32 %v7662_v39, %v4065_v17  ;;  %v4466_v40 = vsub.f32 1.0, %v4465_v53  ;;  %v10713_v59 = vpop.f32.mrf.mxu3  ;;  %v5112_v53 = vpop.xlane.xlu1 %5111 }
0x1275   :  { %v4733_v20 = vsel %vm939_vm5, %v10713_v59, -inf  ;;  %v5132_v25 = vsub.f32 %v10586_v62, %v5112_v53 }
0x1276   :  { %v4067_v15 = vadd.f32 %v7662_v39, %v4066_v1  ;;  %v4467_v30 = vmul.f32 %v7664_v18, %v4466_v40  ;;  %5120 = vmax.xlane.f32.xlu2 %v5119_v49 }
0x1277   :  { %v7666_v23 = vpop.eup %7665 }
0x1278   :  { %v4468_v38 = vadd.f32 %v7664_v18, %v4467_v30  ;;  %v4079_v36 = vmul.f32 %v7666_v23, %v3972_v61  ;;  %v4071_v28 = vsel %vm4070_vm13, %v7662_v39, %v4067_v15  ;;  %vm4084_vm2 = vweird.f32 %v7666_v23  ;;  %v5109_v39 = vpop.xlane.xlu2 %5108 }
0x1279   :  { %v4076_v42 = vsel %vm4073_vm14, %v4075_v3, %v4071_v28  ;;  %vm4085_vm7 = vmor %vm4083_vm6, %vm4084_vm2  ;;  %v5131_v43 = vsub.f32 %v10556_v50, %v5109_v39 }
0x127a   :  { %v4080_v29 = vsub.f32 1.0, %v4079_v36  ;;  %v4077_v47 = vmul.f32 %v10537_v56, %v4076_v42  ;;  %v4472_v27 = vsel %vm4471_vm0, %v7664_v18, %v4468_v38  ;;  %v4090_v56 = vor.u32 1.1754944e-38, %v4089_v57 }
0x127b   :  { %v4477_v48 = vsel %vm4474_vm1, %v4476_v22, %v4472_v27  ;;  %v5139_v17 = vmul.f32 1.442695, %v5131_v43 }
0x127c   :  { %v4081_v9 = vmul.f32 %v7666_v23, %v4080_v29  ;;  %7081 = vmatmul.msk.f32.gmra.mxu2 %vm939_vm5, %v4077_v47  ;;  %v10719_v24 = vpop.f32.mrf.mxu3  ;;  %v4478_v14 = vmul.f32 %v10546_v32, %v4477_v48 }
0x127d   :  { %v4736_v37 = vsel %vm939_vm5, %v10719_v24, -inf  ;;  %7667 = vpow2.f32 %v5139_v17 }
0x127e   :  { %v4082_v41 = vadd.f32 %v7666_v23, %v4081_v9  ;;  %4734 = vmax.xlane.f32.xlu2 %v4733_v20  ;;  %7106 = vmatmul.msk.f32.gmra.mxu0 %vm939_vm5, %v4478_v14 }
0x1280   :  { %v4086_v46 = vsel %vm4085_vm7, %v7666_v23, %v4082_v41 }
0x1281   :  { %v4091_v63 = vsel %vm4088_vm8, %v4090_v56, %v4086_v46 }
0x1282   :  { %v4092_v21 = vmul.f32 %v10568_v34, %v4091_v63  ;;  %v5125_v34 = vsel %vm939_vm5, %v10737_v7, -inf }
0x1283   :  { %v10753_v40 = vpop.eup %7667 }
0x1284   :  { %7082 = vmatmul.msk.f32.gmra.mxu2 %vm939_vm5, %v4092_v21  ;;  %v10729_v32 = vpop.f32.mrf.mxu3  ;;  %v5155_v50 = vsel %vm939_vm5, %v10753_v40, 0.0 }
0x1285   :  { %v4739_v31 = vsel %vm939_vm5, %v10729_v32, -inf }
0x1286   :  { %4740 = vmax.xlane.f32.xlu1 %v4739_v31  ;;  %5123 = vmax.xlane.f32.xlu2 %v5122_v26 }
0x128c   :  { %v10748_v60 = vpop.f32.mrf.mxu3 }
0x128d   :  { %v4742_v1 = vsel %vm939_vm5, %v10748_v60, -inf }
0x128e   :  { %4737 = vmax.xlane.f32.xlu2 %v4736_v37 }
0x1296   :  { %5126 = vmax.xlane.f32.xlu2 %v5125_v34 }
0x12ae   :  { %7376 = vrot.lane.b32.xlu2 %v10481_v33, %s7827_s22  ;;  %v5141_v33 = vmul.f32 1.442695, %v5132_v25  ;;  %v10800_v25 = vpop.f32.mrf.mxu0 }
0x12af   :  { %v10744_v61 = vpop.f32.mrf.mxu1 }
0x12b0   :  { %v5128_v18 = vsel %vm939_vm5, %v10744_v61, -inf  ;;  %7669 = vpow2.f32 %v5141_v33 }
0x12b1   :  { %5129 = vmax.xlane.f32.xlu0 %v5128_v18 }
0x12b6   :  { %v10757_v51 = vpop.eup %7669 }
0x12b7   :  { %v5158_v49 = vsel %vm939_vm5, %v10757_v51, 0.0 }
0x12b9   :  { %4743 = vmax.xlane.f32.xlu0 %v4742_v1 }
0x12c1   :  { %5156 = vadd.xlane.f32.xlu0 %v5155_v50 }
0x12c9   :  { %v4723_v15 = vpop.xlane.xlu2 %4722  ;;  %5159 = vadd.xlane.f32.xlu0 %v5158_v49 }
0x12ca   :  { %v4745_v62 = vsub.f32 %v10685_v13, %v4723_v15 }
0x12cc   :  { %v4753_v30 = vmul.f32 1.442695, %v4745_v62  ;;  %v10810_v62 = vpop.f32.mrf.mxu0 }
0x12ce   :  { %7671 = vpow2.f32 %v4753_v30 }
0x12d1   :  { %v5115_v4 = vpop.xlane.xlu2 %5114  ;;  %v4726_v23 = vpop.xlane.xlu1 %4725 }
0x12d2   :  { %v5133_v3 = vsub.f32 %v10691_v54, %v5115_v4  ;;  %v4746_v38 = vsub.f32 %v10693_v12, %v4726_v23 }
0x12d4   :  { %v10764_v36 = vpop.eup %7671  ;;  %v5143_v28 = vmul.f32 1.442695, %v5133_v3  ;;  %v4755_v22 = vmul.f32 1.442695, %v4746_v38 }
0x12d5   :  { %v4769_v42 = vsel %vm939_vm5, %v10764_v36, 0.0 }
0x12d6   :  { %7673 = vpow2.f32 %v5143_v28  ;;  %4770 = vadd.xlane.f32.xlu1 %v4769_v42 }
0x12d7   :  { %7675 = vpow2.f32 %v4755_v22 }
0x12d9   :  { %v4729_v29 = vpop.xlane.xlu2 %4728  ;;  %v5118_v13 = vpop.xlane.xlu1 %5117 }
0x12da   :  { %v5134_v47 = vsub.f32 %v10699_v10, %v5118_v13  ;;  %v4550_v13 = vpop.f32.mrf.mxu0 }
0x12dc   :  { %v10769_v27 = vpop.eup %7673  ;;  %v5145_v57 = vmul.f32 1.442695, %v5134_v47 }
0x12dd   :  { %v10771_v54 = vpop.eup %7675  ;;  %v5161_v12 = vsel %vm939_vm5, %v10769_v27, 0.0 }
0x12de   :  { %5162 = vadd.xlane.f32.xlu1 %v5161_v12  ;;  %v4772_v48 = vsel %vm939_vm5, %v10771_v54, 0.0  ;;  %7677 = vpow2.f32 %v5145_v57 }
0x12df   :  { %4773 = vadd.xlane.f32.xlu0 %v4772_v48 }
0x12e1   :  { %v4732_v9 = vpop.xlane.xlu2 %4731 }
0x12e4   :  { %v10777_v45 = vpop.eup %7677 }
0x12e5   :  { %v5164_v10 = vsel %vm939_vm5, %v10777_v45, 0.0 }
0x12e6   :  { %5165 = vadd.xlane.f32.xlu1 %v5164_v10 }
0x12e9   :  { %v5121_v14 = vpop.xlane.xlu2 %5120 }
0x12ea   :  { %v5135_v20 = vsub.f32 %v10711_v11, %v5121_v14 }
0x12ec   :  { %v5147_v41 = vmul.f32 1.442695, %v5135_v20 }
0x12ee   :  { %7679 = vpow2.f32 %v5147_v41 }
0x12f1   :  { %v4735_v56 = vpop.xlane.xlu2 %4734 }
0x12f2   :  { %v4749_v33 = vsub.f32 %v10713_v59, %v4735_v56  ;;  %v10833_v56 = vpop.f32.mrf.mxu0 }
0x12f4   :  { %v10782_v46 = vpop.eup %7679 }
0x12f5   :  { %v5167_v63 = vsel %vm939_vm5, %v10782_v46, 0.0 }
0x12f6   :  { %5168 = vadd.xlane.f32.xlu0 %v5167_v63 }
0x12f9   :  { %v5124_v21 = vpop.xlane.xlu2 %5123 }
0x12fa   :  { %v5136_v31 = vsub.f32 %v10725_v58, %v5124_v21  ;;  %v4748_v58 = vsub.f32 %v10707_v2, %v4732_v9  ;;  %v4761_v2 = vmul.f32 1.442695, %v4749_v33 }
0x12fc   :  { %v5149_v26 = vmul.f32 1.442695, %v5136_v31  ;;  %v4759_v17 = vmul.f32 1.442695, %v4748_v58 }
0x12fe   :  { %7681 = vpow2.f32 %v5149_v26 }
0x12ff   :  { %7371 = vrot.lane.b32.xlu1 %v10396_v0, %s7827_s22  ;;  %v4747_v0 = vsub.f32 %v10701_v52, %v4729_v29  ;;  %v4741_v52 = vpop.xlane.xlu1 %4740 }
0x1300   :  { %v4751_v59 = vsub.f32 %v10729_v32, %v4741_v52 }
0x1301   :  { %v4738_v34 = vpop.xlane.xlu2 %4737 }
0x1302   :  { %v4765_v3 = vmul.f32 1.442695, %v4751_v59 }
0x1304   :  { %v10789_v37 = vpop.eup %7681 }
0x1305   :  { %v5170_v11 = vsel %vm939_vm5, %v10789_v37, 0.0 }
0x1306   :  { %5171 = vadd.xlane.f32.xlu2 %v5170_v11 }
0x1309   :  { %v5127_v39 = vpop.xlane.xlu2 %5126 }
0x130a   :  { %7381 = vrot.lane.b32.xlu0 %v10451_v19, %s7827_s22  ;;  %v5137_v43 = vsub.f32 %v10737_v7, %v5127_v39  ;;  %v4757_v19 = vmul.f32 1.442695, %v4747_v0 }
0x130c   :  { %v5151_v18 = vmul.f32 1.442695, %v5137_v43 }
0x130e   :  { %7683 = vpow2.f32 %v5151_v18 }
0x130f   :  { %7685 = vpow2.f32 %v4759_v17 }
0x1310   :  { %7687 = vpow2.f32 %v4757_v19 }
0x1311   :  { %7689 = vpow2.f32 %v4761_v2  ;;  %v4556_v2 = vpop.f32.mrf.mxu0 }
0x1314   :  { %v10802_v1 = vpop.eup %7683 }
0x1315   :  { %v5173_v7 = vsel %vm939_vm5, %v10802_v1, 0.0  ;;  %v10808_v49 = vpop.eup %7685 }
0x1316   :  { %v10812_v30 = vpop.eup %7687  ;;  %v4778_v4 = vsel %vm939_vm5, %v10808_v49, 0.0 }
0x1317   :  { %v4775_v23 = vsel %vm939_vm5, %v10812_v30, 0.0  ;;  %v10821_v22 = vpop.eup %7689 }
0x131e   :  { %7386 = vrot.lane.b32.xlu2 %v10468_v6, %s7827_s22  ;;  %v4750_v6 = vsub.f32 %v10719_v24, %v4738_v34 }
0x1320   :  { %v4763_v15 = vmul.f32 1.442695, %v4750_v6 }
0x1322   :  { %7691 = vpow2.f32 %v4763_v15 }
0x1324   :  { %v5130_v53 = vpop.xlane.xlu0 %5129 }
0x1325   :  { %v5138_v38 = vsub.f32 %v10744_v61, %v5130_v53 }
0x1327   :  { %v5153_v29 = vmul.f32 1.442695, %v5138_v38 }
0x1328   :  { %v10823_v32 = vpop.eup %7691 }
0x1329   :  { %5174 = vadd.xlane.f32.xlu1 %v5173_v7  ;;  %v4784_v61 = vsel %vm939_vm5, %v10823_v32, 0.0 }
0x132c   :  { %v4744_v50 = vpop.xlane.xlu0 %4743 }
0x132d   :  { %v4752_v24 = vsub.f32 %v10748_v60, %v4744_v50  ;;  %v4781_v60 = vsel %vm939_vm5, %v10821_v22, 0.0 }
0x132f   :  { %v4767_v42 = vmul.f32 1.442695, %v4752_v24 }
0x1331   :  { %4779 = vadd.xlane.f32.xlu1 %v4778_v4  ;;  %v4559_v4 = vpop.f32.mrf.mxu0 }
0x1334   :  { %v5157_v28 = vpop.xlane.xlu0 %5156  ;;  %4776 = vadd.xlane.f32.xlu0 %v4775_v23 }
0x1335   :  { %7693 = vrcp.f32 %v5157_v28  ;;  %v5190_v10 = vand.u32 2147483648, %v5157_v28  ;;  %v5188_v41 = vand.u32 2147483647, %v5157_v28  ;;  %vm5184_vm10 = vweird.f32 %v5157_v28 }
0x1336   :  { %7695 = vpow2.f32 %v4765_v3 }
0x1337   :  { %7697 = vpow2.f32 %v4767_v42  ;;  %v5191_v11 = vor.u32 1.1754944e-38, %v5190_v10  ;;  %vm5189_vm12 = vcmp.eq.f32.partialorder %v5188_v41, 8.507059e+37 }
0x1338   :  { %7699 = vpow2.f32 %v5153_v29 }
0x1339   :  { %4782 = vadd.xlane.f32.xlu1 %v4781_v60 }
0x133b   :  { %v7694_v47 = vpop.eup %7693 }
0x133c   :  { %v5180_v57 = vmul.f32 %v7694_v47, %v5157_v28  ;;  %v5160_v12 = vpop.xlane.xlu0 %5159  ;;  %4785 = vadd.xlane.f32.xlu0 %v4784_v61  ;;  %v10829_v48 = vpop.eup %7695  ;;  %vm5185_vm9 = vweird.f32 %v7694_v47 }
0x133d   :  { %7701 = vrcp.f32 %v5160_v12  ;;  %v10831_v14 = vpop.eup %7697  ;;  %v4787_v63 = vsel %vm939_vm5, %v10829_v48, 0.0  ;;  %vm5186_vm11 = vmor %vm5184_vm10, %vm5185_vm9  ;;  %v5205_v53 = vand.u32 2147483648, %v5160_v12  ;;  %v5203_v33 = vand.u32 2147483647, %v5160_v12 }
0x133e   :  { %v5181_v9 = vsub.f32 1.0, %v5180_v57  ;;  %v10837_v21 = vpop.eup %7699  ;;  %v4790_v34 = vsel %vm939_vm5, %v10831_v14, 0.0  ;;  %vm5199_vm14 = vweird.f32 %v5160_v12 }
0x133f   :  { %v5176_v17 = vsel %vm939_vm5, %v10837_v21, 0.0  ;;  %v5206_v50 = vor.u32 1.1754944e-38, %v5205_v53  ;;  %vm5204_vm0 = vcmp.eq.f32.partialorder %v5203_v33, 8.507059e+37 }
0x1340   :  { %v5182_v20 = vmul.f32 %v7694_v47, %v5181_v9 }
0x1341   :  { %4788 = vadd.xlane.f32.xlu1 %v4787_v63 }
0x1342   :  { %v5183_v31 = vadd.f32 %v7694_v47, %v5182_v20 }
0x1343   :  { %v7702_v26 = vpop.eup %7701 }
0x1344   :  { %v5187_v39 = vsel %vm5186_vm11, %v7694_v47, %v5183_v31  ;;  %v5195_v43 = vmul.f32 %v7702_v26, %v5160_v12  ;;  %4791 = vadd.xlane.f32.xlu0 %v4790_v34  ;;  %vm5200_vm13 = vweird.f32 %v7702_v26 }
0x1345   :  { %v5192_v18 = vsel %vm5189_vm12, %v5191_v11, %v5187_v39  ;;  %vm5201_vm15 = vmor %vm5199_vm14, %vm5200_vm13 }
0x1346   :  { %v5193_v58 = vmul.f32 %v10753_v40, %v5192_v18  ;;  %v5196_v0 = vsub.f32 1.0, %v5195_v43 }
0x1347   :  { %5177 = vadd.xlane.f32.xlu2 %v5176_v17 }
0x1348   :  { %v5197_v19 = vmul.f32 %v7702_v26, %v5196_v0  ;;  %7147 = vmatmul.msk.f32.vlgmr.msrb.gmra.mxu0 %vm939_vm5, %v5193_v58  ;;  %v7377_v58 = vpop.permute.xlu2 %7376 }
0x1349   :  { %v10845_v7 = vpop.xlane.xlu1 %4770 }
0x134a   :  { %v5198_v6 = vadd.f32 %v7702_v26, %v5197_v19 }
0x134c   :  { %v5202_v40 = vsel %vm5201_vm15, %v7702_v26, %v5198_v6 }
0x134d   :  { %v5207_v52 = vsel %vm5204_vm0, %v5206_v50, %v5202_v40  ;;  %v7378_v40 = vunpack.i.l.bf16 %v7377_v58 }
0x134e   :  { %v5208_v15 = vmul.f32 %v10757_v51, %v5207_v52  ;;  %v4562_v51 = vpop.f32.mrf.mxu0 }
0x1350   :  { %7148 = vmatmul.msk.f32.gmra.mxu0 %vm939_vm5, %v5208_v15 }
0x1351   :  { %v5163_v59 = vpop.xlane.xlu1 %5162 }
0x1352   :  { %7703 = vrcp.f32 %v5163_v59  ;;  %v5220_v28 = vand.u32 2147483648, %v5163_v59  ;;  %v5218_v29 = vand.u32 2147483647, %v5163_v59  ;;  %vm5214_vm2 = vweird.f32 %v5163_v59  ;;  %v10855_v61 = vpop.xlane.xlu0 %4773 }
0x1354   :  { %v5221_v47 = vor.u32 1.1754944e-38, %v5220_v28  ;;  %vm5219_vm7 = vcmp.eq.f32.partialorder %v5218_v29, 8.507059e+37 }
0x1356   :  { %v4565_v41 = vpop.f32.mrf.mxu0 }
0x1358   :  { %v7704_v24 = vpop.eup %7703  ;;  %4580 = vrot.lane.b32.xlu0 %v4550_v13, %s7831_s17 }
0x1359   :  { %v5210_v23 = vmul.f32 %v7704_v24, %v5163_v59  ;;  %v5166_v3 = vpop.xlane.xlu1 %5165  ;;  %vm5215_vm1 = vweird.f32 %v7704_v24 }
0x135a   :  { %7705 = vrcp.f32 %v5166_v3  ;;  %4578 = vrot.lane.b32.xlu1 %v10810_v62, %s7831_s17  ;;  %vm5216_vm6 = vmor %vm5214_vm2, %vm5215_vm1  ;;  %v5235_v20 = vand.u32 2147483648, %v5166_v3  ;;  %v5233_v63 = vand.u32 2147483647, %v5166_v3  ;;  %vm5229_vm9 = vweird.f32 %v5166_v3 }
0x135b   :  { %v5211_v38 = vsub.f32 1.0, %v5210_v23  ;;  %7707 = vrcp.f32 %v10845_v7  ;;  %vm4798_vm1 = vweird.f32 %v10845_v7 }
0x135c   :  { %vm5234_vm11 = vcmp.eq.f32.partialorder %v5233_v63, 8.507059e+37 }
0x135d   :  { %v5212_v42 = vmul.f32 %v7704_v24, %v5211_v38 }
0x135f   :  { %v5213_v60 = vadd.f32 %v7704_v24, %v5212_v42  ;;  %4576 = vrot.lane.b32.xlu2 %v10800_v25, %s7831_s17 }
0x1360   :  { %4584 = vrot.lane.b32.xlu0 %v4556_v2, %s7831_s17  ;;  %v7706_v13 = vpop.eup %7705 }
0x1361   :  { %v5217_v57 = vsel %vm5216_vm6, %v7704_v24, %v5213_v60  ;;  %v5225_v62 = vmul.f32 %v7706_v13, %v5166_v3  ;;  %vm5230_vm8 = vweird.f32 %v7706_v13  ;;  %v7708_v34 = vpop.eup %7707  ;;  %v7379_v24 = vunpack.i.h.bf16 %v7377_v58 }
0x1362   :  { %v5222_v12 = vsel %vm5219_vm7, %v5221_v47, %v5217_v57  ;;  %4586 = vrot.lane.b32.xlu1 %v4559_v4, %s7831_s17  ;;  %vm5231_vm10 = vmor %vm5229_vm9, %vm5230_vm8  ;;  %v4794_v18 = vmul.f32 %v7708_v34, %v10845_v7  ;;  %vm4799_vm0 = vweird.f32 %v7708_v34  ;;  %vm4813_vm7 = vweird.f32 %v10855_v61 }
0x1363   :  { %v5223_v9 = vmul.f32 %v10769_v27, %v5222_v12  ;;  %v5226_v10 = vsub.f32 1.0, %v5225_v62  ;;  %v5236_v27 = vor.u32 1.1754944e-38, %v5235_v20  ;;  %vm4800_vm2 = vmor %vm4798_vm1, %vm4799_vm0 }
0x1364   :  { %v4795_v53 = vsub.f32 1.0, %v4794_v18 }
0x1365   :  { %7149 = vmatmul.msk.f32.gmra.mxu0 %vm939_vm5, %v5223_v9  ;;  %v5227_v25 = vmul.f32 %v7706_v13, %v5226_v10 }
0x1366   :  { %v4796_v15 = vmul.f32 %v7708_v34, %v4795_v53 }
0x1367   :  { %4582 = vrot.lane.b32.xlu2 %v10833_v56, %s7831_s17  ;;  %v5228_v31 = vadd.f32 %v7706_v13, %v5227_v25 }
0x1368   :  { %4590 = vrot.lane.b32.xlu0 %v4565_v41, %s7831_s17  ;;  %v4797_v28 = vadd.f32 %v7708_v34, %v4796_v15 }
0x1369   :  { %v5169_v26 = vpop.xlane.xlu0 %5168  ;;  %v5232_v11 = vsel %vm5231_vm10, %v7706_v13, %v5228_v31  ;;  %v4802_v13 = vand.u32 2147483647, %v10845_v7 }
0x136a   :  { %7709 = vrcp.f32 %v5169_v26  ;;  %v5237_v39 = vsel %vm5234_vm11, %v5236_v27, %v5232_v11  ;;  %v5248_v52 = vand.u32 2147483647, %v5169_v26  ;;  %vm5244_vm13 = vweird.f32 %v5169_v26 }
0x136b   :  { %v5238_v43 = vmul.f32 %v10777_v45, %v5237_v39  ;;  %7711 = vrcp.f32 %v10855_v61  ;;  %v5250_v45 = vand.u32 2147483648, %v5169_v26  ;;  %v4801_v62 = vsel %vm4800_vm2, %v7708_v34, %v4797_v28 }
0x136c   :  { %vm5249_vm15 = vcmp.eq.f32.partialorder %v5248_v52, 8.507059e+37  ;;  %vm4803_vm6 = vcmp.eq.f32.partialorder %v4802_v13, 8.507059e+37  ;;  %v4819_v27 = vand.u32 2147483648, %v10855_v61 }
0x136d   :  { %7150 = vmatmul.msk.f32.gmra.mxu0 %vm939_vm5, %v5238_v43  ;;  %v5251_v23 = vor.u32 1.1754944e-38, %v5250_v45  ;;  %v3658_v45 = vld [vmem:[%s11846_s6 + $0xa8] sm:$0xff] }
0x136f   :  { %4588 = vrot.lane.b32.xlu2 %v4562_v51, %s7831_s17  ;;  %v4804_v51 = vand.u32 2147483648, %v10845_v7 }
0x1370   :  { %v7710_v56 = vpop.eup %7709 }
0x1371   :  { %v5240_v0 = vmul.f32 %v7710_v56, %v5169_v26  ;;  %v7372_v17 = vpop.permute.xlu1 %7371  ;;  %v10869_v6 = vpop.eup %7711  ;;  %vm5245_vm12 = vweird.f32 %v7710_v56  ;;  %v4805_v25 = vor.u32 1.1754944e-38, %v4804_v51  ;;  %v4817_v26 = vand.u32 2147483647, %v10855_v61 }
0x1372   :  { %v7373_v33 = vunpack.i.l.bf16 %v7372_v17  ;;  %v7374_v50 = vunpack.i.h.bf16 %v7372_v17  ;;  %v4809_v59 = vmul.f32 %v10869_v6, %v10855_v61  ;;  %vm5246_vm14 = vmor %vm5244_vm13, %vm5245_vm12  ;;  %vm4814_vm8 = vweird.f32 %v10869_v6 }
0x1373   :  { %v5241_v19 = vsub.f32 1.0, %v5240_v0  ;;  %vm4815_vm10 = vmor %vm4813_vm7, %vm4814_vm8  ;;  %v4820_v0 = vor.u32 1.1754944e-38, %v4819_v27  ;;  %vm4818_vm13 = vcmp.eq.f32.partialorder %v4817_v26, 8.507059e+37  ;;  %v4158_v26 = vpop.f32.mrf.mxu2 }
0x1374   :  { %4969 = vmatpush.msra.mxu2 %v7373_v33  ;;  %v4810_v42 = vsub.f32 1.0, %v4809_v59 }
0x1375   :  { %v5242_v2 = vmul.f32 %v7710_v56, %v5241_v19 }
0x1376   :  { %4970 = vmatpush.msra.mxu2 %v7374_v50  ;;  %v4811_v12 = vmul.f32 %v10869_v6, %v4810_v42 }
0x1377   :  { %v5243_v4 = vadd.f32 %v7710_v56, %v5242_v2 }
0x1378   :  { %4971 = vmatpush.msra.mxu2 %v7378_v40  ;;  %v4812_v31 = vadd.f32 %v10869_v6, %v4811_v12 }
0x1379   :  { %v5172_v3 = vpop.xlane.xlu2 %5171  ;;  %v5247_v38 = vsel %vm5246_vm14, %v7710_v56, %v5243_v4 }
0x137a   :  { %7713 = vrcp.f32 %v5172_v3  ;;  %4972 = vmatpush.msra.mxu2 %v7379_v24  ;;  %v5252_v29 = vsel %vm5249_vm15, %v5251_v23, %v5247_v38  ;;  %v5265_v11 = vand.u32 2147483648, %v5172_v3  ;;  %v5263_v18 = vand.u32 2147483647, %v5172_v3  ;;  %v3656_v24 = vld [vmem:[%s11846_s6 + $0x28] sm:$0xff] }
0x137b   :  { %v5253_v47 = vmul.f32 %v10782_v46, %v5252_v29  ;;  %v4806_v46 = vsel %vm4803_vm6, %v4805_v25, %v4801_v62  ;;  %vm5259_vm11 = vweird.f32 %v5172_v3  ;;  %v4816_v58 = vsel %vm4815_vm10, %v10869_v6, %v4812_v31  ;;  %v3659_v6 = vld [vmem:[%s11846_s6 + $0xe8] sm:$0xff] }
0x137c   :  { %v7382_v60 = vpop.permute.xlu0 %7381  ;;  %v4807_v39 = vmul.f32 %v10764_v36, %v4806_v46  ;;  %v5266_v17 = vor.u32 1.1754944e-38, %v5265_v11  ;;  %vm5264_vm14 = vcmp.eq.f32.partialorder %v5263_v18, 8.507059e+37  ;;  %v4821_v19 = vsel %vm4818_vm13, %v4820_v0, %v4816_v58  ;;  %5488 = vmatpush.msra.mxu3 %v3659_v6 }
0x137d   :  { %v7383_v57 = vunpack.i.l.bf16 %v7382_v60  ;;  %7151 = vmatmul.msk.f32.gmra.mxu0 %vm939_vm5, %v5253_v47  ;;  %v7384_v9 = vunpack.i.h.bf16 %v7382_v60  ;;  %v4822_v33 = vmul.f32 %v10771_v54, %v4821_v19 }
0x137e   :  { %5489 = vmatpush.msra.mxu3 %v3658_v45 }
0x137f   :  { %4973 = vmatpush.msra.mxu2 %v7383_v57 }
0x1380   :  { %v7714_v10 = vpop.eup %7713 }
0x1381   :  { %v5255_v20 = vmul.f32 %v7714_v10, %v5172_v3  ;;  %v7387_v41 = vpop.permute.xlu2 %7386  ;;  %4974 = vmatpush.msra.mxu2 %v7384_v9  ;;  %vm5260_vm9 = vweird.f32 %v7714_v10 }
0x1382   :  { %v7388_v63 = vunpack.i.l.bf16 %v7387_v41  ;;  %v7389_v34 = vunpack.i.h.bf16 %v7387_v41  ;;  %vm5261_vm12 = vmor %vm5259_vm11, %vm5260_vm9 }
0x1383   :  { %v5256_v7 = vsub.f32 1.0, %v5255_v20 }
0x1384   :  { %4975 = vmatpush.msra.mxu2 %v7388_v63 }
0x1385   :  { %v5257_v43 = vmul.f32 %v7714_v10, %v5256_v7 }
0x1386   :  { %4976 = vmatpush.msra.mxu2 %v7389_v34 }
0x1387   :  { %v5258_v56 = vadd.f32 %v7714_v10, %v5257_v43  ;;  %7123 = vmatmul.msk.f32.vlgmr.msra.gmra.mxu2 %vm939_vm5, %v4807_v39 }
0x1389   :  { %v5262_v61 = vsel %vm5261_vm12, %v7714_v10, %v5258_v56 }
0x138a   :  { %v5267_v53 = vsel %vm5264_vm14, %v5266_v17, %v5262_v61 }
0x138b   :  { %v5268_v36 = vmul.f32 %v10789_v37, %v5267_v53  ;;  %v3657_v37 = vld [vmem:[%s11846_s6 + $0x68] sm:$0xff] }
0x138c   :  { %5490 = vmatpush.msra.mxu3 %v3657_v37 }
0x138d   :  { %7152 = vmatmul.msk.f32.gmra.mxu0 %vm939_vm5, %v5268_v36 }
0x138e   :  { %5491 = vmatpush.msra.mxu3 %v3656_v24 }
0x138f   :  { %7124 = vmatmul.msk.f32.gmra.mxu2 %vm939_vm5, %v4822_v33 }
0x139c   :  { %v5175_v2 = vpop.xlane.xlu1 %5174 }
0x139d   :  { %7715 = vrcp.f32 %v5175_v2  ;;  %v5280_v4 = vand.u32 2147483648, %v5175_v2  ;;  %v5278_v23 = vand.u32 2147483647, %v5175_v2  ;;  %vm5274_vm0 = vweird.f32 %v5175_v2 }
0x139f   :  { %v5281_v28 = vor.u32 1.1754944e-38, %v5280_v4  ;;  %vm5279_vm2 = vcmp.eq.f32.partialorder %v5278_v23, 8.507059e+37 }
0x13a3   :  { %v7716_v50 = vpop.eup %7715 }
0x13a4   :  { %v5270_v54 = vmul.f32 %v7716_v50, %v5175_v2  ;;  %v10900_v40 = vpop.xlane.xlu1 %4779  ;;  %vm5275_vm15 = vweird.f32 %v7716_v50 }
0x13a5   :  { %7717 = vrcp.f32 %v10900_v40  ;;  %vm5276_vm1 = vmor %vm5274_vm0, %vm5275_vm15  ;;  %v4849_v56 = vand.u32 2147483648, %v10900_v40  ;;  %vm4843_vm11 = vweird.f32 %v10900_v40  ;;  %v4847_v58 = vand.u32 2147483647, %v10900_v40 }
0x13a6   :  { %v5271_v52 = vsub.f32 1.0, %v5270_v54  ;;  %v4161_v54 = vpop.f32.mrf.mxu2 }
0x13a7   :  { %v4777_v15 = vpop.xlane.xlu0 %4776  ;;  %v4850_v19 = vor.u32 1.1754944e-38, %v4849_v56  ;;  %vm4848_vm13 = vcmp.eq.f32.partialorder %v4847_v58, 8.507059e+37 }
0x13a8   :  { %7719 = vrcp.f32 %v4777_v15  ;;  %v5272_v59 = vmul.f32 %v7716_v50, %v5271_v52  ;;  %v4834_v20 = vand.u32 2147483648, %v4777_v15  ;;  %vm4828_vm7 = vweird.f32 %v4777_v15 }
0x13a9   :  { %v4832_v46 = vand.u32 2147483647, %v4777_v15 }
0x13aa   :  { %v5273_v3 = vadd.f32 %v7716_v50, %v5272_v59 }
0x13ab   :  { %v7718_v38 = vpop.eup %7717  ;;  %vm4833_vm9 = vcmp.eq.f32.partialorder %v4832_v46, 8.507059e+37 }
0x13ac   :  { %v10906_v42 = vpop.xlane.xlu1 %4782  ;;  %v5277_v29 = vsel %vm5276_vm1, %v7716_v50, %v5273_v3  ;;  %v4839_v60 = vmul.f32 %v7718_v38, %v10900_v40  ;;  %vm4844_vm10 = vweird.f32 %v7718_v38 }
0x13ad   :  { %7721 = vrcp.f32 %v10906_v42  ;;  %v5282_v13 = vsel %vm5279_vm2, %v5281_v28, %v5277_v29  ;;  %vm4845_vm12 = vmor %vm4843_vm11, %vm4844_vm10  ;;  %v4864_v40 = vand.u32 2147483648, %v10906_v42  ;;  %vm4858_vm15 = vweird.f32 %v10906_v42 }
0x13ae   :  { %v7720_v51 = vpop.eup %7719  ;;  %v5283_v12 = vmul.f32 %v10802_v1, %v5282_v13  ;;  %v4840_v9 = vsub.f32 1.0, %v4839_v60  ;;  %v4835_v1 = vor.u32 1.1754944e-38, %v4834_v20  ;;  %v4164_v20 = vpop.f32.mrf.mxu2 }
0x13af   :  { %v4824_v47 = vmul.f32 %v7720_v51, %v4777_v15  ;;  %v10910_v62 = vpop.xlane.xlu0 %4785  ;;  %vm4829_vm6 = vweird.f32 %v7720_v51  ;;  %v4862_v15 = vand.u32 2147483647, %v10906_v42 }
0x13b0   :  { %7153 = vmatmul.msk.f32.gmra.mxu0 %vm939_vm5, %v5283_v12  ;;  %7723 = vrcp.f32 %v10910_v62  ;;  %vm4830_vm8 = vmor %vm4828_vm7, %vm4829_vm6  ;;  %v4841_v63 = vmul.f32 %v7718_v38, %v4840_v9  ;;  %vm4873_vm10 = vweird.f32 %v10910_v62 }
0x13b1   :  { %v4825_v57 = vsub.f32 1.0, %v4824_v47  ;;  %vm4863_vm2 = vcmp.eq.f32.partialorder %v4862_v15, 8.507059e+37 }
0x13b2   :  { %v4842_v39 = vadd.f32 %v7718_v38, %v4841_v63 }
0x13b3   :  { %v4826_v10 = vmul.f32 %v7720_v51, %v4825_v57  ;;  %v10913_v25 = vpop.eup %7721 }
0x13b4   :  { %v4854_v31 = vmul.f32 %v10913_v25, %v10906_v42  ;;  %v10921_v18 = vpop.xlane.xlu1 %4788  ;;  %v4846_v53 = vsel %vm4845_vm12, %v7718_v38, %v4842_v39  ;;  %vm4859_vm14 = vweird.f32 %v10913_v25 }
0x13b5   :  { %v4827_v41 = vadd.f32 %v7720_v51, %v4826_v10  ;;  %v4851_v6 = vsel %vm4848_vm13, %v4850_v19, %v4846_v53  ;;  %vm10944_vm0 = vmor %vm4858_vm15, %vm4859_vm14  ;;  %v4894_v56 = vand.u32 2147483648, %v10921_v18  ;;  %vm4888_vm14 = vweird.f32 %v10921_v18 }
0x13b6   :  { %v10919_v34 = vpop.eup %7723  ;;  %v4855_v43 = vsub.f32 1.0, %v4854_v31  ;;  %v4852_v4 = vmul.f32 %v10808_v49, %v4851_v6 }
0x13b7   :  { %v4831_v7 = vsel %vm4830_vm8, %v7720_v51, %v4827_v41  ;;  %v4869_v17 = vmul.f32 %v10919_v34, %v10910_v62  ;;  %v4865_v51 = vor.u32 1.1754944e-38, %v4864_v40  ;;  %vm4874_vm7 = vweird.f32 %v10919_v34 }
0x13b8   :  { %v4836_v11 = vsel %vm4833_vm9, %v4835_v1, %v4831_v7  ;;  %v4856_v61 = vmul.f32 %v10913_v25, %v4855_v43  ;;  %v4879_v41 = vand.u32 2147483648, %v10910_v62  ;;  %vm4875_vm11 = vmor %vm4873_vm10, %vm4874_vm7 }
0x13b9   :  { %v4837_v0 = vmul.f32 %v10812_v30, %v4836_v11  ;;  %v4870_v33 = vsub.f32 1.0, %v4869_v17  ;;  %v10934_v30 = vpop.xlane.xlu0 %4791 }
0x13ba   :  { %v5178_v27 = vpop.xlane.xlu2 %5177  ;;  %v4857_v45 = vadd.f32 %v10913_v25, %v4856_v61 }
0x13bb   :  { %7725 = vrcp.f32 %v5178_v27  ;;  %7125 = vmatmul.msk.f32.gmra.mxu2 %vm939_vm5, %v4837_v0  ;;  %v4871_v3 = vmul.f32 %v10919_v34, %v4870_v33  ;;  %v5293_v38 = vand.u32 2147483647, %v5178_v27  ;;  %v5295_v28 = vand.u32 2147483648, %v5178_v27 }
0x13bc   :  { %7727 = vrcp.f32 %v10921_v18  ;;  %v4861_v49 = vsel %vm10944_vm0, %v10913_v25, %v4857_v45  ;;  %vm5289_vm6 = vweird.f32 %v5178_v27  ;;  %v4877_v25 = vand.u32 2147483647, %v10910_v62 }
0x13bd   :  { %7729 = vrcp.f32 %v10934_v30  ;;  %v5296_v47 = vor.u32 1.1754944e-38, %v5295_v28  ;;  %v4866_v13 = vsel %vm4863_vm2, %v4865_v51, %v4861_v49  ;;  %v4872_v57 = vadd.f32 %v10919_v34, %v4871_v3 }
0x13be   :  { %vm5294_vm9 = vcmp.eq.f32.partialorder %v5293_v38, 8.507059e+37  ;;  %v4867_v63 = vmul.f32 %v10821_v22, %v4866_v13  ;;  %v4880_v62 = vor.u32 1.1754944e-38, %v4879_v41  ;;  %vm4878_vm12 = vcmp.eq.f32.partialorder %v4877_v25, 8.507059e+37  ;;  %v11013_v41 = vld [vmem:[%s11845_s5 + $0x9] ss:$0 sm:$0xff] }
0x13bf   :  { %v4876_v22 = vsel %vm4875_vm11, %v10919_v34, %v4872_v57  ;;  %v4892_v0 = vand.u32 2147483647, %v10921_v18  ;;  %v4167_v34 = vpop.f32.mrf.mxu2  ;;  %vm4903_vm2 = vweird.f32 %v10934_v30 }
0x13c1   :  { %v7726_v36 = vpop.eup %7725  ;;  %vm4893_vm0 = vcmp.eq.f32.partialorder %v4892_v0, 8.507059e+37 }
0x13c2   :  { %v4577_v2 = vpop.permute.xlu2 %4576  ;;  %v5285_v50 = vmul.f32 %v7726_v36, %v5178_v27  ;;  %v10936_v37 = vpop.eup %7727  ;;  %vm5290_vm1 = vweird.f32 %v7726_v36 }
0x13c3   :  { %v4600_v52 = vsel %vm857_vm4, %v4158_v26, %v4577_v2  ;;  %v4884_v42 = vmul.f32 %v10936_v37, %v10921_v18  ;;  %7126 = vmatmul.msk.f32.gmra.mxu2 %vm939_vm5, %v4852_v4  ;;  %vm5291_vm8 = vmor %vm5289_vm6, %vm5290_vm1  ;;  %v7730_v10 = vpop.eup %7729  ;;  %vm4889_vm13 = vweird.f32 %v10936_v37  ;;  %v4909_v18 = vand.u32 2147483648, %v10934_v30 }
0x13c4   :  { %v5286_v59 = vsub.f32 1.0, %v5285_v50  ;;  %7155 = vmatmul.msk.f32.vlgmr.msra.gmra.mxu3 %vm711_vm3, %v4600_v52  ;;  %v4899_v11 = vmul.f32 %v7730_v10, %v10934_v30  ;;  %vm4890_vm15 = vmor %vm4888_vm14, %vm4889_vm13  ;;  %vm4904_vm1 = vweird.f32 %v7730_v10 }
0x13c5   :  { %v5364_v24 = vpop.f32.mrf.mxu0  ;;  %v4885_v12 = vsub.f32 1.0, %v4884_v42  ;;  %vm4905_vm6 = vmor %vm4903_vm2, %vm4904_vm1 }
0x13c6   :  { %5396 = vrot.lane.b32.xlu1 %v5364_v24, %s7831_s17  ;;  %v5287_v29 = vmul.f32 %v7726_v36, %v5286_v59  ;;  %v4900_v43 = vsub.f32 1.0, %v4899_v11 }
0x13c7   :  { %v4886_v27 = vmul.f32 %v10936_v37, %v4885_v12  ;;  %v4170_v40 = vpop.f32.mrf.mxu2 }
0x13c8   :  { %v5288_v60 = vadd.f32 %v7726_v36, %v5287_v29  ;;  %v4901_v61 = vmul.f32 %v7730_v10, %v4900_v43 }
0x13c9   :  { %v4887_v39 = vadd.f32 %v10936_v37, %v4886_v27 }
0x13ca   :  { %v5292_v9 = vsel %vm5291_vm8, %v7726_v36, %v5288_v60  ;;  %v4581_v58 = vpop.permute.xlu0 %4580  ;;  %v4895_v36 = vor.u32 1.1754944e-38, %v4894_v56  ;;  %v4902_v2 = vadd.f32 %v7730_v10, %v4901_v61  ;;  %v4583_v6 = vpop.permute.xlu2 %4582 }
0x13cb   :  { %v5297_v46 = vsel %vm5294_vm9, %v5296_v47, %v5292_v9  ;;  %7127 = vmatmul.msk.f32.gmra.mxu2 %vm939_vm5, %v4867_v63  ;;  %v4602_v53 = vsel %vm857_vm4, %v4164_v20, %v4581_v58  ;;  %v4891_v19 = vsel %vm4890_vm15, %v10936_v37, %v4887_v39  ;;  %v4603_v50 = vsel %vm857_vm4, %v4167_v34, %v4583_v6 }
0x13cc   :  { %v4579_v31 = vpop.permute.xlu1 %4578  ;;  %v5298_v1 = vmul.f32 %v10837_v21, %v5297_v46  ;;  %v4881_v21 = vsel %vm4878_vm12, %v4880_v62, %v4876_v22  ;;  %v4896_v33 = vsel %vm4893_vm0, %v4895_v36, %v4891_v19  ;;  %v4906_v37 = vsel %vm4905_vm6, %v7730_v10, %v4902_v2 }
0x13cd   :  { %v5367_v7 = vpop.f32.mrf.mxu0  ;;  %v4601_v26 = vsel %vm857_vm4, %v4161_v54, %v4579_v31  ;;  %v4882_v17 = vmul.f32 %v10823_v32, %v4881_v21  ;;  %v4907_v32 = vand.u32 2147483647, %v10934_v30  ;;  %v4897_v45 = vmul.f32 %v10829_v48, %v4896_v33 }
0x13ce   :  { %5398 = vrot.lane.b32.xlu2 %v5367_v7, %s7831_s17  ;;  %7154 = vmatmul.msk.f32.gmra.mxu0 %vm939_vm5, %v5298_v1  ;;  %v4910_v54 = vor.u32 1.1754944e-38, %v4909_v18 }
0x13cf   :  { %7156 = vmatmul.msk.f32.gmra.mxu3 %vm711_vm3, %v4601_v26  ;;  %vm4908_vm7 = vcmp.eq.f32.partialorder %v4907_v32, 8.507059e+37  ;;  %v4173_v4 = vpop.f32.mrf.mxu2 }
0x13d0   :  { %v4911_v15 = vsel %vm4908_vm7, %v4910_v54, %v4906_v37 }
0x13d1   :  { %v4912_v30 = vmul.f32 %v10831_v14, %v4911_v15 }
0x13d2   :  { %v4585_v59 = vpop.permute.xlu0 %4584  ;;  %v4589_v28 = vpop.permute.xlu2 %4588 }
0x13d3   :  { %7128 = vmatmul.msk.f32.gmra.mxu2 %vm939_vm5, %v4882_v17  ;;  %v4604_v48 = vsel %vm857_vm4, %v4170_v40, %v4585_v59 }
0x13d4   :  { %v4587_v24 = vpop.permute.xlu1 %4586 }
0x13d5   :  { %v4605_v3 = vsel %vm857_vm4, %v4173_v4, %v4587_v24 }
0x13d7   :  { %7157 = vmatmul.msk.f32.gmra.mxu3 %vm711_vm3, %v4602_v53  ;;  %v4176_v38 = vpop.f32.mrf.mxu2 }
0x13d8   :  { %v4606_v42 = vsel %vm857_vm4, %v4176_v38, %v4589_v28  ;;  %v11940_v28 = vld [vmem:[#allocation21_spill] sm:$0xff] }
0x13da   :  { %v4591_v29 = vpop.permute.xlu0 %4590 }
0x13db   :  { %7129 = vmatmul.msk.f32.gmra.mxu2 %vm939_vm5, %v4897_v45 }
0x13df   :  { %7158 = vmatmul.msk.f32.gmra.mxu3 %vm711_vm3, %v4603_v50  ;;  %v4179_v49 = vpop.f32.mrf.mxu2 }
0x13e0   :  { %v4607_v51 = vsel %vm857_vm4, %v4179_v49, %v4591_v29 }
0x13e2   :  { %v5370_v52 = vpop.f32.mrf.mxu0 }
0x13e3   :  { %5400 = vrot.lane.b32.xlu0 %v5370_v52, %s7831_s17  ;;  %7130 = vmatmul.msk.f32.gmra.mxu2 %vm939_vm5, %v4912_v30 }
0x13e7   :  { %7159 = vmatmul.msk.f32.gmra.mxu3 %vm711_vm3, %v4604_v48 }
0x13ea   :  { %v5373_v23 = vpop.f32.mrf.mxu0 }
0x13eb   :  { %5402 = vrot.lane.b32.xlu1 %v5373_v23, %s7831_s17 }
0x13ef   :  { %7160 = vmatmul.msk.f32.gmra.mxu3 %vm711_vm3, %v4605_v3 }
0x13f7   :  { %7161 = vmatmul.msk.f32.gmra.mxu3 %vm711_vm3, %v4606_v42 }
0x13fa   :  { %v5376_v14 = vpop.f32.mrf.mxu0 }
0x13fb   :  { %5404 = vrot.lane.b32.xlu2 %v5376_v14, %s7831_s17 }
0x13ff   :  { %7162 = vmatmul.msk.f32.gmra.mxu3 %vm711_vm3, %v4607_v51  ;;  %v11941_v51 = vld [vmem:[#allocation23_spill] sm:$0xff] }
0x140a   :  { %v5379_v60 = vpop.f32.mrf.mxu0  ;;  %v4978_v13 = vpop.f32.mrf.mxu2 }
0x140b   :  { %5406 = vrot.lane.b32.xlu0 %v5379_v60, %s7831_s17 }
0x1412   :  { %v4981_v10 = vpop.f32.mrf.mxu2 }
0x1428   :  { %v5399_v9 = vpop.permute.xlu2 %5398 }
0x1429   :  { %v5421_v20 = vsel %vm857_vm4, %v4981_v10, %v5399_v9 }
0x142d   :  { %v5382_v47 = vpop.f32.mrf.mxu0 }
0x142e   :  { %5408 = vrot.lane.b32.xlu1 %v5382_v47, %s7831_s17 }
0x1438   :  { %v5397_v57 = vpop.permute.xlu1 %5396 }
0x1439   :  { %v5420_v12 = vsel %vm857_vm4, %v4978_v13, %v5397_v57 }
0x143a   :  { %7163 = vmatmul.msk.f32.gmra.mxu3 %vm711_vm3, %v5420_v12 }
0x143e   :  { %v4984_v1 = vpop.f32.mrf.mxu2 }
0x1442   :  { %7164 = vmatmul.msk.f32.gmra.mxu3 %vm711_vm3, %v5421_v20 }
0x1446   :  { %v4987_v39 = vpop.f32.mrf.mxu2 }
0x1447   :  { %v5493_v46 = vpop.f32.mrf.mxu3 }
0x1448   :  { %v5541_v25 = vadd.f32 %v5493_v46, %v9759_v5 }
0x144a   :  { %v5558_v63 = vadd.f32 %v11013_v41, %v5541_v25  ;;  %v11942_v25 = vld [vmem:[#allocation24_spill] sm:$0xff] }
0x144b   :  { %v5385_v31 = vpop.f32.mrf.mxu0 }
0x144c   :  { %5410 = vrot.lane.b32.xlu2 %v5385_v31, %s7831_s17  ;;  %v5574_v7 = vsel %vm711_vm3, %v5558_v63, 0.0 }
0x144d   :  { %5575 = vadd.xlane.f32.xlu0 %v5574_v7 }
0x144e   :  { %v4990_v34 = vpop.f32.mrf.mxu2 }
0x1452   :  { %v5496_v26 = vpop.f32.mrf.mxu3 }
0x1453   :  { %v5542_v27 = vadd.f32 %v5496_v26, %v9767_v35 }
0x1455   :  { %v5401_v11 = vpop.permute.xlu0 %5400  ;;  %v11021_v22 = vadd.f32 %v11013_v41, %v5542_v27  ;;  %v5405_v0 = vpop.permute.xlu2 %5404 }
0x1456   :  { %v5422_v62 = vsel %vm857_vm4, %v4984_v1, %v5401_v11  ;;  %v5424_v61 = vsel %vm857_vm4, %v4990_v34, %v5405_v0  ;;  %v4993_v54 = vpop.f32.mrf.mxu2 }
0x1457   :  { %7165 = vmatmul.msk.f32.gmra.mxu3 %vm711_vm3, %v5422_v62  ;;  %v5577_v5 = vsel %vm711_vm3, %v11021_v22, 0.0 }
0x1458   :  { %5578 = vadd.xlane.f32.xlu1 %v5577_v5 }
0x145a   :  { %v5499_v21 = vpop.f32.mrf.mxu3 }
0x145b   :  { %v5543_v33 = vadd.f32 %v5499_v21, %v9774_v16  ;;  %v11939_v16 = vld [vmem:[#allocation22_spill] sm:$0xff]  ;;  %v11943_v21 = vld [vmem:[#allocation5_spill] sm:$0xff] }
0x145d   :  { %v5403_v43 = vpop.permute.xlu1 %5402  ;;  %v11039_v18 = vadd.f32 %v11013_v41, %v5543_v33 }
0x145e   :  { %v5423_v56 = vsel %vm857_vm4, %v4987_v39, %v5403_v43  ;;  %v4996_v30 = vpop.f32.mrf.mxu2 }
0x145f   :  { %7166 = vmatmul.msk.f32.gmra.mxu3 %vm711_vm3, %v5423_v56  ;;  %v5580_v45 = vsel %vm711_vm3, %v11039_v18, 0.0 }
0x1462   :  { %v5502_v35 = vpop.f32.mrf.mxu3 }
0x1463   :  { %v5544_v58 = vadd.f32 %v5502_v35, %v9781_v8 }
0x1465   :  { %v5561_v17 = vadd.f32 %v11013_v41, %v5544_v58 }
0x1466   :  { %v4999_v23 = vpop.f32.mrf.mxu2 }
0x1467   :  { %v5583_v53 = vsel %vm711_vm3, %v5561_v17, 0.0  ;;  %7167 = vmatmul.msk.f32.gmra.mxu3 %vm711_vm3, %v5424_v61 }
0x1468   :  { %5584 = vadd.xlane.f32.xlu0 %v5583_v53 }
0x146a   :  { %v5505_v19 = vpop.f32.mrf.mxu3 }
0x146b   :  { %v5545_v36 = vadd.f32 %v5505_v19, %v9788_v55  ;;  %v11944_v19 = vld [vmem:[#allocation8_spill] sm:$0xff] }
0x146d   :  { %v5562_v2 = vadd.f32 %v11013_v41, %v5545_v36 }
0x146f   :  { %v5586_v8 = vsel %vm711_vm3, %v5562_v2, 0.0 }
0x1470   :  { %5587 = vadd.xlane.f32.xlu1 %v5586_v8 }
0x1472   :  { %v5508_v6 = vpop.f32.mrf.mxu3 }
0x1473   :  { %v5546_v32 = vadd.f32 %v5508_v6, %v9795_v44 }
0x1475   :  { %5581 = vadd.xlane.f32.xlu2 %v5580_v45  ;;  %v11045_v50 = vadd.f32 %v11013_v41, %v5546_v32  ;;  %v11945_v45 = vld [vmem:[#allocation25_spill] sm:$0xff] }
0x1477   :  { %v5589_v52 = vsel %vm711_vm3, %v11045_v50, 0.0 }
0x147a   :  { %v5511_v55 = vpop.f32.mrf.mxu3 }
0x147b   :  { %v5547_v37 = vadd.f32 %v5511_v55, %v11939_v16 }
0x147d   :  { %v5407_v40 = vpop.permute.xlu0 %5406  ;;  %v11051_v15 = vadd.f32 %v11013_v41, %v5547_v37  ;;  %5590 = vadd.xlane.f32.xlu2 %v5589_v52 }
0x147e   :  { %v5425_v44 = vsel %vm857_vm4, %v4993_v54, %v5407_v40 }
0x147f   :  { %7168 = vmatmul.msk.f32.gmra.mxu3 %vm711_vm3, %v5425_v44  ;;  %v5592_v59 = vsel %vm711_vm3, %v11051_v15, 0.0 }
0x1480   :  { %5593 = vadd.xlane.f32.xlu1 %v5592_v59 }
0x1482   :  { %v5514_v14 = vpop.f32.mrf.mxu3 }
0x1483   :  { %v5548_v60 = vadd.f32 %v5514_v14, %v11941_v51  ;;  %v11947_v14 = vld [vmem:[#allocation12_spill] sm:$0xff] }
0x1485   :  { %v11069_v13 = vadd.f32 %v11013_v41, %v5548_v60 }
0x1487   :  { %v5595_v10 = vsel %vm711_vm3, %v11069_v13, 0.0 }
0x14a0   :  { %v5409_v48 = vpop.permute.xlu1 %5408 }
0x14a1   :  { %v5426_v4 = vsel %vm857_vm4, %v4996_v30, %v5409_v48 }
0x14a2   :  { %7169 = vmatmul.msk.f32.gmra.mxu3 %vm711_vm3, %v5426_v4 }
0x14a6   :  { %v5411_v24 = vpop.permute.xlu2 %5410 }
0x14a7   :  { %v5427_v3 = vsel %vm857_vm4, %v4999_v23, %v5411_v24 }
0x14aa   :  { %7170 = vmatmul.msk.f32.gmra.mxu3 %vm711_vm3, %v5427_v3 }
0x14bd   :  { %v5517_v57 = vpop.f32.mrf.mxu3 }
0x14c0   :  { %v5576_v38 = vpop.xlane.xlu0 %5575 }
0x14c1   :  { %v5622_v42 = vmul.f32 %v5576_v38, %v11940_v28  ;;  %v11946_v38 = vld [vmem:[#allocation6_spill] sm:$0xff] }
0x14c3   :  { %v11062_v29 = vsub.f32 %v5558_v63, %v5622_v42  ;;  %v5549_v63 = vadd.f32 %v5517_v57, %v11942_v25 }
0x14c5   :  { %v5654_v49 = vmul.f32 %v11062_v29, %v11062_v29  ;;  %v5520_v31 = vpop.f32.mrf.mxu3  ;;  %v11082_v1 = vadd.f32 %v11013_v41, %v5549_v63  ;;  %v3660_v63 = vld [vmem:[%s11846_s6 + $0x30] sm:$0xff] }
0x14c6   :  { %v5550_v55 = vadd.f32 %v5520_v31, %v11945_v45  ;;  %v11182_v45 = vld [vmem:[%s11845_s5 + $0xd] ss:$0 sm:$0xff] }
0x14c7   :  { %v5670_v47 = vsel %vm711_vm3, %v5654_v49, 0.0 }
0x14c8   :  { %5671 = vadd.xlane.f32.xlu0 %v5670_v47 }
0x14cb   :  { %v5579_v12 = vpop.xlane.xlu1 %5578 }
0x14cc   :  { %v5623_v9 = vmul.f32 %v5579_v12, %v11940_v28  ;;  %v3663_v12 = vld [vmem:[%s11846_s6 + $0xf0] sm:$0xff] }
0x14cd   :  { %6021 = vmatpush.msrb.mxu2 %v3663_v12 }
0x14ce   :  { %v11075_v20 = vsub.f32 %v11021_v22, %v5623_v9  ;;  %v5598_v22 = vsel %vm711_vm3, %v11082_v1, 0.0  ;;  %v3662_v9 = vld [vmem:[%s11846_s6 + $0xb0] sm:$0xff] }
0x14cf   :  { %6022 = vmatpush.msrb.mxu2 %v3662_v9 }
0x14d0   :  { %5596 = vadd.xlane.f32.xlu0 %v5595_v10  ;;  %v5655_v46 = vmul.f32 %v11075_v20, %v11075_v20 }
0x14d2   :  { %v5673_v7 = vsel %vm711_vm3, %v5655_v46, 0.0  ;;  %v3661_v46 = vld [vmem:[%s11846_s6 + $0x70] sm:$0xff] }
0x14d3   :  { %5674 = vadd.xlane.f32.xlu2 %v5673_v7  ;;  %6023 = vmatpush.msrb.mxu2 %v3661_v46 }
0x14d5   :  { %6024 = vmatpush.msrb.mxu2 %v3660_v63 }
0x14da   :  { %v5523_v11 = vpop.f32.mrf.mxu3 }
0x14db   :  { %v5585_v26 = vpop.xlane.xlu0 %5584  ;;  %5599 = vadd.xlane.f32.xlu2 %v5598_v22  ;;  %v5551_v39 = vadd.f32 %v5523_v11, %v11943_v21 }
0x14dc   :  { %v5625_v27 = vmul.f32 %v5585_v26, %v11940_v28 }
0x14dd   :  { %v11095_v58 = vadd.f32 %v11013_v41, %v5551_v39 }
0x14de   :  { %v11087_v62 = vsub.f32 %v5561_v17, %v5625_v27 }
0x14df   :  { %v5604_v33 = vsel %vm711_vm3, %v11095_v58, 0.0 }
0x14e0   :  { %v5657_v5 = vmul.f32 %v11087_v62, %v11087_v62 }
0x14e2   :  { %v5679_v43 = vsel %vm711_vm3, %v5657_v5, 0.0  ;;  %v5526_v34 = vpop.f32.mrf.mxu3 }
0x14e3   :  { %5680 = vadd.xlane.f32.xlu0 %v5679_v43  ;;  %v5588_v56 = vpop.xlane.xlu1 %5587  ;;  %v5552_v36 = vadd.f32 %v5526_v34, %v11944_v19 }
0x14e4   :  { %v5626_v35 = vmul.f32 %v5588_v56, %v11940_v28  ;;  %v11948_v56 = vld [vmem:[#allocation7_spill] sm:$0xff] }
0x14e5   :  { %v11112_v32 = vadd.f32 %v11013_v41, %v5552_v36 }
0x14e6   :  { %v11097_v0 = vsub.f32 %v5562_v2, %v5626_v35 }
0x14e7   :  { %v5607_v54 = vsel %vm711_vm3, %v11112_v32, 0.0 }
0x14e8   :  { %v5582_v17 = vpop.xlane.xlu2 %5581  ;;  %v5658_v61 = vmul.f32 %v11097_v0, %v11097_v0 }
0x14e9   :  { %v5624_v53 = vmul.f32 %v5582_v17, %v11940_v28 }
0x14ea   :  { %v5682_v8 = vsel %vm711_vm3, %v5658_v61, 0.0  ;;  %v5529_v24 = vpop.f32.mrf.mxu3 }
0x14eb   :  { %v11107_v6 = vsub.f32 %v11039_v18, %v5624_v53  ;;  %5605 = vadd.xlane.f32.xlu0 %v5604_v33  ;;  %5683 = vadd.xlane.f32.xlu2 %v5682_v8  ;;  %v11119_v18 = vadd.f32 %v11013_v41, %v5550_v55  ;;  %v11177_v33 = vld [vmem:[%s11845_s5 + $0xc] ss:$0 sm:$0xff] }
0x14ed   :  { %v5656_v2 = vmul.f32 %v11107_v6, %v11107_v6  ;;  %v5601_v48 = vsel %vm711_vm3, %v11119_v18, 0.0 }
0x14ef   :  { %v5676_v16 = vsel %vm711_vm3, %v5656_v2, 0.0 }
0x14f0   :  { %5677 = vadd.xlane.f32.xlu1 %v5676_v16  ;;  %v5591_v37 = vpop.xlane.xlu2 %5590 }
0x14f1   :  { %v5627_v40 = vmul.f32 %v5591_v37, %v11940_v28 }
0x14f3   :  { %v5594_v52 = vpop.xlane.xlu1 %5593  ;;  %5608 = vadd.xlane.f32.xlu2 %v5607_v54  ;;  %v11127_v30 = vsub.f32 %v11045_v50, %v5627_v40 }
0x14f4   :  { %v5628_v44 = vmul.f32 %v5594_v52, %v11940_v28 }
0x14f5   :  { %v5659_v3 = vmul.f32 %v11127_v30, %v11127_v30 }
0x14f6   :  { %v11124_v59 = vsub.f32 %v11051_v15, %v5628_v44  ;;  %v5553_v15 = vadd.f32 %v5529_v24, %v11946_v38  ;;  %v11949_v38 = vld [vmem:[#allocation10_spill] sm:$0xff] }
0x14f7   :  { %v5685_v42 = vsel %vm711_vm3, %v5659_v3, 0.0 }
0x14f8   :  { %5602 = vadd.xlane.f32.xlu1 %v5601_v48  ;;  %v5660_v4 = vmul.f32 %v11124_v59, %v11124_v59  ;;  %v11140_v51 = vadd.f32 %v11013_v41, %v5553_v15 }
0x14fa   :  { %v5688_v23 = vsel %vm711_vm3, %v5660_v4, 0.0  ;;  %v5610_v57 = vsel %vm711_vm3, %v11140_v51, 0.0 }
0x14fb   :  { %5689 = vadd.xlane.f32.xlu0 %v5688_v23 }
0x1500   :  { %5686 = vadd.xlane.f32.xlu1 %v5685_v42 }
0x1502   :  { %v5532_v50 = vpop.f32.mrf.mxu3 }
0x1503   :  { %v5554_v49 = vadd.f32 %v5532_v50, %v11947_v14 }
0x1505   :  { %v11143_v60 = vadd.f32 %v11013_v41, %v5554_v49 }
0x1507   :  { %v5613_v47 = vsel %vm711_vm3, %v11143_v60, 0.0 }
0x1508   :  { %5614 = vadd.xlane.f32.xlu0 %v5613_v47  ;;  %5611 = vadd.xlane.f32.xlu1 %v5610_v57 }
0x1525   :  { %v5535_v22 = vpop.f32.mrf.mxu3 }
0x1526   :  { %v5555_v35 = vadd.f32 %v5535_v22, %v11948_v56 }
0x152d   :  { %v5538_v44 = vpop.f32.mrf.mxu3 }
0x152e   :  { %v5556_v15 = vadd.f32 %v5538_v44, %v11949_v38 }
0x1530   :  { %v11205_v49 = vadd.f32 %v11013_v41, %v5556_v15 }
0x1532   :  { %v5619_v63 = vsel %vm711_vm3, %v11205_v49, 0.0 }
0x153b   :  { %v5672_v10 = vpop.xlane.xlu0 %5671 }
0x153c   :  { %v5718_v25 = vmul.f32 %v5672_v10, %v11940_v28 }
0x153e   :  { %v5734_v31 = vadd.f32 1e-05, %v5718_v25 }
0x1540   :  { %7731 = vrsqrt.f32 %v5734_v31  ;;  %vm5756_vm9 = vweird.f32 %v5734_v31 }
0x1543   :  { %v5597_v7 = vpop.xlane.xlu0 %5596 }
0x1544   :  { %v5629_v26 = vmul.f32 %v5597_v7, %v11940_v28 }
0x1546   :  { %v7732_v27 = vpop.eup %7731  ;;  %v11164_v11 = vsub.f32 %v11069_v13, %v5629_v26  ;;  %v5675_v43 = vpop.xlane.xlu2 %5674  ;;  %v11172_v13 = vadd.f32 %v11013_v41, %v5555_v35 }
0x1547   :  { %v5751_v5 = vmul.f32 %v7732_v27, %v5734_v31  ;;  %v5719_v34 = vmul.f32 %v5675_v43, %v11940_v28  ;;  %vm5757_vm8 = vweird.f32 %v7732_v27 }
0x1548   :  { %v5661_v21 = vmul.f32 %v11164_v11, %v11164_v11  ;;  %vm5758_vm10 = vmor %vm5756_vm9, %vm5757_vm8  ;;  %v5616_v37 = vsel %vm711_vm3, %v11172_v13, 0.0 }
0x1549   :  { %v5752_v39 = vmul.f32 %v7732_v27, %v5751_v5  ;;  %v5735_v53 = vadd.f32 1e-05, %v5719_v34 }
0x154a   :  { %v5691_v17 = vsel %vm711_vm3, %v5661_v21, 0.0 }
0x154b   :  { %v5753_v61 = vmul.f32 0.5, %v5752_v39  ;;  %5692 = vadd.xlane.f32.xlu2 %v5691_v17  ;;  %7733 = vrsqrt.f32 %v5735_v53  ;;  %vm5766_vm12 = vweird.f32 %v5735_v53 }
0x154d   :  { %v5754_v19 = vsub.f32 1.5, %v5753_v61 }
0x154e   :  { %v5600_v2 = vpop.xlane.xlu2 %5599 }
0x154f   :  { %v5755_v36 = vmul.f32 %v7732_v27, %v5754_v19  ;;  %v5630_v16 = vmul.f32 %v5600_v2, %v11940_v28 }
0x1551   :  { %v5759_v8 = vsel %vm5758_vm10, %v7732_v27, %v5755_v36  ;;  %v7734_v54 = vpop.eup %7733  ;;  %v11190_v52 = vsub.f32 %v11082_v1, %v5630_v16 }
0x1552   :  { %v5910_v55 = vmul.f32 %v5759_v8, %v11062_v29  ;;  %v5761_v48 = vmul.f32 %v7734_v54, %v5735_v53  ;;  %vm5767_vm11 = vweird.f32 %v7734_v54 }
0x1553   :  { %5617 = vadd.xlane.f32.xlu2 %v5616_v37  ;;  %v5662_v29 = vmul.f32 %v11190_v52, %v11190_v52  ;;  %vm5768_vm13 = vmor %vm5766_vm12, %vm5767_vm11 }
0x1554   :  { %v5927_v40 = vmul.f32 %v11177_v33, %v5910_v55  ;;  %v5762_v23 = vmul.f32 %v7734_v54, %v5761_v48 }
0x1555   :  { %v5694_v42 = vsel %vm711_vm3, %v5662_v29, 0.0 }
0x1556   :  { %v11193_v4 = vadd.f32 %v11182_v45, %v5927_v40  ;;  %v5681_v24 = vpop.xlane.xlu0 %5680  ;;  %v5763_v1 = vmul.f32 0.5, %v5762_v23  ;;  %5695 = vadd.xlane.f32.xlu1 %v5694_v42 }
0x1557   :  { %v5721_v3 = vmul.f32 %v5681_v24, %v11940_v28 }
0x1558   :  { %7171 = vmatmul.msk.f32.vlgmr.msrb.gmra.mxu2 %vm711_vm3, %v11193_v4  ;;  %v5764_v14 = vsub.f32 1.5, %v5763_v1 }
0x1559   :  { %v11202_v50 = vadd.f32 1e-05, %v5721_v3 }
0x155a   :  { %v5765_v47 = vmul.f32 %v7734_v54, %v5764_v14 }
0x155b   :  { %7735 = vrsqrt.f32 %v11202_v50  ;;  %vm5786_vm2 = vweird.f32 %v11202_v50 }
0x155c   :  { %v5769_v9 = vsel %vm5768_vm13, %v7734_v54, %v5765_v47 }
0x155d   :  { %v5911_v25 = vmul.f32 %v5769_v9, %v11075_v20 }
0x155e   :  { %v5606_v57 = vpop.xlane.xlu0 %5605  ;;  %v5684_v12 = vpop.xlane.xlu2 %5683  ;;  %5620 = vadd.xlane.f32.xlu1 %v5619_v63 }
0x155f   :  { %v5632_v10 = vmul.f32 %v5606_v57, %v11940_v28  ;;  %v5722_v46 = vmul.f32 %v5684_v12, %v11940_v28  ;;  %v5928_v7 = vmul.f32 %v11177_v33, %v5911_v25 }
0x1561   :  { %v11214_v41 = vsub.f32 %v11095_v58, %v5632_v10  ;;  %v11216_v31 = vadd.f32 1e-05, %v5722_v46  ;;  %v11221_v22 = vpop.eup %7735  ;;  %v11225_v20 = vadd.f32 %v11182_v45, %v5928_v7 }
0x1562   :  { %v5781_v39 = vmul.f32 %v11221_v22, %v11202_v50  ;;  %vm5787_vm15 = vweird.f32 %v11221_v22 }
0x1563   :  { %v5678_v26 = vpop.xlane.xlu1 %5677  ;;  %v5664_v27 = vmul.f32 %v11214_v41, %v11214_v41  ;;  %7737 = vrsqrt.f32 %v11216_v31  ;;  %7172 = vmatmul.msk.f32.gmra.mxu2 %vm711_vm3, %v11225_v20  ;;  %vm5788_vm6 = vmor %vm5786_vm2, %vm5787_vm15  ;;  %vm5796_vm8 = vweird.f32 %v11216_v31 }
0x1564   :  { %v5720_v5 = vmul.f32 %v5678_v26, %v11940_v28  ;;  %v5782_v43 = vmul.f32 %v11221_v22, %v5781_v39 }
0x1565   :  { %v5700_v21 = vsel %vm711_vm3, %v5664_v27, 0.0 }
0x1566   :  { %v5736_v58 = vadd.f32 1e-05, %v5720_v5  ;;  %5701 = vadd.xlane.f32.xlu2 %v5700_v21  ;;  %v5609_v56 = vpop.xlane.xlu2 %5608  ;;  %v5783_v8 = vmul.f32 0.5, %v5782_v43 }
0x1567   :  { %v5633_v53 = vmul.f32 %v5609_v56, %v11940_v28 }
0x1568   :  { %7739 = vrsqrt.f32 %v5736_v58  ;;  %v5784_v48 = vsub.f32 1.5, %v5783_v8  ;;  %vm5776_vm0 = vweird.f32 %v5736_v58 }
0x1569   :  { %v11234_v34 = vpop.eup %7737  ;;  %v11247_v40 = vsub.f32 %v11112_v32, %v5633_v53 }
0x156a   :  { %v5791_v2 = vmul.f32 %v11234_v34, %v11216_v31  ;;  %v5785_v42 = vmul.f32 %v11221_v22, %v5784_v48  ;;  %vm5797_vm7 = vweird.f32 %v11234_v34 }
0x156b   :  { %v5603_v35 = vpop.xlane.xlu1 %5602  ;;  %v5665_v15 = vmul.f32 %v11247_v40, %v11247_v40  ;;  %vm5798_vm9 = vmor %vm5796_vm8, %vm5797_vm7 }
0x156c   :  { %v5631_v17 = vmul.f32 %v5603_v35, %v11940_v28  ;;  %v5792_v24 = vmul.f32 %v11234_v34, %v5791_v2  ;;  %v5789_v10 = vsel %vm5788_vm6, %v11221_v22, %v5785_v42  ;;  %v3664_v42 = vld [vmem:[%s11846_s6 + $0x38] sm:$0xff] }
0x156d   :  { %v5703_v9 = vsel %vm711_vm3, %v5665_v15, 0.0 }
0x156e   :  { %v7740_v61 = vpop.eup %7739  ;;  %v11239_v19 = vsub.f32 %v11119_v18, %v5631_v17  ;;  %v5690_v36 = vpop.xlane.xlu0 %5689  ;;  %v5793_v1 = vmul.f32 0.5, %v5792_v24 }
0x156f   :  { %v5771_v55 = vmul.f32 %v7740_v61, %v5736_v58  ;;  %v5724_v16 = vmul.f32 %v5690_v36, %v11940_v28  ;;  %vm5777_vm14 = vweird.f32 %v7740_v61 }
0x1570   :  { %v5663_v37 = vmul.f32 %v11239_v19, %v11239_v19  ;;  %vm5778_vm1 = vmor %vm5776_vm0, %vm5777_vm14  ;;  %v5794_v46 = vsub.f32 1.5, %v5793_v1 }
0x1571   :  { %v5772_v54 = vmul.f32 %v7740_v61, %v5771_v55  ;;  %v11249_v44 = vadd.f32 1e-05, %v5724_v16 }
0x1572   :  { %v5697_v18 = vsel %vm711_vm3, %v5663_v37, 0.0  ;;  %v5795_v58 = vmul.f32 %v11234_v34, %v5794_v46 }
0x1573   :  { %v5773_v29 = vmul.f32 0.5, %v5772_v54  ;;  %5698 = vadd.xlane.f32.xlu0 %v5697_v18  ;;  %v5687_v23 = vpop.xlane.xlu1 %5686  ;;  %7741 = vrsqrt.f32 %v11249_v44  ;;  %vm5816_vm14 = vweird.f32 %v11249_v44 }
0x1574   :  { %v5723_v3 = vmul.f32 %v5687_v23, %v11940_v28 }
0x1575   :  { %v5774_v38 = vsub.f32 1.5, %v5773_v29 }
0x1576   :  { %v5739_v32 = vadd.f32 1e-05, %v5723_v3 }
0x1577   :  { %v5775_v14 = vmul.f32 %v7740_v61, %v5774_v38 }
0x1578   :  { %7743 = vrsqrt.f32 %v5739_v32  ;;  %vm5806_vm11 = vweird.f32 %v5739_v32 }
0x1579   :  { %v5779_v47 = vsel %vm5778_vm1, %v7740_v61, %v5775_v14  ;;  %v7742_v7 = vpop.eup %7741  ;;  %v5799_v61 = vsel %vm5798_vm9, %v11234_v34, %v5795_v58 }
0x157a   :  { %v5912_v57 = vmul.f32 %v5779_v47, %v11107_v6  ;;  %v5913_v6 = vmul.f32 %v5789_v10, %v11087_v62  ;;  %v5811_v39 = vmul.f32 %v7742_v7, %v11249_v44  ;;  %v5914_v2 = vmul.f32 %v5799_v61, %v11097_v0 }
0x157b   :  { %v5615_v12 = vpop.xlane.xlu0 %5614  ;;  %v5612_v63 = vpop.xlane.xlu1 %5611  ;;  %5704 = vadd.xlane.f32.xlu0 %v5703_v9  ;;  %vm5817_vm13 = vweird.f32 %v7742_v7 }
0x157c   :  { %v5635_v25 = vmul.f32 %v5615_v12, %v11940_v28  ;;  %v5634_v26 = vmul.f32 %v5612_v63, %v11940_v28  ;;  %v5929_v27 = vmul.f32 %v11177_v33, %v5912_v57  ;;  %v5930_v17 = vmul.f32 %v11177_v33, %v5913_v6  ;;  %vm5818_vm15 = vmor %vm5816_vm14, %vm5817_vm13 }
0x157d   :  { %v5812_v53 = vmul.f32 %v7742_v7, %v5811_v39  ;;  %v5931_v37 = vmul.f32 %v11177_v33, %v5914_v2 }
0x157e   :  { %v11267_v50 = vsub.f32 %v11143_v60, %v5635_v25  ;;  %v7744_v5 = vpop.eup %7743  ;;  %v11272_v22 = vsub.f32 %v11140_v51, %v5634_v26  ;;  %v11275_v21 = vadd.f32 %v11182_v45, %v5929_v27  ;;  %v11292_v55 = vadd.f32 %v11182_v45, %v5930_v17 }
0x157f   :  { %v5801_v43 = vmul.f32 %v7744_v5, %v5739_v32  ;;  %v5813_v31 = vmul.f32 0.5, %v5812_v53  ;;  %vm5807_vm10 = vweird.f32 %v7744_v5  ;;  %v11299_v48 = vadd.f32 %v11182_v45, %v5931_v37 }
0x1580   :  { %v5667_v60 = vmul.f32 %v11267_v50, %v11267_v50  ;;  %7173 = vmatmul.msk.f32.gmra.mxu2 %vm711_vm3, %v11275_v21  ;;  %v5666_v62 = vmul.f32 %v11272_v22, %v11272_v22  ;;  %vm5808_vm12 = vmor %vm5806_vm11, %vm5807_vm10 }
0x1581   :  { %v5802_v51 = vmul.f32 %v7744_v5, %v5801_v43  ;;  %v5814_v34 = vsub.f32 1.5, %v5813_v31 }
0x1582   :  { %v5709_v56 = vsel %vm711_vm3, %v5667_v60, 0.0  ;;  %v5706_v35 = vsel %vm711_vm3, %v5666_v62, 0.0 }
0x1583   :  { %5710 = vadd.xlane.f32.xlu2 %v5709_v56  ;;  %v5803_v36 = vmul.f32 0.5, %v5802_v51  ;;  %5707 = vadd.xlane.f32.xlu1 %v5706_v35  ;;  %v5815_v0 = vmul.f32 %v7742_v7, %v5814_v34  ;;  %v11341_v56 = vld [vmem:[%s11845_s5 + $0xa] ss:$0 sm:$0xff] }
0x1585   :  { %v5804_v8 = vsub.f32 1.5, %v5803_v36  ;;  %v5819_v29 = vsel %vm5818_vm15, %v7742_v7, %v5815_v0 }
0x1586   :  { %v5916_v23 = vmul.f32 %v5819_v29, %v11124_v59  ;;  %v3665_v59 = vld [vmem:[%s11846_s6 + $0x78] sm:$0xff]  ;;  %s6829_s6 = sshll.u32 %s11848_s8, 4  ;;  %s6830_s6 = int_to_ptr.hbm [resolvable:$true] %s6829_s6 }
0x1587   :  { %v5805_v16 = vmul.f32 %v7744_v5, %v5804_v8  ;;  %6153 = vmatpush.msrb.mxu1 %v3665_v59 }
0x1588   :  { %7174 = vmatmul.msk.f32.gmra.mxu2 %vm711_vm3, %v11292_v55 }
0x1589   :  { %v5809_v54 = vsel %vm5808_vm12, %v7744_v5, %v5805_v16  ;;  %6154 = vmatpush.msrb.mxu1 %v3664_v42 }
0x158a   :  { %v5915_v18 = vmul.f32 %v5809_v54, %v11127_v30  ;;  %v5933_v30 = vmul.f32 %v11177_v33, %v5916_v23 }
0x158c   :  { %v5932_v24 = vmul.f32 %v11177_v33, %v5915_v18  ;;  %v11313_v38 = vadd.f32 %v11182_v45, %v5933_v30 }
0x158e   :  { %v11307_v3 = vadd.f32 %v11182_v45, %v5932_v24 }
0x1590   :  { %7175 = vmatmul.msk.f32.gmra.mxu2 %vm711_vm3, %v11299_v48 }
0x1598   :  { %7176 = vmatmul.msk.f32.gmra.mxu2 %vm711_vm3, %v11307_v3 }
0x15a0   :  { %7177 = vmatmul.msk.f32.gmra.mxu2 %vm711_vm3, %v11313_v38 }
0x15be   :  { %v5693_v44 = vpop.xlane.xlu2 %5692 }
0x15bf   :  { %v5725_v32 = vmul.f32 %v5693_v44, %v11940_v28 }
0x15c1   :  { %v5741_v15 = vadd.f32 1e-05, %v5725_v32 }
0x15c3   :  { %7745 = vrsqrt.f32 %v5741_v15  ;;  %vm5826_vm1 = vweird.f32 %v5741_v15 }
0x15c6   :  { %v5618_v1 = vpop.xlane.xlu2 %5617 }
0x15c7   :  { %v5636_v14 = vmul.f32 %v5618_v1, %v11940_v28 }
0x15c9   :  { %v7746_v47 = vpop.eup %7745  ;;  %v11326_v57 = vsub.f32 %v11172_v13, %v5636_v14  ;;  %v5696_v46 = vpop.xlane.xlu1 %5695 }
0x15ca   :  { %v5821_v12 = vmul.f32 %v7746_v47, %v5741_v15  ;;  %v5726_v25 = vmul.f32 %v5696_v46, %v11940_v28  ;;  %vm5827_vm0 = vweird.f32 %v7746_v47 }
0x15cb   :  { %v5668_v9 = vmul.f32 %v11326_v57, %v11326_v57  ;;  %vm5828_vm2 = vmor %vm5826_vm1, %vm5827_vm0 }
0x15cc   :  { %v5822_v10 = vmul.f32 %v7746_v47, %v5821_v12  ;;  %v5742_v26 = vadd.f32 1e-05, %v5726_v25 }
0x15cd   :  { %v5712_v63 = vsel %vm711_vm3, %v5668_v9, 0.0 }
0x15ce   :  { %v5823_v7 = vmul.f32 0.5, %v5822_v10  ;;  %5713 = vadd.xlane.f32.xlu0 %v5712_v63  ;;  %7747 = vrsqrt.f32 %v5742_v26  ;;  %vm5836_vm7 = vweird.f32 %v5742_v26 }
0x15d0   :  { %v5824_v27 = vsub.f32 1.5, %v5823_v7 }
0x15d1   :  { %v5621_v6 = vpop.xlane.xlu1 %5620 }
0x15d2   :  { %v5825_v5 = vmul.f32 %v7746_v47, %v5824_v27  ;;  %v5637_v39 = vmul.f32 %v5621_v6, %v11940_v28 }
0x15d4   :  { %v5829_v13 = vsel %vm5828_vm2, %v7746_v47, %v5825_v5  ;;  %v7748_v43 = vpop.eup %7747  ;;  %v11335_v60 = vsub.f32 %v11205_v49, %v5637_v39 }
0x15d5   :  { %v5917_v58 = vmul.f32 %v5829_v13, %v11164_v11  ;;  %v5831_v51 = vmul.f32 %v7748_v43, %v5742_v26  ;;  %vm5837_vm6 = vweird.f32 %v7748_v43 }
0x15d6   :  { %v5669_v17 = vmul.f32 %v11335_v60, %v11335_v60  ;;  %vm5838_vm8 = vmor %vm5836_vm7, %vm5837_vm6 }
0x15d7   :  { %v5934_v62 = vmul.f32 %v11177_v33, %v5917_v58  ;;  %v5832_v61 = vmul.f32 %v7748_v43, %v5831_v51 }
0x15d8   :  { %v5715_v49 = vsel %vm711_vm3, %v5669_v17, 0.0 }
0x15d9   :  { %v5702_v35 = vpop.xlane.xlu2 %5701  ;;  %v11346_v11 = vadd.f32 %v11182_v45, %v5934_v62  ;;  %v5833_v8 = vmul.f32 0.5, %v5832_v61  ;;  %5716 = vadd.xlane.f32.xlu1 %v5715_v49 }
0x15da   :  { %v5728_v53 = vmul.f32 %v5702_v35, %v11940_v28 }
0x15db   :  { %v6026_v36 = vpop.f32.mrf.mxu2  ;;  %7178 = vmatmul.msk.f32.gmra.mxu2 %vm711_vm3, %v11346_v11  ;;  %v5834_v16 = vsub.f32 1.5, %v5833_v8 }
0x15dc   :  { %v6027_v2 = vadd.f32 %v11341_v56, %v6026_v36  ;;  %v5744_v31 = vadd.f32 1e-05, %v5728_v53 }
0x15dd   :  { %v5835_v34 = vmul.f32 %v7748_v43, %v5834_v16 }
0x15de   :  { %v6074_v37 = vmax.f32 %v6027_v2, 0.0  ;;  %7749 = vrsqrt.f32 %v5744_v31  ;;  %vm5856_vm13 = vweird.f32 %v5744_v31 }
0x15df   :  { %v5839_v54 = vsel %vm5838_vm8, %v7748_v43, %v5835_v34 }
0x15e0   :  { %7187 = vmatmul.msk.f32.vlgmr.msrb.gmra.mxu1 %vm857_vm4, %v6074_v37  ;;  %v5918_v18 = vmul.f32 %v5839_v54, %v11190_v52 }
0x15e2   :  { %v5935_v0 = vmul.f32 %v11177_v33, %v5918_v18 }
0x15e4   :  { %v7750_v29 = vpop.eup %7749  ;;  %v11358_v30 = vadd.f32 %v11182_v45, %v5935_v0 }
0x15e5   :  { %v5851_v15 = vmul.f32 %v7750_v29, %v5744_v31  ;;  %vm5857_vm10 = vweird.f32 %v7750_v29 }
0x15e6   :  { %v5699_v24 = vpop.xlane.xlu0 %5698  ;;  %v6029_v32 = vpop.f32.mrf.mxu2  ;;  %7179 = vmatmul.msk.f32.gmra.mxu2 %vm711_vm3, %v11358_v30  ;;  %vm5858_vm14 = vmor %vm5856_vm13, %vm5857_vm10 }
0x15e7   :  { %v5727_v23 = vmul.f32 %v5699_v24, %v11940_v28  ;;  %v6030_v59 = vadd.f32 %v11341_v56, %v6029_v32  ;;  %v5852_v52 = vmul.f32 %v7750_v29, %v5851_v15 }
0x15e9   :  { %v5743_v44 = vadd.f32 1e-05, %v5727_v23  ;;  %v6075_v42 = vmax.f32 %v6030_v59, 0.0  ;;  %v5853_v9 = vmul.f32 0.5, %v5852_v52 }
0x15eb   :  { %7751 = vrsqrt.f32 %v5743_v44  ;;  %7188 = vmatmul.msk.f32.gmra.mxu1 %vm857_vm4, %v6075_v42  ;;  %v5854_v63 = vsub.f32 1.5, %v5853_v9  ;;  %vm5846_vm11 = vweird.f32 %v5743_v44 }
0x15ed   :  { %v5855_v43 = vmul.f32 %v7750_v29, %v5854_v63 }
0x15ee   :  { %v5705_v1 = vpop.xlane.xlu0 %5704 }
0x15ef   :  { %v5729_v14 = vmul.f32 %v5705_v1, %v11940_v28  ;;  %v5859_v53 = vsel %vm5858_vm14, %v7750_v29, %v5855_v43 }
0x15f0   :  { %v5920_v37 = vmul.f32 %v5859_v53, %v11214_v41 }
0x15f1   :  { %v7752_v47 = vpop.eup %7751  ;;  %v5745_v12 = vadd.f32 1e-05, %v5729_v14 }
0x15f2   :  { %v5841_v10 = vmul.f32 %v7752_v47, %v5743_v44  ;;  %vm5847_vm9 = vweird.f32 %v7752_v47  ;;  %v5937_v29 = vmul.f32 %v11177_v33, %v5920_v37 }
0x15f3   :  { %7753 = vrsqrt.f32 %v5745_v12  ;;  %vm5848_vm12 = vmor %vm5846_vm11, %vm5847_vm9  ;;  %vm5866_vm0 = vweird.f32 %v5745_v12 }
0x15f4   :  { %v5842_v46 = vmul.f32 %v7752_v47, %v5841_v10  ;;  %v11384_v42 = vadd.f32 %v11182_v45, %v5937_v29 }
0x15f6   :  { %v5711_v25 = vpop.xlane.xlu2 %5710  ;;  %v5843_v7 = vmul.f32 0.5, %v5842_v46  ;;  %v5708_v26 = vpop.xlane.xlu1 %5707 }
0x15f7   :  { %v5731_v27 = vmul.f32 %v5711_v25, %v11940_v28  ;;  %v5730_v5 = vmul.f32 %v5708_v26, %v11940_v28 }
0x15f8   :  { %v5844_v13 = vsub.f32 1.5, %v5843_v7 }
0x15f9   :  { %v11367_v6 = vadd.f32 1e-05, %v5731_v27  ;;  %v7754_v58 = vpop.eup %7753  ;;  %v5746_v39 = vadd.f32 1e-05, %v5730_v5 }
0x15fa   :  { %v5845_v62 = vmul.f32 %v7752_v47, %v5844_v13  ;;  %v5861_v51 = vmul.f32 %v7754_v58, %v5745_v12  ;;  %vm5867_vm15 = vweird.f32 %v7754_v58 }
0x15fb   :  { %7755 = vrsqrt.f32 %v11367_v6  ;;  %vm5868_vm1 = vmor %vm5866_vm0, %vm5867_vm15  ;;  %vm5876_vm6 = vweird.f32 %v5746_v39  ;;  %vm5886_vm9 = vweird.f32 %v11367_v6 }
0x15fc   :  { %7757 = vrsqrt.f32 %v5746_v39  ;;  %v5849_v35 = vsel %vm5848_vm12, %v7752_v47, %v5845_v62  ;;  %v5862_v17 = vmul.f32 %v7754_v58, %v5861_v51 }
0x15fd   :  { %v5919_v61 = vmul.f32 %v5849_v35, %v11239_v19 }
0x15fe   :  { %v5863_v49 = vmul.f32 0.5, %v5862_v17 }
0x15ff   :  { %v5936_v36 = vmul.f32 %v11177_v33, %v5919_v61 }
0x1600   :  { %v5864_v2 = vsub.f32 1.5, %v5863_v49 }
0x1601   :  { %v7756_v8 = vpop.eup %7755  ;;  %v11374_v34 = vadd.f32 %v11182_v45, %v5936_v36 }
0x1602   :  { %v7758_v16 = vpop.eup %7757  ;;  %v5865_v54 = vmul.f32 %v7754_v58, %v5864_v2  ;;  %v5881_v18 = vmul.f32 %v7756_v8, %v11367_v6  ;;  %vm5887_vm8 = vweird.f32 %v7756_v8 }
0x1603   :  { %v5871_v31 = vmul.f32 %v7758_v16, %v5746_v39  ;;  %v6032_v0 = vpop.f32.mrf.mxu2  ;;  %7180 = vmatmul.msk.f32.gmra.mxu2 %vm711_vm3, %v11374_v34  ;;  %vm5877_vm2 = vweird.f32 %v7758_v16  ;;  %vm5888_vm10 = vmor %vm5886_vm9, %vm5887_vm8 }
0x1604   :  { %v6033_v24 = vadd.f32 %v11341_v56, %v6032_v0  ;;  %v5869_v41 = vsel %vm5868_vm1, %v7754_v58, %v5865_v54  ;;  %v5882_v44 = vmul.f32 %v7756_v8, %v5881_v18  ;;  %vm5878_vm7 = vmor %vm5876_vm6, %vm5877_vm2 }
0x1605   :  { %v5872_v19 = vmul.f32 %v7758_v16, %v5871_v31  ;;  %v5921_v59 = vmul.f32 %v5869_v41, %v11247_v40  ;;  %v11423_v41 = vld [vmem:[%s11845_s5 + $0xb] ss:$0 sm:$0xff] }
0x1606   :  { %v6076_v32 = vmax.f32 %v6033_v24, 0.0  ;;  %v5883_v1 = vmul.f32 0.5, %v5882_v44 }
0x1607   :  { %v5873_v23 = vmul.f32 0.5, %v5872_v19  ;;  %v5938_v12 = vmul.f32 %v11177_v33, %v5921_v59 }
0x1608   :  { %7189 = vmatmul.msk.f32.gmra.mxu1 %vm857_vm4, %v6076_v32  ;;  %v5884_v10 = vsub.f32 1.5, %v5883_v1 }
0x1609   :  { %v5874_v15 = vsub.f32 1.5, %v5873_v23  ;;  %v11393_v25 = vadd.f32 %v11182_v45, %v5938_v12 }
0x160a   :  { %v5885_v63 = vmul.f32 %v7756_v8, %v5884_v10 }
0x160b   :  { %v5875_v52 = vmul.f32 %v7758_v16, %v5874_v15  ;;  %v6035_v14 = vpop.f32.mrf.mxu2  ;;  %7181 = vmatmul.msk.f32.gmra.mxu2 %vm711_vm3, %v11384_v42 }
0x160c   :  { %v6036_v47 = vadd.f32 %v11341_v56, %v6035_v14  ;;  %v5889_v5 = vsel %vm5888_vm10, %v7756_v8, %v5885_v63 }
0x160d   :  { %v5879_v9 = vsel %vm5878_vm7, %v7758_v16, %v5875_v52 }
0x160e   :  { %v6077_v46 = vmax.f32 %v6036_v47, 0.0  ;;  %v5922_v40 = vmul.f32 %v5879_v9, %v11272_v22  ;;  %v5923_v22 = vmul.f32 %v5889_v5, %v11267_v50 }
0x1610   :  { %7190 = vmatmul.msk.f32.gmra.mxu1 %vm857_vm4, %v6077_v46  ;;  %v5939_v27 = vmul.f32 %v11177_v33, %v5922_v40  ;;  %v5940_v43 = vmul.f32 %v11177_v33, %v5923_v22 }
0x1612   :  { %v11403_v58 = vadd.f32 %v11182_v45, %v5939_v27  ;;  %v11411_v51 = vadd.f32 %v11182_v45, %v5940_v43 }
0x1613   :  { %v6038_v7 = vpop.f32.mrf.mxu2  ;;  %7182 = vmatmul.msk.f32.gmra.mxu2 %vm711_vm3, %v11393_v25 }
0x1614   :  { %v6039_v26 = vadd.f32 %v11341_v56, %v6038_v7 }
0x1616   :  { %v6078_v13 = vmax.f32 %v6039_v26, 0.0 }
0x1618   :  { %7191 = vmatmul.msk.f32.gmra.mxu1 %vm857_vm4, %v6078_v13 }
0x161b   :  { %v6041_v39 = vpop.f32.mrf.mxu2  ;;  %7183 = vmatmul.msk.f32.gmra.mxu2 %vm711_vm3, %v11403_v58 }
0x161c   :  { %v6042_v6 = vadd.f32 %v11341_v56, %v6041_v39 }
0x161e   :  { %v6079_v62 = vmax.f32 %v6042_v6, 0.0 }
0x1620   :  { %7192 = vmatmul.msk.f32.gmra.mxu1 %vm857_vm4, %v6079_v62 }
0x1623   :  { %v6044_v35 = vpop.f32.mrf.mxu2  ;;  %7184 = vmatmul.msk.f32.gmra.mxu2 %vm711_vm3, %v11411_v51 }
0x1624   :  { %v6045_v50 = vadd.f32 %v11341_v56, %v6044_v35 }
0x1626   :  { %v6080_v17 = vmax.f32 %v6045_v50, 0.0 }
0x1628   :  { %7193 = vmatmul.msk.f32.gmra.mxu1 %vm857_vm4, %v6080_v17 }
0x1641   :  { %v5714_v61 = vpop.xlane.xlu0 %5713 }
0x1642   :  { %v5732_v53 = vmul.f32 %v5714_v61, %v11940_v28 }
0x1644   :  { %v5748_v49 = vadd.f32 1e-05, %v5732_v53 }
0x1646   :  { %7759 = vrsqrt.f32 %v5748_v49  ;;  %vm5896_vm12 = vweird.f32 %v5748_v49 }
0x164c   :  { %v7760_v36 = vpop.eup %7759  ;;  %v5717_v16 = vpop.xlane.xlu1 %5716 }
0x164d   :  { %v5891_v8 = vmul.f32 %v7760_v36, %v5748_v49  ;;  %v5733_v37 = vmul.f32 %v5717_v16, %v11940_v28  ;;  %vm5897_vm11 = vweird.f32 %v7760_v36 }
0x164e   :  { %vm5898_vm13 = vmor %vm5896_vm12, %vm5897_vm11 }
0x164f   :  { %v5892_v2 = vmul.f32 %v7760_v36, %v5891_v8  ;;  %v5749_v31 = vadd.f32 1e-05, %v5733_v37 }
0x1651   :  { %v5893_v54 = vmul.f32 0.5, %v5892_v2  ;;  %7761 = vrsqrt.f32 %v5749_v31  ;;  %vm5906_vm15 = vweird.f32 %v5749_v31 }
0x1653   :  { %v5894_v18 = vsub.f32 1.5, %v5893_v54 }
0x1655   :  { %v5895_v0 = vmul.f32 %v7760_v36, %v5894_v18 }
0x1657   :  { %v5899_v19 = vsel %vm5898_vm13, %v7760_v36, %v5895_v0  ;;  %v7762_v29 = vpop.eup %7761 }
0x1658   :  { %v5924_v24 = vmul.f32 %v5899_v19, %v11326_v57  ;;  %v5901_v44 = vmul.f32 %v7762_v29, %v5749_v31  ;;  %vm5907_vm14 = vweird.f32 %v7762_v29 }
0x1659   :  { %vm5908_vm0 = vmor %vm5906_vm15, %vm5907_vm14 }
0x165a   :  { %v5941_v23 = vmul.f32 %v11177_v33, %v5924_v24  ;;  %v5902_v15 = vmul.f32 %v7762_v29, %v5901_v44 }
0x165c   :  { %v11427_v32 = vadd.f32 %v11182_v45, %v5941_v23  ;;  %v5903_v57 = vmul.f32 0.5, %v5902_v15 }
0x165d   :  { %v6156_v59 = vpop.f32.mrf.mxu1 }
0x165e   :  { %v6157_v52 = vadd.f32 %v11423_v41, %v6156_v59  ;;  %v6047_v1 = vpop.f32.mrf.mxu2  ;;  %7185 = vmatmul.msk.f32.gmra.mxu2 %vm711_vm3, %v11427_v32  ;;  %v5904_v12 = vsub.f32 1.5, %v5903_v57 }
0x165f   :  { %v6048_v14 = vadd.f32 %v11341_v56, %v6047_v1 }
0x1660   :  { %v11434_v47 = vadd.f32 %v6157_v52, %v11193_v4  ;;  %v5905_v46 = vmul.f32 %v7762_v29, %v5904_v12 }
0x1661   :  { %v6081_v9 = vmax.f32 %v6048_v14, 0.0 }
0x1662   :  { %v6220_v10 = vsel %vm711_vm3, %v11434_v47, 0.0  ;;  %v5909_v40 = vsel %vm5908_vm0, %v7762_v29, %v5905_v46 }
0x1663   :  { %6221 = vadd.xlane.f32.xlu2 %v6220_v10  ;;  %7194 = vmatmul.msk.f32.gmra.mxu1 %vm857_vm4, %v6081_v9  ;;  %v5925_v63 = vmul.f32 %v5909_v40, %v11335_v60 }
0x1665   :  { %v5942_v7 = vmul.f32 %v11177_v33, %v5925_v63 }
0x1667   :  { %v11442_v4 = vadd.f32 %v11182_v45, %v5942_v7 }
0x1668   :  { %v6159_v26 = vpop.f32.mrf.mxu1 }
0x1669   :  { %v6160_v27 = vadd.f32 %v11423_v41, %v6159_v26  ;;  %v6050_v5 = vpop.f32.mrf.mxu2  ;;  %7186 = vmatmul.msk.f32.gmra.mxu2 %vm711_vm3, %v11442_v4 }
0x166a   :  { %v6051_v13 = vadd.f32 %v11341_v56, %v6050_v5 }
0x166b   :  { %v11449_v22 = vadd.f32 %v6160_v27, %v11225_v20 }
0x166c   :  { %v6082_v39 = vmax.f32 %v6051_v13, 0.0 }
0x166d   :  { %v6223_v60 = vsel %vm711_vm3, %v11449_v22, 0.0 }
0x166e   :  { %7195 = vmatmul.msk.f32.gmra.mxu1 %vm857_vm4, %v6082_v39  ;;  %6224 = vadd.xlane.f32.xlu0 %v6223_v60 }
0x1685   :  { %v6162_v33 = vpop.f32.mrf.mxu1 }
0x1686   :  { %v6163_v45 = vadd.f32 %v11423_v41, %v6162_v33  ;;  %v6053_v6 = vpop.f32.mrf.mxu2 }
0x1687   :  { %v6054_v43 = vadd.f32 %v11341_v56, %v6053_v6 }
0x1688   :  { %v11457_v62 = vadd.f32 %v6163_v45, %v11275_v21 }
0x1689   :  { %v6083_v35 = vmax.f32 %v6054_v43, 0.0 }
0x168a   :  { %v6226_v20 = vsel %vm711_vm3, %v11457_v62, 0.0 }
0x168b   :  { %6227 = vadd.xlane.f32.xlu1 %v6226_v20  ;;  %7196 = vmatmul.msk.f32.gmra.mxu1 %vm857_vm4, %v6083_v35 }
0x168d   :  { %v6165_v50 = vpop.f32.mrf.mxu1 }
0x168e   :  { %v6166_v17 = vadd.f32 %v11423_v41, %v6165_v50  ;;  %v6056_v61 = vpop.f32.mrf.mxu2 }
0x168f   :  { %v6057_v53 = vadd.f32 %v11341_v56, %v6056_v61 }
0x1690   :  { %v11465_v49 = vadd.f32 %v6166_v17, %v11292_v55 }
0x1691   :  { %v6084_v36 = vmax.f32 %v6057_v53, 0.0 }
0x1692   :  { %v6229_v21 = vsel %vm711_vm3, %v11465_v49, 0.0 }
0x1693   :  { %6230 = vadd.xlane.f32.xlu0 %v6229_v21  ;;  %7197 = vmatmul.msk.f32.gmra.mxu1 %vm857_vm4, %v6084_v36 }
0x1695   :  { %v6168_v8 = vpop.f32.mrf.mxu1 }
0x1696   :  { %v6169_v2 = vadd.f32 %v11423_v41, %v6168_v8  ;;  %v6059_v16 = vpop.f32.mrf.mxu2 }
0x1697   :  { %v6060_v37 = vadd.f32 %v11341_v56, %v6059_v16 }
0x1698   :  { %v11473_v54 = vadd.f32 %v6169_v2, %v11299_v48 }
0x1699   :  { %v6085_v31 = vmax.f32 %v6060_v37, 0.0 }
0x169a   :  { %v6232_v55 = vsel %vm711_vm3, %v11473_v54, 0.0 }
0x169b   :  { %6233 = vadd.xlane.f32.xlu2 %v6232_v55  ;;  %7198 = vmatmul.msk.f32.gmra.mxu1 %vm857_vm4, %v6085_v31 }
0x169d   :  { %v6171_v18 = vpop.f32.mrf.mxu1 }
0x169e   :  { %v6172_v0 = vadd.f32 %v11423_v41, %v6171_v18  ;;  %v6062_v19 = vpop.f32.mrf.mxu2 }
0x169f   :  { %v6063_v24 = vadd.f32 %v11341_v56, %v6062_v19 }
0x16a0   :  { %v6209_v29 = vadd.f32 %v6172_v0, %v11307_v3 }
0x16a1   :  { %v6086_v23 = vmax.f32 %v6063_v24, 0.0 }
0x16a2   :  { %v6235_v44 = vsel %vm711_vm3, %v6209_v29, 0.0 }
0x16a3   :  { %6236 = vadd.xlane.f32.xlu1 %v6235_v44  ;;  %7199 = vmatmul.msk.f32.gmra.mxu1 %vm857_vm4, %v6086_v23 }
0x16a5   :  { %v6174_v48 = vpop.f32.mrf.mxu1 }
0x16a6   :  { %v6175_v15 = vadd.f32 %v11423_v41, %v6174_v48  ;;  %v6065_v59 = vpop.f32.mrf.mxu2 }
0x16a7   :  { %v6066_v52 = vadd.f32 %v11341_v56, %v6065_v59 }
0x16a8   :  { %v11486_v1 = vadd.f32 %v6175_v15, %v11313_v38 }
0x16a9   :  { %v6087_v57 = vmax.f32 %v6066_v52, 0.0 }
0x16aa   :  { %v6238_v14 = vsel %vm711_vm3, %v11486_v1, 0.0 }
0x16ab   :  { %6239 = vadd.xlane.f32.xlu0 %v6238_v14  ;;  %7200 = vmatmul.msk.f32.gmra.mxu1 %vm857_vm4, %v6087_v57 }
0x16d6   :  { %v6222_v31 = vpop.xlane.xlu2 %6221 }
0x16d7   :  { %v6268_v18 = vmul.f32 %v6222_v31, %v11940_v28 }
0x16d9   :  { %v11549_v24 = vsub.f32 %v11434_v47, %v6268_v18 }
0x16db   :  { %v6300_v15 = vmul.f32 %v11549_v24, %v11549_v24 }
0x16e0   :  { %v6177_v3 = vpop.f32.mrf.mxu1 }
0x16e1   :  { %v6178_v12 = vadd.f32 %v11423_v41, %v6177_v3  ;;  %v6068_v9 = vpop.f32.mrf.mxu2  ;;  %v6225_v14 = vpop.xlane.xlu0 %6224 }
0x16e2   :  { %v6069_v10 = vadd.f32 %v11341_v56, %v6068_v9 }
0x16e3   :  { %v11494_v46 = vadd.f32 %v6178_v12, %v11346_v11  ;;  %v6269_v12 = vmul.f32 %v6225_v14, %v11940_v28 }
0x16e4   :  { %v6088_v40 = vmax.f32 %v6069_v10, 0.0 }
0x16e5   :  { %v6241_v38 = vsel %vm711_vm3, %v11494_v46, 0.0 }
0x16e6   :  { %6242 = vadd.xlane.f32.xlu2 %v6241_v38  ;;  %7201 = vmatmul.msk.f32.gmra.mxu1 %vm857_vm4, %v6088_v40  ;;  %v11570_v40 = vsub.f32 %v11449_v22, %v6269_v12 }
0x16e8   :  { %v6301_v22 = vmul.f32 %v11570_v40, %v11570_v40 }
0x16eb   :  { %v6180_v63 = vpop.f32.mrf.mxu1 }
0x16ec   :  { %v6181_v7 = vadd.f32 %v11423_v41, %v6180_v63  ;;  %v6071_v26 = vpop.f32.mrf.mxu2 }
0x16ed   :  { %v6072_v27 = vadd.f32 %v11341_v56, %v6071_v26 }
0x16ee   :  { %v11502_v5 = vadd.f32 %v6181_v7, %v11358_v30 }
0x16ef   :  { %v6089_v13 = vmax.f32 %v6072_v27, 0.0 }
0x16f0   :  { %v6244_v11 = vsel %vm711_vm3, %v11502_v5, 0.0 }
0x16f1   :  { %6245 = vadd.xlane.f32.xlu2 %v6244_v11  ;;  %7202 = vmatmul.msk.f32.gmra.mxu1 %vm857_vm4, %v6089_v13 }
0x16fe   :  { %v6228_v35 = vpop.xlane.xlu1 %6227 }
0x16ff   :  { %v6270_v50 = vmul.f32 %v6228_v35, %v11940_v28 }
0x1701   :  { %v11525_v61 = vsub.f32 %v11457_v62, %v6270_v50 }
0x1703   :  { %v6302_v2 = vmul.f32 %v11525_v61, %v11525_v61 }
0x1705   :  { %v6322_v37 = vsel %vm711_vm3, %v6302_v2, 0.0 }
0x1706   :  { %v6231_v7 = vpop.xlane.xlu0 %6230 }
0x1707   :  { %v6271_v13 = vmul.f32 %v6231_v7, %v11940_v28 }
0x1708   :  { %v6183_v39 = vpop.f32.mrf.mxu1 }
0x1709   :  { %v6184_v60 = vadd.f32 %v11423_v41, %v6183_v39 }
0x170b   :  { %v11509_v33 = vadd.f32 %v6184_v60, %v11374_v34  ;;  %v11589_v60 = vsub.f32 %v11465_v49, %v6271_v13 }
0x170d   :  { %v6247_v45 = vsel %vm711_vm3, %v11509_v33, 0.0 }
0x170e   :  { %6248 = vadd.xlane.f32.xlu1 %v6247_v45  ;;  %v6234_v44 = vpop.xlane.xlu2 %6233 }
0x170f   :  { %v6272_v48 = vmul.f32 %v6234_v44, %v11940_v28 }
0x1710   :  { %v6186_v56 = vpop.f32.mrf.mxu1 }
0x1711   :  { %v6187_v30 = vadd.f32 %v11423_v41, %v6186_v56  ;;  %v11558_v59 = vsub.f32 %v11473_v54, %v6272_v48 }
0x1713   :  { %v11515_v6 = vadd.f32 %v6187_v30, %v11384_v42  ;;  %v6304_v47 = vmul.f32 %v11558_v59, %v11558_v59 }
0x1715   :  { %v6250_v43 = vsel %vm711_vm3, %v11515_v6, 0.0  ;;  %v6328_v52 = vsel %vm711_vm3, %v6304_v47, 0.0 }
0x1716   :  { %6251 = vadd.xlane.f32.xlu0 %v6250_v43  ;;  %v6237_v53 = vpop.xlane.xlu1 %6236 }
0x1717   :  { %v6273_v21 = vmul.f32 %v6237_v53, %v11940_v28 }
0x1718   :  { %v6189_v20 = vpop.f32.mrf.mxu1 }
0x1719   :  { %v6190_v34 = vadd.f32 %v11423_v41, %v6189_v20 }
0x171b   :  { %v11522_v17 = vadd.f32 %v6190_v34, %v11393_v25  ;;  %v11536_v25 = vsub.f32 %v6209_v29, %v6273_v21 }
0x171d   :  { %v6253_v42 = vsel %vm711_vm3, %v11522_v17, 0.0  ;;  %v6305_v19 = vmul.f32 %v11536_v25, %v11536_v25 }
0x171e   :  { %6254 = vadd.xlane.f32.xlu2 %v6253_v42 }
0x171f   :  { %v6331_v29 = vsel %vm711_vm3, %v6305_v19, 0.0 }
0x1720   :  { %v6192_v36 = vpop.f32.mrf.mxu1 }
0x1721   :  { %v6193_v8 = vadd.f32 %v11423_v41, %v6192_v36 }
0x1723   :  { %v11534_v16 = vadd.f32 %v6193_v8, %v11403_v58 }
0x1725   :  { %v6256_v62 = vsel %vm711_vm3, %v11534_v16, 0.0 }
0x1726   :  { %6257 = vadd.xlane.f32.xlu1 %v6256_v62  ;;  %6323 = vadd.xlane.f32.xlu2 %v6322_v37 }
0x1728   :  { %v6195_v55 = vpop.f32.mrf.mxu1 }
0x1729   :  { %v6196_v0 = vadd.f32 %v11423_v41, %v6195_v55 }
0x172b   :  { %v11546_v58 = vadd.f32 %v6196_v0, %v11411_v51  ;;  %v6316_v51 = vsel %vm711_vm3, %v6300_v15, 0.0 }
0x172d   :  { %v6259_v23 = vsel %vm711_vm3, %v11546_v58, 0.0 }
0x172e   :  { %6332 = vadd.xlane.f32.xlu2 %v6331_v29  ;;  %6260 = vadd.xlane.f32.xlu0 %v6259_v23 }
0x1736   :  { %6317 = vadd.xlane.f32.xlu0 %v6316_v51 }
0x173e   :  { %6329 = vadd.xlane.f32.xlu0 %v6328_v52 }
0x1759   :  { %v6243_v57 = vpop.xlane.xlu2 %6242 }
0x175a   :  { %v6275_v26 = vmul.f32 %v6243_v57, %v11940_v28 }
0x175c   :  { %v11585_v11 = vsub.f32 %v11494_v46, %v6275_v26  ;;  %v6303_v46 = vmul.f32 %v11589_v60, %v11589_v60 }
0x175e   :  { %v6307_v30 = vmul.f32 %v11585_v11, %v11585_v11  ;;  %v6325_v20 = vsel %vm711_vm3, %v6303_v46, 0.0 }
0x1760   :  { %v6337_v49 = vsel %vm711_vm3, %v6307_v30, 0.0 }
0x1763   :  { %v6198_v3 = vpop.f32.mrf.mxu1 }
0x1764   :  { %v6199_v9 = vadd.f32 %v11423_v41, %v6198_v3  ;;  %v6246_v54 = vpop.xlane.xlu2 %6245 }
0x1765   :  { %v6276_v38 = vmul.f32 %v6246_v54, %v11940_v28 }
0x1766   :  { %v11567_v10 = vadd.f32 %v6199_v9, %v11427_v32 }
0x1767   :  { %v11577_v27 = vsub.f32 %v11502_v5, %v6276_v38  ;;  %v6319_v5 = vsel %vm711_vm3, %v6301_v22, 0.0 }
0x1768   :  { %v6262_v63 = vsel %vm711_vm3, %v11567_v10, 0.0 }
0x1769   :  { %6263 = vadd.xlane.f32.xlu1 %v6262_v63  ;;  %v6308_v32 = vmul.f32 %v11577_v27, %v11577_v27 }
0x176b   :  { %v6340_v39 = vsel %vm711_vm3, %v6308_v32, 0.0 }
0x176c   :  { %6341 = vadd.xlane.f32.xlu0 %v6340_v39 }
0x176e   :  { %v6201_v45 = vpop.f32.mrf.mxu1 }
0x176f   :  { %v6202_v56 = vadd.f32 %v11423_v41, %v6201_v45  ;;  %v6240_v41 = vpop.xlane.xlu0 %6239 }
0x1770   :  { %v6274_v8 = vmul.f32 %v6240_v41, %v11940_v28 }
0x1771   :  { %6320 = vadd.xlane.f32.xlu1 %v6319_v5  ;;  %v11596_v43 = vadd.f32 %v6202_v56, %v11442_v4  ;;  %v11652_v56 = vld [vmem:[%s11845_s5 + $0xe] ss:$0 sm:$0xff] }
0x1773   :  { %v6265_v35 = vsel %vm711_vm3, %v11596_v43, 0.0 }
0x1774   :  { %6266 = vadd.xlane.f32.xlu2 %v6265_v35  ;;  %6338 = vadd.xlane.f32.xlu0 %v6337_v49  ;;  %v11658_v49 = vld [vmem:[%s11845_s5 + $0xf] ss:$0 sm:$0xff] }
0x1779   :  { %6326 = vadd.xlane.f32.xlu1 %v6325_v20 }
0x1781   :  { %v6249_v50 = vpop.xlane.xlu1 %6248 }
0x1782   :  { %v6277_v34 = vmul.f32 %v6249_v50, %v11940_v28 }
0x1784   :  { %v11606_v4 = vsub.f32 %v11509_v33, %v6277_v34  ;;  %v11619_v33 = vsub.f32 %v11486_v1, %v6274_v8 }
0x1786   :  { %v6309_v42 = vmul.f32 %v11606_v4, %v11606_v4  ;;  %v6306_v0 = vmul.f32 %v11619_v33, %v11619_v33 }
0x1788   :  { %v6343_v53 = vsel %vm711_vm3, %v6309_v42, 0.0  ;;  %v6334_v19 = vsel %vm711_vm3, %v6306_v0, 0.0 }
0x1789   :  { %v6252_v36 = vpop.xlane.xlu0 %6251  ;;  %6344 = vadd.xlane.f32.xlu2 %v6343_v53 }
0x178a   :  { %v6278_v21 = vmul.f32 %v6252_v36, %v11940_v28 }
0x178c   :  { %v11614_v2 = vsub.f32 %v11515_v6, %v6278_v21 }
0x178e   :  { %v6310_v62 = vmul.f32 %v11614_v2, %v11614_v2 }
0x1790   :  { %v6346_v37 = vsel %vm711_vm3, %v6310_v62, 0.0 }
0x1791   :  { %6347 = vadd.xlane.f32.xlu1 %v6346_v37  ;;  %v6255_v31 = vpop.xlane.xlu2 %6254 }
0x1792   :  { %v6279_v55 = vmul.f32 %v6255_v31, %v11940_v28 }
0x1794   :  { %v11624_v18 = vsub.f32 %v11522_v17, %v6279_v55 }
0x1796   :  { %v6311_v6 = vmul.f32 %v11624_v18, %v11624_v18 }
0x1798   :  { %v6349_v1 = vsel %vm711_vm3, %v6311_v6, 0.0 }
0x1799   :  { %v6258_v29 = vpop.xlane.xlu1 %6257  ;;  %6335 = vadd.xlane.f32.xlu1 %v6334_v19  ;;  %6350 = vadd.xlane.f32.xlu0 %v6349_v1  ;;  %v6324_v23 = vpop.xlane.xlu2 %6323 }
0x179a   :  { %v6280_v44 = vmul.f32 %v6258_v29, %v11940_v28  ;;  %v6366_v48 = vmul.f32 %v6324_v23, %v11940_v28 }
0x179c   :  { %v11635_v17 = vsub.f32 %v11534_v16, %v6280_v44  ;;  %v6382_v15 = vadd.f32 1e-05, %v6366_v48 }
0x179e   :  { %7763 = vrsqrt.f32 %v6382_v15  ;;  %v6312_v51 = vmul.f32 %v11635_v17, %v11635_v17  ;;  %vm6422_vm1 = vweird.f32 %v6382_v15 }
0x17a0   :  { %v6352_v47 = vsel %vm711_vm3, %v6312_v51, 0.0 }
0x17a1   :  { %6353 = vadd.xlane.f32.xlu2 %v6352_v47  ;;  %v6261_v52 = vpop.xlane.xlu0 %6260  ;;  %v6333_v57 = vpop.xlane.xlu2 %6332 }
0x17a2   :  { %v6281_v14 = vmul.f32 %v6261_v52, %v11940_v28  ;;  %v6369_v3 = vmul.f32 %v6333_v57, %v11940_v28 }
0x17a4   :  { %v7764_v12 = vpop.eup %7763  ;;  %v11643_v9 = vsub.f32 %v11546_v58, %v6281_v14  ;;  %v6385_v16 = vadd.f32 1e-05, %v6369_v3 }
0x17a5   :  { %v6417_v54 = vmul.f32 %v7764_v12, %v6382_v15  ;;  %vm6423_vm4 = vweird.f32 %v7764_v12 }
0x17a6   :  { %7765 = vrsqrt.f32 %v6385_v16  ;;  %v6313_v38 = vmul.f32 %v11643_v9, %v11643_v9  ;;  %vm6424_vm2 = vmor %vm6422_vm1, %vm6423_vm4  ;;  %vm6452_vm7 = vweird.f32 %v6385_v16 }
0x17a7   :  { %v6418_v63 = vmul.f32 %v7764_v12, %v6417_v54 }
0x17a8   :  { %v6355_v7 = vsel %vm711_vm3, %v6313_v38, 0.0 }
0x17a9   :  { %v6419_v26 = vmul.f32 0.5, %v6418_v63  ;;  %6356 = vadd.xlane.f32.xlu1 %v6355_v7  ;;  %v6318_v13 = vpop.xlane.xlu0 %6317 }
0x17aa   :  { %v6364_v32 = vmul.f32 %v6318_v13, %v11940_v28 }
0x17ab   :  { %v6420_v22 = vsub.f32 1.5, %v6419_v26 }
0x17ac   :  { %v7766_v39 = vpop.eup %7765  ;;  %v6380_v5 = vadd.f32 1e-05, %v6364_v32 }
0x17ad   :  { %v6421_v58 = vmul.f32 %v7764_v12, %v6420_v22  ;;  %v6447_v45 = vmul.f32 %v7766_v39, %v6385_v16  ;;  %vm6453_vm6 = vweird.f32 %v7766_v39 }
0x17ae   :  { %7767 = vrsqrt.f32 %v6380_v5  ;;  %vm6454_vm8 = vmor %vm6452_vm7, %vm6453_vm6  ;;  %vm6402_vm10 = vweird.f32 %v6380_v5 }
0x17af   :  { %v6448_v30 = vmul.f32 %v7766_v39, %v6447_v45  ;;  %v6425_v46 = vsel %vm6424_vm2, %v7764_v12, %v6421_v58 }
0x17b0   :  { %v6558_v35 = vmul.f32 %v6425_v46, %v11525_v61 }
0x17b1   :  { %v6449_v20 = vmul.f32 0.5, %v6448_v30  ;;  %v6330_v41 = vpop.xlane.xlu0 %6329 }
0x17b2   :  { %v6368_v50 = vmul.f32 %v6330_v41, %v11940_v28  ;;  %v6575_v34 = vmul.f32 %v11652_v56, %v6558_v35 }
0x17b3   :  { %v6450_v42 = vsub.f32 1.5, %v6449_v20 }
0x17b4   :  { %v7768_v53 = vpop.eup %7767  ;;  %v6384_v36 = vadd.f32 1e-05, %v6368_v50  ;;  %v6592_v21 = vadd.f32 %v11658_v49, %v6575_v34 }
0x17b5   :  { %v6451_v8 = vmul.f32 %v7766_v39, %v6450_v42  ;;  %v6397_v61 = vmul.f32 %v7768_v53, %v6380_v5  ;;  %vm6403_vm9 = vweird.f32 %v7768_v53 }
0x17b6   :  { %7769 = vrsqrt.f32 %v6384_v36  ;;  %v6613_v62 = vsel %vm711_vm3, %v6592_v21, 0.0  ;;  %vm6404_vm11 = vmor %vm6402_vm10, %vm6403_vm9  ;;  %vm6442_vm13 = vweird.f32 %v6384_v36 }
0x17b7   :  { %v6398_v37 = vmul.f32 %v7768_v53, %v6397_v61  ;;  %6614 = vadd.xlane.f32.xlu0 %v6613_v62  ;;  %v6455_v31 = vsel %vm6454_vm8, %v7766_v39, %v6451_v8 }
0x17b8   :  { %v6561_v55 = vmul.f32 %v6455_v31, %v11536_v25 }
0x17b9   :  { %v6399_v0 = vmul.f32 0.5, %v6398_v37 }
0x17ba   :  { %v6578_v6 = vmul.f32 %v11652_v56, %v6561_v55 }
0x17bb   :  { %v6400_v19 = vsub.f32 1.5, %v6399_v0 }
0x17bc   :  { %v7770_v1 = vpop.eup %7769  ;;  %v6595_v29 = vadd.f32 %v11658_v49, %v6578_v6 }
0x17bd   :  { %v6401_v23 = vmul.f32 %v7768_v53, %v6400_v19  ;;  %v6437_v44 = vmul.f32 %v7770_v1, %v6384_v36  ;;  %vm6443_vm12 = vweird.f32 %v7770_v1 }
0x17be   :  { %v6622_v48 = vsel %vm711_vm3, %v6595_v29, 0.0  ;;  %vm6444_vm14 = vmor %vm6442_vm13, %vm6443_vm12 }
0x17bf   :  { %v6438_v15 = vmul.f32 %v7770_v1, %v6437_v44  ;;  %6623 = vadd.xlane.f32.xlu0 %v6622_v48  ;;  %v6405_v51 = vsel %vm6404_vm11, %v7768_v53, %v6401_v23 }
0x17c0   :  { %v6556_v47 = vmul.f32 %v6405_v51, %v11549_v24 }
0x17c1   :  { %v6439_v25 = vmul.f32 0.5, %v6438_v15 }
0x17c2   :  { %v6573_v52 = vmul.f32 %v11652_v56, %v6556_v47 }
0x17c3   :  { %v6440_v57 = vsub.f32 1.5, %v6439_v25 }
0x17c4   :  { %v6590_v14 = vadd.f32 %v11658_v49, %v6573_v52 }
0x17c5   :  { %v6441_v3 = vmul.f32 %v7770_v1, %v6440_v57 }
0x17c6   :  { %v6607_v12 = vsel %vm711_vm3, %v6590_v14, 0.0 }
0x17c7   :  { %6608 = vadd.xlane.f32.xlu1 %v6607_v12  ;;  %v6445_v16 = vsel %vm6444_vm14, %v7770_v1, %v6441_v3 }
0x17c8   :  { %v6560_v54 = vmul.f32 %v6445_v16, %v11558_v59 }
0x17ca   :  { %v6577_v38 = vmul.f32 %v11652_v56, %v6560_v54 }
0x17cc   :  { %v6594_v24 = vadd.f32 %v11658_v49, %v6577_v38 }
0x17ce   :  { %v6619_v63 = vsel %vm711_vm3, %v6594_v24, 0.0 }
0x17cf   :  { %6620 = vadd.xlane.f32.xlu1 %v6619_v63 }
0x17dc   :  { %v11676_v7 = vpop.xlane.xlu1 %6263 }
0x17df   :  { %v6342_v26 = vpop.xlane.xlu0 %6341 }
0x17e0   :  { %v6372_v13 = vmul.f32 %v6342_v26, %v11940_v28 }
0x17e2   :  { %v6388_v22 = vadd.f32 1e-05, %v6372_v13 }
0x17e4   :  { %v6321_v32 = vpop.xlane.xlu1 %6320  ;;  %7771 = vrsqrt.f32 %v6388_v22  ;;  %vm6482_vm4 = vweird.f32 %v6388_v22 }
0x17e5   :  { %v6365_v39 = vmul.f32 %v6321_v32, %v11940_v28 }
0x17e7   :  { %v6381_v5 = vadd.f32 1e-05, %v6365_v39  ;;  %v6267_v59 = vpop.xlane.xlu2 %6266  ;;  %v6339_v19 = vpop.xlane.xlu0 %6338 }
0x17e8   :  { %v6283_v58 = vmul.f32 %v6267_v59, %v11940_v28  ;;  %v6371_v47 = vmul.f32 %v6339_v19, %v11940_v28 }
0x17e9   :  { %7773 = vrsqrt.f32 %v6381_v5  ;;  %vm6412_vm2 = vweird.f32 %v6381_v5 }
0x17ea   :  { %v7772_v30 = vpop.eup %7771  ;;  %v11682_v46 = vsub.f32 %v11596_v43, %v6283_v58  ;;  %v11697_v16 = vadd.f32 1e-05, %v6371_v47 }
0x17eb   :  { %v6477_v20 = vmul.f32 %v7772_v30, %v6388_v22  ;;  %vm6483_vm15 = vweird.f32 %v7772_v30 }
0x17ec   :  { %v6327_v45 = vpop.xlane.xlu1 %6326  ;;  %v6315_v34 = vmul.f32 %v11682_v46, %v11682_v46  ;;  %vm6484_vm1 = vmor %vm6482_vm4, %vm6483_vm15  ;;  %vm6472_vm15 = vweird.f32 %v11697_v16 }
0x17ed   :  { %v6367_v35 = vmul.f32 %v6327_v45, %v11940_v28  ;;  %v6478_v42 = vmul.f32 %v7772_v30, %v6477_v20 }
0x17ee   :  { %v6361_v36 = vsel %vm711_vm3, %v6315_v34, 0.0 }
0x17ef   :  { %v7774_v41 = vpop.eup %7773  ;;  %v6383_v50 = vadd.f32 1e-05, %v6367_v35  ;;  %v6479_v21 = vmul.f32 0.5, %v6478_v42  ;;  %6362 = vadd.xlane.f32.xlu0 %v6361_v36 }
0x17f0   :  { %v6407_v53 = vmul.f32 %v7774_v41, %v6381_v5  ;;  %vm6413_vm0 = vweird.f32 %v7774_v41 }
0x17f1   :  { %7775 = vrsqrt.f32 %v6383_v50  ;;  %v6480_v61 = vsub.f32 1.5, %v6479_v21  ;;  %vm6414_vm6 = vmor %vm6412_vm2, %vm6413_vm0  ;;  %vm6432_vm8 = vweird.f32 %v6383_v50 }
0x17f2   :  { %v6408_v8 = vmul.f32 %v7774_v41, %v6407_v53 }
0x17f3   :  { %v6481_v43 = vmul.f32 %v7772_v30, %v6480_v61 }
0x17f4   :  { %v6409_v62 = vmul.f32 0.5, %v6408_v8 }
0x17f5   :  { %v6485_v6 = vsel %vm6484_vm1, %v7772_v30, %v6481_v43 }
0x17f6   :  { %v6410_v37 = vsub.f32 1.5, %v6409_v62  ;;  %v6564_v29 = vmul.f32 %v6485_v6, %v11577_v27 }
0x17f7   :  { %v7776_v31 = vpop.eup %7775 }
0x17f8   :  { %v6411_v55 = vmul.f32 %v7774_v41, %v6410_v37  ;;  %v6427_v0 = vmul.f32 %v7776_v31, %v6383_v50  ;;  %v6581_v51 = vmul.f32 %v11652_v56, %v6564_v29  ;;  %vm6433_vm7 = vweird.f32 %v7776_v31 }
0x17f9   :  { %vm6434_vm9 = vmor %vm6432_vm8, %vm6433_vm7 }
0x17fa   :  { %v6428_v1 = vmul.f32 %v7776_v31, %v6427_v0  ;;  %v6415_v23 = vsel %vm6414_vm6, %v7774_v41, %v6411_v55  ;;  %v6598_v14 = vadd.f32 %v11658_v49, %v6581_v51 }
0x17fb   :  { %v6557_v44 = vmul.f32 %v6415_v23, %v11570_v40 }
0x17fc   :  { %v6429_v48 = vmul.f32 0.5, %v6428_v1  ;;  %v6345_v15 = vpop.xlane.xlu2 %6344  ;;  %v6631_v40 = vsel %vm711_vm3, %v6598_v14, 0.0 }
0x17fd   :  { %v6373_v25 = vmul.f32 %v6345_v15, %v11940_v28  ;;  %v6574_v52 = vmul.f32 %v11652_v56, %v6557_v44  ;;  %6632 = vadd.xlane.f32.xlu1 %v6631_v40 }
0x17fe   :  { %v6430_v57 = vsub.f32 1.5, %v6429_v48 }
0x17ff   :  { %v6389_v3 = vadd.f32 1e-05, %v6373_v25  ;;  %v6591_v27 = vadd.f32 %v11658_v49, %v6574_v52 }
0x1800   :  { %v6431_v12 = vmul.f32 %v7776_v31, %v6430_v57 }
0x1801   :  { %7777 = vrsqrt.f32 %v6389_v3  ;;  %v6610_v54 = vsel %vm711_vm3, %v6591_v27, 0.0  ;;  %vm6492_vm11 = vweird.f32 %v6389_v3 }
0x1802   :  { %6611 = vadd.xlane.f32.xlu2 %v6610_v54  ;;  %v6435_v38 = vsel %vm6434_vm9, %v7776_v31, %v6431_v12  ;;  %7779 = vrsqrt.f32 %v11697_v16 }
0x1803   :  { %v6559_v24 = vmul.f32 %v6435_v38, %v11589_v60 }
0x1804   :  { %v6348_v63 = vpop.xlane.xlu1 %6347 }
0x1805   :  { %v6374_v26 = vmul.f32 %v6348_v63, %v11940_v28  ;;  %v6576_v13 = vmul.f32 %v11652_v56, %v6559_v24 }
0x1807   :  { %v7778_v32 = vpop.eup %7777  ;;  %v6593_v22 = vadd.f32 %v11658_v49, %v6576_v13  ;;  %v11705_v5 = vadd.f32 1e-05, %v6374_v26 }
0x1808   :  { %v6487_v39 = vmul.f32 %v7778_v32, %v6389_v3  ;;  %v11708_v45 = vpop.eup %7779  ;;  %vm6493_vm10 = vweird.f32 %v7778_v32 }
0x1809   :  { %v6616_v59 = vsel %vm711_vm3, %v6593_v22, 0.0  ;;  %7781 = vrsqrt.f32 %v11705_v5  ;;  %v6467_v50 = vmul.f32 %v11708_v45, %v11697_v16  ;;  %vm6494_vm12 = vmor %vm6492_vm11, %vm6493_vm10  ;;  %vm6473_vm13 = vweird.f32 %v11708_v45 }
0x180a   :  { %v6488_v58 = vmul.f32 %v7778_v32, %v6487_v39  ;;  %6617 = vadd.xlane.f32.xlu2 %v6616_v59  ;;  %vm11730_vm4 = vmor %vm6472_vm15, %vm6473_vm13  ;;  %vm6502_vm10 = vweird.f32 %v11705_v5 }
0x180b   :  { %v6468_v21 = vmul.f32 %v11708_v45, %v6467_v50 }
0x180c   :  { %v6489_v60 = vmul.f32 0.5, %v6488_v58  ;;  %v6336_v30 = vpop.xlane.xlu1 %6335  ;;  %v6351_v35 = vpop.xlane.xlu0 %6350 }
0x180d   :  { %v6370_v20 = vmul.f32 %v6336_v30, %v11940_v28  ;;  %v6375_v41 = vmul.f32 %v6351_v35, %v11940_v28  ;;  %v6469_v55 = vmul.f32 0.5, %v6468_v21  ;;  %v6282_v35 = vmul.f32 %v11676_v7, %v11940_v28 }
0x180e   :  { %v6490_v34 = vsub.f32 1.5, %v6489_v60 }
0x180f   :  { %v6386_v42 = vadd.f32 1e-05, %v6370_v20  ;;  %v6391_v53 = vadd.f32 1e-05, %v6375_v41  ;;  %v11716_v61 = vpop.eup %7781  ;;  %v6470_v48 = vsub.f32 1.5, %v6469_v55 }
0x1810   :  { %v6491_v36 = vmul.f32 %v7778_v32, %v6490_v34  ;;  %v6497_v0 = vmul.f32 %v11716_v61, %v11705_v5  ;;  %vm6503_vm8 = vweird.f32 %v11716_v61 }
0x1811   :  { %7783 = vrsqrt.f32 %v6386_v42  ;;  %v6471_v3 = vmul.f32 %v11708_v45, %v6470_v48  ;;  %vm6462_vm1 = vweird.f32 %v6386_v42  ;;  %vm6512_vm6 = vweird.f32 %v6391_v53  ;;  %vm11748_vm11 = vmor %vm6502_vm10, %vm6503_vm8 }
0x1812   :  { %7785 = vrsqrt.f32 %v6391_v53  ;;  %v6495_v8 = vsel %vm6494_vm12, %v7778_v32, %v6491_v36  ;;  %v11754_v36 = vsub.f32 %v11567_v10, %v6282_v35 }
0x1813   :  { %v6565_v62 = vmul.f32 %v6495_v8, %v11606_v4  ;;  %v6498_v4 = vmul.f32 %v11716_v61, %v6497_v0  ;;  %v6475_v16 = vsel %vm11730_vm4, %v11708_v45, %v6471_v3 }
0x1814   :  { %v6354_v43 = vpop.xlane.xlu2 %6353  ;;  %v6563_v41 = vmul.f32 %v6475_v16, %v11585_v11  ;;  %v6314_v10 = vmul.f32 %v11754_v36, %v11754_v36 }
0x1815   :  { %v6376_v37 = vmul.f32 %v6354_v43, %v11940_v28  ;;  %v6582_v31 = vmul.f32 %v11652_v56, %v6565_v62  ;;  %v6499_v27 = vmul.f32 0.5, %v6498_v4 }
0x1816   :  { %v6580_v8 = vmul.f32 %v11652_v56, %v6563_v41 }
0x1817   :  { %v7784_v6 = vpop.eup %7783  ;;  %v6392_v19 = vadd.f32 1e-05, %v6376_v37  ;;  %v6599_v1 = vadd.f32 %v11658_v49, %v6582_v31  ;;  %v6500_v32 = vsub.f32 1.5, %v6499_v27 }
0x1818   :  { %v7786_v29 = vpop.eup %7785  ;;  %v6457_v23 = vmul.f32 %v7784_v6, %v6386_v42  ;;  %vm6463_vm14 = vweird.f32 %v7784_v6 }
0x1819   :  { %v6507_v44 = vmul.f32 %v7786_v29, %v6391_v53  ;;  %7787 = vrsqrt.f32 %v6392_v19  ;;  %v6634_v51 = vsel %vm711_vm3, %v6599_v1, 0.0  ;;  %vm6513_vm0 = vweird.f32 %v7786_v29  ;;  %vm6464_vm2 = vmor %vm6462_vm1, %vm6463_vm14 }
0x181a   :  { %v6458_v15 = vmul.f32 %v7784_v6, %v6457_v23  ;;  %6635 = vadd.xlane.f32.xlu0 %v6634_v51  ;;  %vm6514_vm7 = vmor %vm6512_vm6, %vm6513_vm0  ;;  %v6501_v50 = vmul.f32 %v11716_v61, %v6500_v32  ;;  %vm6522_vm12 = vweird.f32 %v6392_v19  ;;  %v6597_v1 = vadd.f32 %v11658_v49, %v6580_v8 }
0x181b   :  { %v6508_v47 = vmul.f32 %v7786_v29, %v6507_v44 }
0x181c   :  { %v6459_v25 = vmul.f32 0.5, %v6458_v15  ;;  %v6357_v52 = vpop.xlane.xlu1 %6356  ;;  %v6505_v37 = vsel %vm11748_vm11, %v11716_v61, %v6501_v50  ;;  %v6358_v61 = vsel %vm711_vm3, %v6314_v10, 0.0  ;;  %v6628_v48 = vsel %vm711_vm3, %v6597_v1, 0.0 }
0x181d   :  { %v6509_v57 = vmul.f32 0.5, %v6508_v47  ;;  %v6377_v14 = vmul.f32 %v6357_v52, %v11940_v28 }
0x181e   :  { %v6460_v12 = vsub.f32 1.5, %v6459_v25 }
0x181f   :  { %v7788_v40 = vpop.eup %7787  ;;  %v6510_v54 = vsub.f32 1.5, %v6509_v57  ;;  %v6393_v38 = vadd.f32 1e-05, %v6377_v14 }
0x1820   :  { %v6461_v63 = vmul.f32 %v7784_v6, %v6460_v12  ;;  %v6517_v26 = vmul.f32 %v7788_v40, %v6392_v19  ;;  %vm6523_vm9 = vweird.f32 %v7788_v40 }
0x1821   :  { %v6511_v13 = vmul.f32 %v7786_v29, %v6510_v54  ;;  %7789 = vrsqrt.f32 %v6393_v38  ;;  %vm6524_vm13 = vmor %vm6522_vm12, %vm6523_vm9  ;;  %vm6532_vm15 = vweird.f32 %v6393_v38  ;;  %vm6796_vm9 = vcmask 25600  }
0x1822   :  { %v6518_v22 = vmul.f32 %v7788_v40, %v6517_v26  ;;  %v6465_v39 = vsel %vm6464_vm2, %v7784_v6, %v6461_v63  ;;  %v6566_v6 = vmul.f32 %v6505_v37, %v11614_v2 }
0x1823   :  { %v6562_v59 = vmul.f32 %v6465_v39, %v11619_v33  ;;  %v6515_v58 = vsel %vm6514_vm7, %v7786_v29, %v6511_v13 }
0x1824   :  { %v6519_v60 = vmul.f32 0.5, %v6518_v22  ;;  %v6567_v30 = vmul.f32 %v6515_v58, %v11624_v18  ;;  %v6583_v44 = vmul.f32 %v11652_v56, %v6566_v6 }
0x1825   :  { %v6579_v20 = vmul.f32 %v11652_v56, %v6562_v59 }
0x1826   :  { %v6520_v34 = vsub.f32 1.5, %v6519_v60  ;;  %v6584_v45 = vmul.f32 %v11652_v56, %v6567_v30  ;;  %v6600_v4 = vadd.f32 %v11658_v49, %v6583_v44 }
0x1827   :  { %v7790_v33 = vpop.eup %7789  ;;  %v6596_v18 = vadd.f32 %v11658_v49, %v6579_v20 }
0x1828   :  { %v6521_v7 = vmul.f32 %v7788_v40, %v6520_v34  ;;  %v6527_v53 = vmul.f32 %v7790_v33, %v6393_v38  ;;  %v6601_v11 = vadd.f32 %v11658_v49, %v6584_v45  ;;  %vm6533_vm14 = vweird.f32 %v7790_v33 }
0x1829   :  { %v6625_v21 = vsel %vm711_vm3, %v6596_v18, 0.0  ;;  %vm6534_vm0 = vmor %vm6532_vm15, %vm6533_vm14  ;;  %v6637_v51 = vsel %vm711_vm3, %v6600_v4, 0.0  ;;  %v6677_v4 = vld [vmem:[%s11847_s7 + $0x30] sm:$0xff] }
0x182a   :  { %v6528_v5 = vmul.f32 %v7790_v33, %v6527_v53  ;;  %6626 = vadd.xlane.f32.xlu2 %v6625_v21  ;;  %v6640_v62 = vsel %vm711_vm3, %v6601_v11, 0.0  ;;  %v6525_v43 = vsel %vm6524_vm13, %v7788_v40, %v6521_v7  ;;  %v6615_v57 = vpop.xlane.xlu0 %6614 }
0x182b   :  { %6641 = vadd.xlane.f32.xlu1 %v6640_v62  ;;  %v6568_v31 = vmul.f32 %v6525_v43, %v11635_v17  ;;  %v6657_v59 = vmul.f32 %v6615_v57, %v11940_v28  ;;  %v6671_v57 = vld [vmem:[%s11847_s7] sm:$0xff] }
0x182c   :  { %v6529_v55 = vmul.f32 0.5, %v6528_v5 }
0x182d   :  { %v6585_v0 = vmul.f32 %v11652_v56, %v6568_v31 }
0x182e   :  { %v6530_v19 = vsub.f32 1.5, %v6529_v55 }
0x182f   :  { %v6602_v29 = vadd.f32 %v11658_v49, %v6585_v0 }
0x1830   :  { %v6531_v23 = vmul.f32 %v7790_v33, %v6530_v19 }
0x1831   :  { %v6643_v17 = vsel %vm711_vm3, %v6602_v29, 0.0 }
0x1832   :  { %6359 = vadd.xlane.f32.xlu2 %v6358_v61  ;;  %6644 = vadd.xlane.f32.xlu0 %v6643_v17  ;;  %v6535_v2 = vsel %vm6534_vm0, %v7790_v33, %v6531_v23  ;;  %v6624_v14 = vpop.xlane.xlu0 %6623 }
0x1833   :  { %6629 = vadd.xlane.f32.xlu1 %v6628_v48  ;;  %v6569_v15 = vmul.f32 %v6535_v2, %v11643_v9  ;;  %v6678_v2 = vld [vmem:[%s11847_s7 + $0x38] sm:$0xff] }
0x1834   :  { %6722 = vmatpush.msra.mxu0 %v6678_v2 }
0x1835   :  { %v6586_v47 = vmul.f32 %v11652_v56, %v6569_v15  ;;  %v6676_v15 = vld [vmem:[%s11847_s7 + $0x28] sm:$0xff] }
0x1836   :  { %6723 = vmatpush.msra.mxu0 %v6677_v4 }
0x1837   :  { %v6603_v25 = vadd.f32 %v11658_v49, %v6586_v47  ;;  %v6674_v47 = vld [vmem:[%s11847_s7 + $0x18] sm:$0xff] }
0x1838   :  { %6724 = vmatpush.msra.mxu0 %v6676_v15 }
0x1839   :  { %v6646_v52 = vsel %vm711_vm3, %v6603_v25, 0.0  ;;  %v6673_v25 = vld [vmem:[%s11847_s7 + $0x10] sm:$0xff] }
0x183a   :  { %6638 = vadd.xlane.f32.xlu2 %v6637_v51  ;;  %v6609_v27 = vpop.xlane.xlu1 %6608  ;;  %v6675_v51 = vld [vmem:[%s11847_s7 + $0x20] sm:$0xff] }
0x183b   :  { %v6655_v54 = vmul.f32 %v6609_v27, %v11940_v28  ;;  %6725 = vmatpush.msra.mxu0 %v6675_v51 }
0x183d   :  { %6726 = vmatpush.msra.mxu0 %v6674_v47 }
0x183f   :  { %6727 = vmatpush.msra.mxu0 %v6673_v25 }
0x1842   :  { %6647 = vadd.xlane.f32.xlu2 %v6646_v52  ;;  %v6621_v41 = vpop.xlane.xlu1 %6620  ;;  %v6672_v52 = vld [vmem:[%s11847_s7 + $0x8] sm:$0xff] }
0x1843   :  { %v6659_v50 = vmul.f32 %v6621_v41, %v11940_v28  ;;  %6728 = vmatpush.msra.mxu0 %v6672_v52 }
0x1845   :  { %6729 = vmatpush.msra.mxu0 %v6671_v57 }
0x1847   :  { %6777 = vmatpush.msrb.mxu0 %v6678_v2 }
0x1849   :  { %6778 = vmatpush.msrb.mxu0 %v6677_v4 }
0x184b   :  { %6779 = vmatpush.msrb.mxu0 %v6676_v15 }
0x184d   :  { %6780 = vmatpush.msrb.mxu0 %v6675_v51 }
0x184f   :  { %6781 = vmatpush.msrb.mxu0 %v6674_v47 }
0x1851   :  { %6782 = vmatpush.msrb.mxu0 %v6673_v25 }
0x1853   :  { %6783 = vmatpush.msrb.mxu0 %v6672_v52 }
0x1855   :  { %6784 = vmatpush.msrb.mxu0 %v6671_v57 }
0x1862   :  { %v6363_v3 = vpop.xlane.xlu0 %6362 }
0x1863   :  { %v6379_v12 = vmul.f32 %v6363_v3, %v11940_v28 }
0x1865   :  { %v6395_v40 = vadd.f32 1e-05, %v6379_v12 }
0x1867   :  { %7791 = vrsqrt.f32 %v6395_v40  ;;  %vm6552_vm1 = vweird.f32 %v6395_v40 }
0x186b   :  { %6679 = vxpose.xlu2.b32.start [1/8] (short) (narrow) %v6655_v54, 8 }
0x186d   :  { %v7792_v9 = vpop.eup %7791 }
0x186e   :  { %v6547_v38 = vmul.f32 %v7792_v9, %v6395_v40  ;;  %vm6553_vm4 = vweird.f32 %v7792_v9 }
0x186f   :  { %vm6554_vm2 = vmor %vm6552_vm1, %vm6553_vm4 }
0x1870   :  { %v6548_v24 = vmul.f32 %v7792_v9, %v6547_v38  ;;  %v6633_v34 = vpop.xlane.xlu1 %6632 }
0x1871   :  { %v6663_v1 = vmul.f32 %v6633_v34, %v11940_v28 }
0x1872   :  { %v6549_v63 = vmul.f32 0.5, %v6548_v24  ;;  %v7408_v24 = vld [vmem:[%s11845_s5 + $0x12] ss:$0 sm:$0xff]  ;;  %s7833_s5 = smov [#allocation2]  }
0x1873   :  { %s6827_s4 = sshll.u32 %s7833_s5, 4  ;;  %s6828_s4 = int_to_ptr.vmem [resolvable:$true] %s6827_s4 }
0x1874   :  { %v6550_v32 = vsub.f32 1.5, %v6549_v63 }
0x1875   :  { %v6612_v26 = vpop.xlane.xlu2 %6611 }
0x1876   :  { %v6656_v13 = vmul.f32 %v6612_v26, %v11940_v28  ;;  %v6551_v22 = vmul.f32 %v7792_v9, %v6550_v32 }
0x1878   :  { %6680 = vxpose.xlu2.b32.cont [2/8] (short) (narrow) %v6656_v13, 8  ;;  %v6555_v39 = vsel %vm6554_vm2, %v7792_v9, %v6551_v22 }
0x1879   :  { %v6571_v16 = vmul.f32 %v6555_v39, %v11682_v46  ;;  %v6660_v46 = vmul.f32 %v6624_v14, %v11940_v28 }
0x187b   :  { %v6588_v58 = vmul.f32 %v11652_v56, %v6571_v16 }
0x187d   :  { %v6605_v60 = vadd.f32 %v11658_v49, %v6588_v58  ;;  %v6618_v35 = vpop.xlane.xlu2 %6617 }
0x187e   :  { %v6658_v20 = vmul.f32 %v6618_v35, %v11940_v28 }
0x187f   :  { %v6652_v30 = vsel %vm711_vm3, %v6605_v60, 0.0 }
0x1880   :  { %6681 = vxpose.xlu2.b32.cont [3/8] (short) (narrow) %v6657_v59, 8  ;;  %6653 = vadd.xlane.f32.xlu1 %v6652_v30 }
0x1888   :  { %6682 = vxpose.xlu2.b32.cont [4/8] (short) (narrow) %v6658_v20, 8 }
0x188d   :  { %v6636_v29 = vpop.xlane.xlu0 %6635 }
0x188e   :  { %v6664_v23 = vmul.f32 %v6636_v29, %v11940_v28 }
0x1890   :  { %6683 = vxpose.xlu2.b32.cont [5/8] (short) (narrow) %v6659_v50, 8 }
0x1898   :  { %6684 = vxpose.xlu2.b32.cont [6/8] (short) (narrow) %v6660_v46, 8 }
0x189d   :  { %v6627_v45 = vpop.xlane.xlu2 %6626 }
0x189e   :  { %v6642_v33 = vpop.xlane.xlu1 %6641  ;;  %v6661_v18 = vmul.f32 %v6627_v45, %v11940_v28 }
0x18a0   :  { %6685 = vxpose.xlu2.b32.cont [7/8] (short) (narrow) %v6661_v18, 8 }
0x18a5   :  { %v6360_v42 = vpop.xlane.xlu2 %6359 }
0x18a6   :  { %v6630_v7 = vpop.xlane.xlu1 %6629  ;;  %v6378_v53 = vmul.f32 %v6360_v42, %v11940_v28 }
0x18a7   :  { %v6662_v11 = vmul.f32 %v6630_v7, %v11940_v28 }
0x18a8   :  { %v6394_v21 = vadd.f32 1e-05, %v6378_v53 }
0x18a9   :  { %6686 = vxpose.xlu2.b32.end [8/8] (short) (narrow) %v6662_v11, 8 }
0x18aa   :  { %7793 = vrsqrt.f32 %v6394_v21  ;;  %vm6542_vm7 = vweird.f32 %v6394_v21 }
0x18ad   :  { %v6639_v61 = vpop.xlane.xlu2 %6638 }
0x18ae   :  { %v6665_v17 = vmul.f32 %v6639_v61, %v11940_v28 }
0x18b0   :  { %v7794_v8 = vpop.eup %7793 }
0x18b1   :  { %v6537_v5 = vmul.f32 %v7794_v8, %v6394_v21  ;;  %vm6543_vm6 = vweird.f32 %v7794_v8 }
0x18b2   :  { %vm6544_vm8 = vmor %vm6542_vm7, %vm6543_vm6 }
0x18b3   :  { %v6538_v62 = vmul.f32 %v7794_v8, %v6537_v5 }
0x18b5   :  { %v6539_v43 = vmul.f32 0.5, %v6538_v62  ;;  %v6648_v44 = vpop.xlane.xlu2 %6647 }
0x18b6   :  { %v6668_v48 = vmul.f32 %v6648_v44, %v11940_v28 }
0x18b7   :  { %v6540_v37 = vsub.f32 1.5, %v6539_v43 }
0x18b9   :  { %v6541_v31 = vmul.f32 %v7794_v8, %v6540_v37 }
0x18bb   :  { %v6545_v55 = vsel %vm6544_vm8, %v7794_v8, %v6541_v31 }
0x18bc   :  { %v6570_v10 = vmul.f32 %v6545_v55, %v11754_v36  ;;  %v6666_v36 = vmul.f32 %v6642_v33, %v11940_v28 }
0x18be   :  { %v6587_v0 = vmul.f32 %v11652_v56, %v6570_v10  ;;  %v6645_v56 = vpop.xlane.xlu0 %6644 }
0x18c0   :  { %v6604_v6 = vadd.f32 %v11658_v49, %v6587_v0  ;;  %v6667_v49 = vmul.f32 %v6645_v56, %v11940_v28 }
0x18c2   :  { %v6649_v19 = vsel %vm711_vm3, %v6604_v6, 0.0  ;;  %vm6792_vm3 = vcmask 1040384  }
0x18c3   :  { %6650 = vadd.xlane.f32.xlu0 %v6649_v19 }
0x18ec   :  { %6734 = vxpose.xlu0.b32.start [1/8] (short) (narrow) %v6663_v1, 8 }
0x18f3   :  { %v6654_v12 = vpop.xlane.xlu1 %6653 }
0x18f4   :  { %6735 = vxpose.xlu0.b32.cont [2/8] (short) (narrow) %v6664_v23, 8  ;;  %v6670_v40 = vmul.f32 %v6654_v12, %v11940_v28 }
0x18fc   :  { %6736 = vxpose.xlu0.b32.cont [3/8] (short) (narrow) %v6665_v17, 8 }
0x1904   :  { %6737 = vxpose.xlu0.b32.cont [4/8] (short) (narrow) %v6666_v36, 8 }
0x190a   :  { %v6695_v14 = vpop.trf.xlu2 }
0x190b   :  { %7203 = vmatmul.msk.f32.vlgmr.msra.gmra.mxu0 %vm939_vm5, %v6695_v14 }
0x190c   :  { %6738 = vxpose.xlu0.b32.cont [5/8] (short) (narrow) %v6667_v49, 8 }
0x1914   :  { %6739 = vxpose.xlu0.b32.cont [6/8] (short) (narrow) %v6668_v48, 8 }
0x1936   :  { %v6651_v3 = vpop.xlane.xlu0 %6650 }
0x1937   :  { %v6669_v27 = vmul.f32 %v6651_v3, %v11940_v28 }
0x1939   :  { %6740 = vxpose.xlu0.b32.cont [7/8] (short) (narrow) %v6669_v27, 8 }
0x1941   :  { %6741 = vxpose.xlu0.b32.end [8/8] (short) (narrow) %v6670_v40, 8 }
0x1988   :  { %v6731_v9 = vpop.f32.mrf.mxu0 }
0x19ad   :  { %v6750_v54 = vpop.trf.xlu0 }
0x19ae   :  { %7204 = vmatmul.msk.f32.vlgmr.msrb.gmra.mxu0 %vm939_vm5, %v6750_v54 }
0x1a2b   :  { %v6786_v38 = vpop.f32.mrf.mxu0 }
0x1a2c   :  { %v6790_v63 = vrot.slane %v6786_v38, 7 }
0x1a2e   :  { %v6793_v26 = vsel %vm6792_vm3, %v6731_v9, %v6790_v63 }
0x1a2f   :  { %v6795_v13 = vadd.f32 %v7408_v24, %v6793_v26 }
0x1a31   :  { %v6797_v32 = vsel %vm6796_vm9, %v6795_v13, -inf }
0x1a32   :  { %6798 = vmax.xlane.f32.xlu1 %v6797_v32 }
0x1aa5   :  { %v6799_v28 = vpop.xlane.xlu1 %6798 }
0x1aa6   :  { %v6800_v22 = vsub.f32 %v6795_v13, %v6799_v28 }
0x1aa8   :  { %v6801_v39 = vmul.f32 1.442695, %v6800_v22 }
0x1aaa   :  { %7795 = vpow2.f32 %v6801_v39 }
0x1ab0   :  { %v7796_v16 = vpop.eup %7795 }
0x1ab1   :  { %v6803_v59 = vsel %vm6796_vm9, %v7796_v16, 0.0 }
0x1ab2   :  { %6804 = vadd.xlane.f32.xlu1 %v6803_v59 }
0x1b25   :  { %v6805_v58 = vpop.xlane.xlu1 %6804 }
0x1b26   :  { %7797 = vrcp.f32 %v6805_v58  ;;  %v6817_v20 = vand.u32 2147483648, %v6805_v58  ;;  %v6815_v50 = vand.u32 2147483647, %v6805_v58  ;;  %vm6811_vm10 = vweird.f32 %v6805_v58 }
0x1b28   :  { %v6818_v34 = vor.u32 1.1754944e-38, %v6817_v20  ;;  %vm6816_vm12 = vcmp.eq.f32.partialorder %v6815_v50, 8.507059e+37 }
0x1b2c   :  { %v7798_v60 = vpop.eup %7797 }
0x1b2d   :  { %v6807_v30 = vmul.f32 %v7798_v60, %v6805_v58  ;;  %vm6812_vm5 = vweird.f32 %v7798_v60 }
0x1b2e   :  { %vm6813_vm11 = vmor %vm6811_vm10, %vm6812_vm5 }
0x1b2f   :  { %v6808_v35 = vsub.f32 1.0, %v6807_v30 }
0x1b31   :  { %v6809_v41 = vmul.f32 %v7798_v60, %v6808_v35 }
0x1b33   :  { %v6810_v46 = vadd.f32 %v7798_v60, %v6809_v41 }
0x1b35   :  { %v6814_v45 = vsel %vm6813_vm11, %v7798_v60, %v6810_v46 }
0x1b36   :  { %v6819_v33 = vsel %vm6816_vm12, %v6818_v34, %v6814_v45 }
0x1b37   :  { %v6820_v18 = vmul.f32 %v7796_v16, %v6819_v33 }
0x1b39   :  { %6821 = vst.msk [vmem:[#allocation2] sm:$0x3] %vm6796_vm9, %v6820_v18 }
0x1b3a   :  { %6832 = dma.vmem_to_hbm [thread:$0]  %s6828_s4, 32, %s6830_s6, [#allocation3]  }
0x1b3b   :  { %7823 = dma.done.wait [#allocation3], 32  }
0x1b3c   :  { %7824 = vsyncadd [#allocation3], 4294967264 }
0x1b3d   :  { %6841 = vsyncpa [#allocation3], 1 }

</bundles_post_ra>
